<compile_context>
chip_gen: v5e
topology: v5e:2x2
jax: 0.10.0
libtpu: 0.0.40
codegen_flags: <defaults>
</compile_context>

<pallas_src>
import functools

import jax
import jax.numpy as jnp
from jax.experimental import pallas as pl
from jax.experimental.pallas import tpu as pltpu


def _lstm_fc_kernel(num_layers, hp, x_ref, *refs):
    """refs = w_ih0, w_hh0, b0, (w_ih_l, w_hh_l, b_l for l>=1)..., w_fc, b_fc, out."""
    Hp = hp

    # ---- Hoisted loads: every weight/bias read from VMEM exactly once. ----
    w_ih0 = refs[0][...]                               # (D, 4Hp)
    w_hh0 = refs[1][...]                               # (Hp, 4Hp)
    b0 = refs[2][...]                                  # (1, 4Hp)
    w_ih_l, w_hh_l, b_l = [], [], []
    idx = 3
    for _ in range(1, num_layers):
        w_ih_l.append(refs[idx][...])                  # (Hp, 4Hp)
        w_hh_l.append(refs[idx + 1][...])              # (Hp, 4Hp)
        b_l.append(refs[idx + 2][...])                 # (1, 4Hp)
        idx += 3
    w_fc = refs[idx][...]                              # (Hp, 128)
    b_fc = refs[idx + 1][...]                          # (1, 128)
    out_ref = refs[idx + 2]                            # (bb, 128)

    x = x_ref[...].astype(jnp.float32)                 # (T, bb, D)
    T, B, D = x.shape

    # Layer-0 input projection for ALL timesteps in one batched matmul; only
    # the recurrent h @ w_hh matmuls sit on the serial critical path.
    x_proj = jnp.dot(x.reshape(T * B, D), w_ih0,
                     preferred_element_type=jnp.float32) + b0
    x_proj = x_proj.reshape(T, B, 4 * Hp)

    h = [jnp.zeros((B, Hp), jnp.float32) for _ in range(num_layers)]
    c = [jnp.zeros((B, Hp), jnp.float32) for _ in range(num_layers)]

    def gate_update(gates, c_prev):
        # Gate blocks are padded to 128 lanes, so these slices are
        # vreg-aligned views (no XLU lane shuffles on the serial path).
        i_g = jax.nn.sigmoid(gates[:, 0:Hp])
        f_g = jax.nn.sigmoid(gates[:, Hp:2 * Hp])
        g_g = jnp.tanh(gates[:, 2 * Hp:3 * Hp])
        o_g = jax.nn.sigmoid(gates[:, 3 * Hp:4 * Hp])
        c_new = f_g * c_prev + i_g * g_g
        h_new = o_g * jnp.tanh(c_new)
        return h_new, c_new

    # Fully unrolled recurrence: T is small & static at these sizes.
    for t in range(T):
        gates0 = x_proj[t] + jnp.dot(h[0], w_hh0,
                                     preferred_element_type=jnp.float32)
        h[0], c[0] = gate_update(gates0, c[0])
        inp = h[0]
        for l in range(1, num_layers):
            # Two separate dots: no per-step lane concat on the critical path.
            gates = (jnp.dot(inp, w_ih_l[l - 1],
                             preferred_element_type=jnp.float32)
                     + jnp.dot(h[l], w_hh_l[l - 1],
                               preferred_element_type=jnp.float32)
                     + b_l[l - 1])
            h[l], c[l] = gate_update(gates, c[l])
            inp = h[l]

    # FC emitted lane-dense: (bb, 128) with the real logit in lane 0.
    out = jnp.dot(h[num_layers - 1], w_fc,
                  preferred_element_type=jnp.float32) + b_fc
    out_ref[...] = out.astype(out_ref.dtype)


def pack_lstm_params(params, *, input_size, hidden_size, num_layers,
                     mxu_dtype=jnp.float32):
    """Build the padded / transposed / bias-fused weight layout ONCE.

    Call this once and reuse the result across forward calls (removes the
    per-invocation transpose/pad XLA ops from the hot path).
    """
    H = hidden_size
    Hp = ((H + 127) // 128) * 128       # pad each gate block to whole vregs
    OUT_LANES = 128                     # lane-dense FC output width

    def pad_gate_cols(w_t):             # (K, 4H) -> (K, 4Hp), gate-blockwise
        K = w_t.shape[0]
        out = jnp.zeros((K, 4 * Hp), mxu_dtype)
        for k in range(4):
            out = out.at[:, k * Hp:k * Hp + H].set(
                w_t[:, k * H:(k + 1) * H].astype(mxu_dtype))
        return out

    def pad_rows(w, kp):                # (K, N) -> (kp, N) with zero rows
        k = w.shape[0]
        if k == kp:
            return w
        return jnp.concatenate(
            [w, jnp.zeros((kp - k,) + w.shape[1:], w.dtype)], axis=0)

    args = []
    w_ih0, w_hh0, b_ih0, b_hh0 = params["layer0"]
    args.append(pad_gate_cols(jnp.asarray(w_ih0).T))                    # (D, 4Hp)
    args.append(pad_rows(pad_gate_cols(jnp.asarray(w_hh0).T), Hp))      # (Hp, 4Hp)
    args.append(pad_gate_cols((b_ih0 + b_hh0).reshape(1, -1)))          # (1, 4Hp)
    for l in range(1, num_layers):
        w_ih, w_hh, b_ih, b_hh = params[f"layer{l}"]
        args.append(pad_rows(pad_gate_cols(jnp.asarray(w_ih).T), Hp))   # (Hp, 4Hp)
        args.append(pad_rows(pad_gate_cols(jnp.asarray(w_hh).T), Hp))   # (Hp, 4Hp)
        args.append(pad_gate_cols((b_ih + b_hh).reshape(1, -1)))        # (1, 4Hp)
    w_fc, b_fc = params["fc"]
    w_fc_p = jnp.zeros((Hp, OUT_LANES), mxu_dtype)
    w_fc_p = w_fc_p.at[:H, 0].set(jnp.asarray(w_fc).reshape(-1).astype(mxu_dtype))
    b_fc_p = jnp.zeros((1, OUT_LANES), jnp.float32).at[0, 0].set(
        jnp.asarray(b_fc).reshape(-1)[0])
    args.append(w_fc_p)                                                 # (Hp, 128)
    args.append(b_fc_p)                                                 # (1, 128)
    return tuple(args), Hp


def lstm_model_forward(x, packed_weights, hidden_pad, *, num_layers,
                       batch_block=8):
    """x: (B, T, D); packed_weights/hidden_pad from pack_lstm_params."""
    B, T, D = x.shape
    bb = batch_block
    B_pad = ((max(B, bb) + bb - 1) // bb) * bb
    out_lanes = packed_weights[-1].shape[1]            # 128 (lane-dense FC)

    x_tbd = jnp.transpose(x, (1, 0, 2))                # (T, B, D)
    if B_pad != B:
        x_tbd = jnp.pad(x_tbd, ((0, 0), (0, B_pad - B), (0, 0)))

    kernel = functools.partial(_lstm_fc_kernel, num_layers, hidden_pad)
    vmem_full = pl.BlockSpec(memory_space=pltpu.MemorySpace.VMEM)
    out = pl.pallas_call(
        kernel,
        grid=(B_pad // bb,),                           # batch-parallel grid
        in_specs=[pl.BlockSpec((T, bb, D), lambda b: (0, b, 0))]
                 + [vmem_full] * len(packed_weights),  # weights stay resident
        out_specs=pl.BlockSpec((bb, out_lanes), lambda b: (b, 0)),
        out_shape=jax.ShapeDtypeStruct((B_pad, out_lanes), x.dtype),
        compiler_params=pltpu.CompilerParams(
            dimension_semantics=("parallel",)),
    )(x_tbd, *packed_weights)
    return out[:B, :1]


def _reference_forward(x, params, *, hidden_size, num_layers):
    """Pure-JAX reference mirroring torch.nn.LSTM (batch_first) + Linear."""
    B, T, _ = x.shape
    H = hidden_size
    inp_seq = x.astype(jnp.float32)
    for l in range(num_layers):
        w_ih, w_hh, b_ih, b_hh = params[f"layer{l}"]
        h = jnp.zeros((B, H), jnp.float32)
        c = jnp.zeros((B, H), jnp.float32)
        outs = []
        for t in range(T):
            gates = inp_seq[:, t, :] @ w_ih.T + h @ w_hh.T + b_ih + b_hh
            i_g = jax.nn.sigmoid(gates[:, 0:H])
            f_g = jax.nn.sigmoid(gates[:, H:2 * H])
            g_g = jnp.tanh(gates[:, 2 * H:3 * H])
            o_g = jax.nn.sigmoid(gates[:, 3 * H:4 * H])
            c = f_g * c + i_g * g_g
            h = o_g * jnp.tanh(c)
            outs.append(h)
        inp_seq = jnp.stack(outs, axis=1)
    w_fc, b_fc = params["fc"]
    return inp_seq[:, -1, :] @ w_fc.T + b_fc


def make_params(key, *, input_size, hidden_size, num_layers):
    H = hidden_size
    bound = 1.0 / jnp.sqrt(jnp.float32(H))
    params = {}
    for l in range(num_layers):
        d_in = input_size if l == 0 else H
        key, k1, k2, k3, k4 = jax.random.split(key, 5)
        params[f"layer{l}"] = (
            jax.random.uniform(k1, (4 * H, d_in), jnp.float32, -bound, bound),
            jax.random.uniform(k2, (4 * H, H), jnp.float32, -bound, bound),
            jax.random.uniform(k3, (4 * H,), jnp.float32, -bound, bound),
            jax.random.uniform(k4, (4 * H,), jnp.float32, -bound, bound),
        )
    key, k1, k2 = jax.random.split(key, 3)
    params["fc"] = (
        jax.random.uniform(k1, (1, H), jnp.float32, -bound, bound),
        jax.random.uniform(k2, (1,), jnp.float32, -bound, bound),
    )
    return params


if __name__ == "__main__":
    INPUT_SIZE = 16
    HIDDEN_SIZE = 32
    NUM_LAYERS = 2
    B, T = 2, 8

    root = jax.random.PRNGKey(0)
    kx, kp = jax.random.split(root)
    x = jax.random.normal(kx, (B, T, INPUT_SIZE), jnp.float32)
    params = make_params(kp, input_size=INPUT_SIZE, hidden_size=HIDDEN_SIZE,
                         num_layers=NUM_LAYERS)

    # Weight layout built once (cache & reuse across calls).
    packed, hp = pack_lstm_params(params, input_size=INPUT_SIZE,
                                  hidden_size=HIDDEN_SIZE,
                                  num_layers=NUM_LAYERS)

    out = lstm_model_forward(x, packed, hp, num_layers=NUM_LAYERS)
    out = jax.block_until_ready(out)

    ref = _reference_forward(x, params, hidden_size=HIDDEN_SIZE,
                             num_layers=NUM_LAYERS)
    assert out.shape == (B, 1), out.shape
    assert jnp.allclose(out, ref, atol=1e-5, rtol=1e-5), (out, ref)

    print("KERNEL_OK")
</pallas_src>

<mosaic_0001>
module attributes {stable_mosaic.version = 11 : i64} {
  func.func @_lstm_fc_kernel(%arg0: i32, %arg1: memref<8x8x16xf32, #tpu.memory_space<vmem>>, %arg2: memref<16x512xf32, #tpu.memory_space<vmem>>, %arg3: memref<128x512xf32, #tpu.memory_space<vmem>>, %arg4: memref<1x512xf32, #tpu.memory_space<vmem>>, %arg5: memref<128x512xf32, #tpu.memory_space<vmem>>, %arg6: memref<128x512xf32, #tpu.memory_space<vmem>>, %arg7: memref<1x512xf32, #tpu.memory_space<vmem>>, %arg8: memref<128x128xf32, #tpu.memory_space<vmem>>, %arg9: memref<1x128xf32, #tpu.memory_space<vmem>>, %arg10: memref<8x128xf32, #tpu.memory_space<vmem>>) attributes {dimension_semantics = [#tpu.dimension_semantics<parallel>], iteration_bounds = array<i64: 1>, scalar_prefetch = 0 : i64, scratch_operands = 0 : i64, tpu.core_type = #tpu.core_type<tc>, window_params = [{transform_indices = @transform_0, window_bounds = array<i64: 8, 8, 16>}, {pipeline_mode = #tpu.pipeline_mode<synchronous>, transform_indices = @transform_1, window_bounds = array<i64: 16, 512>}, {pipeline_mode = #tpu.pipeline_mode<synchronous>, transform_indices = @transform_2, window_bounds = array<i64: 128, 512>}, {pipeline_mode = #tpu.pipeline_mode<synchronous>, transform_indices = @transform_3, window_bounds = array<i64: 1, 512>}, {pipeline_mode = #tpu.pipeline_mode<synchronous>, transform_indices = @transform_4, window_bounds = array<i64: 128, 512>}, {pipeline_mode = #tpu.pipeline_mode<synchronous>, transform_indices = @transform_5, window_bounds = array<i64: 128, 512>}, {pipeline_mode = #tpu.pipeline_mode<synchronous>, transform_indices = @transform_6, window_bounds = array<i64: 1, 512>}, {pipeline_mode = #tpu.pipeline_mode<synchronous>, transform_indices = @transform_7, window_bounds = array<i64: 128, 128>}, {pipeline_mode = #tpu.pipeline_mode<synchronous>, transform_indices = @transform_8, window_bounds = array<i64: 1, 128>}, {transform_indices = @transform_9, window_bounds = array<i64: 8, 128>}]} {
    %c0 = arith.constant 0 : index
    %c0_0 = arith.constant 0 : index
    %0 = vector.load %arg2[%c0, %c0_0] : memref<16x512xf32, #tpu.memory_space<vmem>>, vector<16x512xf32>
    %c0_1 = arith.constant 0 : index
    %c0_2 = arith.constant 0 : index
    %1 = vector.load %arg3[%c0_1, %c0_2] : memref<128x512xf32, #tpu.memory_space<vmem>>, vector<128x512xf32>
    %c0_3 = arith.constant 0 : index
    %c0_4 = arith.constant 0 : index
    %2 = vector.load %arg4[%c0_3, %c0_4] : memref<1x512xf32, #tpu.memory_space<vmem>>, vector<1x512xf32>
    %c0_5 = arith.constant 0 : index
    %c0_6 = arith.constant 0 : index
    %3 = vector.load %arg5[%c0_5, %c0_6] : memref<128x512xf32, #tpu.memory_space<vmem>>, vector<128x512xf32>
    %c0_7 = arith.constant 0 : index
    %c0_8 = arith.constant 0 : index
    %4 = vector.load %arg6[%c0_7, %c0_8] : memref<128x512xf32, #tpu.memory_space<vmem>>, vector<128x512xf32>
    %c0_9 = arith.constant 0 : index
    %c0_10 = arith.constant 0 : index
    %5 = vector.load %arg7[%c0_9, %c0_10] : memref<1x512xf32, #tpu.memory_space<vmem>>, vector<1x512xf32>
    %c0_11 = arith.constant 0 : index
    %c0_12 = arith.constant 0 : index
    %6 = vector.load %arg8[%c0_11, %c0_12] : memref<128x128xf32, #tpu.memory_space<vmem>>, vector<128x128xf32>
    %c0_13 = arith.constant 0 : index
    %c0_14 = arith.constant 0 : index
    %7 = vector.load %arg9[%c0_13, %c0_14] : memref<1x128xf32, #tpu.memory_space<vmem>>, vector<1x128xf32>
    %c0_15 = arith.constant 0 : index
    %c0_16 = arith.constant 0 : index
    %c0_17 = arith.constant 0 : index
    %8 = vector.load %arg1[%c0_15, %c0_16, %c0_17] : memref<8x8x16xf32, #tpu.memory_space<vmem>>, vector<8x8x16xf32>
    %9 = vector.shape_cast %8 : vector<8x8x16xf32> to vector<64x16xf32>
    %cst = arith.constant dense<0.000000e+00> : vector<64x512xf32>
    %10 = tpu.matmul %9, %0, %cst {dimension_numbers = #tpu.dot_dimension_numbers<[1], [0], [0], [1], [0, 0, 1, 1], [], []>} : vector<64x16xf32>, vector<16x512xf32>, vector<64x512xf32> -> vector<64x512xf32>
    %11 = vector.broadcast %2 : vector<1x512xf32> to vector<64x512xf32>
    %12 = arith.addf %10, %11 : vector<64x512xf32>
    %13 = vector.shape_cast %12 : vector<64x512xf32> to vector<8x8x512xf32>
    %cst_18 = arith.constant 0.000000e+00 : f32
    %14 = vector.broadcast %cst_18 : f32 to vector<8x128xf32>
    %cst_19 = arith.constant 0.000000e+00 : f32
    %15 = vector.broadcast %cst_19 : f32 to vector<8x128xf32>
    %cst_20 = arith.constant 0.000000e+00 : f32
    %16 = vector.broadcast %cst_20 : f32 to vector<8x128xf32>
    %cst_21 = arith.constant 0.000000e+00 : f32
    %17 = vector.broadcast %cst_21 : f32 to vector<8x128xf32>
    %18 = vector.extract_strided_slice %13 {offsets = [0, 0, 0], sizes = [1, 8, 512], strides = [1, 1, 1]} : vector<8x8x512xf32> to vector<1x8x512xf32>
    %19 = vector.shape_cast %18 : vector<1x8x512xf32> to vector<8x512xf32>
    %cst_22 = arith.constant dense<0.000000e+00> : vector<8x512xf32>
    %20 = tpu.matmul %14, %1, %cst_22 {dimension_numbers = #tpu.dot_dimension_numbers<[1], [0], [0], [1], [0, 0, 1, 1], [], []>} : vector<8x128xf32>, vector<128x512xf32>, vector<8x512xf32> -> vector<8x512xf32>
    %21 = arith.addf %19, %20 : vector<8x512xf32>
    %22 = vector.extract_strided_slice %21 {offsets = [0, 0], sizes = [8, 128], strides = [1, 1]} : vector<8x512xf32> to vector<8x128xf32>
    %23 = arith.negf %22 : vector<8x128xf32>
    %24 = math.exp %23 : vector<8x128xf32>
    %cst_23 = arith.constant 1.000000e+00 : f32
    %25 = vector.broadcast %cst_23 : f32 to vector<8x128xf32>
    %26 = arith.addf %25, %24 : vector<8x128xf32>
    %27 = arith.divf %25, %26 : vector<8x128xf32>
    %28 = vector.extract_strided_slice %21 {offsets = [0, 128], sizes = [8, 128], strides = [1, 1]} : vector<8x512xf32> to vector<8x128xf32>
    %29 = arith.negf %28 : vector<8x128xf32>
    %30 = math.exp %29 : vector<8x128xf32>
    %cst_24 = arith.constant 1.000000e+00 : f32
    %31 = vector.broadcast %cst_24 : f32 to vector<8x128xf32>
    %32 = arith.addf %31, %30 : vector<8x128xf32>
    %33 = arith.divf %31, %32 : vector<8x128xf32>
    %34 = vector.extract_strided_slice %21 {offsets = [0, 256], sizes = [8, 128], strides = [1, 1]} : vector<8x512xf32> to vector<8x128xf32>
    %35 = math.tanh %34 : vector<8x128xf32>
    %36 = vector.extract_strided_slice %21 {offsets = [0, 384], sizes = [8, 128], strides = [1, 1]} : vector<8x512xf32> to vector<8x128xf32>
    %37 = arith.negf %36 : vector<8x128xf32>
    %38 = math.exp %37 : vector<8x128xf32>
    %cst_25 = arith.constant 1.000000e+00 : f32
    %39 = vector.broadcast %cst_25 : f32 to vector<8x128xf32>
    %40 = arith.addf %39, %38 : vector<8x128xf32>
    %41 = arith.divf %39, %40 : vector<8x128xf32>
    %42 = arith.mulf %33, %16 : vector<8x128xf32>
    %43 = arith.mulf %27, %35 : vector<8x128xf32>
    %44 = arith.addf %42, %43 : vector<8x128xf32>
    %45 = math.tanh %44 : vector<8x128xf32>
    %46 = arith.mulf %41, %45 : vector<8x128xf32>
    %cst_26 = arith.constant dense<0.000000e+00> : vector<8x512xf32>
    %47 = tpu.matmul %46, %3, %cst_26 {dimension_numbers = #tpu.dot_dimension_numbers<[1], [0], [0], [1], [0, 0, 1, 1], [], []>} : vector<8x128xf32>, vector<128x512xf32>, vector<8x512xf32> -> vector<8x512xf32>
    %cst_27 = arith.constant dense<0.000000e+00> : vector<8x512xf32>
    %48 = tpu.matmul %15, %4, %cst_27 {dimension_numbers = #tpu.dot_dimension_numbers<[1], [0], [0], [1], [0, 0, 1, 1], [], []>} : vector<8x128xf32>, vector<128x512xf32>, vector<8x512xf32> -> vector<8x512xf32>
    %49 = arith.addf %47, %48 : vector<8x512xf32>
    %50 = vector.broadcast %5 : vector<1x512xf32> to vector<8x512xf32>
    %51 = arith.addf %49, %50 : vector<8x512xf32>
    %52 = vector.extract_strided_slice %51 {offsets = [0, 0], sizes = [8, 128], strides = [1, 1]} : vector<8x512xf32> to vector<8x128xf32>
    %53 = arith.negf %52 : vector<8x128xf32>
    %54 = math.exp %53 : vector<8x128xf32>
    %cst_28 = arith.constant 1.000000e+00 : f32
    %55 = vector.broadcast %cst_28 : f32 to vector<8x128xf32>
    %56 = arith.addf %55, %54 : vector<8x128xf32>
    %57 = arith.divf %55, %56 : vector<8x128xf32>
    %58 = vector.extract_strided_slice %51 {offsets = [0, 128], sizes = [8, 128], strides = [1, 1]} : vector<8x512xf32> to vector<8x128xf32>
    %59 = arith.negf %58 : vector<8x128xf32>
    %60 = math.exp %59 : vector<8x128xf32>
    %cst_29 = arith.constant 1.000000e+00 : f32
    %61 = vector.broadcast %cst_29 : f32 to vector<8x128xf32>
    %62 = arith.addf %61, %60 : vector<8x128xf32>
    %63 = arith.divf %61, %62 : vector<8x128xf32>
    %64 = vector.extract_strided_slice %51 {offsets = [0, 256], sizes = [8, 128], strides = [1, 1]} : vector<8x512xf32> to vector<8x128xf32>
    %65 = math.tanh %64 : vector<8x128xf32>
    %66 = vector.extract_strided_slice %51 {offsets = [0, 384], sizes = [8, 128], strides = [1, 1]} : vector<8x512xf32> to vector<8x128xf32>
    %67 = arith.negf %66 : vector<8x128xf32>
    %68 = math.exp %67 : vector<8x128xf32>
    %cst_30 = arith.constant 1.000000e+00 : f32
    %69 = vector.broadcast %cst_30 : f32 to vector<8x128xf32>
    %70 = arith.addf %69, %68 : vector<8x128xf32>
    %71 = arith.divf %69, %70 : vector<8x128xf32>
    %72 = arith.mulf %63, %17 : vector<8x128xf32>
    %73 = arith.mulf %57, %65 : vector<8x128xf32>
    %74 = arith.addf %72, %73 : vector<8x128xf32>
    %75 = math.tanh %74 : vector<8x128xf32>
    %76 = arith.mulf %71, %75 : vector<8x128xf32>
    %77 = vector.extract_strided_slice %13 {offsets = [1, 0, 0], sizes = [1, 8, 512], strides = [1, 1, 1]} : vector<8x8x512xf32> to vector<1x8x512xf32>
    %78 = vector.shape_cast %77 : vector<1x8x512xf32> to vector<8x512xf32>
    %cst_31 = arith.constant dense<0.000000e+00> : vector<8x512xf32>
    %79 = tpu.matmul %46, %1, %cst_31 {dimension_numbers = #tpu.dot_dimension_numbers<[1], [0], [0], [1], [0, 0, 1, 1], [], []>} : vector<8x128xf32>, vector<128x512xf32>, vector<8x512xf32> -> vector<8x512xf32>
    %80 = arith.addf %78, %79 : vector<8x512xf32>
    %81 = vector.extract_strided_slice %80 {offsets = [0, 0], sizes = [8, 128], strides = [1, 1]} : vector<8x512xf32> to vector<8x128xf32>
    %82 = arith.negf %81 : vector<8x128xf32>
    %83 = math.exp %82 : vector<8x128xf32>
    %cst_32 = arith.constant 1.000000e+00 : f32
    %84 = vector.broadcast %cst_32 : f32 to vector<8x128xf32>
    %85 = arith.addf %84, %83 : vector<8x128xf32>
    %86 = arith.divf %84, %85 : vector<8x128xf32>
    %87 = vector.extract_strided_slice %80 {offsets = [0, 128], sizes = [8, 128], strides = [1, 1]} : vector<8x512xf32> to vector<8x128xf32>
    %88 = arith.negf %87 : vector<8x128xf32>
    %89 = math.exp %88 : vector<8x128xf32>
    %cst_33 = arith.constant 1.000000e+00 : f32
    %90 = vector.broadcast %cst_33 : f32 to vector<8x128xf32>
    %91 = arith.addf %90, %89 : vector<8x128xf32>
    %92 = arith.divf %90, %91 : vector<8x128xf32>
    %93 = vector.extract_strided_slice %80 {offsets = [0, 256], sizes = [8, 128], strides = [1, 1]} : vector<8x512xf32> to vector<8x128xf32>
    %94 = math.tanh %93 : vector<8x128xf32>
    %95 = vector.extract_strided_slice %80 {offsets = [0, 384], sizes = [8, 128], strides = [1, 1]} : vector<8x512xf32> to vector<8x128xf32>
    %96 = arith.negf %95 : vector<8x128xf32>
    %97 = math.exp %96 : vector<8x128xf32>
    %cst_34 = arith.constant 1.000000e+00 : f32
    %98 = vector.broadcast %cst_34 : f32 to vector<8x128xf32>
    %99 = arith.addf %98, %97 : vector<8x128xf32>
    %100 = arith.divf %98, %99 : vector<8x128xf32>
    %101 = arith.mulf %92, %44 : vector<8x128xf32>
    %102 = arith.mulf %86, %94 : vector<8x128xf32>
    %103 = arith.addf %101, %102 : vector<8x128xf32>
    %104 = math.tanh %103 : vector<8x128xf32>
    %105 = arith.mulf %100, %104 : vector<8x128xf32>
    %cst_35 = arith.constant dense<0.000000e+00> : vector<8x512xf32>
    %106 = tpu.matmul %105, %3, %cst_35 {dimension_numbers = #tpu.dot_dimension_numbers<[1], [0], [0], [1], [0, 0, 1, 1], [], []>} : vector<8x128xf32>, vector<128x512xf32>, vector<8x512xf32> -> vector<8x512xf32>
    %cst_36 = arith.constant dense<0.000000e+00> : vector<8x512xf32>
    %107 = tpu.matmul %76, %4, %cst_36 {dimension_numbers = #tpu.dot_dimension_numbers<[1], [0], [0], [1], [0, 0, 1, 1], [], []>} : vector<8x128xf32>, vector<128x512xf32>, vector<8x512xf32> -> vector<8x512xf32>
    %108 = arith.addf %106, %107 : vector<8x512xf32>
    %109 = vector.broadcast %5 : vector<1x512xf32> to vector<8x512xf32>
    %110 = arith.addf %108, %109 : vector<8x512xf32>
    %111 = vector.extract_strided_slice %110 {offsets = [0, 0], sizes = [8, 128], strides = [1, 1]} : vector<8x512xf32> to vector<8x128xf32>
    %112 = arith.negf %111 : vector<8x128xf32>
    %113 = math.exp %112 : vector<8x128xf32>
    %cst_37 = arith.constant 1.000000e+00 : f32
    %114 = vector.broadcast %cst_37 : f32 to vector<8x128xf32>
    %115 = arith.addf %114, %113 : vector<8x128xf32>
    %116 = arith.divf %114, %115 : vector<8x128xf32>
    %117 = vector.extract_strided_slice %110 {offsets = [0, 128], sizes = [8, 128], strides = [1, 1]} : vector<8x512xf32> to vector<8x128xf32>
    %118 = arith.negf %117 : vector<8x128xf32>
    %119 = math.exp %118 : vector<8x128xf32>
    %cst_38 = arith.constant 1.000000e+00 : f32
    %120 = vector.broadcast %cst_38 : f32 to vector<8x128xf32>
    %121 = arith.addf %120, %119 : vector<8x128xf32>
    %122 = arith.divf %120, %121 : vector<8x128xf32>
    %123 = vector.extract_strided_slice %110 {offsets = [0, 256], sizes = [8, 128], strides = [1, 1]} : vector<8x512xf32> to vector<8x128xf32>
    %124 = math.tanh %123 : vector<8x128xf32>
    %125 = vector.extract_strided_slice %110 {offsets = [0, 384], sizes = [8, 128], strides = [1, 1]} : vector<8x512xf32> to vector<8x128xf32>
    %126 = arith.negf %125 : vector<8x128xf32>
    %127 = math.exp %126 : vector<8x128xf32>
    %cst_39 = arith.constant 1.000000e+00 : f32
    %128 = vector.broadcast %cst_39 : f32 to vector<8x128xf32>
    %129 = arith.addf %128, %127 : vector<8x128xf32>
    %130 = arith.divf %128, %129 : vector<8x128xf32>
    %131 = arith.mulf %122, %74 : vector<8x128xf32>
    %132 = arith.mulf %116, %124 : vector<8x128xf32>
    %133 = arith.addf %131, %132 : vector<8x128xf32>
    %134 = math.tanh %133 : vector<8x128xf32>
    %135 = arith.mulf %130, %134 : vector<8x128xf32>
    %136 = vector.extract_strided_slice %13 {offsets = [2, 0, 0], sizes = [1, 8, 512], strides = [1, 1, 1]} : vector<8x8x512xf32> to vector<1x8x512xf32>
    %137 = vector.shape_cast %136 : vector<1x8x512xf32> to vector<8x512xf32>
    %cst_40 = arith.constant dense<0.000000e+00> : vector<8x512xf32>
    %138 = tpu.matmul %105, %1, %cst_40 {dimension_numbers = #tpu.dot_dimension_numbers<[1], [0], [0], [1], [0, 0, 1, 1], [], []>} : vector<8x128xf32>, vector<128x512xf32>, vector<8x512xf32> -> vector<8x512xf32>
    %139 = arith.addf %137, %138 : vector<8x512xf32>
    %140 = vector.extract_strided_slice %139 {offsets = [0, 0], sizes = [8, 128], strides = [1, 1]} : vector<8x512xf32> to vector<8x128xf32>
    %141 = arith.negf %140 : vector<8x128xf32>
    %142 = math.exp %141 : vector<8x128xf32>
    %cst_41 = arith.constant 1.000000e+00 : f32
    %143 = vector.broadcast %cst_41 : f32 to vector<8x128xf32>
    %144 = arith.addf %143, %142 : vector<8x128xf32>
    %145 = arith.divf %143, %144 : vector<8x128xf32>
    %146 = vector.extract_strided_slice %139 {offsets = [0, 128], sizes = [8, 128], strides = [1, 1]} : vector<8x512xf32> to vector<8x128xf32>
    %147 = arith.negf %146 : vector<8x128xf32>
    %148 = math.exp %147 : vector<8x128xf32>
    %cst_42 = arith.constant 1.000000e+00 : f32
    %149 = vector.broadcast %cst_42 : f32 to vector<8x128xf32>
    %150 = arith.addf %149, %148 : vector<8x128xf32>
    %151 = arith.divf %149, %150 : vector<8x128xf32>
    %152 = vector.extract_strided_slice %139 {offsets = [0, 256], sizes = [8, 128], strides = [1, 1]} : vector<8x512xf32> to vector<8x128xf32>
    %153 = math.tanh %152 : vector<8x128xf32>
    %154 = vector.extract_strided_slice %139 {offsets = [0, 384], sizes = [8, 128], strides = [1, 1]} : vector<8x512xf32> to vector<8x128xf32>
    %155 = arith.negf %154 : vector<8x128xf32>
    %156 = math.exp %155 : vector<8x128xf32>
    %cst_43 = arith.constant 1.000000e+00 : f32
    %157 = vector.broadcast %cst_43 : f32 to vector<8x128xf32>
    %158 = arith.addf %157, %156 : vector<8x128xf32>
    %159 = arith.divf %157, %158 : vector<8x128xf32>
    %160 = arith.mulf %151, %103 : vector<8x128xf32>
    %161 = arith.mulf %145, %153 : vector<8x128xf32>
    %162 = arith.addf %160, %161 : vector<8x128xf32>
    %163 = math.tanh %162 : vector<8x128xf32>
    %164 = arith.mulf %159, %163 : vector<8x128xf32>
    %cst_44 = arith.constant dense<0.000000e+00> : vector<8x512xf32>
    %165 = tpu.matmul %164, %3, %cst_44 {dimension_numbers = #tpu.dot_dimension_numbers<[1], [0], [0], [1], [0, 0, 1, 1], [], []>} : vector<8x128xf32>, vector<128x512xf32>, vector<8x512xf32> -> vector<8x512xf32>
    %cst_45 = arith.constant dense<0.000000e+00> : vector<8x512xf32>
    %166 = tpu.matmul %135, %4, %cst_45 {dimension_numbers = #tpu.dot_dimension_numbers<[1], [0], [0], [1], [0, 0, 1, 1], [], []>} : vector<8x128xf32>, vector<128x512xf32>, vector<8x512xf32> -> vector<8x512xf32>
    %167 = arith.addf %165, %166 : vector<8x512xf32>
    %168 = vector.broadcast %5 : vector<1x512xf32> to vector<8x512xf32>
    %169 = arith.addf %167, %168 : vector<8x512xf32>
    %170 = vector.extract_strided_slice %169 {offsets = [0, 0], sizes = [8, 128], strides = [1, 1]} : vector<8x512xf32> to vector<8x128xf32>
    %171 = arith.negf %170 : vector<8x128xf32>
    %172 = math.exp %171 : vector<8x128xf32>
    %cst_46 = arith.constant 1.000000e+00 : f32
    %173 = vector.broadcast %cst_46 : f32 to vector<8x128xf32>
    %174 = arith.addf %173, %172 : vector<8x128xf32>
    %175 = arith.divf %173, %174 : vector<8x128xf32>
    %176 = vector.extract_strided_slice %169 {offsets = [0, 128], sizes = [8, 128], strides = [1, 1]} : vector<8x512xf32> to vector<8x128xf32>
    %177 = arith.negf %176 : vector<8x128xf32>
    %178 = math.exp %177 : vector<8x128xf32>
    %cst_47 = arith.constant 1.000000e+00 : f32
    %179 = vector.broadcast %cst_47 : f32 to vector<8x128xf32>
    %180 = arith.addf %179, %178 : vector<8x128xf32>
    %181 = arith.divf %179, %180 : vector<8x128xf32>
    %182 = vector.extract_strided_slice %169 {offsets = [0, 256], sizes = [8, 128], strides = [1, 1]} : vector<8x512xf32> to vector<8x128xf32>
    %183 = math.tanh %182 : vector<8x128xf32>
    %184 = vector.extract_strided_slice %169 {offsets = [0, 384], sizes = [8, 128], strides = [1, 1]} : vector<8x512xf32> to vector<8x128xf32>
    %185 = arith.negf %184 : vector<8x128xf32>
    %186 = math.exp %185 : vector<8x128xf32>
    %cst_48 = arith.constant 1.000000e+00 : f32
    %187 = vector.broadcast %cst_48 : f32 to vector<8x128xf32>
    %188 = arith.addf %187, %186 : vector<8x128xf32>
    %189 = arith.divf %187, %188 : vector<8x128xf32>
    %190 = arith.mulf %181, %133 : vector<8x128xf32>
    %191 = arith.mulf %175, %183 : vector<8x128xf32>
    %192 = arith.addf %190, %191 : vector<8x128xf32>
    %193 = math.tanh %192 : vector<8x128xf32>
    %194 = arith.mulf %189, %193 : vector<8x128xf32>
    %195 = vector.extract_strided_slice %13 {offsets = [3, 0, 0], sizes = [1, 8, 512], strides = [1, 1, 1]} : vector<8x8x512xf32> to vector<1x8x512xf32>
    %196 = vector.shape_cast %195 : vector<1x8x512xf32> to vector<8x512xf32>
    %cst_49 = arith.constant dense<0.000000e+00> : vector<8x512xf32>
    %197 = tpu.matmul %164, %1, %cst_49 {dimension_numbers = #tpu.dot_dimension_numbers<[1], [0], [0], [1], [0, 0, 1, 1], [], []>} : vector<8x128xf32>, vector<128x512xf32>, vector<8x512xf32> -> vector<8x512xf32>
    %198 = arith.addf %196, %197 : vector<8x512xf32>
    %199 = vector.extract_strided_slice %198 {offsets = [0, 0], sizes = [8, 128], strides = [1, 1]} : vector<8x512xf32> to vector<8x128xf32>
    %200 = arith.negf %199 : vector<8x128xf32>
    %201 = math.exp %200 : vector<8x128xf32>
    %cst_50 = arith.constant 1.000000e+00 : f32
    %202 = vector.broadcast %cst_50 : f32 to vector<8x128xf32>
    %203 = arith.addf %202, %201 : vector<8x128xf32>
    %204 = arith.divf %202, %203 : vector<8x128xf32>
    %205 = vector.extract_strided_slice %198 {offsets = [0, 128], sizes = [8, 128], strides = [1, 1]} : vector<8x512xf32> to vector<8x128xf32>
    %206 = arith.negf %205 : vector<8x128xf32>
    %207 = math.exp %206 : vector<8x128xf32>
    %cst_51 = arith.constant 1.000000e+00 : f32
    %208 = vector.broadcast %cst_51 : f32 to vector<8x128xf32>
    %209 = arith.addf %208, %207 : vector<8x128xf32>
    %210 = arith.divf %208, %209 : vector<8x128xf32>
    %211 = vector.extract_strided_slice %198 {offsets = [0, 256], sizes = [8, 128], strides = [1, 1]} : vector<8x512xf32> to vector<8x128xf32>
    %212 = math.tanh %211 : vector<8x128xf32>
    %213 = vector.extract_strided_slice %198 {offsets = [0, 384], sizes = [8, 128], strides = [1, 1]} : vector<8x512xf32> to vector<8x128xf32>
    %214 = arith.negf %213 : vector<8x128xf32>
    %215 = math.exp %214 : vector<8x128xf32>
    %cst_52 = arith.constant 1.000000e+00 : f32
    %216 = vector.broadcast %cst_52 : f32 to vector<8x128xf32>
    %217 = arith.addf %216, %215 : vector<8x128xf32>
    %218 = arith.divf %216, %217 : vector<8x128xf32>
    %219 = arith.mulf %210, %162 : vector<8x128xf32>
    %220 = arith.mulf %204, %212 : vector<8x128xf32>
    %221 = arith.addf %219, %220 : vector<8x128xf32>
    %222 = math.tanh %221 : vector<8x128xf32>
    %223 = arith.mulf %218, %222 : vector<8x128xf32>
    %cst_53 = arith.constant dense<0.000000e+00> : vector<8x512xf32>
    %224 = tpu.matmul %223, %3, %cst_53 {dimension_numbers = #tpu.dot_dimension_numbers<[1], [0], [0], [1], [0, 0, 1, 1], [], []>} : vector<8x128xf32>, vector<128x512xf32>, vector<8x512xf32> -> vector<8x512xf32>
    %cst_54 = arith.constant dense<0.000000e+00> : vector<8x512xf32>
    %225 = tpu.matmul %194, %4, %cst_54 {dimension_numbers = #tpu.dot_dimension_numbers<[1], [0], [0], [1], [0, 0, 1, 1], [], []>} : vector<8x128xf32>, vector<128x512xf32>, vector<8x512xf32> -> vector<8x512xf32>
    %226 = arith.addf %224, %225 : vector<8x512xf32>
    %227 = vector.broadcast %5 : vector<1x512xf32> to vector<8x512xf32>
    %228 = arith.addf %226, %227 : vector<8x512xf32>
    %229 = vector.extract_strided_slice %228 {offsets = [0, 0], sizes = [8, 128], strides = [1, 1]} : vector<8x512xf32> to vector<8x128xf32>
    %230 = arith.negf %229 : vector<8x128xf32>
    %231 = math.exp %230 : vector<8x128xf32>
    %cst_55 = arith.constant 1.000000e+00 : f32
    %232 = vector.broadcast %cst_55 : f32 to vector<8x128xf32>
    %233 = arith.addf %232, %231 : vector<8x128xf32>
    %234 = arith.divf %232, %233 : vector<8x128xf32>
    %235 = vector.extract_strided_slice %228 {offsets = [0, 128], sizes = [8, 128], strides = [1, 1]} : vector<8x512xf32> to vector<8x128xf32>
    %236 = arith.negf %235 : vector<8x128xf32>
    %237 = math.exp %236 : vector<8x128xf32>
    %cst_56 = arith.constant 1.000000e+00 : f32
    %238 = vector.broadcast %cst_56 : f32 to vector<8x128xf32>
    %239 = arith.addf %238, %237 : vector<8x128xf32>
    %240 = arith.divf %238, %239 : vector<8x128xf32>
    %241 = vector.extract_strided_slice %228 {offsets = [0, 256], sizes = [8, 128], strides = [1, 1]} : vector<8x512xf32> to vector<8x128xf32>
    %242 = math.tanh %241 : vector<8x128xf32>
    %243 = vector.extract_strided_slice %228 {offsets = [0, 384], sizes = [8, 128], strides = [1, 1]} : vector<8x512xf32> to vector<8x128xf32>
    %244 = arith.negf %243 : vector<8x128xf32>
    %245 = math.exp %244 : vector<8x128xf32>
    %cst_57 = arith.constant 1.000000e+00 : f32
    %246 = vector.broadcast %cst_57 : f32 to vector<8x128xf32>
    %247 = arith.addf %246, %245 : vector<8x128xf32>
    %248 = arith.divf %246, %247 : vector<8x128xf32>
    %249 = arith.mulf %240, %192 : vector<8x128xf32>
    %250 = arith.mulf %234, %242 : vector<8x128xf32>
    %251 = arith.addf %249, %250 : vector<8x128xf32>
    %252 = math.tanh %251 : vector<8x128xf32>
    %253 = arith.mulf %248, %252 : vector<8x128xf32>
    %254 = vector.extract_strided_slice %13 {offsets = [4, 0, 0], sizes = [1, 8, 512], strides = [1, 1, 1]} : vector<8x8x512xf32> to vector<1x8x512xf32>
    %255 = vector.shape_cast %254 : vector<1x8x512xf32> to vector<8x512xf32>
    %cst_58 = arith.constant dense<0.000000e+00> : vector<8x512xf32>
    %256 = tpu.matmul %223, %1, %cst_58 {dimension_numbers = #tpu.dot_dimension_numbers<[1], [0], [0], [1], [0, 0, 1, 1], [], []>} : vector<8x128xf32>, vector<128x512xf32>, vector<8x512xf32> -> vector<8x512xf32>
    %257 = arith.addf %255, %256 : vector<8x512xf32>
    %258 = vector.extract_strided_slice %257 {offsets = [0, 0], sizes = [8, 128], strides = [1, 1]} : vector<8x512xf32> to vector<8x128xf32>
    %259 = arith.negf %258 : vector<8x128xf32>
    %260 = math.exp %259 : vector<8x128xf32>
    %cst_59 = arith.constant 1.000000e+00 : f32
    %261 = vector.broadcast %cst_59 : f32 to vector<8x128xf32>
    %262 = arith.addf %261, %260 : vector<8x128xf32>
    %263 = arith.divf %261, %262 : vector<8x128xf32>
    %264 = vector.extract_strided_slice %257 {offsets = [0, 128], sizes = [8, 128], strides = [1, 1]} : vector<8x512xf32> to vector<8x128xf32>
    %265 = arith.negf %264 : vector<8x128xf32>
    %266 = math.exp %265 : vector<8x128xf32>
    %cst_60 = arith.constant 1.000000e+00 : f32
    %267 = vector.broadcast %cst_60 : f32 to vector<8x128xf32>
    %268 = arith.addf %267, %266 : vector<8x128xf32>
    %269 = arith.divf %267, %268 : vector<8x128xf32>
    %270 = vector.extract_strided_slice %257 {offsets = [0, 256], sizes = [8, 128], strides = [1, 1]} : vector<8x512xf32> to vector<8x128xf32>
    %271 = math.tanh %270 : vector<8x128xf32>
    %272 = vector.extract_strided_slice %257 {offsets = [0, 384], sizes = [8, 128], strides = [1, 1]} : vector<8x512xf32> to vector<8x128xf32>
    %273 = arith.negf %272 : vector<8x128xf32>
    %274 = math.exp %273 : vector<8x128xf32>
    %cst_61 = arith.constant 1.000000e+00 : f32
    %275 = vector.broadcast %cst_61 : f32 to vector<8x128xf32>
    %276 = arith.addf %275, %274 : vector<8x128xf32>
    %277 = arith.divf %275, %276 : vector<8x128xf32>
    %278 = arith.mulf %269, %221 : vector<8x128xf32>
    %279 = arith.mulf %263, %271 : vector<8x128xf32>
    %280 = arith.addf %278, %279 : vector<8x128xf32>
    %281 = math.tanh %280 : vector<8x128xf32>
    %282 = arith.mulf %277, %281 : vector<8x128xf32>
    %cst_62 = arith.constant dense<0.000000e+00> : vector<8x512xf32>
    %283 = tpu.matmul %282, %3, %cst_62 {dimension_numbers = #tpu.dot_dimension_numbers<[1], [0], [0], [1], [0, 0, 1, 1], [], []>} : vector<8x128xf32>, vector<128x512xf32>, vector<8x512xf32> -> vector<8x512xf32>
    %cst_63 = arith.constant dense<0.000000e+00> : vector<8x512xf32>
    %284 = tpu.matmul %253, %4, %cst_63 {dimension_numbers = #tpu.dot_dimension_numbers<[1], [0], [0], [1], [0, 0, 1, 1], [], []>} : vector<8x128xf32>, vector<128x512xf32>, vector<8x512xf32> -> vector<8x512xf32>
    %285 = arith.addf %283, %284 : vector<8x512xf32>
    %286 = vector.broadcast %5 : vector<1x512xf32> to vector<8x512xf32>
    %287 = arith.addf %285, %286 : vector<8x512xf32>
    %288 = vector.extract_strided_slice %287 {offsets = [0, 0], sizes = [8, 128], strides = [1, 1]} : vector<8x512xf32> to vector<8x128xf32>
    %289 = arith.negf %288 : vector<8x128xf32>
    %290 = math.exp %289 : vector<8x128xf32>
    %cst_64 = arith.constant 1.000000e+00 : f32
    %291 = vector.broadcast %cst_64 : f32 to vector<8x128xf32>
    %292 = arith.addf %291, %290 : vector<8x128xf32>
    %293 = arith.divf %291, %292 : vector<8x128xf32>
    %294 = vector.extract_strided_slice %287 {offsets = [0, 128], sizes = [8, 128], strides = [1, 1]} : vector<8x512xf32> to vector<8x128xf32>
    %295 = arith.negf %294 : vector<8x128xf32>
    %296 = math.exp %295 : vector<8x128xf32>
    %cst_65 = arith.constant 1.000000e+00 : f32
    %297 = vector.broadcast %cst_65 : f32 to vector<8x128xf32>
    %298 = arith.addf %297, %296 : vector<8x128xf32>
    %299 = arith.divf %297, %298 : vector<8x128xf32>
    %300 = vector.extract_strided_slice %287 {offsets = [0, 256], sizes = [8, 128], strides = [1, 1]} : vector<8x512xf32> to vector<8x128xf32>
    %301 = math.tanh %300 : vector<8x128xf32>
    %302 = vector.extract_strided_slice %287 {offsets = [0, 384], sizes = [8, 128], strides = [1, 1]} : vector<8x512xf32> to vector<8x128xf32>
    %303 = arith.negf %302 : vector<8x128xf32>
    %304 = math.exp %303 : vector<8x128xf32>
    %cst_66 = arith.constant 1.000000e+00 : f32
    %305 = vector.broadcast %cst_66 : f32 to vector<8x128xf32>
    %306 = arith.addf %305, %304 : vector<8x128xf32>
    %307 = arith.divf %305, %306 : vector<8x128xf32>
    %308 = arith.mulf %299, %251 : vector<8x128xf32>
    %309 = arith.mulf %293, %301 : vector<8x128xf32>
    %310 = arith.addf %308, %309 : vector<8x128xf32>
    %311 = math.tanh %310 : vector<8x128xf32>
    %312 = arith.mulf %307, %311 : vector<8x128xf32>
    %313 = vector.extract_strided_slice %13 {offsets = [5, 0, 0], sizes = [1, 8, 512], strides = [1, 1, 1]} : vector<8x8x512xf32> to vector<1x8x512xf32>
    %314 = vector.shape_cast %313 : vector<1x8x512xf32> to vector<8x512xf32>
    %cst_67 = arith.constant dense<0.000000e+00> : vector<8x512xf32>
    %315 = tpu.matmul %282, %1, %cst_67 {dimension_numbers = #tpu.dot_dimension_numbers<[1], [0], [0], [1], [0, 0, 1, 1], [], []>} : vector<8x128xf32>, vector<128x512xf32>, vector<8x512xf32> -> vector<8x512xf32>
    %316 = arith.addf %314, %315 : vector<8x512xf32>
    %317 = vector.extract_strided_slice %316 {offsets = [0, 0], sizes = [8, 128], strides = [1, 1]} : vector<8x512xf32> to vector<8x128xf32>
    %318 = arith.negf %317 : vector<8x128xf32>
    %319 = math.exp %318 : vector<8x128xf32>
    %cst_68 = arith.constant 1.000000e+00 : f32
    %320 = vector.broadcast %cst_68 : f32 to vector<8x128xf32>
    %321 = arith.addf %320, %319 : vector<8x128xf32>
    %322 = arith.divf %320, %321 : vector<8x128xf32>
    %323 = vector.extract_strided_slice %316 {offsets = [0, 128], sizes = [8, 128], strides = [1, 1]} : vector<8x512xf32> to vector<8x128xf32>
    %324 = arith.negf %323 : vector<8x128xf32>
    %325 = math.exp %324 : vector<8x128xf32>
    %cst_69 = arith.constant 1.000000e+00 : f32
    %326 = vector.broadcast %cst_69 : f32 to vector<8x128xf32>
    %327 = arith.addf %326, %325 : vector<8x128xf32>
    %328 = arith.divf %326, %327 : vector<8x128xf32>
    %329 = vector.extract_strided_slice %316 {offsets = [0, 256], sizes = [8, 128], strides = [1, 1]} : vector<8x512xf32> to vector<8x128xf32>
    %330 = math.tanh %329 : vector<8x128xf32>
    %331 = vector.extract_strided_slice %316 {offsets = [0, 384], sizes = [8, 128], strides = [1, 1]} : vector<8x512xf32> to vector<8x128xf32>
    %332 = arith.negf %331 : vector<8x128xf32>
    %333 = math.exp %332 : vector<8x128xf32>
    %cst_70 = arith.constant 1.000000e+00 : f32
    %334 = vector.broadcast %cst_70 : f32 to vector<8x128xf32>
    %335 = arith.addf %334, %333 : vector<8x128xf32>
    %336 = arith.divf %334, %335 : vector<8x128xf32>
    %337 = arith.mulf %328, %280 : vector<8x128xf32>
    %338 = arith.mulf %322, %330 : vector<8x128xf32>
    %339 = arith.addf %337, %338 : vector<8x128xf32>
    %340 = math.tanh %339 : vector<8x128xf32>
    %341 = arith.mulf %336, %340 : vector<8x128xf32>
    %cst_71 = arith.constant dense<0.000000e+00> : vector<8x512xf32>
    %342 = tpu.matmul %341, %3, %cst_71 {dimension_numbers = #tpu.dot_dimension_numbers<[1], [0], [0], [1], [0, 0, 1, 1], [], []>} : vector<8x128xf32>, vector<128x512xf32>, vector<8x512xf32> -> vector<8x512xf32>
    %cst_72 = arith.constant dense<0.000000e+00> : vector<8x512xf32>
    %343 = tpu.matmul %312, %4, %cst_72 {dimension_numbers = #tpu.dot_dimension_numbers<[1], [0], [0], [1], [0, 0, 1, 1], [], []>} : vector<8x128xf32>, vector<128x512xf32>, vector<8x512xf32> -> vector<8x512xf32>
    %344 = arith.addf %342, %343 : vector<8x512xf32>
    %345 = vector.broadcast %5 : vector<1x512xf32> to vector<8x512xf32>
    %346 = arith.addf %344, %345 : vector<8x512xf32>
    %347 = vector.extract_strided_slice %346 {offsets = [0, 0], sizes = [8, 128], strides = [1, 1]} : vector<8x512xf32> to vector<8x128xf32>
    %348 = arith.negf %347 : vector<8x128xf32>
    %349 = math.exp %348 : vector<8x128xf32>
    %cst_73 = arith.constant 1.000000e+00 : f32
    %350 = vector.broadcast %cst_73 : f32 to vector<8x128xf32>
    %351 = arith.addf %350, %349 : vector<8x128xf32>
    %352 = arith.divf %350, %351 : vector<8x128xf32>
    %353 = vector.extract_strided_slice %346 {offsets = [0, 128], sizes = [8, 128], strides = [1, 1]} : vector<8x512xf32> to vector<8x128xf32>
    %354 = arith.negf %353 : vector<8x128xf32>
    %355 = math.exp %354 : vector<8x128xf32>
    %cst_74 = arith.constant 1.000000e+00 : f32
    %356 = vector.broadcast %cst_74 : f32 to vector<8x128xf32>
    %357 = arith.addf %356, %355 : vector<8x128xf32>
    %358 = arith.divf %356, %357 : vector<8x128xf32>
    %359 = vector.extract_strided_slice %346 {offsets = [0, 256], sizes = [8, 128], strides = [1, 1]} : vector<8x512xf32> to vector<8x128xf32>
    %360 = math.tanh %359 : vector<8x128xf32>
    %361 = vector.extract_strided_slice %346 {offsets = [0, 384], sizes = [8, 128], strides = [1, 1]} : vector<8x512xf32> to vector<8x128xf32>
    %362 = arith.negf %361 : vector<8x128xf32>
    %363 = math.exp %362 : vector<8x128xf32>
    %cst_75 = arith.constant 1.000000e+00 : f32
    %364 = vector.broadcast %cst_75 : f32 to vector<8x128xf32>
    %365 = arith.addf %364, %363 : vector<8x128xf32>
    %366 = arith.divf %364, %365 : vector<8x128xf32>
    %367 = arith.mulf %358, %310 : vector<8x128xf32>
    %368 = arith.mulf %352, %360 : vector<8x128xf32>
    %369 = arith.addf %367, %368 : vector<8x128xf32>
    %370 = math.tanh %369 : vector<8x128xf32>
    %371 = arith.mulf %366, %370 : vector<8x128xf32>
    %372 = vector.extract_strided_slice %13 {offsets = [6, 0, 0], sizes = [1, 8, 512], strides = [1, 1, 1]} : vector<8x8x512xf32> to vector<1x8x512xf32>
    %373 = vector.shape_cast %372 : vector<1x8x512xf32> to vector<8x512xf32>
    %cst_76 = arith.constant dense<0.000000e+00> : vector<8x512xf32>
    %374 = tpu.matmul %341, %1, %cst_76 {dimension_numbers = #tpu.dot_dimension_numbers<[1], [0], [0], [1], [0, 0, 1, 1], [], []>} : vector<8x128xf32>, vector<128x512xf32>, vector<8x512xf32> -> vector<8x512xf32>
    %375 = arith.addf %373, %374 : vector<8x512xf32>
    %376 = vector.extract_strided_slice %375 {offsets = [0, 0], sizes = [8, 128], strides = [1, 1]} : vector<8x512xf32> to vector<8x128xf32>
    %377 = arith.negf %376 : vector<8x128xf32>
    %378 = math.exp %377 : vector<8x128xf32>
    %cst_77 = arith.constant 1.000000e+00 : f32
    %379 = vector.broadcast %cst_77 : f32 to vector<8x128xf32>
    %380 = arith.addf %379, %378 : vector<8x128xf32>
    %381 = arith.divf %379, %380 : vector<8x128xf32>
    %382 = vector.extract_strided_slice %375 {offsets = [0, 128], sizes = [8, 128], strides = [1, 1]} : vector<8x512xf32> to vector<8x128xf32>
    %383 = arith.negf %382 : vector<8x128xf32>
    %384 = math.exp %383 : vector<8x128xf32>
    %cst_78 = arith.constant 1.000000e+00 : f32
    %385 = vector.broadcast %cst_78 : f32 to vector<8x128xf32>
    %386 = arith.addf %385, %384 : vector<8x128xf32>
    %387 = arith.divf %385, %386 : vector<8x128xf32>
    %388 = vector.extract_strided_slice %375 {offsets = [0, 256], sizes = [8, 128], strides = [1, 1]} : vector<8x512xf32> to vector<8x128xf32>
    %389 = math.tanh %388 : vector<8x128xf32>
    %390 = vector.extract_strided_slice %375 {offsets = [0, 384], sizes = [8, 128], strides = [1, 1]} : vector<8x512xf32> to vector<8x128xf32>
    %391 = arith.negf %390 : vector<8x128xf32>
    %392 = math.exp %391 : vector<8x128xf32>
    %cst_79 = arith.constant 1.000000e+00 : f32
    %393 = vector.broadcast %cst_79 : f32 to vector<8x128xf32>
    %394 = arith.addf %393, %392 : vector<8x128xf32>
    %395 = arith.divf %393, %394 : vector<8x128xf32>
    %396 = arith.mulf %387, %339 : vector<8x128xf32>
    %397 = arith.mulf %381, %389 : vector<8x128xf32>
    %398 = arith.addf %396, %397 : vector<8x128xf32>
    %399 = math.tanh %398 : vector<8x128xf32>
    %400 = arith.mulf %395, %399 : vector<8x128xf32>
    %cst_80 = arith.constant dense<0.000000e+00> : vector<8x512xf32>
    %401 = tpu.matmul %400, %3, %cst_80 {dimension_numbers = #tpu.dot_dimension_numbers<[1], [0], [0], [1], [0, 0, 1, 1], [], []>} : vector<8x128xf32>, vector<128x512xf32>, vector<8x512xf32> -> vector<8x512xf32>
    %cst_81 = arith.constant dense<0.000000e+00> : vector<8x512xf32>
    %402 = tpu.matmul %371, %4, %cst_81 {dimension_numbers = #tpu.dot_dimension_numbers<[1], [0], [0], [1], [0, 0, 1, 1], [], []>} : vector<8x128xf32>, vector<128x512xf32>, vector<8x512xf32> -> vector<8x512xf32>
    %403 = arith.addf %401, %402 : vector<8x512xf32>
    %404 = vector.broadcast %5 : vector<1x512xf32> to vector<8x512xf32>
    %405 = arith.addf %403, %404 : vector<8x512xf32>
    %406 = vector.extract_strided_slice %405 {offsets = [0, 0], sizes = [8, 128], strides = [1, 1]} : vector<8x512xf32> to vector<8x128xf32>
    %407 = arith.negf %406 : vector<8x128xf32>
    %408 = math.exp %407 : vector<8x128xf32>
    %cst_82 = arith.constant 1.000000e+00 : f32
    %409 = vector.broadcast %cst_82 : f32 to vector<8x128xf32>
    %410 = arith.addf %409, %408 : vector<8x128xf32>
    %411 = arith.divf %409, %410 : vector<8x128xf32>
    %412 = vector.extract_strided_slice %405 {offsets = [0, 128], sizes = [8, 128], strides = [1, 1]} : vector<8x512xf32> to vector<8x128xf32>
    %413 = arith.negf %412 : vector<8x128xf32>
    %414 = math.exp %413 : vector<8x128xf32>
    %cst_83 = arith.constant 1.000000e+00 : f32
    %415 = vector.broadcast %cst_83 : f32 to vector<8x128xf32>
    %416 = arith.addf %415, %414 : vector<8x128xf32>
    %417 = arith.divf %415, %416 : vector<8x128xf32>
    %418 = vector.extract_strided_slice %405 {offsets = [0, 256], sizes = [8, 128], strides = [1, 1]} : vector<8x512xf32> to vector<8x128xf32>
    %419 = math.tanh %418 : vector<8x128xf32>
    %420 = vector.extract_strided_slice %405 {offsets = [0, 384], sizes = [8, 128], strides = [1, 1]} : vector<8x512xf32> to vector<8x128xf32>
    %421 = arith.negf %420 : vector<8x128xf32>
    %422 = math.exp %421 : vector<8x128xf32>
    %cst_84 = arith.constant 1.000000e+00 : f32
    %423 = vector.broadcast %cst_84 : f32 to vector<8x128xf32>
    %424 = arith.addf %423, %422 : vector<8x128xf32>
    %425 = arith.divf %423, %424 : vector<8x128xf32>
    %426 = arith.mulf %417, %369 : vector<8x128xf32>
    %427 = arith.mulf %411, %419 : vector<8x128xf32>
    %428 = arith.addf %426, %427 : vector<8x128xf32>
    %429 = math.tanh %428 : vector<8x128xf32>
    %430 = arith.mulf %425, %429 : vector<8x128xf32>
    %431 = vector.extract_strided_slice %13 {offsets = [7, 0, 0], sizes = [1, 8, 512], strides = [1, 1, 1]} : vector<8x8x512xf32> to vector<1x8x512xf32>
    %432 = vector.shape_cast %431 : vector<1x8x512xf32> to vector<8x512xf32>
    %cst_85 = arith.constant dense<0.000000e+00> : vector<8x512xf32>
    %433 = tpu.matmul %400, %1, %cst_85 {dimension_numbers = #tpu.dot_dimension_numbers<[1], [0], [0], [1], [0, 0, 1, 1], [], []>} : vector<8x128xf32>, vector<128x512xf32>, vector<8x512xf32> -> vector<8x512xf32>
    %434 = arith.addf %432, %433 : vector<8x512xf32>
    %435 = vector.extract_strided_slice %434 {offsets = [0, 0], sizes = [8, 128], strides = [1, 1]} : vector<8x512xf32> to vector<8x128xf32>
    %436 = arith.negf %435 : vector<8x128xf32>
    %437 = math.exp %436 : vector<8x128xf32>
    %cst_86 = arith.constant 1.000000e+00 : f32
    %438 = vector.broadcast %cst_86 : f32 to vector<8x128xf32>
    %439 = arith.addf %438, %437 : vector<8x128xf32>
    %440 = arith.divf %438, %439 : vector<8x128xf32>
    %441 = vector.extract_strided_slice %434 {offsets = [0, 128], sizes = [8, 128], strides = [1, 1]} : vector<8x512xf32> to vector<8x128xf32>
    %442 = arith.negf %441 : vector<8x128xf32>
    %443 = math.exp %442 : vector<8x128xf32>
    %cst_87 = arith.constant 1.000000e+00 : f32
    %444 = vector.broadcast %cst_87 : f32 to vector<8x128xf32>
    %445 = arith.addf %444, %443 : vector<8x128xf32>
    %446 = arith.divf %444, %445 : vector<8x128xf32>
    %447 = vector.extract_strided_slice %434 {offsets = [0, 256], sizes = [8, 128], strides = [1, 1]} : vector<8x512xf32> to vector<8x128xf32>
    %448 = math.tanh %447 : vector<8x128xf32>
    %449 = vector.extract_strided_slice %434 {offsets = [0, 384], sizes = [8, 128], strides = [1, 1]} : vector<8x512xf32> to vector<8x128xf32>
    %450 = arith.negf %449 : vector<8x128xf32>
    %451 = math.exp %450 : vector<8x128xf32>
    %cst_88 = arith.constant 1.000000e+00 : f32
    %452 = vector.broadcast %cst_88 : f32 to vector<8x128xf32>
    %453 = arith.addf %452, %451 : vector<8x128xf32>
    %454 = arith.divf %452, %453 : vector<8x128xf32>
    %455 = arith.mulf %446, %398 : vector<8x128xf32>
    %456 = arith.mulf %440, %448 : vector<8x128xf32>
    %457 = arith.addf %455, %456 : vector<8x128xf32>
    %458 = math.tanh %457 : vector<8x128xf32>
    %459 = arith.mulf %454, %458 : vector<8x128xf32>
    %cst_89 = arith.constant dense<0.000000e+00> : vector<8x512xf32>
    %460 = tpu.matmul %459, %3, %cst_89 {dimension_numbers = #tpu.dot_dimension_numbers<[1], [0], [0], [1], [0, 0, 1, 1], [], []>} : vector<8x128xf32>, vector<128x512xf32>, vector<8x512xf32> -> vector<8x512xf32>
    %cst_90 = arith.constant dense<0.000000e+00> : vector<8x512xf32>
    %461 = tpu.matmul %430, %4, %cst_90 {dimension_numbers = #tpu.dot_dimension_numbers<[1], [0], [0], [1], [0, 0, 1, 1], [], []>} : vector<8x128xf32>, vector<128x512xf32>, vector<8x512xf32> -> vector<8x512xf32>
    %462 = arith.addf %460, %461 : vector<8x512xf32>
    %463 = vector.broadcast %5 : vector<1x512xf32> to vector<8x512xf32>
    %464 = arith.addf %462, %463 : vector<8x512xf32>
    %465 = vector.extract_strided_slice %464 {offsets = [0, 0], sizes = [8, 128], strides = [1, 1]} : vector<8x512xf32> to vector<8x128xf32>
    %466 = arith.negf %465 : vector<8x128xf32>
    %467 = math.exp %466 : vector<8x128xf32>
    %cst_91 = arith.constant 1.000000e+00 : f32
    %468 = vector.broadcast %cst_91 : f32 to vector<8x128xf32>
    %469 = arith.addf %468, %467 : vector<8x128xf32>
    %470 = arith.divf %468, %469 : vector<8x128xf32>
    %471 = vector.extract_strided_slice %464 {offsets = [0, 128], sizes = [8, 128], strides = [1, 1]} : vector<8x512xf32> to vector<8x128xf32>
    %472 = arith.negf %471 : vector<8x128xf32>
    %473 = math.exp %472 : vector<8x128xf32>
    %cst_92 = arith.constant 1.000000e+00 : f32
    %474 = vector.broadcast %cst_92 : f32 to vector<8x128xf32>
    %475 = arith.addf %474, %473 : vector<8x128xf32>
    %476 = arith.divf %474, %475 : vector<8x128xf32>
    %477 = vector.extract_strided_slice %464 {offsets = [0, 256], sizes = [8, 128], strides = [1, 1]} : vector<8x512xf32> to vector<8x128xf32>
    %478 = math.tanh %477 : vector<8x128xf32>
    %479 = vector.extract_strided_slice %464 {offsets = [0, 384], sizes = [8, 128], strides = [1, 1]} : vector<8x512xf32> to vector<8x128xf32>
    %480 = arith.negf %479 : vector<8x128xf32>
    %481 = math.exp %480 : vector<8x128xf32>
    %cst_93 = arith.constant 1.000000e+00 : f32
    %482 = vector.broadcast %cst_93 : f32 to vector<8x128xf32>
    %483 = arith.addf %482, %481 : vector<8x128xf32>
    %484 = arith.divf %482, %483 : vector<8x128xf32>
    %485 = arith.mulf %476, %428 : vector<8x128xf32>
    %486 = arith.mulf %470, %478 : vector<8x128xf32>
    %487 = arith.addf %485, %486 : vector<8x128xf32>
    %488 = math.tanh %487 : vector<8x128xf32>
    %489 = arith.mulf %484, %488 : vector<8x128xf32>
    %cst_94 = arith.constant dense<0.000000e+00> : vector<8x128xf32>
    %490 = tpu.matmul %489, %6, %cst_94 {dimension_numbers = #tpu.dot_dimension_numbers<[1], [0], [0], [1], [0, 0, 1, 1], [], []>} : vector<8x128xf32>, vector<128x128xf32>, vector<8x128xf32> -> vector<8x128xf32>
    %491 = vector.broadcast %7 : vector<1x128xf32> to vector<8x128xf32>
    %492 = arith.addf %490, %491 : vector<8x128xf32>
    %c0_95 = arith.constant 0 : index
    %c0_96 = arith.constant 0 : index
    %493 = vector.load %arg10[%c0_95, %c0_96] : memref<8x128xf32, #tpu.memory_space<vmem>>, vector<8x128xf32>
    tpu.vector_store %arg10[%c0_95, %c0_96], %492 {strides = array<i32>} : memref<8x128xf32, #tpu.memory_space<vmem>>, vector<8x128xf32>,
    return
  }
  func.func @transform_0(%arg0: i32) -> (i32, i32, i32) {
    %c0_i32 = arith.constant 0 : i32
    %c0_i32_0 = arith.constant 0 : i32
    %c0_i32_1 = arith.constant 0 : i32
    return %c0_i32, %arg0, %c0_i32_0 : i32, i32, i32
  }
  func.func @transform_1(%arg0: i32) -> (i32, i32) {
    %c0_i32 = arith.constant 0 : i32
    %c0_i32_0 = arith.constant 0 : i32
    %c0_i32_1 = arith.constant 0 : i32
    return %c0_i32, %c0_i32_0 : i32, i32
  }
  func.func @transform_2(%arg0: i32) -> (i32, i32) {
    %c0_i32 = arith.constant 0 : i32
    %c0_i32_0 = arith.constant 0 : i32
    %c0_i32_1 = arith.constant 0 : i32
    return %c0_i32, %c0_i32_0 : i32, i32
  }
  func.func @transform_3(%arg0: i32) -> (i32, i32) {
    %c0_i32 = arith.constant 0 : i32
    %c0_i32_0 = arith.constant 0 : i32
    %c0_i32_1 = arith.constant 0 : i32
    return %c0_i32, %c0_i32_0 : i32, i32
  }
  func.func @transform_4(%arg0: i32) -> (i32, i32) {
    %c0_i32 = arith.constant 0 : i32
    %c0_i32_0 = arith.constant 0 : i32
    %c0_i32_1 = arith.constant 0 : i32
    return %c0_i32, %c0_i32_0 : i32, i32
  }
  func.func @transform_5(%arg0: i32) -> (i32, i32) {
    %c0_i32 = arith.constant 0 : i32
    %c0_i32_0 = arith.constant 0 : i32
    %c0_i32_1 = arith.constant 0 : i32
    return %c0_i32, %c0_i32_0 : i32, i32
  }
  func.func @transform_6(%arg0: i32) -> (i32, i32) {
    %c0_i32 = arith.constant 0 : i32
    %c0_i32_0 = arith.constant 0 : i32
    %c0_i32_1 = arith.constant 0 : i32
    return %c0_i32, %c0_i32_0 : i32, i32
  }
  func.func @transform_7(%arg0: i32) -> (i32, i32) {
    %c0_i32 = arith.constant 0 : i32
    %c0_i32_0 = arith.constant 0 : i32
    %c0_i32_1 = arith.constant 0 : i32
    return %c0_i32, %c0_i32_0 : i32, i32
  }
  func.func @transform_8(%arg0: i32) -> (i32, i32) {
    %c0_i32 = arith.constant 0 : i32
    %c0_i32_0 = arith.constant 0 : i32
    %c0_i32_1 = arith.constant 0 : i32
    return %c0_i32, %c0_i32_0 : i32, i32
  }
  func.func @transform_9(%arg0: i32) -> (i32, i32) {
    %c0_i32 = arith.constant 0 : i32
    %c0_i32_0 = arith.constant 0 : i32
    return %arg0, %c0_i32 : i32, i32
  }
}

</mosaic_0001>

<bundles_post_ra>
// kernel: tpu_custom_call.1
= control target key start
LH: loop header
LB: loop body
LE: loop exit
PB: predicated region body
PF: predicated region fallthrough
CT: control target
= control target key end

     0   :  { %14 = vsyncpa [#allocation3], 0  ;;  %s8609_s0 = inlined_call_operand.hbm [shape: f32[8,8,16], index: 0, kind: input, shape index: {}]   ;;  %s8610_s1 = inlined_call_operand.hbm [shape: f32[16,512], index: 1, kind: input, shape index: {}]   ;;  %s8611_s2 = inlined_call_operand.hbm [shape: f32[128,512], index: 2, kind: input, shape index: {}]   ;;  %s8612_s3 = inlined_call_operand.hbm [shape: f32[1,512], index: 3, kind: input, shape index: {}]   ;;  %s8613_s4 = inlined_call_operand.hbm [shape: f32[128,512], index: 4, kind: input, shape index: {}]   ;;  %s8614_s5 = inlined_call_operand.hbm [shape: f32[128,512], index: 5, kind: input, shape index: {}]   ;;  %s8615_s6 = inlined_call_operand.vmem [shape: f32[1,512], index: 6, kind: input, shape index: {}]   ;;  %s8616_s7 = inlined_call_operand.hbm [shape: f32[128,128], index: 7, kind: input, shape index: {}]   ;;  %s8617_s8 = inlined_call_operand.vmem [shape: f32[1,128], index: 8, kind: input, shape index: {}]   ;;  %s8618_s9 = inlined_call_operand.hbm [shape: f32[8,128], index: 9, kind: output, shape index: {}]  }
   0x1   :  { %15 = vsyncpa [#allocation6], 0 }
   0x2   :  { %16 = vsyncpa [#allocation9], 0 }
   0x3   :  { %17 = vsyncpa [#allocation12], 0  ;;  %s36_s11 = sshll.u32 %s8610_s1, 4  ;;  %s37_s11 = int_to_ptr.hbm [resolvable:$true] %s36_s11 }
   0x4   :  { %18 = vsyncpa [#allocation4], 0  ;;  %s4744_s12 = smov [#allocation5]   ;;  %s63_s16 = sshll.u32 %s8612_s3, 4  ;;  %s64_s16 = int_to_ptr.hbm [resolvable:$true] %s63_s16 }
   0x5   :  { %s38_s13 = sshll.u32 %s4744_s12, 4  ;;  %s4745_s17 = smov 512   ;;  %s39_s13 = int_to_ptr.vmem [resolvable:$true] %s38_s13 }
   0x6   :  { %s4746_s18 = smov 32   ;;  %s4747_s19 = smov [#allocation8]  }
   0x7   :  { %44 = dma.hbm_to_vmem [thread:$0]  %s37_s11, 1024, %s39_s13, [#allocation6], %s4745_s17, %s4745_s17, %s4746_s18  }
   0x8   :  { %s65_s20 = sshll.u32 %s4747_s19, 4  ;;  %s86_s22 = sshll.u32 %s8614_s5, 4  ;;  %s66_s20 = int_to_ptr.vmem [resolvable:$true] %s65_s20  ;;  %s87_s22 = int_to_ptr.hbm [resolvable:$true] %s86_s22 }
   0x9   :  { %68 = dma.hbm_to_vmem [thread:$0]  %s64_s16, 64, %s66_s20, [#allocation9]  }
   0xa   :  { %s23_s3 = sshll.u32 %s8609_s0, 4  ;;  %s4748_s25 = smov [#allocation11]   ;;  %s24_s3 = int_to_ptr.hbm [resolvable:$true] %s23_s3 }
   0xb   :  { %s88_s26 = sshll.u32 %s4748_s25, 4  ;;  %s4749_s27 = smov [#allocation2]   ;;  %s89_s26 = int_to_ptr.vmem [resolvable:$true] %s88_s26 }
   0xc   :  { %94 = dma.hbm_to_vmem [thread:$0]  %s87_s22, 8192, %s89_s26, [#allocation12], %s4745_s17, %s4745_s17, %s4746_s18  }
   0xd   :  { %s25_s28 = sshll.u32 %s4749_s27, 4  ;;  %s4750_s29 = smov 128   ;;  %s26_s28 = int_to_ptr.vmem [resolvable:$true] %s25_s28 }
   0xe   :  { %s4751_s5 = smov 8   ;;  %s49_s11 = sshll.u32 %s8611_s2, 4  ;;  %s50_s11 = int_to_ptr.hbm [resolvable:$true] %s49_s11 }
   0xf   :  { %31 = dma.hbm_to_vmem [thread:$0]  %s24_s3, 1024, %s26_s28, [#allocation3], %s4750_s29, %s4750_s29, %s4751_s5  }
  0x10   :  { %s4752_s0 = smov [#allocation7]   ;;  %s73_s15 = sshll.u32 %s8613_s4, 4  ;;  %s74_s15 = int_to_ptr.hbm [resolvable:$true] %s73_s15 }
  0x11   :  { %s51_s12 = sshll.u32 %s4752_s0, 4  ;;  %s4753_s16 = smov [#allocation10]   ;;  %s52_s12 = int_to_ptr.vmem [resolvable:$true] %s51_s12 }
  0x12   :  { %57 = dma.hbm_to_vmem [thread:$0]  %s50_s11, 8192, %s52_s12, [#allocation6], %s4745_s17, %s4745_s17, %s4746_s18  }
  0x13   :  { %s75_s19 = sshll.u32 %s4753_s16, 4  ;;  %s101_s1 = sshll.u32 %s8616_s7, 4  ;;  %s76_s19 = int_to_ptr.vmem [resolvable:$true] %s75_s19  ;;  %s102_s1 = int_to_ptr.hbm [resolvable:$true] %s101_s1 }
  0x14   :  { %81 = dma.hbm_to_vmem [thread:$0]  %s74_s15, 8192, %s76_s19, [#allocation9], %s4745_s17, %s4745_s17, %s4746_s18  }
  0x15   :  { %s4754_s2 = smov [#allocation13]  }
  0x16   :  { %s103_s22 = sshll.u32 %s4754_s2, 4  ;;  %s104_s22 = int_to_ptr.vmem [resolvable:$true] %s103_s22 }
  0x17   :  { %109 = dma.hbm_to_vmem [thread:$0]  %s102_s1, 2048, %s104_s22, [#allocation12], %s4750_s29, %s4750_s29, %s4751_s5  }
  0x18   :  { %4734 = dma.done.wait [#allocation3], 1024  }
  0x19   :  { %4735 = vsyncadd [#allocation3], 4294966272 }
  0x1a   :  { %4736 = dma.done.wait [#allocation6], 9216  }
  0x1b   :  { %4737 = vsyncadd [#allocation6], 4294958080 }
  0x1c   :  { %4738 = dma.done.wait [#allocation9], 8256  }
  0x1d   :  { %4739 = vsyncadd [#allocation9], 4294959040 }
  0x1e   :  { %4740 = dma.done.wait [#allocation12], 10240  }
  0x1f   :  { %4741 = vsyncadd [#allocation12], 4294957056  ;;  %v144_v0 = vld [vmem:[#allocation5 + $0x20] sm:$0xff]  ;;  %vm376_vm0 = vcmask 130048   ;;  %v4840_v3 = vld [vmem:[#allocation2 + $0x28] sm:$0xff]  ;;  %s4756_s18 = smov [#allocation14]  }
  0x20   :  { %v140_v1 = vld [vmem:[#allocation5] sm:$0xff]  ;;  %415 = vmatpush.msra.mxu0 %v144_v0  ;;  %3690 = vmatpush.msra.mxu1 %v144_v0  ;;  %v4842_v4 = vld [vmem:[#allocation2 + $0x30] sm:$0xff]  ;;  %v4844_v5 = vld [vmem:[#allocation2 + $0x38] sm:$0xff]  ;;  %s3595_s23 = sshll.u32 %s4756_s18, 4  ;;  %s3597_s25 = sshll.u32 %s8618_s9, 4  ;;  %s3596_s23 = int_to_ptr.vmem [resolvable:$true] %s3595_s23  ;;  %s3598_s25 = int_to_ptr.hbm [resolvable:$true] %s3597_s25 }
  0x21   :  { %3691 = vmatpush.msra.mxu2 %v144_v0  ;;  %3692 = vmatpush.msra.mxu3 %v144_v0  ;;  %v359_v2 = vld [vmem:[#allocation2] sm:$0xff]  ;;  %v145_v6 = vld [vmem:[#allocation5 + $0x28] sm:$0xff]  ;;  %v146_v7 = vld [vmem:[#allocation5 + $0x30] sm:$0xff] }
  0x22   :  { %416 = vmatpush.msra.mxu0 %v140_v1  ;;  %3693 = vmatpush.msra.mxu1 %v140_v1  ;;  %v147_v8 = vld [vmem:[#allocation5 + $0x38] sm:$0xff]  ;;  %v4849_v9 = vld [vmem:[#allocation7 + $0x1e0] sm:$0xff]  ;;  %v141_v10 = vld [vmem:[#allocation5 + $0x8] sm:$0xff] }
  0x23   :  { %3694 = vmatpush.msra.mxu2 %v140_v1  ;;  %3695 = vmatpush.msra.mxu3 %v140_v1  ;;  %v142_v11 = vld [vmem:[#allocation5 + $0x10] sm:$0xff]  ;;  %v143_v12 = vld [vmem:[#allocation5 + $0x18] sm:$0xff]  ;;  %v4855_v13 = vld [vmem:[#allocation7 + $0x1e8] sm:$0xff] }
  0x24   :  { %3610 = vmatmul.msk.f32.vlgmr.msra.gmra.mxu0 %vm376_vm0, %v359_v2  ;;  %3615 = vmatmul.msk.f32.vlgmr.msra.gmra.mxu1 %vm376_vm0, %v4840_v3  ;;  %v4858_v14 = vld [vmem:[#allocation7 + $0x1c0] sm:$0xff]  ;;  %v4860_v15 = vld [vmem:[#allocation7 + $0x1f8] sm:$0xff]  ;;  %v4862_v16 = vld [vmem:[#allocation7 + $0x1c8] sm:$0xff] }
  0x25   :  { %3616 = vmatmul.msk.f32.vlgmr.msra.gmra.mxu2 %vm376_vm0, %v4842_v4  ;;  %3617 = vmatmul.msk.f32.vlgmr.msra.gmra.mxu3 %vm376_vm0, %v4844_v5  ;;  %v4864_v17 = vld [vmem:[#allocation7 + $0x1f0] sm:$0xff]  ;;  %v360_v18 = vld [vmem:[#allocation2 + $0x8] sm:$0xff]  ;;  %v4870_v19 = vld [vmem:[#allocation7 + $0x1a0] sm:$0xff] }
  0x26   :  { %456 = vmatpush.msrb.mxu1 %v145_v6  ;;  %497 = vmatpush.msrb.mxu2 %v146_v7  ;;  %v4872_v20 = vld [vmem:[#allocation7 + $0x1a8] sm:$0xff]  ;;  %v4877_v21 = vld [vmem:[#allocation7 + $0x1d8] sm:$0xff]  ;;  %v4879_v22 = vld [vmem:[#allocation7 + $0x1d0] sm:$0xff] }
  0x27   :  { %538 = vmatpush.msrb.mxu3 %v147_v8  ;;  %565 = vmatpush.msrb.mxu0 %v4849_v9  ;;  %v4883_v23 = vld [vmem:[#allocation7 + $0x180] sm:$0xff]  ;;  %v4885_v24 = vld [vmem:[#allocation7 + $0x188] sm:$0xff]  ;;  %v4889_v25 = vld [vmem:[#allocation7 + $0x1b8] sm:$0xff] }
  0x28   :  { %457 = vmatpush.msrb.mxu1 %v141_v10  ;;  %498 = vmatpush.msrb.mxu2 %v142_v11  ;;  %v4891_v26 = vld [vmem:[#allocation7 + $0x1b0] sm:$0xff]  ;;  %v4893_v27 = vld [vmem:[#allocation7 + $0x160] sm:$0xff]  ;;  %v4896_v28 = vld [vmem:[#allocation7 + $0x168] sm:$0xff] }
  0x29   :  { %539 = vmatpush.msrb.mxu3 %v143_v12  ;;  %566 = vmatpush.msrb.mxu0 %v4858_v14  ;;  %v4901_v29 = vld [vmem:[#allocation7 + $0x198] sm:$0xff]  ;;  %v4903_v30 = vld [vmem:[#allocation7 + $0x190] sm:$0xff]  ;;  %v4909_v32 = vld [vmem:[#allocation7 + $0x140] sm:$0xff] }
  0x2a   :  { %585 = vmatpush.msra.mxu1 %v4855_v13  ;;  %605 = vmatpush.msra.mxu2 %v4864_v17  ;;  %v361_v31 = vld [vmem:[#allocation2 + $0x10] sm:$0xff]  ;;  %v4912_v33 = vld [vmem:[#allocation7 + $0x148] sm:$0xff]  ;;  %v4917_v34 = vld [vmem:[#allocation7 + $0x178] sm:$0xff] }
  0x2b   :  { %625 = vmatpush.msra.mxu3 %v4860_v15  ;;  %567 = vmatpush.msrb.mxu0 %v4870_v19  ;;  %v4919_v35 = vld [vmem:[#allocation7 + $0x170] sm:$0xff]  ;;  %v4923_v36 = vld [vmem:[#allocation7 + $0x120] sm:$0xff]  ;;  %v4925_v37 = vld [vmem:[#allocation7 + $0x128] sm:$0xff] }
  0x2c   :  { %586 = vmatpush.msra.mxu1 %v4862_v16  ;;  %3611 = vmatmul.msk.f32.gmra.mxu0 %vm376_vm0, %v360_v18  ;;  %v4929_v38 = vld [vmem:[#allocation7 + $0x158] sm:$0xff]  ;;  %v4931_v39 = vld [vmem:[#allocation7 + $0x150] sm:$0xff]  ;;  %v4933_v40 = vld [vmem:[#allocation7 + $0x100] sm:$0xff] }
  0x2d   :  { %3618 = vmatmul.msk.f32.vlgmr.msrb.gmra.mxu1 %vm376_vm0, %v359_v2  ;;  %3626 = vmatmul.msk.f32.vlgmr.msrb.gmra.mxu2 %vm376_vm0, %v359_v2  ;;  %v4936_v41 = vld [vmem:[#allocation7 + $0x108] sm:$0xff]  ;;  %v4941_v42 = vld [vmem:[#allocation7 + $0x138] sm:$0xff]  ;;  %v4943_v43 = vld [vmem:[#allocation7 + $0x130] sm:$0xff] }
  0x2e   :  { %3634 = vmatmul.msk.f32.vlgmr.msrb.gmra.mxu3 %vm376_vm0, %v359_v2  ;;  %587 = vmatpush.msra.mxu1 %v4872_v20  ;;  %v362_v44 = vld [vmem:[#allocation2 + $0x18] sm:$0xff]  ;;  %v4949_v45 = vld [vmem:[#allocation7 + $0xe0] sm:$0xff]  ;;  %v4952_v46 = vld [vmem:[#allocation7 + $0xe8] sm:$0xff] }
  0x2f   :  { %626 = vmatpush.msra.mxu3 %v4877_v21  ;;  %606 = vmatpush.msra.mxu2 %v4879_v22  ;;  %v4957_v47 = vld [vmem:[#allocation7 + $0x118] sm:$0xff]  ;;  %v4959_v48 = vld [vmem:[#allocation7 + $0x110] sm:$0xff]  ;;  %v4963_v49 = vld [vmem:[#allocation7 + $0xc0] sm:$0xff] }
  0x30   :  { %568 = vmatpush.msrb.mxu0 %v4883_v23  ;;  %588 = vmatpush.msra.mxu1 %v4885_v24  ;;  %v4965_v50 = vld [vmem:[#allocation7 + $0xc8] sm:$0xff]  ;;  %v4969_v51 = vld [vmem:[#allocation7 + $0xf8] sm:$0xff]  ;;  %v4971_v52 = vld [vmem:[#allocation7 + $0xf0] sm:$0xff] }
  0x31   :  { %627 = vmatpush.msra.mxu3 %v4889_v25  ;;  %607 = vmatpush.msra.mxu2 %v4891_v26  ;;  %v4973_v53 = vld [vmem:[#allocation7 + $0xa0] sm:$0xff]  ;;  %v4976_v54 = vld [vmem:[#allocation7 + $0xa8] sm:$0xff]  ;;  %v4981_v55 = vld [vmem:[#allocation7 + $0xd8] sm:$0xff] }
  0x32   :  { %569 = vmatpush.msrb.mxu0 %v4893_v27  ;;  %589 = vmatpush.msra.mxu1 %v4896_v28  ;;  %v4983_v56 = vld [vmem:[#allocation7 + $0xd0] sm:$0xff]  ;;  %v4985_v57 = vld [vmem:[#allocation7 + $0x80] sm:$0xff]  ;;  %v4997_v60 = vld [vmem:[#allocation7 + $0x88] sm:$0xff] }
  0x33   :  { %628 = vmatpush.msra.mxu3 %v4901_v29  ;;  %608 = vmatpush.msra.mxu2 %v4903_v30  ;;  %v363_v58 = vld [vmem:[#allocation2 + $0x20] sm:$0xff]  ;;  %v4999_v61 = vld [vmem:[#allocation7 + $0xb8] sm:$0xff]  ;;  %v5005_v63 = vld [vmem:[#allocation7 + $0xb0] sm:$0xff] }
  0x34   :  { %3612 = vmatmul.msk.f32.gmra.mxu0 %vm376_vm0, %v361_v31  ;;  %590 = vmatpush.msra.mxu1 %v4912_v33  ;;  %v4991_v59 = vld [vmem:[#allocation7 + $0x60] sm:$0xff]  ;;  %v5009_v0 = vld [vmem:[#allocation7 + $0x68] sm:$0xff]  ;;  %v5011_v1 = vld [vmem:[#allocation7 + $0x98] sm:$0xff] }
  0x35   :  { %3619 = vmatmul.msk.f32.gmra.mxu1 %vm376_vm0, %v360_v18  ;;  %3627 = vmatmul.msk.f32.gmra.mxu2 %vm376_vm0, %v360_v18  ;;  %9268 = vst [vmem:[#allocation20_spill] sm:$0xff] %v4991_v59  ;;  %v5003_v62 = vld [vmem:[#allocation7 + $0x40] sm:$0xff]  ;;  %v5017_v6 = vld [vmem:[#allocation7 + $0x90] sm:$0xff]  ;;  %v5020_v7 = vld [vmem:[#allocation7 + $0x48] sm:$0xff] }
  0x36   :  { %3635 = vmatmul.msk.f32.gmra.mxu3 %vm376_vm0, %v360_v18  ;;  %570 = vmatpush.msrb.mxu0 %v4909_v32  ;;  %9269 = vst [vmem:[#allocation21_spill] sm:$0xff] %v5003_v62  ;;  %v5013_v2 = vld [vmem:[#allocation7 + $0x20] sm:$0xff]  ;;  %v5023_v8 = vld [vmem:[#allocation7 + $0x78] sm:$0xff]  ;;  %v5033_v11 = vld [vmem:[#allocation7 + $0x28] sm:$0xff] }
  0x37   :  { %629 = vmatpush.msra.mxu3 %v4917_v34  ;;  %609 = vmatpush.msra.mxu2 %v4919_v35  ;;  %9270 = vst [vmem:[#allocation22_spill] sm:$0xff] %v5009_v0  ;;  %v5025_v10 = vld [vmem:[#allocation7] sm:$0xff]  ;;  %v5037_v12 = vld [vmem:[#allocation7 + $0x70] sm:$0xff]  ;;  %v5039_v18 = vld [vmem:[#allocation7 + $0x58] sm:$0xff] }
  0x38   :  { %571 = vmatpush.msrb.mxu0 %v4923_v36  ;;  %591 = vmatpush.msra.mxu1 %v4925_v37  ;;  %9271 = vst [vmem:[#allocation23_spill] sm:$0xff] %v5011_v1 }
  0x39   :  { %630 = vmatpush.msra.mxu3 %v4929_v38  ;;  %610 = vmatpush.msra.mxu2 %v4931_v39  ;;  %9272 = vst [vmem:[#allocation24_spill] sm:$0xff] %v5013_v2 }
  0x3a   :  { %572 = vmatpush.msrb.mxu0 %v4933_v40  ;;  %592 = vmatpush.msra.mxu1 %v4936_v41  ;;  %9273 = vst [vmem:[#allocation25_spill] sm:$0xff] %v5020_v7 }
  0x3b   :  { %631 = vmatpush.msra.mxu3 %v4941_v42  ;;  %611 = vmatpush.msra.mxu2 %v4943_v43  ;;  %9274 = vst [vmem:[#allocation26_spill] sm:$0xff] %v5023_v8 }
  0x3c   :  { %3613 = vmatmul.msk.f32.gmra.mxu0 %vm376_vm0, %v362_v44  ;;  %593 = vmatpush.msra.mxu1 %v4952_v46  ;;  %9275 = vst [vmem:[#allocation27_spill] sm:$0xff] %v5025_v10 }
  0x3d   :  { %3620 = vmatmul.msk.f32.gmra.mxu1 %vm376_vm0, %v361_v31  ;;  %3628 = vmatmul.msk.f32.gmra.mxu2 %vm376_vm0, %v361_v31  ;;  %9276 = vst [vmem:[#allocation28_spill] sm:$0xff] %v5033_v11 }
  0x3e   :  { %3636 = vmatmul.msk.f32.gmra.mxu3 %vm376_vm0, %v361_v31  ;;  %573 = vmatpush.msrb.mxu0 %v4949_v45  ;;  %9277 = vst [vmem:[#allocation29_spill] sm:$0xff] %v5037_v12  ;;  %v8626_v31 = vmov 0.0  }
  0x3f   :  { %632 = vmatpush.msra.mxu3 %v4957_v47  ;;  %612 = vmatpush.msra.mxu2 %v4959_v48  ;;  %9278 = vst [vmem:[#allocation30_spill] sm:$0xff] %v5039_v18 }
  0x40   :  { %574 = vmatpush.msrb.mxu0 %v4963_v49  ;;  %594 = vmatpush.msra.mxu1 %v4965_v50 }
  0x41   :  { %633 = vmatpush.msra.mxu3 %v4969_v51  ;;  %613 = vmatpush.msra.mxu2 %v4971_v52 }
  0x42   :  { %575 = vmatpush.msrb.mxu0 %v4973_v53  ;;  %595 = vmatpush.msra.mxu1 %v4976_v54 }
  0x43   :  { %634 = vmatpush.msra.mxu3 %v4981_v55  ;;  %614 = vmatpush.msra.mxu2 %v4983_v56 }
  0x44   :  { %576 = vmatpush.msrb.mxu0 %v4985_v57  ;;  %596 = vmatpush.msra.mxu1 %v4997_v60 }
  0x45   :  { %3621 = vmatmul.msk.f32.gmra.mxu1 %vm376_vm0, %v362_v44  ;;  %3614 = vmatmul.msk.f32.gmra.mxu0 %vm376_vm0, %v363_v58 }
  0x46   :  { %3629 = vmatmul.msk.f32.gmra.mxu2 %vm376_vm0, %v362_v44  ;;  %3637 = vmatmul.msk.f32.gmra.mxu3 %vm376_vm0, %v362_v44  ;;  %v5043_v44 = vld [vmem:[#allocation7 + $0x8] sm:$0xff] }
  0x47   :  { %577 = vmatpush.msrb.mxu0 %v4991_v59  ;;  %635 = vmatpush.msra.mxu3 %v4999_v61  ;;  %9279 = vst [vmem:[#allocation31_spill] sm:$0xff] %v5043_v44 }
  0x48   :  { %615 = vmatpush.msra.mxu2 %v5005_v63  ;;  %597 = vmatpush.msra.mxu1 %v5009_v0  ;;  %v5350_v0 = vld [vmem:[#allocation10 + $0x190] sm:$0xff] }
  0x49   :  { %578 = vmatpush.msrb.mxu0 %v5003_v62  ;;  %636 = vmatpush.msra.mxu3 %v5011_v1  ;;  %v5056_v62 = vld [vmem:[#allocation7 + $0x18] sm:$0xff]  ;;  %9376 = vst [vmem:[#allocation128_spill] sm:$0xff] %v5350_v0 }
  0x4a   :  { %616 = vmatpush.msra.mxu2 %v5017_v6  ;;  %598 = vmatpush.msra.mxu1 %v5020_v7  ;;  %v5054_v7 = vld [vmem:[#allocation7 + $0x30] sm:$0xff]  ;;  %9283 = vst [vmem:[#allocation35_spill] sm:$0xff] %v5056_v62 }
  0x4b   :  { %579 = vmatpush.msrb.mxu0 %v5013_v2  ;;  %637 = vmatpush.msra.mxu3 %v5023_v8  ;;  %v5047_v2 = vld [vmem:[#allocation7 + $0x50] sm:$0xff]  ;;  %9282 = vst [vmem:[#allocation34_spill] sm:$0xff] %v5054_v7 }
  0x4c   :  { %599 = vmatpush.msra.mxu1 %v5033_v11  ;;  %9280 = vst [vmem:[#allocation32_spill] sm:$0xff] %v5047_v2  ;;  %617 = vmatpush.msra.mxu2 %v5037_v12  ;;  %v5122_v11 = vld [vmem:[#allocation11 + $0x180] sm:$0xff]  ;;  %v5260_v12 = vld [vmem:[#allocation11 + $0x70] sm:$0xff] }
  0x4d   :  { %580 = vmatpush.msrb.mxu0 %v5025_v10  ;;  %3622 = vmatmul.msk.f32.gmra.mxu1 %vm376_vm0, %v363_v58  ;;  %v5049_v10 = vld [vmem:[#allocation7 + $0x38] sm:$0xff]  ;;  %9298 = vst [vmem:[#allocation50_spill] sm:$0xff] %v5122_v11 }
  0x4e   :  { %3630 = vmatmul.msk.f32.gmra.mxu2 %vm376_vm0, %v363_v58  ;;  %581 = vmatmul.f32.vlgmr.msrb.gmra.mxu0 %v8626_v31  ;;  %9281 = vst [vmem:[#allocation33_spill] sm:$0xff] %v5049_v10 }
  0x4f   :  { %3638 = vmatmul.msk.f32.gmra.mxu3 %vm376_vm0, %v363_v58  ;;  %600 = vmatpush.msra.mxu1 %v5043_v44  ;;  %v5061_v58 = vld [vmem:[#allocation7 + $0x10] sm:$0xff]  ;;  %9344 = vst [vmem:[#allocation96_spill] sm:$0xff] %v5260_v12 }
  0x50   :  { %638 = vmatpush.msra.mxu3 %v5039_v18  ;;  %618 = vmatpush.msra.mxu2 %v5047_v2  ;;  %9284 = vst [vmem:[#allocation36_spill] sm:$0xff] %v5061_v58  ;;  %v5094_v44 = vld [vmem:[#allocation11 + $0x1f0] sm:$0xff]  ;;  %v5130_v18 = vld [vmem:[#allocation11 + $0x198] sm:$0xff]  ;;  %v5146_v2 = vld [vmem:[#allocation11 + $0x168] sm:$0xff] }
  0x51   :  { %9288 = vst [vmem:[#allocation40_spill] sm:$0xff] %v5094_v44 }
  0x52   :  { %639 = vmatpush.msra.mxu3 %v5049_v10  ;;  %619 = vmatpush.msra.mxu2 %v5054_v7  ;;  %v5104_v10 = vld [vmem:[#allocation11 + $0x1c8] sm:$0xff]  ;;  %v5110_v7 = vld [vmem:[#allocation11 + $0x1d8] sm:$0xff]  ;;  %9301 = vst [vmem:[#allocation53_spill] sm:$0xff] %v5130_v18 }
  0x53   :  { %9291 = vst [vmem:[#allocation43_spill] sm:$0xff] %v5104_v10 }
  0x54   :  { %640 = vmatpush.msra.mxu3 %v5056_v62  ;;  %620 = vmatpush.msra.mxu2 %v5061_v58  ;;  %v5092_v58 = vld [vmem:[#allocation11 + $0x1e8] sm:$0xff]  ;;  %9293 = vst [vmem:[#allocation45_spill] sm:$0xff] %v5110_v7 }
  0x55   :  { %3623 = vmatmul.msk.f32.gmra.mxu1 %vm376_vm0, %v4840_v3  ;;  %9287 = vst [vmem:[#allocation39_spill] sm:$0xff] %v5092_v58 }
  0x56   :  { %3631 = vmatmul.msk.f32.gmra.mxu2 %vm376_vm0, %v4840_v3  ;;  %732 = vmatpush.msrb.mxu1 %v5092_v58  ;;  %v5114_v58 = vld [vmem:[#allocation11 + $0x1a8] sm:$0xff]  ;;  %9305 = vst [vmem:[#allocation57_spill] sm:$0xff] %v5146_v2 }
  0x57   :  { %3639 = vmatmul.msk.f32.gmra.mxu3 %vm376_vm0, %v4840_v3  ;;  %752 = vmatpush.msrb.mxu2 %v5094_v44  ;;  %9295 = vst [vmem:[#allocation47_spill] sm:$0xff] %v5114_v58  ;;  %v5120_v44 = vld [vmem:[#allocation11 + $0x1b8] sm:$0xff] }
  0x58   :  { %733 = vmatpush.msrb.mxu1 %v5104_v10  ;;  %9297 = vst [vmem:[#allocation49_spill] sm:$0xff] %v5120_v44  ;;  %v5126_v10 = vld [vmem:[#allocation11 + $0x188] sm:$0xff] }
  0x59   :  { %9299 = vst [vmem:[#allocation51_spill] sm:$0xff] %v5126_v10 }
  0x5a   :  { %734 = vmatpush.msrb.mxu1 %v5114_v58  ;;  %v5144_v58 = vld [vmem:[#allocation11 + $0x160] sm:$0xff] }
  0x5b   :  { %9304 = vst [vmem:[#allocation56_spill] sm:$0xff] %v5144_v58 }
  0x5c   :  { %735 = vmatpush.msrb.mxu1 %v5126_v10 }
  0x5d   :  { %3624 = vmatmul.msk.f32.gmra.mxu1 %vm376_vm0, %v4842_v4 }
  0x5e   :  { %3632 = vmatmul.msk.f32.gmra.mxu2 %vm376_vm0, %v4842_v4  ;;  %736 = vmatpush.msrb.mxu1 %v5146_v2  ;;  %v5170_v2 = vld [vmem:[#allocation11 + $0x120] sm:$0xff] }
  0x5f   :  { %3640 = vmatmul.msk.f32.gmra.mxu3 %vm376_vm0, %v4842_v4  ;;  %v5090_v4 = vld [vmem:[#allocation11 + $0x1e0] sm:$0xff]  ;;  %9313 = vst [vmem:[#allocation65_spill] sm:$0xff] %v5170_v2 }
  0x60   :  { %9286 = vst [vmem:[#allocation38_spill] sm:$0xff] %v5090_v4  ;;  %712 = vmatpush.msra.mxu0 %v5090_v4  ;;  %v5112_v4 = vld [vmem:[#allocation11 + $0x1a0] sm:$0xff] }
  0x61   :  { %9294 = vst [vmem:[#allocation46_spill] sm:$0xff] %v5112_v4 }
  0x65   :  { %3625 = vmatmul.msk.f32.gmra.mxu1 %vm376_vm0, %v4844_v5 }
  0x66   :  { %3633 = vmatmul.msk.f32.gmra.mxu2 %vm376_vm0, %v4844_v5 }
  0x67   :  { %3641 = vmatmul.msk.f32.gmra.mxu3 %vm376_vm0, %v4844_v5  ;;  %v5098_v5 = vld [vmem:[#allocation11 + $0x1f8] sm:$0xff] }
  0x68   :  { %9289 = vst [vmem:[#allocation41_spill] sm:$0xff] %v5098_v5  ;;  %772 = vmatpush.msrb.mxu3 %v5098_v5  ;;  %v5118_v5 = vld [vmem:[#allocation11 + $0x1b0] sm:$0xff] }
  0x69   :  { %9296 = vst [vmem:[#allocation48_spill] sm:$0xff] %v5118_v5 }
  0x6a   :  { %773 = vmatpush.msrb.mxu3 %v5110_v7 }
  0x6c   :  { %774 = vmatpush.msrb.mxu3 %v5120_v44 }
  0x6d   :  { %601 = vmatmul.f32.vlgmr.msra.gmra.mxu1 %v8626_v31 }
  0x6e   :  { %621 = vmatmul.f32.vlgmr.msra.gmra.mxu2 %v8626_v31  ;;  %775 = vmatpush.msrb.mxu3 %v5130_v18  ;;  %v5160_v18 = vld [vmem:[#allocation11 + $0x148] sm:$0xff] }
  0x6f   :  { %641 = vmatmul.f32.vlgmr.msra.gmra.mxu3 %v8626_v31  ;;  %v5102_v31 = vld [vmem:[#allocation11 + $0x1c0] sm:$0xff]  ;;  %9310 = vst [vmem:[#allocation62_spill] sm:$0xff] %v5160_v18  ;;  %737 = vmatpush.msrb.mxu1 %v5160_v18 }
  0x70   :  { %9290 = vst [vmem:[#allocation42_spill] sm:$0xff] %v5102_v31  ;;  %713 = vmatpush.msra.mxu0 %v5102_v31  ;;  %v5128_v31 = vld [vmem:[#allocation11 + $0x190] sm:$0xff]  ;;  %v5182_v18 = vld [vmem:[#allocation11 + $0x100] sm:$0xff] }
  0x71   :  { %9300 = vst [vmem:[#allocation52_spill] sm:$0xff] %v5128_v31 }
  0x72   :  { %714 = vmatpush.msra.mxu0 %v5112_v4  ;;  %9317 = vst [vmem:[#allocation69_spill] sm:$0xff] %v5182_v18 }
  0x74   :  { %715 = vmatpush.msra.mxu0 %v5122_v11  ;;  %v5204_v11 = vld [vmem:[#allocation11 + $0xf0] sm:$0xff] }
  0x75   :  { %9324 = vst [vmem:[#allocation76_spill] sm:$0xff] %v5204_v11 }
  0x76   :  { %716 = vmatpush.msra.mxu0 %v5144_v58  ;;  %v5178_v58 = vld [vmem:[#allocation11 + $0x138] sm:$0xff] }
  0x77   :  { %9316 = vst [vmem:[#allocation68_spill] sm:$0xff] %v5178_v58 }
  0xa1   :  { %v5086_v3 = vpop.f32.mrf.mxu0  ;;  %v5088_v62 = vpop.f32.mrf.mxu1 }
  0xa2   :  { %9285 = vst [vmem:[#allocation37_spill] sm:$0xff] %v5088_v62  ;;  %v5106_v62 = vld [vmem:[#allocation11 + $0x1d0] sm:$0xff] }
  0xa3   :  { %9292 = vst [vmem:[#allocation44_spill] sm:$0xff] %v5106_v62  ;;  %753 = vmatpush.msrb.mxu2 %v5106_v62 }
  0xa5   :  { %754 = vmatpush.msrb.mxu2 %v5118_v5  ;;  %v5148_v5 = vld [vmem:[#allocation11 + $0x170] sm:$0xff] }
  0xa6   :  { %9306 = vst [vmem:[#allocation58_spill] sm:$0xff] %v5148_v5 }
  0xa7   :  { %755 = vmatpush.msrb.mxu2 %v5128_v31  ;;  %v5162_v31 = vld [vmem:[#allocation11 + $0x150] sm:$0xff] }
  0xa8   :  { %v5134_v7 = vpop.f32.mrf.mxu2  ;;  %v5136_v62 = vpop.f32.mrf.mxu3  ;;  %9311 = vst [vmem:[#allocation63_spill] sm:$0xff] %v5162_v31 }
  0xa9   :  { %9302 = vst [vmem:[#allocation54_spill] sm:$0xff] %v5134_v7  ;;  %v5150_v44 = vpop.f32.mrf.mxu0  ;;  %756 = vmatpush.msrb.mxu2 %v5148_v5  ;;  %v5158_v7 = vld [vmem:[#allocation11 + $0x140] sm:$0xff]  ;;  %v5172_v5 = vld [vmem:[#allocation11 + $0x128] sm:$0xff] }
  0xaa   :  { %9303 = vst [vmem:[#allocation55_spill] sm:$0xff] %v5136_v62  ;;  %v5140_v4 = vpop.f32.mrf.mxu1  ;;  %v5154_v62 = vld [vmem:[#allocation11 + $0x178] sm:$0xff]  ;;  %717 = vmatpush.msra.mxu0 %v5158_v7  ;;  %738 = vmatpush.msrb.mxu1 %v5172_v5 }
  0xab   :  { %9307 = vst [vmem:[#allocation59_spill] sm:$0xff] %v5150_v44  ;;  %776 = vmatpush.msrb.mxu3 %v5154_v62  ;;  %v5166_v44 = vld [vmem:[#allocation11 + $0x158] sm:$0xff]  ;;  %757 = vmatpush.msrb.mxu2 %v5162_v31  ;;  %v5184_v31 = vld [vmem:[#allocation11 + $0x108] sm:$0xff] }
  0xac   :  { %9308 = vst [vmem:[#allocation60_spill] sm:$0xff] %v5154_v62  ;;  %v5174_v62 = vld [vmem:[#allocation11 + $0x130] sm:$0xff]  ;;  %718 = vmatpush.msra.mxu0 %v5170_v2  ;;  %739 = vmatpush.msrb.mxu1 %v5184_v31 }
  0xad   :  { %9309 = vst [vmem:[#allocation61_spill] sm:$0xff] %v5158_v7  ;;  %777 = vmatpush.msrb.mxu3 %v5166_v44  ;;  %758 = vmatpush.msrb.mxu2 %v5174_v62 }
  0xae   :  { %9312 = vst [vmem:[#allocation64_spill] sm:$0xff] %v5166_v44  ;;  %v5186_v44 = vld [vmem:[#allocation11 + $0x110] sm:$0xff]  ;;  %719 = vmatpush.msra.mxu0 %v5182_v18  ;;  %v5208_v18 = vld [vmem:[#allocation11 + $0xf8] sm:$0xff] }
  0xaf   :  { %9314 = vst [vmem:[#allocation66_spill] sm:$0xff] %v5172_v5  ;;  %778 = vmatpush.msrb.mxu3 %v5178_v58  ;;  %v5194_v5 = vld [vmem:[#allocation11 + $0x118] sm:$0xff]  ;;  %759 = vmatpush.msrb.mxu2 %v5186_v44  ;;  %v5200_v58 = vld [vmem:[#allocation11 + $0xe0] sm:$0xff] }
  0xb0   :  { %9315 = vst [vmem:[#allocation67_spill] sm:$0xff] %v5174_v62  ;;  %v5188_v7 = vpop.f32.mrf.mxu2  ;;  %v5202_v62 = vld [vmem:[#allocation11 + $0xe8] sm:$0xff]  ;;  %720 = vmatpush.msra.mxu0 %v5200_v58 }
  0xb1   :  { %9318 = vst [vmem:[#allocation70_spill] sm:$0xff] %v5184_v31  ;;  %v5190_v10 = vpop.f32.mrf.mxu3  ;;  %779 = vmatpush.msrb.mxu3 %v5194_v5  ;;  %740 = vmatpush.msrb.mxu1 %v5202_v62  ;;  %v5218_v31 = vpop.f32.mrf.mxu0 }
  0xb2   :  { %9319 = vst [vmem:[#allocation71_spill] sm:$0xff] %v5186_v44  ;;  %v5196_v2 = vpop.f32.mrf.mxu1  ;;  %760 = vmatpush.msrb.mxu2 %v5204_v11  ;;  %v5214_v44 = vld [vmem:[#allocation11 + $0xc8] sm:$0xff]  ;;  %v5226_v11 = vld [vmem:[#allocation11 + $0xa0] sm:$0xff] }
  0xb3   :  { %9320 = vst [vmem:[#allocation72_spill] sm:$0xff] %v5194_v5  ;;  %780 = vmatpush.msrb.mxu3 %v5208_v18  ;;  %v5216_v5 = vld [vmem:[#allocation11 + $0xd0] sm:$0xff]  ;;  %741 = vmatpush.msrb.mxu1 %v5214_v44 }
  0xb4   :  { %9321 = vst [vmem:[#allocation73_spill] sm:$0xff] %v5196_v2  ;;  %v5212_v2 = vld [vmem:[#allocation11 + $0xc0] sm:$0xff]  ;;  %761 = vmatpush.msrb.mxu2 %v5216_v5 }
  0xb5   :  { %9322 = vst [vmem:[#allocation74_spill] sm:$0xff] %v5200_v58  ;;  %721 = vmatpush.msra.mxu0 %v5212_v2  ;;  %v5222_v58 = vld [vmem:[#allocation11 + $0xd8] sm:$0xff] }
  0xb6   :  { %9323 = vst [vmem:[#allocation75_spill] sm:$0xff] %v5202_v62  ;;  %781 = vmatpush.msrb.mxu3 %v5222_v58  ;;  %v5230_v62 = vld [vmem:[#allocation11 + $0xb0] sm:$0xff] }
  0xb7   :  { %9325 = vst [vmem:[#allocation77_spill] sm:$0xff] %v5208_v18  ;;  %v5228_v18 = vld [vmem:[#allocation11 + $0xa8] sm:$0xff]  ;;  %722 = vmatpush.msra.mxu0 %v5226_v11  ;;  %762 = vmatpush.msrb.mxu2 %v5230_v62 }
  0xb8   :  { %9326 = vst [vmem:[#allocation78_spill] sm:$0xff] %v5212_v2  ;;  %742 = vmatpush.msrb.mxu1 %v5228_v18  ;;  %v5244_v2 = vpop.f32.mrf.mxu2 }
  0xb9   :  { %9327 = vst [vmem:[#allocation79_spill] sm:$0xff] %v5214_v44  ;;  %v5238_v44 = vld [vmem:[#allocation11 + $0x80] sm:$0xff]  ;;  %v5246_v8 = vpop.f32.mrf.mxu3 }
  0xba   :  { %9328 = vst [vmem:[#allocation80_spill] sm:$0xff] %v5216_v5  ;;  %v5240_v5 = vld [vmem:[#allocation11 + $0x88] sm:$0xff]  ;;  %723 = vmatpush.msra.mxu0 %v5238_v44 }
  0xbb   :  { %9329 = vst [vmem:[#allocation81_spill] sm:$0xff] %v5218_v31  ;;  %v5234_v31 = vld [vmem:[#allocation11 + $0xb8] sm:$0xff]  ;;  %743 = vmatpush.msrb.mxu1 %v5240_v5 }
  0xbc   :  { %9330 = vst [vmem:[#allocation82_spill] sm:$0xff] %v5222_v58  ;;  %782 = vmatpush.msrb.mxu3 %v5234_v31  ;;  %v5242_v58 = vld [vmem:[#allocation11 + $0x90] sm:$0xff] }
  0xbd   :  { %9331 = vst [vmem:[#allocation83_spill] sm:$0xff] %v5226_v11  ;;  %v5252_v11 = vpop.f32.mrf.mxu1  ;;  %763 = vmatpush.msrb.mxu2 %v5242_v58 }
  0xbe   :  { %9332 = vst [vmem:[#allocation84_spill] sm:$0xff] %v5228_v18  ;;  %v5250_v18 = vld [vmem:[#allocation11 + $0x98] sm:$0xff] }
  0xbf   :  { %9333 = vst [vmem:[#allocation85_spill] sm:$0xff] %v5230_v62  ;;  %783 = vmatpush.msrb.mxu3 %v5250_v18  ;;  %v5258_v62 = vld [vmem:[#allocation11 + $0x68] sm:$0xff]  ;;  %764 = vmatpush.msrb.mxu2 %v5260_v12 }
  0xc0   :  { %9334 = vst [vmem:[#allocation86_spill] sm:$0xff] %v5234_v31  ;;  %v5256_v31 = vld [vmem:[#allocation11 + $0x60] sm:$0xff]  ;;  %744 = vmatpush.msrb.mxu1 %v5258_v62  ;;  %v5282_v12 = vld [vmem:[#allocation11 + $0x28] sm:$0xff] }
  0xc1   :  { %9335 = vst [vmem:[#allocation87_spill] sm:$0xff] %v5238_v44  ;;  %724 = vmatpush.msra.mxu0 %v5256_v31  ;;  %v5302_v44 = vpop.f32.mrf.mxu3 }
  0xc2   :  { %9336 = vst [vmem:[#allocation88_spill] sm:$0xff] %v5240_v5  ;;  %v5300_v5 = vpop.f32.mrf.mxu2 }
  0xc3   :  { %9337 = vst [vmem:[#allocation89_spill] sm:$0xff] %v5242_v58  ;;  %v5276_v58 = vld [vmem:[#allocation11 + $0x58] sm:$0xff] }
  0xc4   :  { %9338 = vst [vmem:[#allocation90_spill] sm:$0xff] %v5244_v2  ;;  %v5264_v2 = vld [vmem:[#allocation11 + $0x78] sm:$0xff] }
  0xc5   :  { %9339 = vst [vmem:[#allocation91_spill] sm:$0xff] %v5246_v8  ;;  %784 = vmatpush.msrb.mxu3 %v5264_v2  ;;  %v5270_v8 = vld [vmem:[#allocation11 + $0x48] sm:$0xff] }
  0xc6   :  { %9340 = vst [vmem:[#allocation92_spill] sm:$0xff] %v5250_v18  ;;  %v5272_v18 = vld [vmem:[#allocation11 + $0x50] sm:$0xff]  ;;  %745 = vmatpush.msrb.mxu1 %v5270_v8 }
  0xc7   :  { %9341 = vst [vmem:[#allocation93_spill] sm:$0xff] %v5252_v11  ;;  %v5268_v11 = vld [vmem:[#allocation11 + $0x40] sm:$0xff]  ;;  %765 = vmatpush.msrb.mxu2 %v5272_v18  ;;  %785 = vmatpush.msrb.mxu3 %v5276_v58 }
  0xc8   :  { %9342 = vst [vmem:[#allocation94_spill] sm:$0xff] %v5256_v31  ;;  %725 = vmatpush.msra.mxu0 %v5268_v11  ;;  %v5286_v31 = vpop.f32.mrf.mxu0  ;;  %746 = vmatpush.msrb.mxu1 %v5282_v12 }
  0xc9   :  { %9343 = vst [vmem:[#allocation95_spill] sm:$0xff] %v5258_v62  ;;  %v5280_v62 = vld [vmem:[#allocation11 + $0x20] sm:$0xff]  ;;  %v5368_v59 = vpop.f32.mrf.mxu3 }
  0xca   :  { %9345 = vst [vmem:[#allocation97_spill] sm:$0xff] %v5264_v2  ;;  %v5284_v2 = vld [vmem:[#allocation11 + $0x30] sm:$0xff]  ;;  %726 = vmatpush.msra.mxu0 %v5280_v62 }
  0xcb   :  { %9346 = vst [vmem:[#allocation98_spill] sm:$0xff] %v5268_v11  ;;  %v5290_v11 = vld [vmem:[#allocation11 + $0x38] sm:$0xff]  ;;  %766 = vmatpush.msrb.mxu2 %v5284_v2 }
  0xcc   :  { %9347 = vst [vmem:[#allocation99_spill] sm:$0xff] %v5270_v8  ;;  %786 = vmatpush.msrb.mxu3 %v5290_v11  ;;  %v5298_v8 = vld [vmem:[#allocation11 + $0x10] sm:$0xff] }
  0xcd   :  { %9348 = vst [vmem:[#allocation100_spill] sm:$0xff] %v5272_v18  ;;  %v5294_v18 = vld [vmem:[#allocation11] sm:$0xff]  ;;  %767 = vmatpush.msrb.mxu2 %v5298_v8 }
  0xce   :  { %9349 = vst [vmem:[#allocation101_spill] sm:$0xff] %v5276_v58  ;;  %v5296_v58 = vld [vmem:[#allocation11 + $0x8] sm:$0xff]  ;;  %727 = vmatpush.msra.mxu0 %v5294_v18 }
  0xcf   :  { %9350 = vst [vmem:[#allocation102_spill] sm:$0xff] %v5280_v62  ;;  %747 = vmatpush.msrb.mxu1 %v5296_v58  ;;  %v5316_v62 = vld [vmem:[#allocation10 + $0x1f0] sm:$0xff] }
  0xd0   :  { %9351 = vst [vmem:[#allocation103_spill] sm:$0xff] %v5282_v12  ;;  %v5308_v12 = vld [vmem:[#allocation10 + $0x1e0] sm:$0xff]  ;;  %832 = vmatpush.msra.mxu2 %v5316_v62 }
  0xd1   :  { %9352 = vst [vmem:[#allocation104_spill] sm:$0xff] %v5284_v2  ;;  %v5310_v2 = vld [vmem:[#allocation10 + $0x1e8] sm:$0xff]  ;;  %792 = vmatpush.msrb.mxu0 %v5308_v12 }
  0xd2   :  { %9353 = vst [vmem:[#allocation105_spill] sm:$0xff] %v5286_v31  ;;  %v5306_v31 = vld [vmem:[#allocation11 + $0x18] sm:$0xff]  ;;  %812 = vmatpush.msra.mxu1 %v5310_v2 }
  0xd3   :  { %9354 = vst [vmem:[#allocation106_spill] sm:$0xff] %v5290_v11  ;;  %v5312_v11 = vpop.f32.mrf.mxu1  ;;  %787 = vmatpush.msrb.mxu3 %v5306_v31 }
  0xd4   :  { %9355 = vst [vmem:[#allocation107_spill] sm:$0xff] %v5294_v18  ;;  %v5326_v18 = vld [vmem:[#allocation10 + $0x1d0] sm:$0xff] }
  0xd5   :  { %9356 = vst [vmem:[#allocation108_spill] sm:$0xff] %v5296_v58  ;;  %v5324_v58 = vld [vmem:[#allocation10 + $0x1c8] sm:$0xff]  ;;  %833 = vmatpush.msra.mxu2 %v5326_v18 }
  0xd6   :  { %9357 = vst [vmem:[#allocation109_spill] sm:$0xff] %v5298_v8  ;;  %v5334_v8 = vld [vmem:[#allocation10 + $0x1a8] sm:$0xff]  ;;  %813 = vmatpush.msra.mxu1 %v5324_v58 }
  0xd7   :  { %9358 = vst [vmem:[#allocation110_spill] sm:$0xff] %v5300_v5  ;;  %v5318_v5 = vld [vmem:[#allocation10 + $0x1f8] sm:$0xff] }
  0xd8   :  { %9359 = vst [vmem:[#allocation111_spill] sm:$0xff] %v5302_v44  ;;  %v5322_v44 = vld [vmem:[#allocation10 + $0x1c0] sm:$0xff]  ;;  %852 = vmatpush.msra.mxu3 %v5318_v5  ;;  %814 = vmatpush.msra.mxu1 %v5334_v8 }
  0xd9   :  { %9360 = vst [vmem:[#allocation112_spill] sm:$0xff] %v5306_v31  ;;  %v5332_v31 = vld [vmem:[#allocation10 + $0x1a0] sm:$0xff]  ;;  %793 = vmatpush.msrb.mxu0 %v5322_v44 }
  0xda   :  { %9361 = vst [vmem:[#allocation113_spill] sm:$0xff] %v5308_v12  ;;  %v5340_v12 = vld [vmem:[#allocation10 + $0x1b8] sm:$0xff] }
  0xdb   :  { %9362 = vst [vmem:[#allocation114_spill] sm:$0xff] %v5310_v2  ;;  %v5338_v2 = vld [vmem:[#allocation10 + $0x1b0] sm:$0xff]  ;;  %794 = vmatpush.msrb.mxu0 %v5332_v31  ;;  %v5370_v1 = vpop.f32.mrf.mxu1 }
  0xdc   :  { %9363 = vst [vmem:[#allocation115_spill] sm:$0xff] %v5312_v11  ;;  %v5330_v11 = vld [vmem:[#allocation10 + $0x1d8] sm:$0xff]  ;;  %834 = vmatpush.msra.mxu2 %v5338_v2 }
  0xdd   :  { %9364 = vst [vmem:[#allocation116_spill] sm:$0xff] %v5316_v62  ;;  %853 = vmatpush.msra.mxu3 %v5330_v11  ;;  %v5344_v62 = vld [vmem:[#allocation10 + $0x180] sm:$0xff] }
  0xde   :  { %9365 = vst [vmem:[#allocation117_spill] sm:$0xff] %v5318_v5  ;;  %v5346_v5 = vld [vmem:[#allocation10 + $0x188] sm:$0xff]  ;;  %795 = vmatpush.msrb.mxu0 %v5344_v62  ;;  %835 = vmatpush.msra.mxu2 %v5350_v0  ;;  %v5422_v0 = vld [vmem:[#allocation10 + $0xf0] sm:$0xff] }
  0xdf   :  { %9366 = vst [vmem:[#allocation118_spill] sm:$0xff] %v5322_v44  ;;  %v5352_v44 = vld [vmem:[#allocation10 + $0x198] sm:$0xff]  ;;  %854 = vmatpush.msra.mxu3 %v5340_v12  ;;  %815 = vmatpush.msra.mxu1 %v5346_v5 }
  0xe0   :  { %9367 = vst [vmem:[#allocation119_spill] sm:$0xff] %v5324_v58  ;;  %v5356_v58 = vpop.f32.mrf.mxu0 }
  0xe1   :  { %9368 = vst [vmem:[#allocation120_spill] sm:$0xff] %v5326_v18  ;;  %v5358_v18 = vpop.f32.mrf.mxu2  ;;  %855 = vmatpush.msra.mxu3 %v5352_v44 }
  0xe2   :  { %9369 = vst [vmem:[#allocation121_spill] sm:$0xff] %v5330_v11  ;;  %v5362_v11 = vld [vmem:[#allocation10 + $0x160] sm:$0xff] }
  0xe3   :  { %9370 = vst [vmem:[#allocation122_spill] sm:$0xff] %v5332_v31  ;;  %v5364_v31 = vld [vmem:[#allocation10 + $0x168] sm:$0xff]  ;;  %796 = vmatpush.msrb.mxu0 %v5362_v11 }
  0xe4   :  { %9371 = vst [vmem:[#allocation123_spill] sm:$0xff] %v5334_v8  ;;  %v5366_v8 = vld [vmem:[#allocation10 + $0x170] sm:$0xff]  ;;  %816 = vmatpush.msra.mxu1 %v5364_v31 }
  0xe5   :  { %9372 = vst [vmem:[#allocation124_spill] sm:$0xff] %v5338_v2  ;;  %836 = vmatpush.msra.mxu2 %v5366_v8  ;;  %v5426_v2 = vpop.f32.mrf.mxu1 }
  0xe6   :  { %9373 = vst [vmem:[#allocation125_spill] sm:$0xff] %v5340_v12  ;;  %v5424_v12 = vpop.f32.mrf.mxu3 }
  0xe7   :  { %9374 = vst [vmem:[#allocation126_spill] sm:$0xff] %v5344_v62  ;;  %v5382_v62 = vld [vmem:[#allocation10 + $0x150] sm:$0xff] }
  0xe8   :  { %9375 = vst [vmem:[#allocation127_spill] sm:$0xff] %v5346_v5  ;;  %v5380_v5 = vld [vmem:[#allocation10 + $0x148] sm:$0xff]  ;;  %837 = vmatpush.msra.mxu2 %v5382_v62 }
  0xe9   :  { %9377 = vst [vmem:[#allocation129_spill] sm:$0xff] %v5352_v44  ;;  %817 = vmatpush.msra.mxu1 %v5380_v5  ;;  %v5398_v44 = vld [vmem:[#allocation10 + $0x138] sm:$0xff] }
  0xea   :  { %9378 = vst [vmem:[#allocation130_spill] sm:$0xff] %v5356_v58  ;;  %v5374_v58 = vld [vmem:[#allocation10 + $0x178] sm:$0xff] }
  0xeb   :  { %9379 = vst [vmem:[#allocation131_spill] sm:$0xff] %v5358_v18  ;;  %v5378_v18 = vld [vmem:[#allocation10 + $0x140] sm:$0xff]  ;;  %856 = vmatpush.msra.mxu3 %v5374_v58 }
  0xec   :  { %9380 = vst [vmem:[#allocation132_spill] sm:$0xff] %v5362_v11  ;;  %797 = vmatpush.msrb.mxu0 %v5378_v18  ;;  %v5392_v11 = vld [vmem:[#allocation10 + $0x128] sm:$0xff] }
  0xed   :  { %9381 = vst [vmem:[#allocation133_spill] sm:$0xff] %v5364_v31  ;;  %v5394_v31 = vld [vmem:[#allocation10 + $0x130] sm:$0xff]  ;;  %818 = vmatpush.msra.mxu1 %v5392_v11 }
  0xee   :  { %9382 = vst [vmem:[#allocation134_spill] sm:$0xff] %v5366_v8  ;;  %v5408_v8 = vld [vmem:[#allocation8] sm:$0xf]  ;;  %838 = vmatpush.msra.mxu2 %v5394_v31 }
  0xef   :  { %9383 = vst [vmem:[#allocation135_spill] sm:$0xff] %v5368_v59  ;;  %v5390_v59 = vld [vmem:[#allocation10 + $0x120] sm:$0xff] }
  0xf0   :  { %9384 = vst [vmem:[#allocation136_spill] sm:$0xff] %v5370_v1  ;;  %v5386_v1 = vld [vmem:[#allocation10 + $0x158] sm:$0xff]  ;;  %798 = vmatpush.msrb.mxu0 %v5390_v59 }
  0xf1   :  { %9385 = vst [vmem:[#allocation137_spill] sm:$0xff] %v5374_v58  ;;  %857 = vmatpush.msra.mxu3 %v5386_v1  ;;  %v5402_v58 = vld [vmem:[#allocation10 + $0x100] sm:$0xff] }
  0xf2   :  { %9386 = vst [vmem:[#allocation138_spill] sm:$0xff] %v5378_v18  ;;  %v5404_v18 = vld [vmem:[#allocation10 + $0x108] sm:$0xff]  ;;  %799 = vmatpush.msrb.mxu0 %v5402_v58 }
  0xf3   :  { %9387 = vst [vmem:[#allocation139_spill] sm:$0xff] %v5380_v5  ;;  %v5406_v5 = vld [vmem:[#allocation10 + $0x110] sm:$0xff]  ;;  %858 = vmatpush.msra.mxu3 %v5398_v44  ;;  %819 = vmatpush.msra.mxu1 %v5404_v18 }
  0xf4   :  { %9388 = vst [vmem:[#allocation140_spill] sm:$0xff] %v5382_v62  ;;  %v5412_v62 = vld [vmem:[#allocation10 + $0x118] sm:$0xff]  ;;  %839 = vmatpush.msra.mxu2 %v5406_v5 }
  0xf5   :  { %9389 = vst [vmem:[#allocation141_spill] sm:$0xff] %v5386_v1  ;;  %v5414_v1 = vpop.f32.mrf.mxu2  ;;  %859 = vmatpush.msra.mxu3 %v5412_v62 }
  0xf6   :  { %9390 = vst [vmem:[#allocation142_spill] sm:$0xff] %v5390_v59  ;;  %v5420_v59 = vld [vmem:[#allocation10 + $0xe8] sm:$0xff]  ;;  %840 = vmatpush.msra.mxu2 %v5422_v0 }
  0xf7   :  { %9391 = vst [vmem:[#allocation143_spill] sm:$0xff] %v5392_v11  ;;  %v5418_v11 = vld [vmem:[#allocation10 + $0xe0] sm:$0xff]  ;;  %820 = vmatpush.msra.mxu1 %v5420_v59 }
  0xf8   :  { %9392 = vst [vmem:[#allocation144_spill] sm:$0xff] %v5394_v31  ;;  %800 = vmatpush.msrb.mxu0 %v5418_v11  ;;  %v5455_v31 = vld [vmem:[#allocation10 + $0xb0] sm:$0xff] }
  0xf9   :  { %9393 = vst [vmem:[#allocation145_spill] sm:$0xff] %v5398_v44  ;;  %v5430_v44 = vld [vmem:[#allocation10 + $0xf8] sm:$0xff] }
  0xfa   :  { %9394 = vst [vmem:[#allocation146_spill] sm:$0xff] %v5402_v58  ;;  %v5439_v58 = vld [vmem:[#allocation10 + $0xc8] sm:$0xff]  ;;  %860 = vmatpush.msra.mxu3 %v5430_v44 }
  0xfb   :  { %9395 = vst [vmem:[#allocation147_spill] sm:$0xff] %v5404_v18  ;;  %v5437_v18 = vld [vmem:[#allocation10 + $0xc0] sm:$0xff]  ;;  %821 = vmatpush.msra.mxu1 %v5439_v58 }
  0xfc   :  { %9396 = vst [vmem:[#allocation148_spill] sm:$0xff] %v5406_v5  ;;  %801 = vmatpush.msrb.mxu0 %v5437_v18 }
  0xfd   :  { %9397 = vst [vmem:[#allocation149_spill] sm:$0xff] %v5412_v62  ;;  %v5445_v62 = vld [vmem:[#allocation10 + $0xd8] sm:$0xff] }
  0xfe   :  { %9398 = vst [vmem:[#allocation150_spill] sm:$0xff] %v5414_v1  ;;  %v5433_v1 = vperm.slane %v5408_v8, 0  ;;  %861 = vmatpush.msra.mxu3 %v5445_v62 }
  0xff   :  { %9399 = vst [vmem:[#allocation151_spill] sm:$0xff] %v5418_v11  ;;  %v5453_v11 = vld [vmem:[#allocation10 + $0xa8] sm:$0xff] }
 0x100   :  { %9400 = vst [vmem:[#allocation152_spill] sm:$0xff] %v5420_v59  ;;  %v419_v5 = vadd.f32 %v5086_v3, %v5433_v1  ;;  %v5451_v59 = vld [vmem:[#allocation10 + $0xa0] sm:$0xff]  ;;  %822 = vmatpush.msra.mxu1 %v5453_v11 }
 0x101   :  { %9401 = vst [vmem:[#allocation153_spill] sm:$0xff] %v5422_v0  ;;  %802 = vmatpush.msrb.mxu0 %v5451_v59  ;;  %v5463_v3 = vld [vmem:[#allocation10 + $0x80] sm:$0xff] }
 0x102   :  { %9402 = vst [vmem:[#allocation154_spill] sm:$0xff] %v5424_v12  ;;  %v5441_v12 = vld [vmem:[#allocation10 + $0xd0] sm:$0xff] }
 0x103   :  { %9403 = vst [vmem:[#allocation155_spill] sm:$0xff] %v5426_v2  ;;  %v582_v2 = vpop.f32.mrf.mxu0  ;;  %841 = vmatpush.msra.mxu2 %v5441_v12  ;;  %803 = vmatpush.msrb.mxu0 %v5463_v3 }
 0x104   :  { %9404 = vst [vmem:[#allocation156_spill] sm:$0xff] %v5430_v44  ;;  %v5459_v44 = vld [vmem:[#allocation10 + $0xb8] sm:$0xff]  ;;  %v645_v0 = vadd.f32 %v582_v2, %v419_v5  ;;  %v5477_v2 = vld [vmem:[#allocation10 + $0x60] sm:$0xff]  ;;  %v5479_v5 = vld [vmem:[#allocation10 + $0x68] sm:$0xff] }
 0x105   :  { %9405 = vst [vmem:[#allocation157_spill] sm:$0xff] %v5433_v1  ;;  %v5465_v1 = vld [vmem:[#allocation10 + $0x88] sm:$0xff]  ;;  %842 = vmatpush.msra.mxu2 %v5455_v31  ;;  %862 = vmatpush.msra.mxu3 %v5459_v44 }
 0x106   :  { %9406 = vst [vmem:[#allocation158_spill] sm:$0xff] %v5437_v18  ;;  %823 = vmatpush.msra.mxu1 %v5465_v1  ;;  %v5485_v18 = vpop.f32.mrf.mxu1  ;;  %804 = vmatpush.msrb.mxu0 %v5477_v2 }
 0x107   :  { %9407 = vst [vmem:[#allocation159_spill] sm:$0xff] %v5439_v58  ;;  %v5467_v58 = vld [vmem:[#allocation10 + $0x90] sm:$0xff] }
 0x108   :  { %9408 = vst [vmem:[#allocation160_spill] sm:$0xff] %v5441_v12  ;;  %v5471_v12 = vld [vmem:[#allocation10 + $0x98] sm:$0xff]  ;;  %843 = vmatpush.msra.mxu2 %v5467_v58  ;;  %824 = vmatpush.msra.mxu1 %v5479_v5 }
 0x109   :  { %9409 = vst [vmem:[#allocation161_spill] sm:$0xff] %v5445_v62  ;;  %v5473_v62 = vpop.f32.mrf.mxu2  ;;  %863 = vmatpush.msra.mxu3 %v5471_v12 }
 0x10a   :  { %9410 = vst [vmem:[#allocation162_spill] sm:$0xff] %v5451_v59  ;;  %v5483_v59 = vpop.f32.mrf.mxu3 }
 0x10b   :  { %9411 = vst [vmem:[#allocation163_spill] sm:$0xff] %v5453_v11  ;;  %v5481_v11 = vld [vmem:[#allocation10 + $0x70] sm:$0xff] }
 0x10c   :  { %9412 = vst [vmem:[#allocation164_spill] sm:$0xff] %v5455_v31  ;;  %v5497_v31 = vld [vmem:[#allocation10 + $0x50] sm:$0xff]  ;;  %844 = vmatpush.msra.mxu2 %v5481_v11 }
 0x10d   :  { %9413 = vst [vmem:[#allocation165_spill] sm:$0xff] %v5459_v44  ;;  %v5489_v44 = vld [vmem:[#allocation10 + $0x78] sm:$0xff] }
 0x10e   :  { %9414 = vst [vmem:[#allocation166_spill] sm:$0xff] %v5463_v3  ;;  %v5495_v3 = vld [vmem:[#allocation10 + $0x48] sm:$0xff]  ;;  %864 = vmatpush.msra.mxu3 %v5489_v44  ;;  %845 = vmatpush.msra.mxu2 %v5497_v31 }
 0x10f   :  { %9415 = vst [vmem:[#allocation167_spill] sm:$0xff] %v5465_v1  ;;  %v5493_v1 = vld [vmem:[#allocation10 + $0x40] sm:$0xff]  ;;  %825 = vmatpush.msra.mxu1 %v5495_v3 }
 0x110   :  { %9416 = vst [vmem:[#allocation168_spill] sm:$0xff] %v5473_v62  ;;  %v3642_v62 = vmul.f32 -1.442695, %v645_v0  ;;  %805 = vmatpush.msrb.mxu0 %v5493_v1  ;;  %v5505_v0 = vld [vmem:[#allocation10 + $0x20] sm:$0xff] }
 0x111   :  { %9417 = vst [vmem:[#allocation169_spill] sm:$0xff] %v5477_v2  ;;  %v5513_v2 = vld [vmem:[#allocation10 + $0x38] sm:$0xff] }
 0x112   :  { %9418 = vst [vmem:[#allocation170_spill] sm:$0xff] %v5479_v5  ;;  %v5509_v5 = vld [vmem:[#allocation10 + $0x30] sm:$0xff]  ;;  %3710 = vpow2.f32 %v3642_v62  ;;  %806 = vmatpush.msrb.mxu0 %v5505_v0  ;;  %v5529_v62 = vpop.f32.mrf.mxu3 }
 0x113   :  { %9419 = vst [vmem:[#allocation171_spill] sm:$0xff] %v5483_v59  ;;  %v5507_v59 = vld [vmem:[#allocation10 + $0x28] sm:$0xff]  ;;  %846 = vmatpush.msra.mxu2 %v5509_v5 }
 0x114   :  { %9420 = vst [vmem:[#allocation172_spill] sm:$0xff] %v5485_v18  ;;  %v5501_v18 = vld [vmem:[#allocation10 + $0x58] sm:$0xff]  ;;  %826 = vmatpush.msra.mxu1 %v5507_v59 }
 0x115   :  { %9421 = vst [vmem:[#allocation173_spill] sm:$0xff] %v5489_v44  ;;  %865 = vmatpush.msra.mxu3 %v5501_v18  ;;  %v5521_v44 = vld [vmem:[#allocation10 + $0x10] sm:$0xff] }
 0x116   :  { %9422 = vst [vmem:[#allocation174_spill] sm:$0xff] %v5493_v1  ;;  %v5517_v1 = vld [vmem:[#allocation10] sm:$0xff]  ;;  %847 = vmatpush.msra.mxu2 %v5521_v44 }
 0x117   :  { %9423 = vst [vmem:[#allocation175_spill] sm:$0xff] %v5495_v3  ;;  %v5519_v3 = vld [vmem:[#allocation10 + $0x8] sm:$0xff]  ;;  %866 = vmatpush.msra.mxu3 %v5513_v2  ;;  %807 = vmatpush.msrb.mxu0 %v5517_v1 }
 0x118   :  { %9424 = vst [vmem:[#allocation176_spill] sm:$0xff] %v5497_v31  ;;  %v5525_v31 = vld [vmem:[#allocation10 + $0x18] sm:$0xff]  ;;  %827 = vmatpush.msra.mxu1 %v5519_v3 }
 0x119   :  { %9425 = vst [vmem:[#allocation177_spill] sm:$0xff] %v5505_v0  ;;  %v5531_v0 = vpop.f32.mrf.mxu1  ;;  %867 = vmatpush.msra.mxu3 %v5525_v31 }
 0x11a   :  { %9426 = vst [vmem:[#allocation178_spill] sm:$0xff] %v5507_v59  ;;  %v9432_v59 = vmov 0.0  }
 0x11b   :  { %9427 = vst [vmem:[#allocation179_spill] sm:$0xff] %v5509_v5  ;;  %728 = vmatmul.f32.vlgmr.msra.gmra.mxu0 %v9432_v59  ;;  %748 = vmatmul.f32.vlgmr.msrb.gmra.mxu1 %v9432_v59  ;;  %v5537_v5 = vpop.f32.mrf.mxu2 }
 0x11c   :  { %9428 = vst [vmem:[#allocation180_spill] sm:$0xff] %v5517_v1  ;;  %768 = vmatmul.f32.vlgmr.msrb.gmra.mxu2 %v9432_v59  ;;  %788 = vmatmul.f32.vlgmr.msrb.gmra.mxu3 %v9432_v59  ;;  %v3711_v1 = vpop.eup %3710 }
 0x11d   :  { %9429 = vst [vmem:[#allocation181_spill] sm:$0xff] %v5519_v3  ;;  %v5542_v3 = vperm.slane %v5408_v8, 1  ;;  %948 = vmatpush.msra.mxu0 %v4849_v9  ;;  %968 = vmatpush.msrb.mxu1 %v4855_v13  ;;  %v5558_v9 = vpop.f32.mrf.mxu3 }
 0x11e   :  { %9430 = vst [vmem:[#allocation182_spill] sm:$0xff] %v5529_v62  ;;  %988 = vmatpush.msrb.mxu2 %v4864_v17  ;;  %1008 = vmatpush.msrb.mxu3 %v4860_v15  ;;  %v5568_v15 = vperm.slane %v5408_v8, 3  ;;  %v6043_v62 = vld [vmem:[#allocation7 + $0x40] sm:$0xff] }
 0x11f   :  { %9431 = vst [vmem:[#allocation183_spill] sm:$0xff] %v5531_v0  ;;  %949 = vmatpush.msra.mxu0 %v4858_v14  ;;  %969 = vmatpush.msrb.mxu1 %v4862_v16  ;;  %v5550_v0 = vadd.f32 1.0, %v3711_v1  ;;  %v460_v59 = vadd.f32 %v5140_v4, %v5542_v3  ;;  %v9481_v1 = vld [vmem:[#allocation65_spill] sm:$0xff] }
 0x120   :  { %9433 = vst [vmem:[#allocation184_spill] sm:$0xff] %v5537_v5  ;;  %989 = vmatpush.msrb.mxu2 %v4879_v22  ;;  %1009 = vmatpush.msrb.mxu3 %v4877_v21  ;;  %v6040_v5 = vld [vmem:[#allocation7 + $0x78] sm:$0xff] }
 0x121   :  { %9434 = vst [vmem:[#allocation185_spill] sm:$0xff] %v5542_v3  ;;  %950 = vmatpush.msra.mxu0 %v4870_v19  ;;  %970 = vmatpush.msrb.mxu1 %v4872_v20  ;;  %v602_v13 = vpop.f32.mrf.mxu1  ;;  %3712 = vrcp.f32 %v5550_v0  ;;  %v542_v19 = vadd.f32 %v5190_v10, %v5568_v15  ;;  %vm658_vm2 = vweird.f32 %v5550_v0 }
 0x122   :  { %9435 = vst [vmem:[#allocation186_spill] sm:$0xff] %v5558_v9  ;;  %990 = vmatpush.msrb.mxu2 %v4891_v26  ;;  %1010 = vmatpush.msrb.mxu3 %v4889_v25  ;;  %v646_v14 = vadd.f32 %v602_v13, %v460_v59  ;;  %v6037_v9 = vld [vmem:[#allocation7 + $0x70] sm:$0xff] }
 0x123   :  { %951 = vmatpush.msra.mxu0 %v4883_v23  ;;  %971 = vmatpush.msrb.mxu1 %v4885_v24  ;;  %9436 = vst [vmem:[#allocation187_spill] sm:$0xff] %v5568_v15  ;;  %v5572_v17 = vpop.f32.mrf.mxu2  ;;  %v5593_v24 = vperm.slane %v5408_v8, 2 }
 0x124   :  { %991 = vmatpush.msrb.mxu2 %v4903_v30  ;;  %1011 = vmatpush.msrb.mxu3 %v4901_v29  ;;  %v3643_v16 = vmul.f32 -1.442695, %v646_v14  ;;  %9437 = vst [vmem:[#allocation188_spill] sm:$0xff] %v5572_v17  ;;  %v6034_v17 = vld [vmem:[#allocation7 + $0x68] sm:$0xff] }
 0x125   :  { %952 = vmatpush.msra.mxu0 %v4893_v27  ;;  %972 = vmatpush.msrb.mxu1 %v4896_v28  ;;  %v642_v21 = vpop.f32.mrf.mxu3  ;;  %v501_v29 = vadd.f32 %v5188_v7, %v5593_v24  ;;  %v9456_v7 = vld [vmem:[#allocation35_spill] sm:$0xff] }
 0x126   :  { %992 = vmatpush.msrb.mxu2 %v4919_v35  ;;  %1012 = vmatpush.msrb.mxu3 %v4917_v34  ;;  %3714 = vpow2.f32 %v3643_v16  ;;  %v648_v22 = vadd.f32 %v642_v21, %v542_v19 }
 0x127   :  { %953 = vmatpush.msra.mxu0 %v4909_v32  ;;  %973 = vmatpush.msrb.mxu1 %v4912_v33  ;;  %v5584_v20 = vpop.eup %3712  ;;  %v9438_v33 = vld [vmem:[#allocation23_spill] sm:$0xff] }
 0x128   :  { %993 = vmatpush.msrb.mxu2 %v4931_v39  ;;  %1013 = vmatpush.msrb.mxu3 %v4929_v38  ;;  %v654_v25 = vmul.f32 %v5584_v20, %v5550_v0  ;;  %v3644_v26 = vmul.f32 -1.442695, %v648_v22  ;;  %vm659_vm1 = vweird.f32 %v5584_v20 }
 0x129   :  { %954 = vmatpush.msra.mxu0 %v4923_v36  ;;  %974 = vmatpush.msrb.mxu1 %v4925_v37  ;;  %v9439_v36 = vld [vmem:[#allocation20_spill] sm:$0xff]  ;;  %v9440_v37 = vld [vmem:[#allocation22_spill] sm:$0xff]  ;;  %vm5641_vm4 = vmor %vm658_vm2, %vm659_vm1 }
 0x12a   :  { %994 = vmatpush.msrb.mxu2 %v4943_v43  ;;  %1014 = vmatpush.msrb.mxu3 %v4941_v42  ;;  %3716 = vpow2.f32 %v3644_v26  ;;  %v655_v30 = vsub.f32 1.0, %v654_v25  ;;  %v9443_v43 = vld [vmem:[#allocation21_spill] sm:$0xff] }
 0x12b   :  { %955 = vmatpush.msra.mxu0 %v4933_v40  ;;  %975 = vmatpush.msrb.mxu1 %v4936_v41  ;;  %v622_v28 = vpop.f32.mrf.mxu2  ;;  %v9441_v40 = vld [vmem:[#allocation29_spill] sm:$0xff]  ;;  %v9442_v41 = vld [vmem:[#allocation26_spill] sm:$0xff] }
 0x12c   :  { %995 = vmatpush.msrb.mxu2 %v4959_v48  ;;  %1015 = vmatpush.msrb.mxu3 %v4957_v47  ;;  %v3715_v23 = vpop.eup %3714  ;;  %v647_v32 = vadd.f32 %v622_v28, %v501_v29  ;;  %v656_v35 = vmul.f32 %v5584_v20, %v655_v30  ;;  %v9446_v47 = vld [vmem:[#allocation30_spill] sm:$0xff] }
 0x12d   :  { %956 = vmatpush.msra.mxu0 %v4949_v45  ;;  %976 = vmatpush.msrb.mxu1 %v4952_v46  ;;  %v5599_v27 = vadd.f32 1.0, %v3715_v23  ;;  %v9444_v45 = vld [vmem:[#allocation25_spill] sm:$0xff]  ;;  %v9445_v46 = vld [vmem:[#allocation32_spill] sm:$0xff] }
 0x12e   :  { %996 = vmatpush.msrb.mxu2 %v4971_v52  ;;  %1016 = vmatpush.msrb.mxu3 %v4969_v51  ;;  %v9448_v51 = vld [vmem:[#allocation28_spill] sm:$0xff] }
 0x12f   :  { %957 = vmatpush.msra.mxu0 %v4963_v49  ;;  %977 = vmatpush.msrb.mxu1 %v4965_v50  ;;  %3718 = vrcp.f32 %v5599_v27  ;;  %v657_v49 = vadd.f32 %v5584_v20, %v656_v35  ;;  %v9447_v50 = vld [vmem:[#allocation24_spill] sm:$0xff]  ;;  %v683_v52 = vand.u32 2147483648, %v5599_v27  ;;  %vm677_vm5 = vweird.f32 %v5599_v27 }
 0x130   :  { %997 = vmatpush.msrb.mxu2 %v4983_v56  ;;  %1017 = vmatpush.msrb.mxu3 %v4981_v55  ;;  %v3717_v34 = vpop.eup %3716  ;;  %3720 = vtanh.f32 %v647_v32  ;;  %v9450_v55 = vld [vmem:[#allocation33_spill] sm:$0xff] }
 0x131   :  { %958 = vmatpush.msra.mxu0 %v4973_v53  ;;  %978 = vmatpush.msrb.mxu1 %v4976_v54  ;;  %v691_v39 = vadd.f32 1.0, %v3717_v34  ;;  %v664_v53 = vand.u32 2147483648, %v5550_v0  ;;  %v9449_v54 = vld [vmem:[#allocation34_spill] sm:$0xff]  ;;  %v661_v10 = vsel %vm5641_vm4, %v5584_v20, %v657_v49  ;;  %v684_v59 = vor.u32 1.1754944e-38, %v683_v52  ;;  %v9472_v52 = vld [vmem:[#allocation53_spill] sm:$0xff] }
 0x132   :  { %998 = vmatpush.msrb.mxu2 %v5005_v63  ;;  %1018 = vmatpush.msrb.mxu3 %v4999_v61  ;;  %v9451_v61 = vld [vmem:[#allocation27_spill] sm:$0xff]  ;;  %v9469_v49 = vld [vmem:[#allocation50_spill] sm:$0xff] }
 0x133   :  { %959 = vmatpush.msra.mxu0 %v4985_v57  ;;  %979 = vmatpush.msrb.mxu1 %v4997_v60  ;;  %3722 = vrcp.f32 %v691_v39  ;;  %v662_v57 = vand.u32 2147483647, %v5550_v0  ;;  %v681_v60 = vand.u32 2147483647, %v5599_v27  ;;  %v9452_v63 = vld [vmem:[#allocation31_spill] sm:$0xff]  ;;  %v665_v13 = vor.u32 1.1754944e-38, %v664_v53 }
 0x134   :  { %999 = vmatpush.msrb.mxu2 %v5017_v6  ;;  %1019 = vmatpush.msrb.mxu3 %v9438_v33  ;;  %v9455_v6 = vld [vmem:[#allocation36_spill] sm:$0xff]  ;;  %v703_v28 = vand.u32 2147483648, %v691_v39  ;;  %vm697_vm10 = vweird.f32 %v691_v39  ;;  %v701_v29 = vand.u32 2147483647, %v691_v39 }
 0x135   :  { %960 = vmatpush.msra.mxu0 %v9439_v36  ;;  %980 = vmatpush.msrb.mxu1 %v9440_v37  ;;  %v3719_v38 = vpop.eup %3718  ;;  %vm663_vm7 = vcmp.eq.f32.partialorder %v662_v57, 8.507059e+37  ;;  %vm682_vm8 = vcmp.eq.f32.partialorder %v681_v60, 8.507059e+37  ;;  %v9457_v36 = vld [vmem:[#allocation38_spill] sm:$0xff]  ;;  %v9458_v37 = vld [vmem:[#allocation39_spill] sm:$0xff]  ;;  %v9473_v53 = vld [vmem:[#allocation56_spill] sm:$0xff] }
 0x136   :  { %1000 = vmatpush.msrb.mxu2 %v9441_v40  ;;  %1020 = vmatpush.msrb.mxu3 %v9442_v41  ;;  %v673_v42 = vmul.f32 %v3719_v38, %v5599_v27  ;;  %vm678_vm3 = vweird.f32 %v3719_v38  ;;  %v3721_v8 = vpop.eup %3720  ;;  %v666_v19 = vsel %vm663_vm7, %v665_v13, %v661_v10  ;;  %v704_v32 = vor.u32 1.1754944e-38, %v703_v28  ;;  %v9460_v40 = vld [vmem:[#allocation41_spill] sm:$0xff]  ;;  %v9462_v41 = vld [vmem:[#allocation43_spill] sm:$0xff]  ;;  %v9478_v60 = vld [vmem:[#allocation62_spill] sm:$0xff] }
 0x137   :  { %961 = vmatpush.msra.mxu0 %v9443_v43  ;;  %981 = vmatpush.msrb.mxu1 %v9444_v45  ;;  %vm679_vm6 = vmor %vm677_vm5, %vm678_vm3  ;;  %v708_v23 = vmul.f32 %v3721_v8, %v666_v19  ;;  %vm702_vm12 = vcmp.eq.f32.partialorder %v701_v29, 8.507059e+37  ;;  %v9464_v43 = vld [vmem:[#allocation45_spill] sm:$0xff]  ;;  %v9465_v45 = vld [vmem:[#allocation46_spill] sm:$0xff]  ;;  %9613 = vst [vmem:[#allocation43_spill] sm:$0xff] %v6037_v9 }
 0x138   :  { %1001 = vmatpush.msrb.mxu2 %v9445_v46  ;;  %1021 = vmatpush.msrb.mxu3 %v9446_v47  ;;  %v674_v48 = vsub.f32 1.0, %v673_v42  ;;  %v9463_v42 = vld [vmem:[#allocation44_spill] sm:$0xff]  ;;  %v9466_v46 = vld [vmem:[#allocation47_spill] sm:$0xff]  ;;  %v9477_v57 = vld [vmem:[#allocation61_spill] sm:$0xff]  ;;  %9615 = vst [vmem:[#allocation45_spill] sm:$0xff] %v6043_v62 }
 0x139   :  { %962 = vmatpush.msra.mxu0 %v9447_v50  ;;  %982 = vmatpush.msrb.mxu1 %v9448_v51  ;;  %v3723_v0 = vpop.eup %3722  ;;  %v9467_v47 = vld [vmem:[#allocation48_spill] sm:$0xff]  ;;  %v9470_v50 = vld [vmem:[#allocation51_spill] sm:$0xff]  ;;  %v9485_v10 = vld [vmem:[#allocation69_spill] sm:$0xff]  ;;  %9614 = vst [vmem:[#allocation44_spill] sm:$0xff] %v6040_v5 }
 0x13a   :  { %1002 = vmatpush.msrb.mxu2 %v9449_v54  ;;  %1022 = vmatpush.msrb.mxu3 %v9450_v55  ;;  %v675_v56 = vmul.f32 %v3719_v38, %v674_v48  ;;  %v693_v16 = vmul.f32 %v3723_v0, %v691_v39  ;;  %vm698_vm9 = vweird.f32 %v3723_v0  ;;  %v9461_v39 = vld [vmem:[#allocation42_spill] sm:$0xff]  ;;  %v9468_v48 = vld [vmem:[#allocation49_spill] sm:$0xff]  ;;  %v9471_v51 = vld [vmem:[#allocation52_spill] sm:$0xff] }
 0x13b   :  { %963 = vmatpush.msra.mxu0 %v9451_v61  ;;  %983 = vmatpush.msrb.mxu1 %v9452_v63  ;;  %vm699_vm11 = vmor %vm697_vm10, %vm698_vm9  ;;  %v9474_v54 = vld [vmem:[#allocation57_spill] sm:$0xff]  ;;  %v9475_v55 = vld [vmem:[#allocation58_spill] sm:$0xff]  ;;  %9612 = vst [vmem:[#allocation42_spill] sm:$0xff] %v6034_v17 }
 0x13c   :  { %1003 = vmatpush.msrb.mxu2 %v9455_v6  ;;  %1023 = vmatpush.msrb.mxu3 %v9456_v7  ;;  %v676_v4 = vadd.f32 %v3719_v38, %v675_v56  ;;  %v694_v25 = vsub.f32 1.0, %v693_v16  ;;  %v9476_v56 = vld [vmem:[#allocation60_spill] sm:$0xff]  ;;  %v9479_v61 = vld [vmem:[#allocation63_spill] sm:$0xff]  ;;  %v9482_v6 = vld [vmem:[#allocation66_spill] sm:$0xff] }
 0x13d   :  { %v9480_v63 = vld [vmem:[#allocation64_spill] sm:$0xff]  ;;  %v9483_v7 = vld [vmem:[#allocation67_spill] sm:$0xff]  ;;  %v9489_v13 = vld [vmem:[#allocation74_spill] sm:$0xff] }
 0x13e   :  { %v680_v14 = vsel %vm679_vm6, %v3719_v38, %v676_v4  ;;  %v695_v27 = vmul.f32 %v3723_v0, %v694_v25  ;;  %v9459_v38 = vld [vmem:[#allocation40_spill] sm:$0xff]  ;;  %v9486_v4 = vld [vmem:[#allocation70_spill] sm:$0xff]  ;;  %v9492_v19 = vld [vmem:[#allocation77_spill] sm:$0xff] }
 0x13f   :  { %v685_v21 = vsel %vm682_vm8, %v684_v59, %v680_v14  ;;  %v9484_v8 = vld [vmem:[#allocation68_spill] sm:$0xff]  ;;  %v9490_v14 = vld [vmem:[#allocation75_spill] sm:$0xff]  ;;  %v9496_v25 = vld [vmem:[#allocation82_spill] sm:$0xff] }
 0x140   :  { %v707_v22 = vmul.f32 0.0, %v685_v21  ;;  %v696_v20 = vadd.f32 %v3723_v0, %v695_v27  ;;  %v9488_v59 = vld [vmem:[#allocation72_spill] sm:$0xff]  ;;  %v9493_v21 = vld [vmem:[#allocation78_spill] sm:$0xff]  ;;  %v9497_v27 = vld [vmem:[#allocation83_spill] sm:$0xff] }
 0x141   :  { %v9491_v16 = vld [vmem:[#allocation76_spill] sm:$0xff]  ;;  %v9499_v28 = vld [vmem:[#allocation85_spill] sm:$0xff]  ;;  %v9500_v29 = vld [vmem:[#allocation86_spill] sm:$0xff] }
 0x142   :  { %v5651_v26 = vadd.f32 %v708_v23, %v707_v22  ;;  %v700_v30 = vsel %vm699_vm11, %v3723_v0, %v696_v20  ;;  %v9487_v0 = vld [vmem:[#allocation71_spill] sm:$0xff]  ;;  %v9495_v23 = vld [vmem:[#allocation80_spill] sm:$0xff] }
 0x143   :  { %v705_v34 = vsel %vm702_vm12, %v704_v32, %v700_v30  ;;  %v9494_v22 = vld [vmem:[#allocation79_spill] sm:$0xff]  ;;  %v9498_v20 = vld [vmem:[#allocation84_spill] sm:$0xff] }
 0x144   :  { %3724 = vtanh.f32 %v5651_v26  ;;  %v9501_v30 = vld [vmem:[#allocation87_spill] sm:$0xff]  ;;  %v9502_v32 = vld [vmem:[#allocation88_spill] sm:$0xff] }
 0x14a   :  { %v3725_v33 = vpop.eup %3724 }
 0x14b   :  { %v711_v35 = vmul.f32 %v3725_v33, %v705_v34  ;;  %v9503_v33 = vld [vmem:[#allocation89_spill] sm:$0xff]  ;;  %v9504_v34 = vld [vmem:[#allocation92_spill] sm:$0xff] }
 0x14d   :  { %808 = vmatmul.f32.vlgmr.msrb.gmra.mxu0 %v711_v35  ;;  %828 = vmatmul.f32.vlgmr.msra.gmra.mxu1 %v711_v35 }
 0x14e   :  { %848 = vmatmul.f32.vlgmr.msra.gmra.mxu2 %v711_v35  ;;  %868 = vmatmul.f32.vlgmr.msra.gmra.mxu3 %v711_v35 }
 0x14f   :  { %1095 = vmatpush.msrb.mxu0 %v9457_v36  ;;  %1115 = vmatpush.msra.mxu1 %v9458_v37  ;;  %v9506_v36 = vld [vmem:[#allocation95_spill] sm:$0xff]  ;;  %v9507_v37 = vld [vmem:[#allocation96_spill] sm:$0xff] }
 0x150   :  { %1135 = vmatpush.msra.mxu2 %v9459_v38  ;;  %1155 = vmatpush.msra.mxu3 %v9460_v40  ;;  %v9508_v38 = vld [vmem:[#allocation97_spill] sm:$0xff]  ;;  %v9509_v40 = vld [vmem:[#allocation98_spill] sm:$0xff] }
 0x151   :  { %1096 = vmatpush.msrb.mxu0 %v9461_v39  ;;  %1116 = vmatpush.msra.mxu1 %v9462_v41  ;;  %v9510_v39 = vld [vmem:[#allocation99_spill] sm:$0xff]  ;;  %v9511_v41 = vld [vmem:[#allocation100_spill] sm:$0xff] }
 0x152   :  { %1136 = vmatpush.msra.mxu2 %v9463_v42  ;;  %1156 = vmatpush.msra.mxu3 %v9464_v43  ;;  %v9512_v42 = vld [vmem:[#allocation101_spill] sm:$0xff]  ;;  %v9513_v43 = vld [vmem:[#allocation102_spill] sm:$0xff] }
 0x153   :  { %1097 = vmatpush.msrb.mxu0 %v9465_v45  ;;  %1117 = vmatpush.msra.mxu1 %v9466_v46  ;;  %v9514_v45 = vld [vmem:[#allocation103_spill] sm:$0xff]  ;;  %v9515_v46 = vld [vmem:[#allocation104_spill] sm:$0xff] }
 0x154   :  { %1137 = vmatpush.msra.mxu2 %v9467_v47  ;;  %1157 = vmatpush.msra.mxu3 %v9468_v48  ;;  %v9516_v47 = vld [vmem:[#allocation106_spill] sm:$0xff]  ;;  %v9517_v48 = vld [vmem:[#allocation107_spill] sm:$0xff] }
 0x155   :  { %964 = vmatmul.f32.vlgmr.msra.gmra.mxu0 %v711_v35  ;;  %984 = vmatmul.f32.vlgmr.msrb.gmra.mxu1 %v711_v35 }
 0x156   :  { %1004 = vmatmul.f32.vlgmr.msrb.gmra.mxu2 %v711_v35  ;;  %1024 = vmatmul.f32.vlgmr.msrb.gmra.mxu3 %v711_v35  ;;  %v9505_v35 = vld [vmem:[#allocation94_spill] sm:$0xff] }
 0x157   :  { %1098 = vmatpush.msrb.mxu0 %v9469_v49  ;;  %1118 = vmatpush.msra.mxu1 %v9470_v50  ;;  %v9518_v49 = vld [vmem:[#allocation108_spill] sm:$0xff]  ;;  %v9519_v50 = vld [vmem:[#allocation109_spill] sm:$0xff] }
 0x158   :  { %1138 = vmatpush.msra.mxu2 %v9471_v51  ;;  %1158 = vmatpush.msra.mxu3 %v9472_v52  ;;  %v9520_v51 = vld [vmem:[#allocation112_spill] sm:$0xff]  ;;  %v9521_v52 = vld [vmem:[#allocation113_spill] sm:$0xff] }
 0x159   :  { %1099 = vmatpush.msrb.mxu0 %v9473_v53  ;;  %1119 = vmatpush.msra.mxu1 %v9474_v54  ;;  %v9522_v53 = vld [vmem:[#allocation114_spill] sm:$0xff]  ;;  %v9523_v54 = vld [vmem:[#allocation116_spill] sm:$0xff] }
 0x15a   :  { %1139 = vmatpush.msra.mxu2 %v9475_v55  ;;  %1159 = vmatpush.msra.mxu3 %v9476_v56  ;;  %v9524_v55 = vld [vmem:[#allocation117_spill] sm:$0xff]  ;;  %v9525_v56 = vld [vmem:[#allocation118_spill] sm:$0xff] }
 0x15b   :  { %1100 = vmatpush.msrb.mxu0 %v9477_v57  ;;  %1120 = vmatpush.msra.mxu1 %v9478_v60  ;;  %v9526_v57 = vld [vmem:[#allocation119_spill] sm:$0xff]  ;;  %v9527_v60 = vld [vmem:[#allocation120_spill] sm:$0xff] }
 0x15c   :  { %1140 = vmatpush.msra.mxu2 %v9479_v61  ;;  %1160 = vmatpush.msra.mxu3 %v9480_v63  ;;  %v9528_v61 = vld [vmem:[#allocation121_spill] sm:$0xff]  ;;  %v9529_v63 = vld [vmem:[#allocation122_spill] sm:$0xff] }
 0x15d   :  { %1101 = vmatpush.msrb.mxu0 %v9481_v1  ;;  %1121 = vmatpush.msra.mxu1 %v9482_v6  ;;  %v9530_v1 = vld [vmem:[#allocation123_spill] sm:$0xff]  ;;  %v9531_v6 = vld [vmem:[#allocation124_spill] sm:$0xff] }
 0x15e   :  { %1141 = vmatpush.msra.mxu2 %v9483_v7  ;;  %1161 = vmatpush.msra.mxu3 %v9484_v8  ;;  %v9532_v7 = vld [vmem:[#allocation125_spill] sm:$0xff]  ;;  %v9533_v8 = vld [vmem:[#allocation126_spill] sm:$0xff] }
 0x15f   :  { %1102 = vmatpush.msrb.mxu0 %v9485_v10  ;;  %1122 = vmatpush.msra.mxu1 %v9486_v4  ;;  %v9534_v10 = vld [vmem:[#allocation127_spill] sm:$0xff]  ;;  %v9535_v4 = vld [vmem:[#allocation128_spill] sm:$0xff] }
 0x160   :  { %1142 = vmatpush.msra.mxu2 %v9487_v0  ;;  %1162 = vmatpush.msra.mxu3 %v9488_v59  ;;  %v9536_v0 = vld [vmem:[#allocation129_spill] sm:$0xff]  ;;  %v9537_v59 = vld [vmem:[#allocation132_spill] sm:$0xff] }
 0x161   :  { %1103 = vmatpush.msrb.mxu0 %v9489_v13  ;;  %1123 = vmatpush.msra.mxu1 %v9490_v14  ;;  %v9538_v13 = vld [vmem:[#allocation133_spill] sm:$0xff]  ;;  %v9539_v14 = vld [vmem:[#allocation134_spill] sm:$0xff] }
 0x162   :  { %1143 = vmatpush.msra.mxu2 %v9491_v16  ;;  %1163 = vmatpush.msra.mxu3 %v9492_v19  ;;  %v9540_v16 = vld [vmem:[#allocation137_spill] sm:$0xff]  ;;  %v9541_v19 = vld [vmem:[#allocation138_spill] sm:$0xff] }
 0x163   :  { %1104 = vmatpush.msrb.mxu0 %v9493_v21  ;;  %1124 = vmatpush.msra.mxu1 %v9494_v22  ;;  %v9542_v21 = vld [vmem:[#allocation139_spill] sm:$0xff]  ;;  %v9543_v22 = vld [vmem:[#allocation140_spill] sm:$0xff] }
 0x164   :  { %1144 = vmatpush.msra.mxu2 %v9495_v23  ;;  %1164 = vmatpush.msra.mxu3 %v9496_v25  ;;  %v9544_v23 = vld [vmem:[#allocation141_spill] sm:$0xff]  ;;  %v9545_v25 = vld [vmem:[#allocation142_spill] sm:$0xff] }
 0x165   :  { %1105 = vmatpush.msrb.mxu0 %v9497_v27  ;;  %1125 = vmatpush.msra.mxu1 %v9498_v20  ;;  %v9546_v27 = vld [vmem:[#allocation143_spill] sm:$0xff]  ;;  %v9547_v20 = vld [vmem:[#allocation144_spill] sm:$0xff] }
 0x166   :  { %1145 = vmatpush.msra.mxu2 %v9499_v28  ;;  %1165 = vmatpush.msra.mxu3 %v9500_v29  ;;  %v9548_v28 = vld [vmem:[#allocation145_spill] sm:$0xff]  ;;  %v9549_v29 = vld [vmem:[#allocation146_spill] sm:$0xff] }
 0x167   :  { %1106 = vmatpush.msrb.mxu0 %v9501_v30  ;;  %1126 = vmatpush.msra.mxu1 %v9502_v32  ;;  %v9550_v30 = vld [vmem:[#allocation147_spill] sm:$0xff]  ;;  %v9551_v32 = vld [vmem:[#allocation148_spill] sm:$0xff] }
 0x168   :  { %1146 = vmatpush.msra.mxu2 %v9503_v33  ;;  %1166 = vmatpush.msra.mxu3 %v9504_v34  ;;  %v9552_v33 = vld [vmem:[#allocation149_spill] sm:$0xff]  ;;  %v9553_v34 = vld [vmem:[#allocation151_spill] sm:$0xff] }
 0x169   :  { %1107 = vmatpush.msrb.mxu0 %v9505_v35  ;;  %1127 = vmatpush.msra.mxu1 %v9506_v36  ;;  %v9554_v35 = vld [vmem:[#allocation152_spill] sm:$0xff]  ;;  %v9555_v36 = vld [vmem:[#allocation153_spill] sm:$0xff] }
 0x16a   :  { %1147 = vmatpush.msra.mxu2 %v9507_v37  ;;  %1167 = vmatpush.msra.mxu3 %v9508_v38  ;;  %v9556_v37 = vld [vmem:[#allocation156_spill] sm:$0xff]  ;;  %v9557_v38 = vld [vmem:[#allocation158_spill] sm:$0xff] }
 0x16b   :  { %1108 = vmatpush.msrb.mxu0 %v9509_v40  ;;  %1128 = vmatpush.msra.mxu1 %v9510_v39  ;;  %v9558_v40 = vld [vmem:[#allocation159_spill] sm:$0xff]  ;;  %v9559_v39 = vld [vmem:[#allocation160_spill] sm:$0xff] }
 0x16c   :  { %1148 = vmatpush.msra.mxu2 %v9511_v41  ;;  %1168 = vmatpush.msra.mxu3 %v9512_v42  ;;  %v9560_v41 = vld [vmem:[#allocation161_spill] sm:$0xff]  ;;  %v9561_v42 = vld [vmem:[#allocation162_spill] sm:$0xff] }
 0x16d   :  { %1109 = vmatpush.msrb.mxu0 %v9513_v43  ;;  %1129 = vmatpush.msra.mxu1 %v9514_v45  ;;  %v9562_v43 = vld [vmem:[#allocation163_spill] sm:$0xff]  ;;  %v9563_v45 = vld [vmem:[#allocation164_spill] sm:$0xff] }
 0x16e   :  { %1149 = vmatpush.msra.mxu2 %v9515_v46  ;;  %1169 = vmatpush.msra.mxu3 %v9516_v47  ;;  %v9564_v46 = vld [vmem:[#allocation165_spill] sm:$0xff]  ;;  %v9565_v47 = vld [vmem:[#allocation166_spill] sm:$0xff] }
 0x16f   :  { %1110 = vmatpush.msrb.mxu0 %v9517_v48  ;;  %1130 = vmatpush.msra.mxu1 %v9518_v49  ;;  %v9566_v48 = vld [vmem:[#allocation167_spill] sm:$0xff]  ;;  %v9567_v49 = vld [vmem:[#allocation169_spill] sm:$0xff] }
 0x170   :  { %1150 = vmatpush.msra.mxu2 %v9519_v50  ;;  %1170 = vmatpush.msra.mxu3 %v9520_v51  ;;  %v9568_v50 = vld [vmem:[#allocation170_spill] sm:$0xff]  ;;  %v9569_v51 = vld [vmem:[#allocation173_spill] sm:$0xff] }
 0x171   :  { %1175 = vmatpush.msra.mxu0 %v9521_v52  ;;  %1195 = vmatpush.msrb.mxu1 %v9522_v53  ;;  %v9570_v52 = vld [vmem:[#allocation174_spill] sm:$0xff]  ;;  %v9571_v53 = vld [vmem:[#allocation175_spill] sm:$0xff] }
 0x172   :  { %1215 = vmatpush.msrb.mxu2 %v9523_v54  ;;  %1235 = vmatpush.msrb.mxu3 %v9524_v55  ;;  %v9572_v54 = vld [vmem:[#allocation176_spill] sm:$0xff]  ;;  %v9573_v55 = vld [vmem:[#allocation177_spill] sm:$0xff] }
 0x173   :  { %1176 = vmatpush.msra.mxu0 %v9525_v56  ;;  %1196 = vmatpush.msrb.mxu1 %v9526_v57  ;;  %v9576_v56 = vld [vmem:[#allocation180_spill] sm:$0xff] }
 0x174   :  { %1216 = vmatpush.msrb.mxu2 %v9527_v60  ;;  %1236 = vmatpush.msrb.mxu3 %v9528_v61 }
 0x175   :  { %1177 = vmatpush.msra.mxu0 %v9529_v63  ;;  %1197 = vmatpush.msrb.mxu1 %v9530_v1 }
 0x176   :  { %1217 = vmatpush.msrb.mxu2 %v9531_v6  ;;  %1237 = vmatpush.msrb.mxu3 %v9532_v7 }
 0x177   :  { %1178 = vmatpush.msra.mxu0 %v9533_v8  ;;  %1198 = vmatpush.msrb.mxu1 %v9534_v10 }
 0x178   :  { %1218 = vmatpush.msrb.mxu2 %v9535_v4  ;;  %1238 = vmatpush.msrb.mxu3 %v9536_v0 }
 0x179   :  { %1179 = vmatpush.msra.mxu0 %v9537_v59  ;;  %1199 = vmatpush.msrb.mxu1 %v9538_v13  ;;  %v9581_v13 = vld [vmem:[#allocation157_spill] sm:$0xff] }
 0x17a   :  { %1219 = vmatpush.msrb.mxu2 %v9539_v14  ;;  %1239 = vmatpush.msrb.mxu3 %v9540_v16  ;;  %v9582_v14 = vld [vmem:[#allocation59_spill] sm:$0xff] }
 0x17b   :  { %1180 = vmatpush.msra.mxu0 %v9541_v19  ;;  %1200 = vmatpush.msrb.mxu1 %v9542_v21  ;;  %v422_v16 = vadd.f32 %v9582_v14, %v9581_v13  ;;  %v9583_v19 = vld [vmem:[#allocation73_spill] sm:$0xff] }
 0x17c   :  { %1220 = vmatpush.msrb.mxu2 %v9543_v22  ;;  %1240 = vmatpush.msrb.mxu3 %v9544_v23  ;;  %v463_v21 = vadd.f32 %v9583_v19, %v5542_v3 }
 0x17d   :  { %1181 = vmatpush.msra.mxu0 %v9545_v25  ;;  %1201 = vmatpush.msrb.mxu1 %v9546_v27 }
 0x17e   :  { %1221 = vmatpush.msrb.mxu2 %v9547_v20  ;;  %1241 = vmatpush.msrb.mxu3 %v9548_v28 }
 0x17f   :  { %1182 = vmatpush.msra.mxu0 %v9549_v29  ;;  %1202 = vmatpush.msrb.mxu1 %v9550_v30 }
 0x180   :  { %1222 = vmatpush.msrb.mxu2 %v9551_v32  ;;  %1242 = vmatpush.msrb.mxu3 %v9552_v33 }
 0x181   :  { %1183 = vmatpush.msra.mxu0 %v9553_v34  ;;  %1203 = vmatpush.msrb.mxu1 %v9554_v35 }
 0x182   :  { %1223 = vmatpush.msrb.mxu2 %v9555_v36  ;;  %1243 = vmatpush.msrb.mxu3 %v9556_v37 }
 0x183   :  { %1184 = vmatpush.msra.mxu0 %v9557_v38  ;;  %1204 = vmatpush.msrb.mxu1 %v9558_v40 }
 0x184   :  { %1224 = vmatpush.msrb.mxu2 %v9559_v39  ;;  %1244 = vmatpush.msrb.mxu3 %v9560_v41  ;;  %v9584_v39 = vld [vmem:[#allocation91_spill] sm:$0xff] }
 0x185   :  { %1185 = vmatpush.msra.mxu0 %v9561_v42  ;;  %1205 = vmatpush.msrb.mxu1 %v9562_v43  ;;  %v545_v41 = vadd.f32 %v9584_v39, %v5568_v15 }
 0x186   :  { %1225 = vmatpush.msrb.mxu2 %v9563_v45  ;;  %1245 = vmatpush.msrb.mxu3 %v9564_v46 }
 0x187   :  { %1186 = vmatpush.msra.mxu0 %v9565_v47  ;;  %1206 = vmatpush.msrb.mxu1 %v9566_v48 }
 0x188   :  { %1226 = vmatpush.msrb.mxu2 %v5467_v58  ;;  %1246 = vmatpush.msrb.mxu3 %v5471_v12  ;;  %v9574_v58 = vld [vmem:[#allocation178_spill] sm:$0xff]  ;;  %v9575_v12 = vld [vmem:[#allocation179_spill] sm:$0xff] }
 0x189   :  { %1187 = vmatpush.msra.mxu0 %v9567_v49  ;;  %1207 = vmatpush.msrb.mxu1 %v9568_v50  ;;  %v9586_v50 = vld [vmem:[#allocation90_spill] sm:$0xff] }
 0x18a   :  { %1227 = vmatpush.msrb.mxu2 %v5481_v11  ;;  %1247 = vmatpush.msrb.mxu3 %v9569_v51  ;;  %v9577_v11 = vld [vmem:[#allocation181_spill] sm:$0xff]  ;;  %v504_v51 = vadd.f32 %v9586_v50, %v5593_v24 }
 0x18b   :  { %1188 = vmatpush.msra.mxu0 %v9570_v52  ;;  %1208 = vmatpush.msrb.mxu1 %v9571_v53 }
 0x18c   :  { %1228 = vmatpush.msrb.mxu2 %v9572_v54  ;;  %1248 = vmatpush.msrb.mxu3 %v5501_v18  ;;  %v341_v18 = vld [vmem:[%s8615_s6] sm:$0xf] }
 0x18d   :  { %1189 = vmatpush.msra.mxu0 %v9573_v55  ;;  %1209 = vmatpush.msrb.mxu1 %v9574_v58  ;;  %v5785_v63 = vperm.slane %v341_v18, 0  ;;  %v5787_v1 = vperm.slane %v341_v18, 1  ;;  %v5791_v59 = vperm.slane %v341_v18, 3  ;;  %v5800_v43 = vperm.slane %v341_v18, 2 }
 0x18e   :  { %1229 = vmatpush.msrb.mxu2 %v9575_v12  ;;  %1249 = vmatpush.msrb.mxu3 %v5513_v2 }
 0x18f   :  { %1190 = vmatpush.msra.mxu0 %v9576_v56  ;;  %1210 = vmatpush.msrb.mxu1 %v9577_v11  ;;  %9578 = vst [vmem:[#allocation23_spill] sm:$0xff] %v5785_v63 }
 0x190   :  { %1230 = vmatpush.msrb.mxu2 %v5521_v44  ;;  %1250 = vmatpush.msrb.mxu3 %v5525_v31  ;;  %9579 = vst [vmem:[#allocation20_spill] sm:$0xff] %v5787_v1 }
 0x191   :  { %9580 = vst [vmem:[#allocation22_spill] sm:$0xff] %v5791_v59 }
 0x192   :  { %9585 = vst [vmem:[#allocation29_spill] sm:$0xff] %v5800_v43 }
 0x198   :  { %v729_v57 = vpop.f32.mrf.mxu0  ;;  %v749_v60 = vpop.f32.mrf.mxu1 }
 0x19f   :  { %v789_v61 = vpop.f32.mrf.mxu3  ;;  %v769_v7 = vpop.f32.mrf.mxu2 }
 0x1ca   :  { %v809_v2 = vpop.f32.mrf.mxu0  ;;  %v829_v6 = vpop.f32.mrf.mxu1 }
 0x1cb   :  { %v810_v8 = vadd.f32 %v809_v2, %v729_v57  ;;  %v830_v10 = vadd.f32 %v829_v6, %v749_v60 }
 0x1cd   :  { %v881_v44 = vadd.f32 %v5785_v63, %v810_v8  ;;  %v882_v31 = vadd.f32 %v5787_v1, %v830_v10 }
 0x1cf   :  { %v3645_v4 = vmul.f32 -1.442695, %v881_v44  ;;  %v3646_v0 = vmul.f32 -1.442695, %v882_v31 }
 0x1d1   :  { %3726 = vpow2.f32 %v3645_v4  ;;  %v869_v22 = vpop.f32.mrf.mxu3  ;;  %v849_v30 = vpop.f32.mrf.mxu2 }
 0x1d2   :  { %3728 = vpow2.f32 %v3646_v0  ;;  %v870_v23 = vadd.f32 %v869_v22, %v789_v61  ;;  %v965_v25 = vpop.f32.mrf.mxu0  ;;  %v985_v27 = vpop.f32.mrf.mxu1  ;;  %v850_v42 = vadd.f32 %v849_v30, %v769_v7 }
 0x1d3   :  { %v1028_v20 = vadd.f32 %v965_v25, %v422_v16  ;;  %v1029_v28 = vadd.f32 %v985_v27, %v463_v21 }
 0x1d4   :  { %v884_v29 = vadd.f32 %v5791_v59, %v870_v23  ;;  %v883_v52 = vadd.f32 %v5800_v43, %v850_v42 }
 0x1d5   :  { %v3648_v32 = vmul.f32 -1.442695, %v1028_v20  ;;  %v3649_v33 = vmul.f32 -1.442695, %v1029_v28 }
 0x1d6   :  { %v3647_v34 = vmul.f32 -1.442695, %v884_v29 }
 0x1d7   :  { %v3727_v35 = vpop.eup %3726  ;;  %3730 = vpow2.f32 %v3648_v32 }
 0x1d8   :  { %v3729_v36 = vpop.eup %3728  ;;  %v888_v37 = vadd.f32 1.0, %v3727_v35  ;;  %3732 = vpow2.f32 %v3647_v34 }
 0x1d9   :  { %v907_v38 = vadd.f32 1.0, %v3729_v36  ;;  %3734 = vpow2.f32 %v3649_v33  ;;  %v1025_v40 = vpop.f32.mrf.mxu3  ;;  %v1005_v54 = vpop.f32.mrf.mxu2 }
 0x1da   :  { %3736 = vrcp.f32 %v888_v37  ;;  %v1031_v45 = vadd.f32 %v1025_v40, %v545_v41  ;;  %v898_v58 = vand.u32 2147483647, %v888_v37  ;;  %v900_v18 = vand.u32 2147483648, %v888_v37 }
 0x1db   :  { %3738 = vrcp.f32 %v907_v38  ;;  %v919_v60 = vand.u32 2147483648, %v907_v38  ;;  %v917_v2 = vand.u32 2147483647, %v907_v38  ;;  %v1030_v6 = vadd.f32 %v1005_v54, %v504_v51 }
 0x1dc   :  { %v3650_v56 = vmul.f32 -1.442695, %v1031_v45  ;;  %vm894_vm13 = vweird.f32 %v888_v37  ;;  %vm913_vm14 = vweird.f32 %v907_v38  ;;  %vm5814_vm15 = vcmp.eq.f32.partialorder %v898_v58, 8.507059e+37 }
 0x1dd   :  { %v3731_v46 = vpop.eup %3730  ;;  %v920_v44 = vor.u32 1.1754944e-38, %v919_v60  ;;  %v901_v4 = vor.u32 1.1754944e-38, %v900_v18  ;;  %vm5818_vm2 = vcmp.eq.f32.partialorder %v917_v2, 8.507059e+37 }
 0x1de   :  { %v3733_v47 = vpop.eup %3732  ;;  %v5802_v48 = vadd.f32 1.0, %v3731_v46 }
 0x1df   :  { %v3735_v49 = vpop.eup %3734  ;;  %v5807_v53 = vadd.f32 1.0, %v3733_v47  ;;  %v5925_v47 = vld [vmem:[#allocation7 + $0x190] sm:$0xff] }
 0x1e0   :  { %v3737_v55 = vpop.eup %3736  ;;  %3740 = vrcp.f32 %v5802_v48  ;;  %v5810_v12 = vadd.f32 1.0, %v3735_v49  ;;  %vm1041_vm3 = vweird.f32 %v5802_v48  ;;  %v1045_v23 = vand.u32 2147483647, %v5802_v48 }
 0x1e1   :  { %v3739_v11 = vpop.eup %3738  ;;  %v890_v57 = vmul.f32 %v3737_v55, %v888_v37  ;;  %3742 = vrcp.f32 %v5807_v53  ;;  %vm895_vm0 = vweird.f32 %v3737_v55  ;;  %v1047_v28 = vand.u32 2147483648, %v5802_v48 }
 0x1e2   :  { %v909_v61 = vmul.f32 %v3739_v11, %v907_v38  ;;  %3744 = vrcp.f32 %v5810_v12  ;;  %vm914_vm1 = vweird.f32 %v3739_v11  ;;  %vm896_vm4 = vmor %vm894_vm13, %vm895_vm0  ;;  %vm1060_vm5 = vweird.f32 %v5810_v12 }
 0x1e3   :  { %v891_v7 = vsub.f32 1.0, %v890_v57  ;;  %3746 = vtanh.f32 %v883_v52  ;;  %vm915_vm6 = vmor %vm913_vm14, %vm914_vm1  ;;  %v1066_v34 = vand.u32 2147483648, %v5810_v12  ;;  %vm5840_vm8 = vcmp.eq.f32.partialorder %v1045_v23, 8.507059e+37  ;;  %v5875_v23 = vld [vmem:[#allocation7 + $0x1e0] sm:$0xff] }
 0x1e4   :  { %v910_v8 = vsub.f32 1.0, %v909_v61  ;;  %3748 = vpow2.f32 %v3650_v56  ;;  %v1064_v54 = vand.u32 2147483647, %v5810_v12  ;;  %v1048_v58 = vor.u32 1.1754944e-38, %v1047_v28  ;;  %v5888_v28 = vld [vmem:[#allocation7 + $0x1f8] sm:$0xff] }
 0x1e5   :  { %v892_v31 = vmul.f32 %v3737_v55, %v891_v7  ;;  %3750 = vtanh.f32 %v1030_v6  ;;  %vm933_vm11 = vweird.f32 %v5807_v53  ;;  %v1067_v60 = vor.u32 1.1754944e-38, %v1066_v34 }
 0x1e6   :  { %v3741_v0 = vpop.eup %3740  ;;  %v911_v14 = vmul.f32 %v3739_v11, %v910_v8  ;;  %v939_v18 = vand.u32 2147483648, %v5807_v53  ;;  %vm1065_vm14 = vcmp.eq.f32.partialorder %v1064_v54, 8.507059e+37  ;;  %v937_v6 = vand.u32 2147483647, %v5807_v53  ;;  %v5944_v54 = vld [vmem:[#allocation7 + $0x178] sm:$0xff] }
 0x1e7   :  { %v5822_v19 = vpop.eup %3742  ;;  %v893_v21 = vadd.f32 %v3737_v55, %v892_v31  ;;  %v1037_v22 = vmul.f32 %v3741_v0, %v5802_v48  ;;  %vm1042_vm7 = vweird.f32 %v3741_v0 }
 0x1e8   :  { %v3745_v25 = vpop.eup %3744  ;;  %v912_v27 = vadd.f32 %v3739_v11, %v911_v14  ;;  %v929_v20 = vmul.f32 %v5822_v19, %v5807_v53  ;;  %vm1043_vm10 = vmor %vm1041_vm3, %vm1042_vm7  ;;  %vm934_vm12 = vweird.f32 %v5822_v19  ;;  %vm938_vm0 = vcmp.eq.f32.partialorder %v937_v6, 8.507059e+37  ;;  %v5974_v6 = vld [vmem:[#allocation7 + $0x108] sm:$0xff] }
 0x1e9   :  { %v3747_v29 = vpop.eup %3746  ;;  %v897_v30 = vsel %vm896_vm4, %v3737_v55, %v893_v21  ;;  %v1038_v32 = vsub.f32 1.0, %v1037_v22  ;;  %v1056_v33 = vmul.f32 %v3745_v25, %v5810_v12  ;;  %vm1061_vm9 = vweird.f32 %v3745_v25 }
 0x1ea   :  { %v3749_v35 = vpop.eup %3748  ;;  %v902_v36 = vsel %vm5814_vm15, %v901_v4, %v897_v30  ;;  %v916_v37 = vsel %vm915_vm6, %v3739_v11, %v912_v27  ;;  %v930_v40 = vsub.f32 1.0, %v929_v20  ;;  %vm1062_vm13 = vmor %vm1060_vm5, %vm1061_vm9  ;;  %v5885_v20 = vld [vmem:[#allocation7 + $0x1f0] sm:$0xff]  ;;  %v5893_v30 = vld [vmem:[#allocation7 + $0x1c0] sm:$0xff] }
 0x1eb   :  { %v921_v39 = vsel %vm5818_vm2, %v920_v44, %v916_v37  ;;  %v944_v41 = vmul.f32 %v3747_v29, %v902_v36  ;;  %v1057_v42 = vsub.f32 1.0, %v1056_v33  ;;  %v1039_v45 = vmul.f32 %v3741_v0, %v1038_v32  ;;  %v3751_v38 = vpop.eup %3750  ;;  %vm935_vm15 = vmor %vm933_vm11, %vm934_vm12  ;;  %v5896_v32 = vld [vmem:[#allocation7 + $0x1c8] sm:$0xff]  ;;  %v5902_v36 = vld [vmem:[#allocation7 + $0x1d8] sm:$0xff] }
 0x1ec   :  { %v943_v46 = vmul.f32 0.0, %v921_v39  ;;  %v5844_v49 = vadd.f32 1.0, %v3749_v35  ;;  %v931_v50 = vmul.f32 %v5822_v19, %v930_v40  ;;  %v940_v44 = vor.u32 1.1754944e-38, %v939_v18  ;;  %v5899_v35 = vld [vmem:[#allocation7 + $0x1d0] sm:$0xff]  ;;  %v5905_v37 = vld [vmem:[#allocation7 + $0x1a0] sm:$0xff]  ;;  %v5908_v40 = vld [vmem:[#allocation7 + $0x1a8] sm:$0xff] }
 0x1ed   :  { %v1058_v51 = vmul.f32 %v3745_v25, %v1057_v42  ;;  %v1040_v52 = vadd.f32 %v3741_v0, %v1039_v45  ;;  %v5914_v42 = vld [vmem:[#allocation7 + $0x1b8] sm:$0xff]  ;;  %v5965_v18 = vld [vmem:[#allocation7 + $0x130] sm:$0xff]  ;;  %v6019_v27 = vld [vmem:[#allocation7 + $0x80] sm:$0xff] }
 0x1ee   :  { %v5848_v55 = vadd.f32 %v944_v41, %v943_v46  ;;  %3752 = vrcp.f32 %v5844_v49  ;;  %v932_v57 = vadd.f32 %v5822_v19, %v931_v50  ;;  %vm1080_vm2 = vweird.f32 %v5844_v49  ;;  %v5911_v41 = vld [vmem:[#allocation7 + $0x1b0] sm:$0xff]  ;;  %v5922_v46 = vld [vmem:[#allocation7 + $0x188] sm:$0xff]  ;;  %v5935_v50 = vld [vmem:[#allocation7 + $0x160] sm:$0xff]  ;;  %9607 = vst [vmem:[#allocation35_spill] sm:$0xff] %v6019_v27 }
 0x1ef   :  { %v1044_v56 = vsel %vm1043_vm10, %v3741_v0, %v1040_v52  ;;  %v1059_v11 = vadd.f32 %v3745_v25, %v1058_v51  ;;  %v5938_v51 = vld [vmem:[#allocation7 + $0x168] sm:$0xff]  ;;  %v5941_v52 = vld [vmem:[#allocation7 + $0x170] sm:$0xff] }
 0x1f0   :  { %3754 = vtanh.f32 %v5848_v55  ;;  %v1049_v48 = vsel %vm5840_vm8, %v1048_v58, %v1044_v56  ;;  %v936_v12 = vsel %vm935_vm15, %v5822_v19, %v932_v57  ;;  %v1084_v19 = vand.u32 2147483647, %v5844_v49  ;;  %v5947_v58 = vld [vmem:[#allocation7 + $0x140] sm:$0xff]  ;;  %v5950_v56 = vld [vmem:[#allocation7 + $0x148] sm:$0xff]  ;;  %v5956_v57 = vld [vmem:[#allocation7 + $0x158] sm:$0xff] }
 0x1f1   :  { %v1063_v61 = vsel %vm1062_vm13, %v3745_v25, %v1059_v11  ;;  %v1091_v2 = vmul.f32 %v3751_v38, %v1049_v48  ;;  %v941_v14 = vsel %vm938_vm0, %v940_v44, %v936_v12  ;;  %v5878_v25 = vld [vmem:[#allocation7 + $0x1e8] sm:$0xff]  ;;  %v5919_v38 = vld [vmem:[#allocation7 + $0x180] sm:$0xff]  ;;  %v5953_v11 = vld [vmem:[#allocation7 + $0x150] sm:$0xff] }
 0x1f2   :  { %v1068_v7 = vsel %vm1065_vm14, %v1067_v60, %v1063_v61  ;;  %vm1085_vm4 = vcmp.eq.f32.partialorder %v1084_v19, 8.507059e+37  ;;  %v5959_v60 = vld [vmem:[#allocation7 + $0x120] sm:$0xff]  ;;  %v5962_v48 = vld [vmem:[#allocation7 + $0x128] sm:$0xff]  ;;  %v5968_v61 = vld [vmem:[#allocation7 + $0x138] sm:$0xff] }
 0x1f3   :  { %v1090_v8 = vmul.f32 %v1068_v7, %v5651_v26  ;;  %v1086_v26 = vand.u32 2147483648, %v5844_v49  ;;  %v5977_v7 = vld [vmem:[#allocation7 + $0x110] sm:$0xff]  ;;  %v5983_v12 = vld [vmem:[#allocation7 + $0xe0] sm:$0xff]  ;;  %v6016_v19 = vld [vmem:[#allocation7 + $0xb8] sm:$0xff] }
 0x1f4   :  { %v3753_v10 = vpop.eup %3752  ;;  %9595 = vst [vmem:[#allocation26_spill] sm:$0xff] %v5983_v12  ;;  %v5989_v44 = vld [vmem:[#allocation7 + $0xf0] sm:$0xff] }
 0x1f5   :  { %v5868_v31 = vadd.f32 %v1091_v2, %v1090_v8  ;;  %v1076_v4 = vmul.f32 %v3753_v10, %v5844_v49  ;;  %vm1081_vm1 = vweird.f32 %v3753_v10  ;;  %v1087_v34 = vor.u32 1.1754944e-38, %v1086_v26  ;;  %v5928_v49 = vld [vmem:[#allocation7 + $0x198] sm:$0xff]  ;;  %v5971_v2 = vld [vmem:[#allocation7 + $0x100] sm:$0xff]  ;;  %9597 = vst [vmem:[#allocation25_spill] sm:$0xff] %v5989_v44  ;;  %v6010_v26 = vld [vmem:[#allocation7 + $0xa8] sm:$0xff] }
 0x1f6   :  { %v3755_v0 = vpop.eup %3754  ;;  %vm5881_vm3 = vmor %vm1080_vm2, %vm1081_vm1  ;;  %v5980_v8 = vld [vmem:[#allocation7 + $0x118] sm:$0xff]  ;;  %9604 = vst [vmem:[#allocation27_spill] sm:$0xff] %v6010_v26 }
 0x1f7   :  { %v1077_v16 = vsub.f32 1.0, %v1076_v4  ;;  %v947_v21 = vmul.f32 %v3755_v0, %v941_v14  ;;  %3756 = vtanh.f32 %v5868_v31  ;;  %v5992_v4 = vld [vmem:[#allocation7 + $0xf8] sm:$0xff]  ;;  %v5995_v0 = vld [vmem:[#allocation7 + $0xc0] sm:$0xff]  ;;  %v5998_v14 = vld [vmem:[#allocation7 + $0xc8] sm:$0xff]  ;;  %9606 = vst [vmem:[#allocation36_spill] sm:$0xff] %v6016_v19 }
 0x1f8   :  { %9598 = vst [vmem:[#allocation32_spill] sm:$0xff] %v5992_v4 }
 0x1f9   :  { %v1078_v22 = vmul.f32 %v3753_v10, %v1077_v16  ;;  %1111 = vmatmul.f32.vlgmr.msrb.gmra.mxu0 %v947_v21  ;;  %1131 = vmatmul.f32.vlgmr.msra.gmra.mxu1 %v947_v21  ;;  %9599 = vst [vmem:[#allocation30_spill] sm:$0xff] %v5995_v0  ;;  %v6001_v16 = vld [vmem:[#allocation7 + $0xd0] sm:$0xff] }
 0x1fa   :  { %1151 = vmatmul.f32.vlgmr.msra.gmra.mxu2 %v947_v21  ;;  %1171 = vmatmul.f32.vlgmr.msra.gmra.mxu3 %v947_v21  ;;  %9600 = vst [vmem:[#allocation24_spill] sm:$0xff] %v5998_v14  ;;  %v6004_v21 = vld [vmem:[#allocation7 + $0xd8] sm:$0xff] }
 0x1fb   :  { %v1079_v53 = vadd.f32 %v3753_v10, %v1078_v22  ;;  %1322 = vmatpush.msrb.mxu0 %v5875_v23  ;;  %1342 = vmatpush.msra.mxu1 %v5878_v25  ;;  %9601 = vst [vmem:[#allocation28_spill] sm:$0xff] %v6001_v16  ;;  %v6007_v22 = vld [vmem:[#allocation7 + $0xa0] sm:$0xff] }
 0x1fc   :  { %1362 = vmatpush.msra.mxu2 %v5885_v20  ;;  %1382 = vmatpush.msra.mxu3 %v5888_v28  ;;  %9602 = vst [vmem:[#allocation34_spill] sm:$0xff] %v6004_v21 }
 0x1fd   :  { %v1083_v29 = vsel %vm5881_vm3, %v3753_v10, %v1079_v53  ;;  %1323 = vmatpush.msrb.mxu0 %v5893_v30  ;;  %1343 = vmatpush.msra.mxu1 %v5896_v32  ;;  %v3757_v33 = vpop.eup %3756  ;;  %v5986_v10 = vld [vmem:[#allocation7 + $0xe8] sm:$0xff]  ;;  %9603 = vst [vmem:[#allocation33_spill] sm:$0xff] %v6007_v22  ;;  %v6013_v53 = vld [vmem:[#allocation7 + $0xb0] sm:$0xff] }
 0x1fe   :  { %1363 = vmatpush.msra.mxu2 %v5899_v35  ;;  %1383 = vmatpush.msra.mxu3 %v5902_v36  ;;  %v1088_v39 = vsel %vm1085_vm4, %v1087_v34, %v1083_v29  ;;  %9596 = vst [vmem:[#allocation21_spill] sm:$0xff] %v5986_v10  ;;  %v6022_v29 = vld [vmem:[#allocation7 + $0x88] sm:$0xff]  ;;  %v6028_v34 = vld [vmem:[#allocation7 + $0x98] sm:$0xff] }
 0x1ff   :  { %1324 = vmatpush.msrb.mxu0 %v5905_v37  ;;  %1344 = vmatpush.msra.mxu1 %v5908_v40  ;;  %v5917_v45 = vmul.f32 %v3757_v33, %v1088_v39  ;;  %9605 = vst [vmem:[#allocation31_spill] sm:$0xff] %v6013_v53  ;;  %v6025_v33 = vld [vmem:[#allocation7 + $0x90] sm:$0xff]  ;;  %v6031_v39 = vld [vmem:[#allocation7 + $0x60] sm:$0xff] }
 0x200   :  { %1364 = vmatpush.msra.mxu2 %v5911_v41  ;;  %1384 = vmatpush.msra.mxu3 %v5914_v42  ;;  %9608 = vst [vmem:[#allocation38_spill] sm:$0xff] %v6022_v29 }
 0x201   :  { %1325 = vmatpush.msrb.mxu0 %v5919_v38  ;;  %1345 = vmatpush.msra.mxu1 %v5922_v46  ;;  %9609 = vst [vmem:[#allocation39_spill] sm:$0xff] %v6025_v33 }
 0x202   :  { %1365 = vmatpush.msra.mxu2 %v5925_v47  ;;  %1385 = vmatpush.msra.mxu3 %v5928_v49  ;;  %9610 = vst [vmem:[#allocation40_spill] sm:$0xff] %v6028_v34 }
 0x203   :  { %1191 = vmatmul.f32.vlgmr.msra.gmra.mxu0 %v5917_v45  ;;  %1211 = vmatmul.f32.vlgmr.msrb.gmra.mxu1 %v5917_v45  ;;  %9611 = vst [vmem:[#allocation41_spill] sm:$0xff] %v6031_v39 }
 0x204   :  { %1231 = vmatmul.f32.vlgmr.msrb.gmra.mxu2 %v5917_v45  ;;  %1251 = vmatmul.f32.vlgmr.msrb.gmra.mxu3 %v5917_v45 }
 0x205   :  { %1326 = vmatpush.msrb.mxu0 %v5935_v50  ;;  %1346 = vmatpush.msra.mxu1 %v5938_v51 }
 0x206   :  { %1366 = vmatpush.msra.mxu2 %v5941_v52  ;;  %1386 = vmatpush.msra.mxu3 %v5944_v54 }
 0x207   :  { %1327 = vmatpush.msrb.mxu0 %v5947_v58  ;;  %1347 = vmatpush.msra.mxu1 %v5950_v56 }
 0x208   :  { %1367 = vmatpush.msra.mxu2 %v5953_v11  ;;  %1387 = vmatpush.msra.mxu3 %v5956_v57 }
 0x209   :  { %1328 = vmatpush.msrb.mxu0 %v5959_v60  ;;  %1348 = vmatpush.msra.mxu1 %v5962_v48 }
 0x20a   :  { %1368 = vmatpush.msra.mxu2 %v5965_v18  ;;  %1388 = vmatpush.msra.mxu3 %v5968_v61 }
 0x20b   :  { %1329 = vmatpush.msrb.mxu0 %v5971_v2  ;;  %1349 = vmatpush.msra.mxu1 %v5974_v6 }
 0x20c   :  { %1369 = vmatpush.msra.mxu2 %v5977_v7  ;;  %1389 = vmatpush.msra.mxu3 %v5980_v8 }
 0x20d   :  { %1330 = vmatpush.msrb.mxu0 %v5983_v12  ;;  %1350 = vmatpush.msra.mxu1 %v5986_v10 }
 0x20e   :  { %1370 = vmatpush.msra.mxu2 %v5989_v44  ;;  %1390 = vmatpush.msra.mxu3 %v5992_v4 }
 0x20f   :  { %1331 = vmatpush.msrb.mxu0 %v5995_v0  ;;  %1351 = vmatpush.msra.mxu1 %v5998_v14 }
 0x210   :  { %1371 = vmatpush.msra.mxu2 %v6001_v16  ;;  %1391 = vmatpush.msra.mxu3 %v6004_v21 }
 0x211   :  { %1332 = vmatpush.msrb.mxu0 %v6007_v22  ;;  %1352 = vmatpush.msra.mxu1 %v6010_v26 }
 0x212   :  { %1372 = vmatpush.msra.mxu2 %v6013_v53  ;;  %1392 = vmatpush.msra.mxu3 %v6016_v19 }
 0x213   :  { %1333 = vmatpush.msrb.mxu0 %v6019_v27  ;;  %1353 = vmatpush.msra.mxu1 %v6022_v29 }
 0x214   :  { %1373 = vmatpush.msra.mxu2 %v6025_v33  ;;  %1393 = vmatpush.msra.mxu3 %v6028_v34  ;;  %v6046_v34 = vld [vmem:[#allocation7 + $0x48] sm:$0xff] }
 0x215   :  { %1334 = vmatpush.msrb.mxu0 %v6031_v39  ;;  %1354 = vmatpush.msra.mxu1 %v6034_v17  ;;  %9616 = vst [vmem:[#allocation46_spill] sm:$0xff] %v6046_v34  ;;  %v6049_v39 = vld [vmem:[#allocation7 + $0x50] sm:$0xff]  ;;  %v6052_v17 = vld [vmem:[#allocation7 + $0x58] sm:$0xff] }
 0x216   :  { %1374 = vmatpush.msra.mxu2 %v6037_v9  ;;  %1394 = vmatpush.msra.mxu3 %v6040_v5  ;;  %9617 = vst [vmem:[#allocation47_spill] sm:$0xff] %v6049_v39  ;;  %v6055_v9 = vld [vmem:[#allocation7 + $0x20] sm:$0xff]  ;;  %v6058_v5 = vld [vmem:[#allocation7 + $0x28] sm:$0xff] }
 0x217   :  { %1335 = vmatpush.msrb.mxu0 %v6043_v62  ;;  %1355 = vmatpush.msra.mxu1 %v6046_v34  ;;  %9618 = vst [vmem:[#allocation48_spill] sm:$0xff] %v6052_v17  ;;  %v6061_v62 = vld [vmem:[#allocation7 + $0x30] sm:$0xff]  ;;  %v6064_v34 = vld [vmem:[#allocation7 + $0x38] sm:$0xff] }
 0x218   :  { %1375 = vmatpush.msra.mxu2 %v6049_v39  ;;  %1395 = vmatpush.msra.mxu3 %v6052_v17  ;;  %9619 = vst [vmem:[#allocation49_spill] sm:$0xff] %v6055_v9  ;;  %v6067_v39 = vld [vmem:[#allocation7] sm:$0xff]  ;;  %v6070_v17 = vld [vmem:[#allocation7 + $0x8] sm:$0xff] }
 0x219   :  { %1336 = vmatpush.msrb.mxu0 %v6055_v9  ;;  %9620 = vst [vmem:[#allocation50_spill] sm:$0xff] %v6058_v5  ;;  %1356 = vmatpush.msra.mxu1 %v6058_v5  ;;  %v6073_v9 = vld [vmem:[#allocation7 + $0x10] sm:$0xff]  ;;  %v6076_v5 = vld [vmem:[#allocation7 + $0x18] sm:$0xff] }
 0x21a   :  { %9621 = vst [vmem:[#allocation51_spill] sm:$0xff] %v6061_v62  ;;  %1376 = vmatpush.msra.mxu2 %v6061_v62  ;;  %1396 = vmatpush.msra.mxu3 %v6064_v34 }
 0x21b   :  { %9622 = vst [vmem:[#allocation52_spill] sm:$0xff] %v6064_v34  ;;  %1337 = vmatpush.msrb.mxu0 %v6067_v39  ;;  %1357 = vmatpush.msra.mxu1 %v6070_v17  ;;  %v6095_v34 = vld [vmem:[#allocation11 + $0x1c0] sm:$0xff] }
 0x21c   :  { %9623 = vst [vmem:[#allocation53_spill] sm:$0xff] %v6067_v39  ;;  %1377 = vmatpush.msra.mxu2 %v6073_v9  ;;  %1397 = vmatpush.msra.mxu3 %v6076_v5  ;;  %v6083_v39 = vld [vmem:[#allocation11 + $0x1e0] sm:$0xff] }
 0x21d   :  { %9624 = vst [vmem:[#allocation56_spill] sm:$0xff] %v6070_v17  ;;  %1338 = vmatmul.f32.vlgmr.msrb.gmra.mxu0 %v5917_v45  ;;  %1358 = vmatmul.f32.vlgmr.msra.gmra.mxu1 %v5917_v45  ;;  %v6086_v17 = vld [vmem:[#allocation11 + $0x1e8] sm:$0xff] }
 0x21e   :  { %9625 = vst [vmem:[#allocation57_spill] sm:$0xff] %v6073_v9  ;;  %1378 = vmatmul.f32.vlgmr.msra.gmra.mxu2 %v5917_v45  ;;  %1398 = vmatmul.f32.vlgmr.msra.gmra.mxu3 %v5917_v45  ;;  %v6089_v9 = vld [vmem:[#allocation11 + $0x1f0] sm:$0xff]  ;;  %v6098_v45 = vld [vmem:[#allocation11 + $0x1c8] sm:$0xff] }
 0x21f   :  { %9626 = vst [vmem:[#allocation58_spill] sm:$0xff] %v6076_v5  ;;  %1469 = vmatpush.msra.mxu0 %v6083_v39  ;;  %1489 = vmatpush.msrb.mxu1 %v6086_v17  ;;  %v6092_v5 = vld [vmem:[#allocation11 + $0x1f8] sm:$0xff] }
 0x220   :  { %9627 = vst [vmem:[#allocation60_spill] sm:$0xff] %v6083_v39  ;;  %1509 = vmatpush.msrb.mxu2 %v6089_v9  ;;  %1529 = vmatpush.msrb.mxu3 %v6092_v5  ;;  %v6101_v39 = vld [vmem:[#allocation11 + $0x1d0] sm:$0xff] }
 0x221   :  { %9628 = vst [vmem:[#allocation61_spill] sm:$0xff] %v6086_v17  ;;  %1470 = vmatpush.msra.mxu0 %v6095_v34  ;;  %1490 = vmatpush.msrb.mxu1 %v6098_v45  ;;  %v6104_v17 = vld [vmem:[#allocation11 + $0x1d8] sm:$0xff] }
 0x222   :  { %9629 = vst [vmem:[#allocation62_spill] sm:$0xff] %v6089_v9  ;;  %1510 = vmatpush.msrb.mxu2 %v6101_v39  ;;  %1530 = vmatpush.msrb.mxu3 %v6104_v17  ;;  %v6107_v9 = vld [vmem:[#allocation11 + $0x1a0] sm:$0xff] }
 0x223   :  { %9630 = vst [vmem:[#allocation63_spill] sm:$0xff] %v6092_v5  ;;  %1471 = vmatpush.msra.mxu0 %v6107_v9  ;;  %v6110_v5 = vld [vmem:[#allocation11 + $0x1a8] sm:$0xff] }
 0x224   :  { %9631 = vst [vmem:[#allocation64_spill] sm:$0xff] %v6095_v34  ;;  %1491 = vmatpush.msrb.mxu1 %v6110_v5  ;;  %v6113_v34 = vld [vmem:[#allocation11 + $0x1b0] sm:$0xff] }
 0x225   :  { %9632 = vst [vmem:[#allocation65_spill] sm:$0xff] %v6098_v45  ;;  %1511 = vmatpush.msrb.mxu2 %v6113_v34  ;;  %v6116_v45 = vld [vmem:[#allocation11 + $0x1b8] sm:$0xff] }
 0x226   :  { %9633 = vst [vmem:[#allocation66_spill] sm:$0xff] %v6101_v39  ;;  %1531 = vmatpush.msrb.mxu3 %v6116_v45  ;;  %v6119_v39 = vld [vmem:[#allocation11 + $0x180] sm:$0xff] }
 0x227   :  { %9634 = vst [vmem:[#allocation67_spill] sm:$0xff] %v6104_v17  ;;  %1472 = vmatpush.msra.mxu0 %v6119_v39  ;;  %v6122_v17 = vld [vmem:[#allocation11 + $0x188] sm:$0xff] }
 0x228   :  { %9635 = vst [vmem:[#allocation68_spill] sm:$0xff] %v6107_v9  ;;  %1492 = vmatpush.msrb.mxu1 %v6122_v17  ;;  %v6125_v9 = vld [vmem:[#allocation11 + $0x190] sm:$0xff] }
 0x229   :  { %9636 = vst [vmem:[#allocation69_spill] sm:$0xff] %v6110_v5  ;;  %1512 = vmatpush.msrb.mxu2 %v6125_v9  ;;  %v6128_v5 = vld [vmem:[#allocation11 + $0x198] sm:$0xff] }
 0x22a   :  { %9637 = vst [vmem:[#allocation70_spill] sm:$0xff] %v6113_v34  ;;  %1532 = vmatpush.msrb.mxu3 %v6128_v5  ;;  %v6131_v34 = vld [vmem:[#allocation11 + $0x160] sm:$0xff] }
 0x22b   :  { %9638 = vst [vmem:[#allocation71_spill] sm:$0xff] %v6116_v45  ;;  %1473 = vmatpush.msra.mxu0 %v6131_v34  ;;  %v6134_v45 = vld [vmem:[#allocation11 + $0x168] sm:$0xff] }
 0x22c   :  { %9639 = vst [vmem:[#allocation72_spill] sm:$0xff] %v6119_v39  ;;  %1493 = vmatpush.msrb.mxu1 %v6134_v45  ;;  %v6137_v39 = vld [vmem:[#allocation11 + $0x170] sm:$0xff] }
 0x22d   :  { %9640 = vst [vmem:[#allocation74_spill] sm:$0xff] %v6122_v17  ;;  %1513 = vmatpush.msrb.mxu2 %v6137_v39  ;;  %v6140_v17 = vld [vmem:[#allocation11 + $0x178] sm:$0xff] }
 0x22e   :  { %9641 = vst [vmem:[#allocation75_spill] sm:$0xff] %v6125_v9  ;;  %1533 = vmatpush.msrb.mxu3 %v6140_v17  ;;  %v6143_v9 = vld [vmem:[#allocation11 + $0x140] sm:$0xff] }
 0x22f   :  { %9642 = vst [vmem:[#allocation76_spill] sm:$0xff] %v6128_v5  ;;  %1474 = vmatpush.msra.mxu0 %v6143_v9  ;;  %v6146_v5 = vld [vmem:[#allocation11 + $0x148] sm:$0xff] }
 0x230   :  { %9643 = vst [vmem:[#allocation77_spill] sm:$0xff] %v6131_v34  ;;  %1494 = vmatpush.msrb.mxu1 %v6146_v5  ;;  %v6149_v34 = vld [vmem:[#allocation11 + $0x150] sm:$0xff] }
 0x231   :  { %9644 = vst [vmem:[#allocation78_spill] sm:$0xff] %v6134_v45  ;;  %1514 = vmatpush.msrb.mxu2 %v6149_v34  ;;  %v6152_v45 = vld [vmem:[#allocation11 + $0x158] sm:$0xff] }
 0x232   :  { %9645 = vst [vmem:[#allocation79_spill] sm:$0xff] %v6137_v39  ;;  %1534 = vmatpush.msrb.mxu3 %v6152_v45  ;;  %v6155_v39 = vld [vmem:[#allocation11 + $0x120] sm:$0xff] }
 0x233   :  { %9646 = vst [vmem:[#allocation80_spill] sm:$0xff] %v6140_v17  ;;  %1475 = vmatpush.msra.mxu0 %v6155_v39  ;;  %v6158_v17 = vld [vmem:[#allocation11 + $0x128] sm:$0xff] }
 0x234   :  { %9647 = vst [vmem:[#allocation82_spill] sm:$0xff] %v6143_v9  ;;  %1495 = vmatpush.msrb.mxu1 %v6158_v17  ;;  %v6161_v9 = vld [vmem:[#allocation11 + $0x130] sm:$0xff] }
 0x235   :  { %9648 = vst [vmem:[#allocation83_spill] sm:$0xff] %v6146_v5  ;;  %1515 = vmatpush.msrb.mxu2 %v6161_v9  ;;  %v6164_v5 = vld [vmem:[#allocation11 + $0x138] sm:$0xff] }
 0x236   :  { %9649 = vst [vmem:[#allocation84_spill] sm:$0xff] %v6149_v34  ;;  %1535 = vmatpush.msrb.mxu3 %v6164_v5  ;;  %v6167_v34 = vld [vmem:[#allocation11 + $0x100] sm:$0xff] }
 0x237   :  { %9650 = vst [vmem:[#allocation85_spill] sm:$0xff] %v6152_v45  ;;  %1476 = vmatpush.msra.mxu0 %v6167_v34  ;;  %v6170_v45 = vld [vmem:[#allocation11 + $0x108] sm:$0xff] }
 0x238   :  { %9651 = vst [vmem:[#allocation86_spill] sm:$0xff] %v6155_v39  ;;  %1496 = vmatpush.msrb.mxu1 %v6170_v45  ;;  %v6173_v39 = vld [vmem:[#allocation11 + $0x110] sm:$0xff] }
 0x239   :  { %9652 = vst [vmem:[#allocation87_spill] sm:$0xff] %v6158_v17  ;;  %1516 = vmatpush.msrb.mxu2 %v6173_v39  ;;  %v6176_v17 = vld [vmem:[#allocation11 + $0x118] sm:$0xff] }
 0x23a   :  { %9653 = vst [vmem:[#allocation88_spill] sm:$0xff] %v6161_v9  ;;  %1536 = vmatpush.msrb.mxu3 %v6176_v17  ;;  %v6179_v9 = vld [vmem:[#allocation11 + $0xe0] sm:$0xff] }
 0x23b   :  { %9654 = vst [vmem:[#allocation89_spill] sm:$0xff] %v6164_v5  ;;  %1477 = vmatpush.msra.mxu0 %v6179_v9  ;;  %v6182_v5 = vld [vmem:[#allocation11 + $0xe8] sm:$0xff] }
 0x23c   :  { %9655 = vst [vmem:[#allocation92_spill] sm:$0xff] %v6167_v34  ;;  %1497 = vmatpush.msrb.mxu1 %v6182_v5  ;;  %v6185_v34 = vld [vmem:[#allocation11 + $0xf0] sm:$0xff] }
 0x23d   :  { %9656 = vst [vmem:[#allocation94_spill] sm:$0xff] %v6170_v45  ;;  %1517 = vmatpush.msrb.mxu2 %v6185_v34  ;;  %v6188_v45 = vld [vmem:[#allocation11 + $0xf8] sm:$0xff] }
 0x23e   :  { %9657 = vst [vmem:[#allocation95_spill] sm:$0xff] %v6173_v39  ;;  %1537 = vmatpush.msrb.mxu3 %v6188_v45  ;;  %v6191_v39 = vld [vmem:[#allocation11 + $0xc0] sm:$0xff] }
 0x23f   :  { %9658 = vst [vmem:[#allocation96_spill] sm:$0xff] %v6176_v17  ;;  %1478 = vmatpush.msra.mxu0 %v6191_v39  ;;  %v6194_v17 = vld [vmem:[#allocation11 + $0xc8] sm:$0xff] }
 0x240   :  { %9659 = vst [vmem:[#allocation97_spill] sm:$0xff] %v6179_v9  ;;  %1498 = vmatpush.msrb.mxu1 %v6194_v17  ;;  %v6197_v9 = vld [vmem:[#allocation11 + $0xd0] sm:$0xff] }
 0x241   :  { %9660 = vst [vmem:[#allocation98_spill] sm:$0xff] %v6182_v5  ;;  %1518 = vmatpush.msrb.mxu2 %v6197_v9  ;;  %v6200_v5 = vld [vmem:[#allocation11 + $0xd8] sm:$0xff] }
 0x242   :  { %9661 = vst [vmem:[#allocation99_spill] sm:$0xff] %v6185_v34  ;;  %1538 = vmatpush.msrb.mxu3 %v6200_v5  ;;  %v6203_v34 = vld [vmem:[#allocation11 + $0xa0] sm:$0xff] }
 0x243   :  { %9662 = vst [vmem:[#allocation100_spill] sm:$0xff] %v6188_v45  ;;  %1479 = vmatpush.msra.mxu0 %v6203_v34  ;;  %v6206_v45 = vld [vmem:[#allocation11 + $0xa8] sm:$0xff] }
 0x244   :  { %9663 = vst [vmem:[#allocation101_spill] sm:$0xff] %v6191_v39  ;;  %1499 = vmatpush.msrb.mxu1 %v6206_v45  ;;  %v6209_v39 = vld [vmem:[#allocation11 + $0xb0] sm:$0xff] }
 0x245   :  { %9664 = vst [vmem:[#allocation102_spill] sm:$0xff] %v6194_v17  ;;  %1519 = vmatpush.msrb.mxu2 %v6209_v39  ;;  %v6212_v17 = vld [vmem:[#allocation11 + $0xb8] sm:$0xff] }
 0x246   :  { %9665 = vst [vmem:[#allocation103_spill] sm:$0xff] %v6197_v9  ;;  %1539 = vmatpush.msrb.mxu3 %v6212_v17  ;;  %v6215_v9 = vld [vmem:[#allocation11 + $0x80] sm:$0xff] }
 0x247   :  { %9666 = vst [vmem:[#allocation104_spill] sm:$0xff] %v6200_v5  ;;  %1480 = vmatpush.msra.mxu0 %v6215_v9  ;;  %v6218_v5 = vld [vmem:[#allocation11 + $0x88] sm:$0xff] }
 0x248   :  { %9667 = vst [vmem:[#allocation106_spill] sm:$0xff] %v6203_v34  ;;  %1500 = vmatpush.msrb.mxu1 %v6218_v5  ;;  %v6221_v34 = vld [vmem:[#allocation11 + $0x90] sm:$0xff] }
 0x249   :  { %9668 = vst [vmem:[#allocation107_spill] sm:$0xff] %v6206_v45  ;;  %1520 = vmatpush.msrb.mxu2 %v6221_v34  ;;  %v6224_v45 = vld [vmem:[#allocation11 + $0x98] sm:$0xff] }
 0x24a   :  { %9669 = vst [vmem:[#allocation108_spill] sm:$0xff] %v6209_v39  ;;  %1540 = vmatpush.msrb.mxu3 %v6224_v45  ;;  %v6227_v39 = vld [vmem:[#allocation11 + $0x60] sm:$0xff] }
 0x24b   :  { %9670 = vst [vmem:[#allocation109_spill] sm:$0xff] %v6212_v17  ;;  %1481 = vmatpush.msra.mxu0 %v6227_v39  ;;  %v6230_v17 = vld [vmem:[#allocation11 + $0x68] sm:$0xff] }
 0x24c   :  { %9671 = vst [vmem:[#allocation112_spill] sm:$0xff] %v6215_v9  ;;  %1501 = vmatpush.msrb.mxu1 %v6230_v17  ;;  %v6233_v9 = vld [vmem:[#allocation11 + $0x70] sm:$0xff] }
 0x24d   :  { %9672 = vst [vmem:[#allocation113_spill] sm:$0xff] %v6218_v5  ;;  %1521 = vmatpush.msrb.mxu2 %v6233_v9  ;;  %v6236_v5 = vld [vmem:[#allocation11 + $0x78] sm:$0xff] }
 0x24e   :  { %9673 = vst [vmem:[#allocation114_spill] sm:$0xff] %v6221_v34  ;;  %1541 = vmatpush.msrb.mxu3 %v6236_v5  ;;  %v6239_v34 = vld [vmem:[#allocation11 + $0x40] sm:$0xff] }
 0x24f   :  { %9674 = vst [vmem:[#allocation116_spill] sm:$0xff] %v6224_v45  ;;  %1482 = vmatpush.msra.mxu0 %v6239_v34  ;;  %v6242_v45 = vld [vmem:[#allocation11 + $0x48] sm:$0xff] }
 0x250   :  { %9675 = vst [vmem:[#allocation117_spill] sm:$0xff] %v6227_v39  ;;  %1502 = vmatpush.msrb.mxu1 %v6242_v45  ;;  %v6245_v39 = vld [vmem:[#allocation11 + $0x50] sm:$0xff] }
 0x251   :  { %9676 = vst [vmem:[#allocation118_spill] sm:$0xff] %v6230_v17  ;;  %1522 = vmatpush.msrb.mxu2 %v6245_v39  ;;  %v6248_v17 = vld [vmem:[#allocation11 + $0x58] sm:$0xff] }
 0x252   :  { %9677 = vst [vmem:[#allocation119_spill] sm:$0xff] %v6233_v9  ;;  %1542 = vmatpush.msrb.mxu3 %v6248_v17  ;;  %v6251_v9 = vld [vmem:[#allocation11 + $0x20] sm:$0xff] }
 0x253   :  { %9678 = vst [vmem:[#allocation120_spill] sm:$0xff] %v6236_v5  ;;  %1483 = vmatpush.msra.mxu0 %v6251_v9  ;;  %v6254_v5 = vld [vmem:[#allocation11 + $0x28] sm:$0xff] }
 0x254   :  { %9679 = vst [vmem:[#allocation121_spill] sm:$0xff] %v6239_v34  ;;  %1503 = vmatpush.msrb.mxu1 %v6254_v5  ;;  %v6257_v34 = vld [vmem:[#allocation11 + $0x30] sm:$0xff] }
 0x255   :  { %9680 = vst [vmem:[#allocation122_spill] sm:$0xff] %v6242_v45  ;;  %1523 = vmatpush.msrb.mxu2 %v6257_v34  ;;  %v6260_v45 = vld [vmem:[#allocation11 + $0x38] sm:$0xff] }
 0x256   :  { %9681 = vst [vmem:[#allocation123_spill] sm:$0xff] %v6245_v39  ;;  %1543 = vmatpush.msrb.mxu3 %v6260_v45  ;;  %v6263_v39 = vld [vmem:[#allocation11] sm:$0xff] }
 0x257   :  { %9682 = vst [vmem:[#allocation124_spill] sm:$0xff] %v6248_v17  ;;  %1484 = vmatpush.msra.mxu0 %v6263_v39  ;;  %v6266_v17 = vld [vmem:[#allocation11 + $0x8] sm:$0xff] }
 0x258   :  { %9683 = vst [vmem:[#allocation125_spill] sm:$0xff] %v6251_v9  ;;  %1504 = vmatpush.msrb.mxu1 %v6266_v17  ;;  %v6269_v9 = vld [vmem:[#allocation11 + $0x10] sm:$0xff] }
 0x259   :  { %9684 = vst [vmem:[#allocation126_spill] sm:$0xff] %v6254_v5  ;;  %1524 = vmatpush.msrb.mxu2 %v6269_v9  ;;  %v6272_v5 = vld [vmem:[#allocation11 + $0x18] sm:$0xff] }
 0x25a   :  { %9685 = vst [vmem:[#allocation127_spill] sm:$0xff] %v6257_v34  ;;  %1544 = vmatpush.msrb.mxu3 %v6272_v5  ;;  %v6275_v34 = vld [vmem:[#allocation10 + $0x1e0] sm:$0xff] }
 0x25b   :  { %9686 = vst [vmem:[#allocation128_spill] sm:$0xff] %v6260_v45  ;;  %1549 = vmatpush.msrb.mxu0 %v6275_v34  ;;  %v6278_v45 = vld [vmem:[#allocation10 + $0x1e8] sm:$0xff] }
 0x25c   :  { %9687 = vst [vmem:[#allocation129_spill] sm:$0xff] %v6263_v39  ;;  %1569 = vmatpush.msra.mxu1 %v6278_v45  ;;  %v6281_v39 = vld [vmem:[#allocation10 + $0x1f0] sm:$0xff] }
 0x25d   :  { %9688 = vst [vmem:[#allocation132_spill] sm:$0xff] %v6266_v17  ;;  %1589 = vmatpush.msra.mxu2 %v6281_v39  ;;  %v6284_v17 = vld [vmem:[#allocation10 + $0x1f8] sm:$0xff] }
 0x25e   :  { %9689 = vst [vmem:[#allocation133_spill] sm:$0xff] %v6269_v9  ;;  %1609 = vmatpush.msra.mxu3 %v6284_v17  ;;  %v6287_v9 = vld [vmem:[#allocation10 + $0x1c0] sm:$0xff] }
 0x25f   :  { %9690 = vst [vmem:[#allocation134_spill] sm:$0xff] %v6272_v5  ;;  %1550 = vmatpush.msrb.mxu0 %v6287_v9  ;;  %v6290_v5 = vld [vmem:[#allocation10 + $0x1c8] sm:$0xff] }
 0x260   :  { %9691 = vst [vmem:[#allocation137_spill] sm:$0xff] %v6275_v34  ;;  %1570 = vmatpush.msra.mxu1 %v6290_v5  ;;  %v6293_v34 = vld [vmem:[#allocation10 + $0x1d0] sm:$0xff] }
 0x261   :  { %9692 = vst [vmem:[#allocation138_spill] sm:$0xff] %v6278_v45  ;;  %1590 = vmatpush.msra.mxu2 %v6293_v34  ;;  %v6296_v45 = vld [vmem:[#allocation10 + $0x1d8] sm:$0xff] }
 0x262   :  { %9693 = vst [vmem:[#allocation139_spill] sm:$0xff] %v6281_v39  ;;  %1610 = vmatpush.msra.mxu3 %v6296_v45  ;;  %v6299_v39 = vld [vmem:[#allocation10 + $0x1a0] sm:$0xff] }
 0x263   :  { %9694 = vst [vmem:[#allocation140_spill] sm:$0xff] %v6284_v17  ;;  %1551 = vmatpush.msrb.mxu0 %v6299_v39  ;;  %v6302_v17 = vld [vmem:[#allocation10 + $0x1a8] sm:$0xff] }
 0x264   :  { %9695 = vst [vmem:[#allocation141_spill] sm:$0xff] %v6287_v9  ;;  %1571 = vmatpush.msra.mxu1 %v6302_v17  ;;  %v6305_v9 = vld [vmem:[#allocation10 + $0x1b0] sm:$0xff] }
 0x265   :  { %9696 = vst [vmem:[#allocation142_spill] sm:$0xff] %v6290_v5  ;;  %1591 = vmatpush.msra.mxu2 %v6305_v9  ;;  %v6308_v5 = vld [vmem:[#allocation10 + $0x1b8] sm:$0xff] }
 0x266   :  { %9697 = vst [vmem:[#allocation143_spill] sm:$0xff] %v6293_v34  ;;  %1611 = vmatpush.msra.mxu3 %v6308_v5  ;;  %v6311_v34 = vld [vmem:[#allocation10 + $0x180] sm:$0xff] }
 0x267   :  { %9698 = vst [vmem:[#allocation144_spill] sm:$0xff] %v6296_v45  ;;  %1552 = vmatpush.msrb.mxu0 %v6311_v34  ;;  %v6314_v45 = vld [vmem:[#allocation10 + $0x188] sm:$0xff] }
 0x268   :  { %9699 = vst [vmem:[#allocation145_spill] sm:$0xff] %v6299_v39  ;;  %1572 = vmatpush.msra.mxu1 %v6314_v45  ;;  %v6317_v39 = vld [vmem:[#allocation10 + $0x190] sm:$0xff] }
 0x269   :  { %9700 = vst [vmem:[#allocation146_spill] sm:$0xff] %v6302_v17  ;;  %1592 = vmatpush.msra.mxu2 %v6317_v39  ;;  %v6320_v17 = vld [vmem:[#allocation10 + $0x198] sm:$0xff] }
 0x26a   :  { %9701 = vst [vmem:[#allocation147_spill] sm:$0xff] %v6305_v9  ;;  %1612 = vmatpush.msra.mxu3 %v6320_v17  ;;  %v6323_v9 = vld [vmem:[#allocation10 + $0x160] sm:$0xff] }
 0x26b   :  { %9702 = vst [vmem:[#allocation148_spill] sm:$0xff] %v6308_v5  ;;  %1553 = vmatpush.msrb.mxu0 %v6323_v9  ;;  %v6326_v5 = vld [vmem:[#allocation10 + $0x168] sm:$0xff] }
 0x26c   :  { %9703 = vst [vmem:[#allocation149_spill] sm:$0xff] %v6311_v34  ;;  %1573 = vmatpush.msra.mxu1 %v6326_v5  ;;  %v6329_v34 = vld [vmem:[#allocation10 + $0x170] sm:$0xff] }
 0x26d   :  { %9704 = vst [vmem:[#allocation151_spill] sm:$0xff] %v6314_v45  ;;  %1593 = vmatpush.msra.mxu2 %v6329_v34  ;;  %v6332_v45 = vld [vmem:[#allocation10 + $0x178] sm:$0xff] }
 0x26e   :  { %9705 = vst [vmem:[#allocation152_spill] sm:$0xff] %v6317_v39  ;;  %1613 = vmatpush.msra.mxu3 %v6332_v45  ;;  %v6335_v39 = vld [vmem:[#allocation10 + $0x140] sm:$0xff] }
 0x26f   :  { %9706 = vst [vmem:[#allocation153_spill] sm:$0xff] %v6320_v17  ;;  %1554 = vmatpush.msrb.mxu0 %v6335_v39  ;;  %v6338_v17 = vld [vmem:[#allocation10 + $0x148] sm:$0xff] }
 0x270   :  { %9707 = vst [vmem:[#allocation156_spill] sm:$0xff] %v6323_v9  ;;  %1574 = vmatpush.msra.mxu1 %v6338_v17  ;;  %v6341_v9 = vld [vmem:[#allocation10 + $0x150] sm:$0xff] }
 0x271   :  { %9708 = vst [vmem:[#allocation158_spill] sm:$0xff] %v6326_v5  ;;  %1594 = vmatpush.msra.mxu2 %v6341_v9  ;;  %v6344_v5 = vld [vmem:[#allocation10 + $0x158] sm:$0xff] }
 0x272   :  { %9709 = vst [vmem:[#allocation159_spill] sm:$0xff] %v6329_v34  ;;  %1614 = vmatpush.msra.mxu3 %v6344_v5  ;;  %v6347_v34 = vld [vmem:[#allocation10 + $0x120] sm:$0xff] }
 0x273   :  { %9710 = vst [vmem:[#allocation160_spill] sm:$0xff] %v6332_v45  ;;  %1555 = vmatpush.msrb.mxu0 %v6347_v34  ;;  %v6350_v45 = vld [vmem:[#allocation10 + $0x128] sm:$0xff] }
 0x274   :  { %9711 = vst [vmem:[#allocation161_spill] sm:$0xff] %v6335_v39  ;;  %1575 = vmatpush.msra.mxu1 %v6350_v45  ;;  %v6353_v39 = vld [vmem:[#allocation10 + $0x130] sm:$0xff] }
 0x275   :  { %9712 = vst [vmem:[#allocation162_spill] sm:$0xff] %v6338_v17  ;;  %1595 = vmatpush.msra.mxu2 %v6353_v39  ;;  %v6356_v17 = vld [vmem:[#allocation10 + $0x138] sm:$0xff] }
 0x276   :  { %9713 = vst [vmem:[#allocation163_spill] sm:$0xff] %v6341_v9  ;;  %1615 = vmatpush.msra.mxu3 %v6356_v17  ;;  %v6359_v9 = vld [vmem:[#allocation10 + $0x100] sm:$0xff]  ;;  %v1132_v62 = vpop.f32.mrf.mxu1 }
 0x277   :  { %9714 = vst [vmem:[#allocation164_spill] sm:$0xff] %v6344_v5  ;;  %1556 = vmatpush.msrb.mxu0 %v6359_v9  ;;  %v6362_v5 = vld [vmem:[#allocation10 + $0x108] sm:$0xff] }
 0x278   :  { %9715 = vst [vmem:[#allocation165_spill] sm:$0xff] %v6347_v34  ;;  %1576 = vmatpush.msra.mxu1 %v6362_v5  ;;  %v6365_v34 = vld [vmem:[#allocation10 + $0x110] sm:$0xff] }
 0x279   :  { %9716 = vst [vmem:[#allocation166_spill] sm:$0xff] %v6350_v45  ;;  %1596 = vmatpush.msra.mxu2 %v6365_v34  ;;  %v6368_v45 = vld [vmem:[#allocation10 + $0x118] sm:$0xff] }
 0x27a   :  { %9717 = vst [vmem:[#allocation167_spill] sm:$0xff] %v6353_v39  ;;  %1616 = vmatpush.msra.mxu3 %v6368_v45  ;;  %v6371_v39 = vld [vmem:[#allocation10 + $0xe0] sm:$0xff] }
 0x27b   :  { %9718 = vst [vmem:[#allocation169_spill] sm:$0xff] %v6356_v17  ;;  %1557 = vmatpush.msrb.mxu0 %v6371_v39  ;;  %v6374_v17 = vld [vmem:[#allocation10 + $0xe8] sm:$0xff] }
 0x27c   :  { %9719 = vst [vmem:[#allocation170_spill] sm:$0xff] %v6359_v9  ;;  %1577 = vmatpush.msra.mxu1 %v6374_v17  ;;  %v6377_v9 = vld [vmem:[#allocation10 + $0xf0] sm:$0xff] }
 0x27d   :  { %9720 = vst [vmem:[#allocation173_spill] sm:$0xff] %v6362_v5  ;;  %1597 = vmatpush.msra.mxu2 %v6377_v9  ;;  %v6380_v5 = vld [vmem:[#allocation10 + $0xf8] sm:$0xff]  ;;  %v1172_v33 = vpop.f32.mrf.mxu3 }
 0x27e   :  { %9721 = vst [vmem:[#allocation174_spill] sm:$0xff] %v6365_v34  ;;  %1617 = vmatpush.msra.mxu3 %v6380_v5  ;;  %v6383_v34 = vld [vmem:[#allocation10 + $0xc0] sm:$0xff] }
 0x27f   :  { %9722 = vst [vmem:[#allocation175_spill] sm:$0xff] %v6368_v45  ;;  %1558 = vmatpush.msrb.mxu0 %v6383_v34  ;;  %v6386_v45 = vld [vmem:[#allocation10 + $0xc8] sm:$0xff] }
 0x280   :  { %9723 = vst [vmem:[#allocation176_spill] sm:$0xff] %v6371_v39  ;;  %1578 = vmatpush.msra.mxu1 %v6386_v45  ;;  %v6389_v39 = vld [vmem:[#allocation10 + $0xd0] sm:$0xff]  ;;  %v1212_v29 = vpop.f32.mrf.mxu1 }
 0x281   :  { %9724 = vst [vmem:[#allocation177_spill] sm:$0xff] %v6374_v17  ;;  %1598 = vmatpush.msra.mxu2 %v6389_v39  ;;  %v6392_v17 = vld [vmem:[#allocation10 + $0xd8] sm:$0xff]  ;;  %v1213_v19 = vadd.f32 %v1212_v29, %v1132_v62 }
 0x282   :  { %9725 = vst [vmem:[#allocation178_spill] sm:$0xff] %v6377_v9  ;;  %1618 = vmatpush.msra.mxu3 %v6392_v17  ;;  %v6395_v9 = vld [vmem:[#allocation10 + $0xa0] sm:$0xff] }
 0x283   :  { %9726 = vst [vmem:[#allocation179_spill] sm:$0xff] %v6380_v5  ;;  %1559 = vmatpush.msrb.mxu0 %v6395_v9  ;;  %v6398_v5 = vld [vmem:[#allocation10 + $0xa8] sm:$0xff]  ;;  %v1256_v53 = vadd.f32 %v1213_v19, %v5787_v1 }
 0x284   :  { %9727 = vst [vmem:[#allocation180_spill] sm:$0xff] %v6383_v34  ;;  %1579 = vmatpush.msra.mxu1 %v6398_v5  ;;  %v6401_v34 = vld [vmem:[#allocation10 + $0xb0] sm:$0xff] }
 0x285   :  { %9728 = vst [vmem:[#allocation181_spill] sm:$0xff] %v6386_v45  ;;  %1599 = vmatpush.msra.mxu2 %v6401_v34  ;;  %v6404_v45 = vld [vmem:[#allocation10 + $0xb8] sm:$0xff]  ;;  %v3652_v22 = vmul.f32 -1.442695, %v1256_v53 }
 0x286   :  { %9729 = vst [vmem:[#allocation59_spill] sm:$0xff] %v6389_v39  ;;  %1619 = vmatpush.msra.mxu3 %v6404_v45  ;;  %v6407_v39 = vld [vmem:[#allocation10 + $0x80] sm:$0xff] }
 0x287   :  { %9730 = vst [vmem:[#allocation73_spill] sm:$0xff] %v6392_v17  ;;  %1560 = vmatpush.msrb.mxu0 %v6407_v39  ;;  %v6410_v17 = vld [vmem:[#allocation10 + $0x88] sm:$0xff] }
 0x288   :  { %9731 = vst [vmem:[#allocation91_spill] sm:$0xff] %v6395_v9  ;;  %1580 = vmatpush.msra.mxu1 %v6410_v17  ;;  %v6413_v9 = vld [vmem:[#allocation10 + $0x90] sm:$0xff] }
 0x289   :  { %9732 = vst [vmem:[#allocation90_spill] sm:$0xff] %v6398_v5  ;;  %1600 = vmatpush.msra.mxu2 %v6413_v9  ;;  %v6416_v5 = vld [vmem:[#allocation10 + $0x98] sm:$0xff] }
 0x28a   :  { %9733 = vst [vmem:[#allocation189_spill] sm:$0xff] %v6401_v34  ;;  %1620 = vmatpush.msra.mxu3 %v6416_v5  ;;  %v6419_v34 = vld [vmem:[#allocation10 + $0x60] sm:$0xff] }
 0x28b   :  { %9734 = vst [vmem:[#allocation190_spill] sm:$0xff] %v6404_v45  ;;  %1561 = vmatpush.msrb.mxu0 %v6419_v34  ;;  %v6422_v45 = vld [vmem:[#allocation10 + $0x68] sm:$0xff] }
 0x28c   :  { %9735 = vst [vmem:[#allocation191_spill] sm:$0xff] %v6407_v39  ;;  %1581 = vmatpush.msra.mxu1 %v6422_v45  ;;  %v6425_v39 = vld [vmem:[#allocation10 + $0x70] sm:$0xff] }
 0x28d   :  { %9736 = vst [vmem:[#allocation192_spill] sm:$0xff] %v6410_v17  ;;  %1601 = vmatpush.msra.mxu2 %v6425_v39  ;;  %v6428_v17 = vld [vmem:[#allocation10 + $0x78] sm:$0xff] }
 0x28e   :  { %9737 = vst [vmem:[#allocation193_spill] sm:$0xff] %v6413_v9  ;;  %1621 = vmatpush.msra.mxu3 %v6428_v17  ;;  %v6431_v9 = vld [vmem:[#allocation10 + $0x40] sm:$0xff] }
 0x28f   :  { %9738 = vst [vmem:[#allocation194_spill] sm:$0xff] %v6416_v5  ;;  %1562 = vmatpush.msrb.mxu0 %v6431_v9  ;;  %v6434_v5 = vld [vmem:[#allocation10 + $0x48] sm:$0xff] }
 0x290   :  { %9739 = vst [vmem:[#allocation195_spill] sm:$0xff] %v6419_v34  ;;  %1582 = vmatpush.msra.mxu1 %v6434_v5  ;;  %v6437_v34 = vld [vmem:[#allocation10 + $0x50] sm:$0xff] }
 0x291   :  { %9740 = vst [vmem:[#allocation196_spill] sm:$0xff] %v6422_v45  ;;  %1602 = vmatpush.msra.mxu2 %v6437_v34  ;;  %v6440_v45 = vld [vmem:[#allocation10 + $0x58] sm:$0xff] }
 0x292   :  { %9741 = vst [vmem:[#allocation197_spill] sm:$0xff] %v6425_v39  ;;  %1622 = vmatpush.msra.mxu3 %v6440_v45  ;;  %v6443_v39 = vld [vmem:[#allocation10 + $0x20] sm:$0xff] }
 0x293   :  { %9742 = vst [vmem:[#allocation198_spill] sm:$0xff] %v6428_v17  ;;  %1563 = vmatpush.msrb.mxu0 %v6443_v39  ;;  %v6446_v17 = vld [vmem:[#allocation10 + $0x28] sm:$0xff] }
 0x294   :  { %9743 = vst [vmem:[#allocation199_spill] sm:$0xff] %v6431_v9  ;;  %1583 = vmatpush.msra.mxu1 %v6446_v17  ;;  %v6449_v9 = vld [vmem:[#allocation10 + $0x30] sm:$0xff] }
 0x295   :  { %9744 = vst [vmem:[#allocation200_spill] sm:$0xff] %v6434_v5  ;;  %1603 = vmatpush.msra.mxu2 %v6449_v9  ;;  %v6452_v5 = vld [vmem:[#allocation10 + $0x38] sm:$0xff] }
 0x296   :  { %9745 = vst [vmem:[#allocation201_spill] sm:$0xff] %v6437_v34  ;;  %1623 = vmatpush.msra.mxu3 %v6452_v5  ;;  %v6455_v34 = vld [vmem:[#allocation10] sm:$0xff] }
 0x297   :  { %9746 = vst [vmem:[#allocation202_spill] sm:$0xff] %v6440_v45  ;;  %1564 = vmatpush.msrb.mxu0 %v6455_v34  ;;  %v6458_v45 = vld [vmem:[#allocation10 + $0x8] sm:$0xff] }
 0x298   :  { %9747 = vst [vmem:[#allocation203_spill] sm:$0xff] %v6443_v39  ;;  %1584 = vmatpush.msra.mxu1 %v6458_v45  ;;  %v6461_v39 = vld [vmem:[#allocation10 + $0x10] sm:$0xff] }
 0x299   :  { %9748 = vst [vmem:[#allocation204_spill] sm:$0xff] %v6446_v17  ;;  %1604 = vmatpush.msra.mxu2 %v6461_v39  ;;  %v6464_v17 = vld [vmem:[#allocation10 + $0x18] sm:$0xff] }
 0x29a   :  { %9749 = vst [vmem:[#allocation205_spill] sm:$0xff] %v6449_v9  ;;  %1624 = vmatpush.msra.mxu3 %v6464_v17  ;;  %v1112_v9 = vpop.f32.mrf.mxu0 }
 0x29b   :  { %9750 = vst [vmem:[#allocation206_spill] sm:$0xff] %v6452_v5 }
 0x29c   :  { %9751 = vst [vmem:[#allocation207_spill] sm:$0xff] %v6455_v34 }
 0x29d   :  { %9752 = vst [vmem:[#allocation208_spill] sm:$0xff] %v6458_v45  ;;  %v1152_v45 = vpop.f32.mrf.mxu2 }
 0x29e   :  { %9753 = vst [vmem:[#allocation209_spill] sm:$0xff] %v6461_v39  ;;  %v1252_v39 = vpop.f32.mrf.mxu3 }
 0x29f   :  { %9754 = vst [vmem:[#allocation210_spill] sm:$0xff] %v6464_v17  ;;  %v1253_v21 = vadd.f32 %v1252_v39, %v1172_v33 }
 0x2a1   :  { %v1258_v17 = vadd.f32 %v1253_v21, %v5791_v59 }
 0x2a2   :  { %v1192_v5 = vpop.f32.mrf.mxu0 }
 0x2a3   :  { %v1193_v27 = vadd.f32 %v1192_v5, %v1112_v9  ;;  %v3653_v16 = vmul.f32 -1.442695, %v1258_v17  ;;  %v9755_v17 = vld [vmem:[#allocation81_spill] sm:$0xff] }
 0x2a4   :  { %v425_v21 = vadd.f32 %v9755_v17, %v9581_v13 }
 0x2a5   :  { %v1255_v34 = vadd.f32 %v1193_v27, %v5785_v63  ;;  %v1232_v44 = vpop.f32.mrf.mxu2  ;;  %v9757_v63 = vld [vmem:[#allocation111_spill] sm:$0xff] }
 0x2a6   :  { %v1233_v62 = vadd.f32 %v1232_v44, %v1152_v45  ;;  %v548_v17 = vadd.f32 %v9757_v63, %v5568_v15 }
 0x2a7   :  { %v3651_v26 = vmul.f32 -1.442695, %v1255_v34 }
 0x2a8   :  { %v1257_v19 = vadd.f32 %v1233_v62, %v5800_v43 }
 0x2a9   :  { %3758 = vpow2.f32 %v3651_v26 }
 0x2aa   :  { %3760 = vpow2.f32 %v3652_v22  ;;  %v1339_v62 = vpop.f32.mrf.mxu0 }
 0x2ab   :  { %3762 = vpow2.f32 %v3653_v16  ;;  %v9756_v16 = vld [vmem:[#allocation93_spill] sm:$0xff]  ;;  %v1402_v59 = vadd.f32 %v1339_v62, %v425_v21 }
 0x2af   :  { %v3759_v14 = vpop.eup %3758 }
 0x2b0   :  { %v3761_v0 = vpop.eup %3760  ;;  %v1262_v4 = vadd.f32 1.0, %v3759_v14 }
 0x2b1   :  { %v1281_v5 = vadd.f32 1.0, %v3761_v0  ;;  %v3763_v9 = vpop.eup %3762  ;;  %v466_v0 = vadd.f32 %v9756_v16, %v5542_v3 }
 0x2b2   :  { %3764 = vrcp.f32 %v1262_v4  ;;  %v6471_v53 = vadd.f32 1.0, %v3763_v9  ;;  %v1272_v33 = vand.u32 2147483647, %v1262_v4  ;;  %v1274_v39 = vand.u32 2147483648, %v1262_v4  ;;  %v1359_v9 = vpop.f32.mrf.mxu1 }
 0x2b3   :  { %3766 = vrcp.f32 %v1281_v5  ;;  %v1293_v34 = vand.u32 2147483648, %v1281_v5  ;;  %v1291_v45 = vand.u32 2147483647, %v1281_v5  ;;  %v1403_v1 = vadd.f32 %v1359_v9, %v466_v0 }
 0x2b4   :  { %3768 = vrcp.f32 %v6471_v53  ;;  %vm1268_vm7 = vweird.f32 %v1262_v4  ;;  %vm1287_vm8 = vweird.f32 %v1281_v5  ;;  %vm1273_vm10 = vcmp.eq.f32.partialorder %v1272_v33, 8.507059e+37 }
 0x2b5   :  { %3770 = vtanh.f32 %v1257_v19  ;;  %v3654_v19 = vmul.f32 -1.442695, %v1402_v59  ;;  %v1275_v3 = vor.u32 1.1754944e-38, %v1274_v39  ;;  %v1294_v21 = vor.u32 1.1754944e-38, %v1293_v34  ;;  %v1399_v59 = vpop.f32.mrf.mxu3 }
 0x2b6   :  { %vm1292_vm12 = vcmp.eq.f32.partialorder %v1291_v45, 8.507059e+37  ;;  %v1405_v33 = vadd.f32 %v1399_v59, %v548_v17  ;;  %vm1307_vm14 = vweird.f32 %v6471_v53  ;;  %v1379_v45 = vpop.f32.mrf.mxu2 }
 0x2b7   :  { %3772 = vpow2.f32 %v3654_v19 }
 0x2b8   :  { %v3765_v26 = vpop.eup %3764  ;;  %v3656_v62 = vmul.f32 -1.442695, %v1405_v33 }
 0x2b9   :  { %v3767_v22 = vpop.eup %3766  ;;  %v1264_v27 = vmul.f32 %v3765_v26, %v1262_v4  ;;  %vm1269_vm5 = vweird.f32 %v3765_v26 }
 0x2ba   :  { %v1283_v14 = vmul.f32 %v3767_v22, %v1281_v5  ;;  %vm1288_vm6 = vweird.f32 %v3767_v22  ;;  %v3769_v16 = vpop.eup %3768  ;;  %vm1270_vm9 = vmor %vm1268_vm7, %vm1269_vm5 }
 0x2bb   :  { %v1265_v29 = vsub.f32 1.0, %v1264_v27  ;;  %v3771_v12 = vpop.eup %3770  ;;  %vm1289_vm11 = vmor %vm1287_vm8, %vm1288_vm6  ;;  %vm1308_vm13 = vweird.f32 %v3769_v16 }
 0x2bc   :  { %v1284_v44 = vsub.f32 1.0, %v1283_v14  ;;  %v3655_v14 = vmul.f32 -1.442695, %v1403_v1  ;;  %vm1309_vm15 = vmor %vm1307_vm14, %vm1308_vm13 }
 0x2bd   :  { %v1266_v43 = vmul.f32 %v3765_v26, %v1265_v29  ;;  %v1303_v29 = vmul.f32 %v3769_v16, %v6471_v53  ;;  %v3773_v9 = vpop.eup %3772 }
 0x2be   :  { %v1285_v13 = vmul.f32 %v3767_v22, %v1284_v44  ;;  %3774 = vpow2.f32 %v3655_v14 }
 0x2bf   :  { %v1267_v27 = vadd.f32 %v3765_v26, %v1266_v43  ;;  %v1304_v4 = vsub.f32 1.0, %v1303_v29 }
 0x2c0   :  { %v1286_v10 = vadd.f32 %v3767_v22, %v1285_v13 }
 0x2c1   :  { %v1271_v0 = vsel %vm1270_vm9, %v3765_v26, %v1267_v27  ;;  %v1305_v39 = vmul.f32 %v3769_v16, %v1304_v4  ;;  %v9758_v27 = vld [vmem:[#allocation110_spill] sm:$0xff] }
 0x2c2   :  { %v1276_v63 = vsel %vm1273_vm10, %v1275_v3, %v1271_v0  ;;  %v1290_v44 = vsel %vm1289_vm11, %v3767_v22, %v1286_v10  ;;  %v6485_v3 = vadd.f32 1.0, %v3773_v9  ;;  %v1313_v10 = vand.u32 2147483648, %v6471_v53 }
 0x2c3   :  { %v1295_v5 = vsel %vm1292_vm12, %v1294_v21, %v1290_v44  ;;  %v1318_v43 = vmul.f32 %v3771_v12, %v1276_v63  ;;  %v1306_v15 = vadd.f32 %v3769_v16, %v1305_v39  ;;  %v507_v19 = vadd.f32 %v9758_v27, %v5593_v24  ;;  %v9778_v27 = vld [vmem:[#allocation44_spill] sm:$0xff] }
 0x2c4   :  { %v1317_v1 = vmul.f32 %v1295_v5, %v5848_v55  ;;  %v3775_v26 = vpop.eup %3774  ;;  %v1311_v55 = vand.u32 2147483647, %v6471_v53  ;;  %v1314_v34 = vor.u32 1.1754944e-38, %v1313_v10  ;;  %v1419_v33 = vand.u32 2147483647, %v6485_v3  ;;  %v9771_v10 = vld [vmem:[#allocation35_spill] sm:$0xff] }
 0x2c5   :  { %v6488_v22 = vadd.f32 1.0, %v3775_v26  ;;  %v1310_v12 = vsel %vm1309_vm15, %v3769_v16, %v1306_v15  ;;  %v1404_v63 = vadd.f32 %v1379_v45, %v507_v19  ;;  %vm1415_vm3 = vweird.f32 %v6485_v3  ;;  %v9776_v45 = vld [vmem:[#allocation42_spill] sm:$0xff]  ;;  %v9779_v19 = vld [vmem:[#allocation45_spill] sm:$0xff] }
 0x2c6   :  { %v6482_v13 = vadd.f32 %v1318_v43, %v1317_v1  ;;  %vm1312_vm0 = vcmp.eq.f32.partialorder %v1311_v55, 8.507059e+37  ;;  %v1421_v43 = vand.u32 2147483648, %v6485_v3  ;;  %vm1420_vm7 = vcmp.eq.f32.partialorder %v1419_v33, 8.507059e+37  ;;  %v9773_v55 = vld [vmem:[#allocation39_spill] sm:$0xff] }
 0x2c7   :  { %v1315_v14 = vsel %vm1312_vm0, %v1314_v34, %v1310_v12  ;;  %v1440_v59 = vand.u32 2147483648, %v6488_v22  ;;  %vm1434_vm4 = vweird.f32 %v6488_v22  ;;  %v9774_v12 = vld [vmem:[#allocation40_spill] sm:$0xff]  ;;  %v9775_v34 = vld [vmem:[#allocation41_spill] sm:$0xff]  ;;  %v9794_v33 = vld [vmem:[#allocation63_spill] sm:$0xff] }
 0x2c8   :  { %3776 = vtanh.f32 %v6482_v13 }
 0x2c9   :  { %3778 = vpow2.f32 %v3656_v62 }
 0x2ca   :  { %3780 = vrcp.f32 %v6485_v3 }
 0x2cb   :  { %3782 = vrcp.f32 %v6488_v22 }
 0x2ce   :  { %v3777_v17 = vpop.eup %3776 }
 0x2cf   :  { %v3779_v29 = vpop.eup %3778  ;;  %v1321_v21 = vmul.f32 %v3777_v17, %v1315_v14  ;;  %v9777_v17 = vld [vmem:[#allocation43_spill] sm:$0xff]  ;;  %v9780_v14 = vld [vmem:[#allocation46_spill] sm:$0xff] }
 0x2d0   :  { %v3781_v0 = vpop.eup %3780  ;;  %v6496_v44 = vadd.f32 1.0, %v3779_v29  ;;  %v9781_v29 = vld [vmem:[#allocation47_spill] sm:$0xff] }
 0x2d1   :  { %v3783_v53 = vpop.eup %3782  ;;  %v1411_v4 = vmul.f32 %v3781_v0, %v6485_v3  ;;  %1485 = vmatmul.f32.vlgmr.msra.gmra.mxu0 %v1321_v21  ;;  %1505 = vmatmul.f32.vlgmr.msrb.gmra.mxu1 %v1321_v21  ;;  %vm1416_vm1 = vweird.f32 %v3781_v0  ;;  %v9770_v3 = vld [vmem:[#allocation36_spill] sm:$0xff] }
 0x2d2   :  { %v1430_v15 = vmul.f32 %v3783_v53, %v6488_v22  ;;  %3784 = vrcp.f32 %v6496_v44  ;;  %1525 = vmatmul.f32.vlgmr.msrb.gmra.mxu2 %v1321_v21  ;;  %1545 = vmatmul.f32.vlgmr.msrb.gmra.mxu3 %v1321_v21  ;;  %vm1435_vm2 = vweird.f32 %v3783_v53  ;;  %vm1417_vm5 = vmor %vm1415_vm3, %vm1416_vm1  ;;  %vm1454_vm10 = vweird.f32 %v6496_v44  ;;  %v9782_v21 = vld [vmem:[#allocation48_spill] sm:$0xff] }
 0x2d3   :  { %v1412_v16 = vsub.f32 1.0, %v1411_v4  ;;  %1696 = vmatpush.msra.mxu0 %v5875_v23  ;;  %1716 = vmatpush.msrb.mxu1 %v5878_v25  ;;  %3786 = vtanh.f32 %v1404_v63  ;;  %v1438_v25 = vand.u32 2147483647, %v6488_v22  ;;  %vm1436_vm6 = vmor %vm1434_vm4, %vm1435_vm2  ;;  %v9772_v22 = vld [vmem:[#allocation38_spill] sm:$0xff]  ;;  %v9787_v4 = vld [vmem:[#allocation53_spill] sm:$0xff] }
 0x2d4   :  { %v1431_v5 = vsub.f32 1.0, %v1430_v15  ;;  %1736 = vmatpush.msrb.mxu2 %v5885_v20  ;;  %1756 = vmatpush.msrb.mxu3 %v5888_v28  ;;  %v9784_v63 = vld [vmem:[#allocation50_spill] sm:$0xff]  ;;  %v9788_v15 = vld [vmem:[#allocation56_spill] sm:$0xff] }
 0x2d5   :  { %v1413_v1 = vmul.f32 %v3781_v0, %v1412_v16  ;;  %1697 = vmatpush.msra.mxu0 %v5893_v30  ;;  %1717 = vmatpush.msrb.mxu1 %v5896_v32  ;;  %v1422_v30 = vor.u32 1.1754944e-38, %v1421_v43  ;;  %vm1439_vm8 = vcmp.eq.f32.partialorder %v1438_v25, 8.507059e+37  ;;  %v9789_v16 = vld [vmem:[#allocation57_spill] sm:$0xff]  ;;  %v9791_v43 = vld [vmem:[#allocation60_spill] sm:$0xff] }
 0x2d6   :  { %v1432_v23 = vmul.f32 %v3783_v53, %v1431_v5  ;;  %1737 = vmatpush.msrb.mxu2 %v5899_v35  ;;  %1757 = vmatpush.msrb.mxu3 %v5902_v36  ;;  %v1441_v35 = vor.u32 1.1754944e-38, %v1440_v59  ;;  %v9790_v5 = vld [vmem:[#allocation58_spill] sm:$0xff]  ;;  %v9792_v59 = vld [vmem:[#allocation61_spill] sm:$0xff] }
 0x2d7   :  { %v1414_v20 = vadd.f32 %v3781_v0, %v1413_v1  ;;  %1698 = vmatpush.msra.mxu0 %v5905_v37  ;;  %1718 = vmatpush.msrb.mxu1 %v5908_v40  ;;  %v9793_v1 = vld [vmem:[#allocation62_spill] sm:$0xff]  ;;  %v9796_v25 = vld [vmem:[#allocation65_spill] sm:$0xff] }
 0x2d8   :  { %v3785_v28 = vpop.eup %3784  ;;  %v1433_v32 = vadd.f32 %v3783_v53, %v1432_v23  ;;  %1738 = vmatpush.msrb.mxu2 %v5911_v41  ;;  %1758 = vmatpush.msrb.mxu3 %v5914_v42  ;;  %v9795_v23 = vld [vmem:[#allocation64_spill] sm:$0xff] }
 0x2d9   :  { %v1418_v36 = vsel %vm1417_vm5, %v3781_v0, %v1414_v20  ;;  %v1450_v37 = vmul.f32 %v3785_v28, %v6496_v44  ;;  %1699 = vmatpush.msra.mxu0 %v5919_v38  ;;  %1719 = vmatpush.msrb.mxu1 %v5922_v46  ;;  %v3787_v40 = vpop.eup %3786  ;;  %vm1455_vm9 = vweird.f32 %v3785_v28  ;;  %v9783_v0 = vld [vmem:[#allocation49_spill] sm:$0xff]  ;;  %v9797_v20 = vld [vmem:[#allocation66_spill] sm:$0xff] }
 0x2da   :  { %v1423_v39 = vsel %vm1420_vm7, %v1422_v30, %v1418_v36  ;;  %v1437_v62 = vsel %vm1436_vm6, %v3783_v53, %v1433_v32  ;;  %1739 = vmatpush.msrb.mxu2 %v5925_v47  ;;  %1759 = vmatpush.msrb.mxu3 %v5928_v49  ;;  %v1458_v49 = vand.u32 2147483647, %v6496_v44  ;;  %vm1456_vm11 = vmor %vm1454_vm10, %vm1455_vm9  ;;  %v9786_v53 = vld [vmem:[#allocation52_spill] sm:$0xff]  ;;  %v9800_v32 = vld [vmem:[#allocation69_spill] sm:$0xff] }
 0x2db   :  { %v1442_v41 = vsel %vm1439_vm8, %v1441_v35, %v1437_v62  ;;  %v1465_v42 = vmul.f32 %v3787_v40, %v1423_v39  ;;  %v1451_v9 = vsub.f32 1.0, %v1450_v37  ;;  %1700 = vmatpush.msra.mxu0 %v5935_v50  ;;  %1720 = vmatpush.msrb.mxu1 %v5938_v51  ;;  %v9759_v51 = vld [vmem:[#allocation26_spill] sm:$0xff]  ;;  %v9799_v30 = vld [vmem:[#allocation68_spill] sm:$0xff]  ;;  %v9802_v36 = vld [vmem:[#allocation71_spill] sm:$0xff] }
 0x2dc   :  { %v1464_v26 = vmul.f32 %v1442_v41, %v5868_v31  ;;  %1740 = vmatpush.msrb.mxu2 %v5941_v52  ;;  %1760 = vmatpush.msrb.mxu3 %v5944_v54  ;;  %v1460_v31 = vand.u32 2147483648, %v6496_v44  ;;  %v9760_v52 = vld [vmem:[#allocation21_spill] sm:$0xff]  ;;  %vm1459_vm12 = vcmp.eq.f32.partialorder %v1458_v49, 8.507059e+37  ;;  %v9785_v44 = vld [vmem:[#allocation51_spill] sm:$0xff]  ;;  %v9801_v35 = vld [vmem:[#allocation70_spill] sm:$0xff] }
 0x2dd   :  { %v1452_v38 = vmul.f32 %v3785_v28, %v1451_v9  ;;  %1701 = vmatpush.msra.mxu0 %v5947_v58  ;;  %1721 = vmatpush.msrb.mxu1 %v5950_v56  ;;  %v9761_v58 = vld [vmem:[#allocation25_spill] sm:$0xff]  ;;  %v9762_v56 = vld [vmem:[#allocation32_spill] sm:$0xff]  ;;  %v9804_v40 = vld [vmem:[#allocation74_spill] sm:$0xff] }
 0x2de   :  { %v6533_v46 = vadd.f32 %v1465_v42, %v1464_v26  ;;  %1741 = vmatpush.msrb.mxu2 %v5953_v11  ;;  %1761 = vmatpush.msrb.mxu3 %v5956_v57  ;;  %v1461_v54 = vor.u32 1.1754944e-38, %v1460_v31  ;;  %v9763_v11 = vld [vmem:[#allocation30_spill] sm:$0xff]  ;;  %v9764_v57 = vld [vmem:[#allocation24_spill] sm:$0xff]  ;;  %v9805_v39 = vld [vmem:[#allocation75_spill] sm:$0xff] }
 0x2df   :  { %v1453_v47 = vadd.f32 %v3785_v28, %v1452_v38  ;;  %1702 = vmatpush.msra.mxu0 %v5959_v60  ;;  %1722 = vmatpush.msrb.mxu1 %v5962_v48  ;;  %v9803_v37 = vld [vmem:[#allocation72_spill] sm:$0xff]  ;;  %v9807_v41 = vld [vmem:[#allocation77_spill] sm:$0xff]  ;;  %v9808_v42 = vld [vmem:[#allocation78_spill] sm:$0xff] }
 0x2e0   :  { %3788 = vtanh.f32 %v6533_v46  ;;  %1742 = vmatpush.msrb.mxu2 %v5965_v18  ;;  %1762 = vmatpush.msrb.mxu3 %v5968_v61  ;;  %v9765_v18 = vld [vmem:[#allocation28_spill] sm:$0xff]  ;;  %v9766_v61 = vld [vmem:[#allocation34_spill] sm:$0xff]  ;;  %v9809_v9 = vld [vmem:[#allocation79_spill] sm:$0xff] }
 0x2e1   :  { %1703 = vmatpush.msra.mxu0 %v5971_v2  ;;  %1723 = vmatpush.msrb.mxu1 %v5974_v6  ;;  %v1457_v50 = vsel %vm1456_vm11, %v3785_v28, %v1453_v47  ;;  %v9767_v6 = vld [vmem:[#allocation33_spill] sm:$0xff]  ;;  %v9798_v28 = vld [vmem:[#allocation67_spill] sm:$0xff]  ;;  %v9806_v62 = vld [vmem:[#allocation76_spill] sm:$0xff] }
 0x2e2   :  { %1743 = vmatpush.msrb.mxu2 %v5977_v7  ;;  %1763 = vmatpush.msrb.mxu3 %v5980_v8  ;;  %v1462_v48 = vsel %vm1459_vm12, %v1461_v54, %v1457_v50  ;;  %v9768_v7 = vld [vmem:[#allocation27_spill] sm:$0xff]  ;;  %v9810_v26 = vld [vmem:[#allocation80_spill] sm:$0xff]  ;;  %v9811_v38 = vld [vmem:[#allocation82_spill] sm:$0xff] }
 0x2e3   :  { %1704 = vmatpush.msra.mxu0 %v9759_v51  ;;  %1724 = vmatpush.msrb.mxu1 %v9760_v52  ;;  %v9769_v8 = vld [vmem:[#allocation31_spill] sm:$0xff]  ;;  %v9813_v31 = vld [vmem:[#allocation84_spill] sm:$0xff]  ;;  %v9814_v49 = vld [vmem:[#allocation85_spill] sm:$0xff] }
 0x2e4   :  { %1744 = vmatpush.msrb.mxu2 %v9761_v58  ;;  %1764 = vmatpush.msrb.mxu3 %v9762_v56  ;;  %v9812_v47 = vld [vmem:[#allocation83_spill] sm:$0xff]  ;;  %v9815_v50 = vld [vmem:[#allocation86_spill] sm:$0xff]  ;;  %v9817_v52 = vld [vmem:[#allocation88_spill] sm:$0xff] }
 0x2e5   :  { %1705 = vmatpush.msra.mxu0 %v9763_v11  ;;  %1725 = vmatpush.msrb.mxu1 %v9764_v57  ;;  %v9816_v51 = vld [vmem:[#allocation87_spill] sm:$0xff]  ;;  %v9818_v54 = vld [vmem:[#allocation89_spill] sm:$0xff]  ;;  %v9819_v58 = vld [vmem:[#allocation92_spill] sm:$0xff] }
 0x2e6   :  { %v3789_v60 = vpop.eup %3788  ;;  %1745 = vmatpush.msrb.mxu2 %v9765_v18  ;;  %1765 = vmatpush.msrb.mxu3 %v9766_v61  ;;  %v9820_v56 = vld [vmem:[#allocation94_spill] sm:$0xff]  ;;  %v9821_v11 = vld [vmem:[#allocation95_spill] sm:$0xff]  ;;  %v9822_v57 = vld [vmem:[#allocation96_spill] sm:$0xff] }
 0x2e7   :  { %v1468_v2 = vmul.f32 %v3789_v60, %v1462_v48  ;;  %1706 = vmatpush.msra.mxu0 %v9767_v6  ;;  %1726 = vmatpush.msrb.mxu1 %v9768_v7  ;;  %v9823_v60 = vld [vmem:[#allocation97_spill] sm:$0xff]  ;;  %v9824_v48 = vld [vmem:[#allocation98_spill] sm:$0xff]  ;;  %v9825_v18 = vld [vmem:[#allocation99_spill] sm:$0xff] }
 0x2e8   :  { %1746 = vmatpush.msrb.mxu2 %v9769_v8  ;;  %1766 = vmatpush.msrb.mxu3 %v9770_v3  ;;  %v9826_v61 = vld [vmem:[#allocation100_spill] sm:$0xff]  ;;  %v9828_v6 = vld [vmem:[#allocation102_spill] sm:$0xff]  ;;  %v9829_v7 = vld [vmem:[#allocation103_spill] sm:$0xff] }
 0x2e9   :  { %1565 = vmatmul.f32.vlgmr.msrb.gmra.mxu0 %v1468_v2  ;;  %1585 = vmatmul.f32.vlgmr.msra.gmra.mxu1 %v1468_v2  ;;  %v9830_v8 = vld [vmem:[#allocation104_spill] sm:$0xff]  ;;  %v9831_v3 = vld [vmem:[#allocation106_spill] sm:$0xff] }
 0x2ea   :  { %1605 = vmatmul.f32.vlgmr.msra.gmra.mxu2 %v1468_v2  ;;  %1625 = vmatmul.f32.vlgmr.msra.gmra.mxu3 %v1468_v2 }
 0x2eb   :  { %1707 = vmatpush.msra.mxu0 %v9771_v10  ;;  %1727 = vmatpush.msrb.mxu1 %v9772_v22  ;;  %v9832_v10 = vld [vmem:[#allocation107_spill] sm:$0xff]  ;;  %v9833_v22 = vld [vmem:[#allocation108_spill] sm:$0xff] }
 0x2ec   :  { %1747 = vmatpush.msrb.mxu2 %v9773_v55  ;;  %1767 = vmatpush.msrb.mxu3 %v9774_v12  ;;  %v9834_v55 = vld [vmem:[#allocation109_spill] sm:$0xff]  ;;  %v9835_v12 = vld [vmem:[#allocation112_spill] sm:$0xff] }
 0x2ed   :  { %1708 = vmatpush.msra.mxu0 %v9775_v34  ;;  %1728 = vmatpush.msrb.mxu1 %v9776_v45  ;;  %v9836_v34 = vld [vmem:[#allocation113_spill] sm:$0xff]  ;;  %v9837_v45 = vld [vmem:[#allocation114_spill] sm:$0xff] }
 0x2ee   :  { %1748 = vmatpush.msrb.mxu2 %v9777_v17  ;;  %1768 = vmatpush.msrb.mxu3 %v9778_v27  ;;  %v9838_v17 = vld [vmem:[#allocation116_spill] sm:$0xff]  ;;  %v9839_v27 = vld [vmem:[#allocation117_spill] sm:$0xff] }
 0x2ef   :  { %1709 = vmatpush.msra.mxu0 %v9779_v19  ;;  %1729 = vmatpush.msrb.mxu1 %v9780_v14  ;;  %v9840_v19 = vld [vmem:[#allocation118_spill] sm:$0xff]  ;;  %v9841_v14 = vld [vmem:[#allocation119_spill] sm:$0xff] }
 0x2f0   :  { %1749 = vmatpush.msrb.mxu2 %v9781_v29  ;;  %1769 = vmatpush.msrb.mxu3 %v9782_v21  ;;  %v9842_v29 = vld [vmem:[#allocation120_spill] sm:$0xff]  ;;  %v9843_v21 = vld [vmem:[#allocation121_spill] sm:$0xff] }
 0x2f1   :  { %1710 = vmatpush.msra.mxu0 %v9783_v0  ;;  %1730 = vmatpush.msrb.mxu1 %v9784_v63  ;;  %v9844_v0 = vld [vmem:[#allocation122_spill] sm:$0xff]  ;;  %v9845_v63 = vld [vmem:[#allocation123_spill] sm:$0xff] }
 0x2f2   :  { %1750 = vmatpush.msrb.mxu2 %v9785_v44  ;;  %1770 = vmatpush.msrb.mxu3 %v9786_v53  ;;  %v9846_v44 = vld [vmem:[#allocation124_spill] sm:$0xff]  ;;  %v9847_v53 = vld [vmem:[#allocation125_spill] sm:$0xff] }
 0x2f3   :  { %1711 = vmatpush.msra.mxu0 %v9787_v4  ;;  %1731 = vmatpush.msrb.mxu1 %v9788_v15  ;;  %v9848_v4 = vld [vmem:[#allocation126_spill] sm:$0xff]  ;;  %v9849_v15 = vld [vmem:[#allocation127_spill] sm:$0xff] }
 0x2f4   :  { %1751 = vmatpush.msrb.mxu2 %v9789_v16  ;;  %1771 = vmatpush.msrb.mxu3 %v9790_v5  ;;  %v9850_v16 = vld [vmem:[#allocation128_spill] sm:$0xff]  ;;  %v9851_v5 = vld [vmem:[#allocation129_spill] sm:$0xff] }
 0x2f5   :  { %1712 = vmatmul.f32.vlgmr.msra.gmra.mxu0 %v1468_v2  ;;  %1732 = vmatmul.f32.vlgmr.msrb.gmra.mxu1 %v1468_v2 }
 0x2f6   :  { %1752 = vmatmul.f32.vlgmr.msrb.gmra.mxu2 %v1468_v2  ;;  %1772 = vmatmul.f32.vlgmr.msrb.gmra.mxu3 %v1468_v2  ;;  %v9827_v2 = vld [vmem:[#allocation101_spill] sm:$0xff] }
 0x2f7   :  { %1843 = vmatpush.msrb.mxu0 %v9791_v43  ;;  %1863 = vmatpush.msra.mxu1 %v9792_v59  ;;  %v9852_v43 = vld [vmem:[#allocation132_spill] sm:$0xff]  ;;  %v9853_v59 = vld [vmem:[#allocation133_spill] sm:$0xff] }
 0x2f8   :  { %1883 = vmatpush.msra.mxu2 %v9793_v1  ;;  %1903 = vmatpush.msra.mxu3 %v9794_v33  ;;  %v9854_v1 = vld [vmem:[#allocation134_spill] sm:$0xff]  ;;  %v9855_v33 = vld [vmem:[#allocation137_spill] sm:$0xff] }
 0x2f9   :  { %1844 = vmatpush.msrb.mxu0 %v9795_v23  ;;  %1864 = vmatpush.msra.mxu1 %v9796_v25  ;;  %v9856_v23 = vld [vmem:[#allocation138_spill] sm:$0xff]  ;;  %v9857_v25 = vld [vmem:[#allocation139_spill] sm:$0xff] }
 0x2fa   :  { %1884 = vmatpush.msra.mxu2 %v9797_v20  ;;  %1904 = vmatpush.msra.mxu3 %v9798_v28  ;;  %v9858_v20 = vld [vmem:[#allocation140_spill] sm:$0xff]  ;;  %v9859_v28 = vld [vmem:[#allocation141_spill] sm:$0xff] }
 0x2fb   :  { %1845 = vmatpush.msrb.mxu0 %v9799_v30  ;;  %1865 = vmatpush.msra.mxu1 %v9800_v32  ;;  %v9860_v30 = vld [vmem:[#allocation142_spill] sm:$0xff]  ;;  %v9861_v32 = vld [vmem:[#allocation143_spill] sm:$0xff] }
 0x2fc   :  { %1885 = vmatpush.msra.mxu2 %v9801_v35  ;;  %1905 = vmatpush.msra.mxu3 %v9802_v36  ;;  %v9862_v35 = vld [vmem:[#allocation144_spill] sm:$0xff]  ;;  %v9863_v36 = vld [vmem:[#allocation145_spill] sm:$0xff] }
 0x2fd   :  { %1846 = vmatpush.msrb.mxu0 %v9803_v37  ;;  %1866 = vmatpush.msra.mxu1 %v9804_v40  ;;  %v9864_v37 = vld [vmem:[#allocation146_spill] sm:$0xff]  ;;  %v9865_v40 = vld [vmem:[#allocation147_spill] sm:$0xff] }
 0x2fe   :  { %1886 = vmatpush.msra.mxu2 %v9805_v39  ;;  %1906 = vmatpush.msra.mxu3 %v9806_v62  ;;  %v9866_v39 = vld [vmem:[#allocation148_spill] sm:$0xff]  ;;  %v9867_v62 = vld [vmem:[#allocation149_spill] sm:$0xff] }
 0x2ff   :  { %1847 = vmatpush.msrb.mxu0 %v9807_v41  ;;  %1867 = vmatpush.msra.mxu1 %v9808_v42  ;;  %v9868_v41 = vld [vmem:[#allocation151_spill] sm:$0xff]  ;;  %v9869_v42 = vld [vmem:[#allocation152_spill] sm:$0xff] }
 0x300   :  { %1887 = vmatpush.msra.mxu2 %v9809_v9  ;;  %1907 = vmatpush.msra.mxu3 %v9810_v26  ;;  %v9870_v9 = vld [vmem:[#allocation153_spill] sm:$0xff]  ;;  %v9871_v26 = vld [vmem:[#allocation156_spill] sm:$0xff] }
 0x301   :  { %1848 = vmatpush.msrb.mxu0 %v9811_v38  ;;  %1868 = vmatpush.msra.mxu1 %v9812_v47  ;;  %v9872_v38 = vld [vmem:[#allocation158_spill] sm:$0xff]  ;;  %v9873_v47 = vld [vmem:[#allocation159_spill] sm:$0xff] }
 0x302   :  { %1888 = vmatpush.msra.mxu2 %v9813_v31  ;;  %1908 = vmatpush.msra.mxu3 %v9814_v49  ;;  %v9874_v31 = vld [vmem:[#allocation160_spill] sm:$0xff]  ;;  %v9875_v49 = vld [vmem:[#allocation161_spill] sm:$0xff] }
 0x303   :  { %1849 = vmatpush.msrb.mxu0 %v9815_v50  ;;  %1869 = vmatpush.msra.mxu1 %v9816_v51  ;;  %v9876_v50 = vld [vmem:[#allocation162_spill] sm:$0xff]  ;;  %v9877_v51 = vld [vmem:[#allocation163_spill] sm:$0xff] }
 0x304   :  { %1889 = vmatpush.msra.mxu2 %v9817_v52  ;;  %1909 = vmatpush.msra.mxu3 %v9818_v54  ;;  %v9878_v52 = vld [vmem:[#allocation164_spill] sm:$0xff]  ;;  %v9879_v54 = vld [vmem:[#allocation165_spill] sm:$0xff] }
 0x305   :  { %1850 = vmatpush.msrb.mxu0 %v9819_v58  ;;  %1870 = vmatpush.msra.mxu1 %v9820_v56  ;;  %v9880_v58 = vld [vmem:[#allocation166_spill] sm:$0xff]  ;;  %v9881_v56 = vld [vmem:[#allocation167_spill] sm:$0xff] }
 0x306   :  { %1890 = vmatpush.msra.mxu2 %v9821_v11  ;;  %1910 = vmatpush.msra.mxu3 %v9822_v57  ;;  %v9882_v11 = vld [vmem:[#allocation169_spill] sm:$0xff]  ;;  %v9883_v57 = vld [vmem:[#allocation170_spill] sm:$0xff] }
 0x307   :  { %1851 = vmatpush.msrb.mxu0 %v9823_v60  ;;  %1871 = vmatpush.msra.mxu1 %v9824_v48  ;;  %v9884_v60 = vld [vmem:[#allocation173_spill] sm:$0xff]  ;;  %v9885_v48 = vld [vmem:[#allocation174_spill] sm:$0xff] }
 0x308   :  { %1891 = vmatpush.msra.mxu2 %v9825_v18  ;;  %1911 = vmatpush.msra.mxu3 %v9826_v61  ;;  %v9886_v18 = vld [vmem:[#allocation175_spill] sm:$0xff]  ;;  %v9887_v61 = vld [vmem:[#allocation176_spill] sm:$0xff] }
 0x309   :  { %1852 = vmatpush.msrb.mxu0 %v9827_v2  ;;  %1872 = vmatpush.msra.mxu1 %v9828_v6  ;;  %v9888_v2 = vld [vmem:[#allocation177_spill] sm:$0xff]  ;;  %v9889_v6 = vld [vmem:[#allocation178_spill] sm:$0xff] }
 0x30a   :  { %1892 = vmatpush.msra.mxu2 %v9829_v7  ;;  %1912 = vmatpush.msra.mxu3 %v9830_v8  ;;  %v9890_v7 = vld [vmem:[#allocation179_spill] sm:$0xff]  ;;  %v9891_v8 = vld [vmem:[#allocation180_spill] sm:$0xff] }
 0x30b   :  { %1853 = vmatpush.msrb.mxu0 %v9831_v3  ;;  %1873 = vmatpush.msra.mxu1 %v9832_v10  ;;  %v9892_v3 = vld [vmem:[#allocation181_spill] sm:$0xff]  ;;  %v9893_v10 = vld [vmem:[#allocation59_spill] sm:$0xff] }
 0x30c   :  { %1893 = vmatpush.msra.mxu2 %v9833_v22  ;;  %1913 = vmatpush.msra.mxu3 %v9834_v55  ;;  %v9894_v22 = vld [vmem:[#allocation73_spill] sm:$0xff]  ;;  %v9895_v55 = vld [vmem:[#allocation91_spill] sm:$0xff] }
 0x30d   :  { %1854 = vmatpush.msrb.mxu0 %v9835_v12  ;;  %1874 = vmatpush.msra.mxu1 %v9836_v34  ;;  %v9896_v12 = vld [vmem:[#allocation90_spill] sm:$0xff]  ;;  %v9897_v34 = vld [vmem:[#allocation189_spill] sm:$0xff] }
 0x30e   :  { %1894 = vmatpush.msra.mxu2 %v9837_v45  ;;  %1914 = vmatpush.msra.mxu3 %v9838_v17  ;;  %v9898_v45 = vld [vmem:[#allocation190_spill] sm:$0xff]  ;;  %v9899_v17 = vld [vmem:[#allocation191_spill] sm:$0xff] }
 0x30f   :  { %1855 = vmatpush.msrb.mxu0 %v9839_v27  ;;  %1875 = vmatpush.msra.mxu1 %v9840_v19  ;;  %v9900_v27 = vld [vmem:[#allocation192_spill] sm:$0xff]  ;;  %v9901_v19 = vld [vmem:[#allocation193_spill] sm:$0xff] }
 0x310   :  { %1895 = vmatpush.msra.mxu2 %v9841_v14  ;;  %1915 = vmatpush.msra.mxu3 %v9842_v29  ;;  %v9902_v14 = vld [vmem:[#allocation194_spill] sm:$0xff]  ;;  %v9903_v29 = vld [vmem:[#allocation195_spill] sm:$0xff] }
 0x311   :  { %1856 = vmatpush.msrb.mxu0 %v9843_v21  ;;  %1876 = vmatpush.msra.mxu1 %v9844_v0  ;;  %v9904_v21 = vld [vmem:[#allocation196_spill] sm:$0xff]  ;;  %v9905_v0 = vld [vmem:[#allocation197_spill] sm:$0xff] }
 0x312   :  { %1896 = vmatpush.msra.mxu2 %v9845_v63  ;;  %1916 = vmatpush.msra.mxu3 %v9846_v44  ;;  %v9906_v63 = vld [vmem:[#allocation198_spill] sm:$0xff]  ;;  %v9907_v44 = vld [vmem:[#allocation199_spill] sm:$0xff] }
 0x313   :  { %1857 = vmatpush.msrb.mxu0 %v9847_v53  ;;  %1877 = vmatpush.msra.mxu1 %v9848_v4  ;;  %v9908_v53 = vld [vmem:[#allocation200_spill] sm:$0xff]  ;;  %v9909_v4 = vld [vmem:[#allocation201_spill] sm:$0xff] }
 0x314   :  { %1897 = vmatpush.msra.mxu2 %v9849_v15  ;;  %1917 = vmatpush.msra.mxu3 %v9850_v16  ;;  %v9910_v15 = vld [vmem:[#allocation202_spill] sm:$0xff]  ;;  %v9911_v16 = vld [vmem:[#allocation203_spill] sm:$0xff] }
 0x315   :  { %1858 = vmatpush.msrb.mxu0 %v9851_v5  ;;  %1878 = vmatpush.msra.mxu1 %v9852_v43  ;;  %v9912_v5 = vld [vmem:[#allocation204_spill] sm:$0xff]  ;;  %v9913_v43 = vld [vmem:[#allocation205_spill] sm:$0xff] }
 0x316   :  { %1898 = vmatpush.msra.mxu2 %v9853_v59  ;;  %1918 = vmatpush.msra.mxu3 %v9854_v1  ;;  %v9914_v59 = vld [vmem:[#allocation206_spill] sm:$0xff]  ;;  %v9915_v1 = vld [vmem:[#allocation207_spill] sm:$0xff] }
 0x317   :  { %1923 = vmatpush.msra.mxu0 %v9855_v33  ;;  %1943 = vmatpush.msrb.mxu1 %v9856_v23  ;;  %v9916_v33 = vld [vmem:[#allocation208_spill] sm:$0xff]  ;;  %v9917_v23 = vld [vmem:[#allocation209_spill] sm:$0xff] }
 0x318   :  { %1963 = vmatpush.msrb.mxu2 %v9857_v25  ;;  %1983 = vmatpush.msrb.mxu3 %v9858_v20  ;;  %v9918_v25 = vld [vmem:[#allocation210_spill] sm:$0xff] }
 0x319   :  { %1924 = vmatpush.msra.mxu0 %v9859_v28  ;;  %1944 = vmatpush.msrb.mxu1 %v9860_v30 }
 0x31a   :  { %1964 = vmatpush.msrb.mxu2 %v9861_v32  ;;  %1984 = vmatpush.msrb.mxu3 %v9862_v35 }
 0x31b   :  { %1925 = vmatpush.msra.mxu0 %v9863_v36  ;;  %1945 = vmatpush.msrb.mxu1 %v9864_v37 }
 0x31c   :  { %1965 = vmatpush.msrb.mxu2 %v9865_v40  ;;  %1985 = vmatpush.msrb.mxu3 %v9866_v39  ;;  %v9919_v40 = vld [vmem:[#allocation23_spill] sm:$0xff] }
 0x31d   :  { %1926 = vmatpush.msra.mxu0 %v9867_v62  ;;  %1946 = vmatpush.msrb.mxu1 %v9868_v41  ;;  %v9920_v62 = vld [vmem:[#allocation20_spill] sm:$0xff] }
 0x31e   :  { %1966 = vmatpush.msrb.mxu2 %v9869_v42  ;;  %1986 = vmatpush.msrb.mxu3 %v9870_v9 }
 0x31f   :  { %1927 = vmatpush.msra.mxu0 %v9871_v26  ;;  %1947 = vmatpush.msrb.mxu1 %v9872_v38 }
 0x320   :  { %1967 = vmatpush.msrb.mxu2 %v9873_v47  ;;  %1987 = vmatpush.msrb.mxu3 %v9874_v31  ;;  %v9921_v31 = vld [vmem:[#allocation22_spill] sm:$0xff] }
 0x321   :  { %1928 = vmatpush.msra.mxu0 %v9875_v49  ;;  %1948 = vmatpush.msrb.mxu1 %v9876_v50  ;;  %v9922_v50 = vld [vmem:[#allocation157_spill] sm:$0xff] }
 0x322   :  { %1968 = vmatpush.msrb.mxu2 %v9877_v51  ;;  %1988 = vmatpush.msrb.mxu3 %v9878_v52  ;;  %v9923_v51 = vld [vmem:[#allocation105_spill] sm:$0xff] }
 0x323   :  { %1929 = vmatpush.msra.mxu0 %v9879_v54  ;;  %1949 = vmatpush.msrb.mxu1 %v9880_v58  ;;  %v428_v52 = vadd.f32 %v9923_v51, %v9922_v50  ;;  %v9924_v54 = vld [vmem:[#allocation185_spill] sm:$0xff]  ;;  %v9925_v58 = vld [vmem:[#allocation115_spill] sm:$0xff] }
 0x324   :  { %1969 = vmatpush.msrb.mxu2 %v9881_v56  ;;  %1989 = vmatpush.msrb.mxu3 %v9882_v11  ;;  %v469_v56 = vadd.f32 %v9925_v58, %v9924_v54 }
 0x325   :  { %1930 = vmatpush.msra.mxu0 %v9883_v57  ;;  %1950 = vmatpush.msrb.mxu1 %v9884_v60 }
 0x326   :  { %1970 = vmatpush.msrb.mxu2 %v9885_v48  ;;  %1990 = vmatpush.msrb.mxu3 %v9886_v18 }
 0x327   :  { %1931 = vmatpush.msra.mxu0 %v9887_v61  ;;  %1951 = vmatpush.msrb.mxu1 %v9888_v2 }
 0x328   :  { %1971 = vmatpush.msrb.mxu2 %v9889_v6  ;;  %1991 = vmatpush.msrb.mxu3 %v9890_v7 }
 0x329   :  { %1932 = vmatpush.msra.mxu0 %v9891_v8  ;;  %1952 = vmatpush.msrb.mxu1 %v9892_v3 }
 0x32a   :  { %1972 = vmatpush.msrb.mxu2 %v9893_v10  ;;  %1992 = vmatpush.msrb.mxu3 %v9894_v22 }
 0x32b   :  { %1933 = vmatpush.msra.mxu0 %v9895_v55  ;;  %1953 = vmatpush.msrb.mxu1 %v9896_v12  ;;  %v9926_v55 = vld [vmem:[#allocation187_spill] sm:$0xff] }
 0x32c   :  { %1973 = vmatpush.msrb.mxu2 %v9897_v34  ;;  %1993 = vmatpush.msrb.mxu3 %v9898_v45  ;;  %v9927_v12 = vld [vmem:[#allocation135_spill] sm:$0xff] }
 0x32d   :  { %1934 = vmatpush.msra.mxu0 %v9899_v17  ;;  %1954 = vmatpush.msrb.mxu1 %v9900_v27  ;;  %v551_v34 = vadd.f32 %v9927_v12, %v9926_v55 }
 0x32e   :  { %1974 = vmatpush.msrb.mxu2 %v9901_v19  ;;  %1994 = vmatpush.msrb.mxu3 %v9902_v14  ;;  %v9928_v19 = vld [vmem:[#allocation29_spill] sm:$0xff] }
 0x32f   :  { %1935 = vmatpush.msra.mxu0 %v9903_v29  ;;  %1955 = vmatpush.msrb.mxu1 %v9904_v21 }
 0x330   :  { %1975 = vmatpush.msrb.mxu2 %v9905_v0  ;;  %1995 = vmatpush.msrb.mxu3 %v9906_v63 }
 0x331   :  { %1936 = vmatpush.msra.mxu0 %v9907_v44  ;;  %1956 = vmatpush.msrb.mxu1 %v9908_v53 }
 0x332   :  { %1976 = vmatpush.msrb.mxu2 %v9909_v4  ;;  %1996 = vmatpush.msrb.mxu3 %v9910_v15 }
 0x333   :  { %1937 = vmatpush.msra.mxu0 %v9911_v16  ;;  %1957 = vmatpush.msrb.mxu1 %v9912_v5 }
 0x334   :  { %1977 = vmatpush.msrb.mxu2 %v9913_v43  ;;  %1997 = vmatpush.msrb.mxu3 %v9914_v59 }
 0x335   :  { %1938 = vmatpush.msra.mxu0 %v9915_v1  ;;  %1958 = vmatpush.msrb.mxu1 %v9916_v33 }
 0x336   :  { %1978 = vmatpush.msrb.mxu2 %v9917_v23  ;;  %1998 = vmatpush.msrb.mxu3 %v9918_v25 }
 0x34e   :  { %v1486_v20 = vpop.f32.mrf.mxu0  ;;  %v1506_v28 = vpop.f32.mrf.mxu1 }
 0x355   :  { %v1546_v30 = vpop.f32.mrf.mxu3  ;;  %v1526_v26 = vpop.f32.mrf.mxu2 }
 0x366   :  { %v1566_v32 = vpop.f32.mrf.mxu0  ;;  %v1586_v35 = vpop.f32.mrf.mxu1 }
 0x367   :  { %v1567_v36 = vadd.f32 %v1566_v32, %v1486_v20  ;;  %v1587_v37 = vadd.f32 %v1586_v35, %v1506_v28  ;;  %v9929_v35 = vld [vmem:[#allocation131_spill] sm:$0xff] }
 0x369   :  { %v1629_v39 = vadd.f32 %v1567_v36, %v9919_v40  ;;  %v1630_v41 = vadd.f32 %v1587_v37, %v9920_v62  ;;  %v510_v36 = vadd.f32 %v9929_v35, %v5593_v24 }
 0x36b   :  { %v3657_v42 = vmul.f32 -1.442695, %v1629_v39  ;;  %v3658_v9 = vmul.f32 -1.442695, %v1630_v41 }
 0x36d   :  { %3790 = vpow2.f32 %v3657_v42  ;;  %v1626_v38 = vpop.f32.mrf.mxu3  ;;  %v1606_v7 = vpop.f32.mrf.mxu2 }
 0x36e   :  { %3792 = vpow2.f32 %v3658_v9  ;;  %v1627_v47 = vadd.f32 %v1626_v38, %v1546_v30  ;;  %v1607_v22 = vadd.f32 %v1606_v7, %v1526_v26 }
 0x370   :  { %v1632_v49 = vadd.f32 %v1627_v47, %v9921_v31  ;;  %v1631_v14 = vadd.f32 %v1607_v22, %v9928_v19 }
 0x372   :  { %v3659_v11 = vmul.f32 -1.442695, %v1632_v49  ;;  %v1713_v57 = vpop.f32.mrf.mxu0  ;;  %v1733_v60 = vpop.f32.mrf.mxu1 }
 0x373   :  { %v3791_v48 = vpop.eup %3790  ;;  %v1776_v18 = vadd.f32 %v1713_v57, %v428_v52  ;;  %v1777_v61 = vadd.f32 %v1733_v60, %v469_v56 }
 0x374   :  { %v3793_v2 = vpop.eup %3792  ;;  %v1636_v6 = vadd.f32 1.0, %v3791_v48  ;;  %3794 = vpow2.f32 %v3659_v11 }
 0x375   :  { %v1655_v8 = vadd.f32 1.0, %v3793_v2  ;;  %v3660_v3 = vmul.f32 -1.442695, %v1776_v18  ;;  %v3661_v10 = vmul.f32 -1.442695, %v1777_v61 }
 0x376   :  { %3796 = vrcp.f32 %v1636_v6  ;;  %v1646_v59 = vand.u32 2147483647, %v1636_v6  ;;  %v1648_v1 = vand.u32 2147483648, %v1636_v6  ;;  %vm1642_vm0 = vweird.f32 %v1636_v6 }
 0x377   :  { %3798 = vrcp.f32 %v1655_v8  ;;  %v1667_v23 = vand.u32 2147483648, %v1655_v8  ;;  %v1665_v28 = vand.u32 2147483647, %v1655_v8  ;;  %vm1661_vm15 = vweird.f32 %v1655_v8 }
 0x378   :  { %3800 = vpow2.f32 %v3660_v3  ;;  %vm1647_vm2 = vcmp.eq.f32.partialorder %v1646_v59, 8.507059e+37  ;;  %v1649_v41 = vor.u32 1.1754944e-38, %v1648_v1 }
 0x379   :  { %3802 = vpow2.f32 %v3661_v10  ;;  %v1773_v45 = vpop.f32.mrf.mxu3  ;;  %v1753_v30 = vpop.f32.mrf.mxu2  ;;  %v1668_v38 = vor.u32 1.1754944e-38, %v1667_v23  ;;  %vm1666_vm4 = vcmp.eq.f32.partialorder %v1665_v28, 8.507059e+37 }
 0x37a   :  { %v3795_v17 = vpop.eup %3794  ;;  %v1779_v27 = vadd.f32 %v1773_v45, %v551_v34  ;;  %v1778_v49 = vadd.f32 %v1753_v30, %v510_v36 }
 0x37b   :  { %v6719_v29 = vadd.f32 1.0, %v3795_v17 }
 0x37c   :  { %v3797_v21 = vpop.eup %3796  ;;  %v3662_v0 = vmul.f32 -1.442695, %v1779_v27 }
 0x37d   :  { %v3799_v63 = vpop.eup %3798  ;;  %v1638_v44 = vmul.f32 %v3797_v21, %v1636_v6  ;;  %3804 = vrcp.f32 %v6719_v29  ;;  %vm1643_vm13 = vweird.f32 %v3797_v21  ;;  %vm1681_vm5 = vweird.f32 %v6719_v29 }
 0x37e   :  { %v3801_v53 = vpop.eup %3800  ;;  %v1657_v4 = vmul.f32 %v3799_v63, %v1655_v8  ;;  %3806 = vpow2.f32 %v3662_v0  ;;  %vm1662_vm14 = vweird.f32 %v3799_v63  ;;  %vm1644_vm1 = vmor %vm1642_vm0, %vm1643_vm13  ;;  %v1687_v10 = vand.u32 2147483648, %v6719_v29 }
 0x37f   :  { %v3803_v15 = vpop.eup %3802  ;;  %v1639_v16 = vsub.f32 1.0, %v1638_v44  ;;  %3808 = vtanh.f32 %v1631_v14  ;;  %v6722_v5 = vadd.f32 1.0, %v3801_v53  ;;  %vm1663_vm3 = vmor %vm1661_vm15, %vm1662_vm14  ;;  %v6875_v44 = vld [vmem:[#allocation7 + $0x138] sm:$0xff] }
 0x380   :  { %v1658_v43 = vsub.f32 1.0, %v1657_v4  ;;  %v6724_v33 = vadd.f32 1.0, %v3803_v15  ;;  %v1688_v1 = vor.u32 1.1754944e-38, %v1687_v10  ;;  %v6835_v10 = vld [vmem:[#allocation7 + $0x198] sm:$0xff] }
 0x381   :  { %v1640_v25 = vmul.f32 %v3797_v21, %v1639_v16  ;;  %3810 = vrcp.f32 %v6722_v5  ;;  %v1793_v3 = vand.u32 2147483647, %v6722_v5  ;;  %v1795_v12 = vand.u32 2147483648, %v6722_v5 }
 0x382   :  { %v1659_v20 = vmul.f32 %v3799_v63, %v1658_v43  ;;  %3812 = vrcp.f32 %v6724_v33  ;;  %v1814_v34 = vand.u32 2147483648, %v6724_v33  ;;  %v1812_v14 = vand.u32 2147483647, %v6724_v33 }
 0x383   :  { %v6728_v32 = vpop.eup %3804  ;;  %v1641_v37 = vadd.f32 %v3797_v21, %v1640_v25  ;;  %vm1808_vm9 = vweird.f32 %v6724_v33  ;;  %vm1789_vm10 = vweird.f32 %v6722_v5  ;;  %vm1794_vm13 = vcmp.eq.f32.partialorder %v1793_v3, 8.507059e+37  ;;  %v6832_v3 = vld [vmem:[#allocation7 + $0x190] sm:$0xff] }
 0x384   :  { %v3807_v39 = vpop.eup %3806  ;;  %v1660_v42 = vadd.f32 %v3799_v63, %v1659_v20  ;;  %v1677_v9 = vmul.f32 %v6728_v32, %v6719_v29  ;;  %vm1682_vm6 = vweird.f32 %v6728_v32  ;;  %v1796_v4 = vor.u32 1.1754944e-38, %v1795_v12  ;;  %v6841_v12 = vld [vmem:[#allocation7 + $0x168] sm:$0xff] }
 0x385   :  { %v3809_v26 = vpop.eup %3808  ;;  %v1645_v47 = vsel %vm1644_vm1, %v3797_v21, %v1641_v37  ;;  %v6735_v51 = vadd.f32 1.0, %v3807_v39  ;;  %v1685_v21 = vand.u32 2147483647, %v6719_v29  ;;  %vm6762_vm11 = vmor %vm1681_vm5, %vm1682_vm6  ;;  %vm1813_vm15 = vcmp.eq.f32.partialorder %v1812_v14, 8.507059e+37  ;;  %v6863_v14 = vld [vmem:[#allocation7 + $0x158] sm:$0xff] }
 0x386   :  { %v1650_v52 = vsel %vm1647_vm2, %v1649_v41, %v1645_v47  ;;  %v1664_v58 = vsel %vm1663_vm3, %v3799_v63, %v1660_v42  ;;  %v1678_v56 = vsub.f32 1.0, %v1677_v9  ;;  %v6777_v41 = vld [vmem:[#allocation7 + $0x1e0] sm:$0xff]  ;;  %v6785_v9 = vld [vmem:[#allocation7 + $0x1f0] sm:$0xff] }
 0x387   :  { %v3811_v11 = vpop.eup %3810  ;;  %v1669_v57 = vsel %vm1666_vm4, %v1668_v38, %v1664_v58  ;;  %v1692_v60 = vmul.f32 %v3809_v26, %v1650_v52  ;;  %3814 = vrcp.f32 %v6735_v51  ;;  %vm1686_vm0 = vcmp.eq.f32.partialorder %v1685_v21, 8.507059e+37  ;;  %v6788_v26 = vld [vmem:[#allocation7 + $0x1f8] sm:$0xff]  ;;  %v6797_v47 = vld [vmem:[#allocation7 + $0x1c0] sm:$0xff]  ;;  %v6806_v52 = vld [vmem:[#allocation7 + $0x1d0] sm:$0xff] }
 0x388   :  { %v3813_v48 = vpop.eup %3812  ;;  %v1691_v18 = vmul.f32 %v1669_v57, %v6482_v13  ;;  %v1785_v61 = vmul.f32 %v3811_v11, %v6722_v5  ;;  %3816 = vtanh.f32 %v1778_v49  ;;  %v1679_v6 = vmul.f32 %v6728_v32, %v1678_v56  ;;  %v6800_v49 = vld [vmem:[#allocation7 + $0x1c8] sm:$0xff]  ;;  %v6809_v58 = vld [vmem:[#allocation7 + $0x1d8] sm:$0xff]  ;;  %v6866_v21 = vld [vmem:[#allocation7 + $0x120] sm:$0xff] }
 0x389   :  { %v1804_v2 = vmul.f32 %v3813_v48, %v6724_v33  ;;  %vm1790_vm7 = vweird.f32 %v3811_v11  ;;  %vm1809_vm8 = vweird.f32 %v3813_v48  ;;  %v1815_v5 = vor.u32 1.1754944e-38, %v1814_v34  ;;  %v6815_v57 = vld [vmem:[#allocation7 + $0x1a8] sm:$0xff]  ;;  %v6851_v34 = vld [vmem:[#allocation7 + $0x178] sm:$0xff]  ;;  %v6938_v38 = vld [vmem:[#allocation7 + $0x60] sm:$0xff] }
 0x38a   :  { %v6743_v7 = vadd.f32 %v1692_v60, %v1691_v18  ;;  %v1786_v8 = vsub.f32 1.0, %v1785_v61  ;;  %v1680_v13 = vadd.f32 %v6728_v32, %v1679_v6  ;;  %vm1791_vm12 = vmor %vm1789_vm10, %vm1790_vm7  ;;  %v1834_v39 = vand.u32 2147483648, %v6735_v51  ;;  %v6818_v60 = vld [vmem:[#allocation7 + $0x1b0] sm:$0xff]  ;;  %v6827_v6 = vld [vmem:[#allocation7 + $0x188] sm:$0xff]  ;;  %9950 = vst [vmem:[#allocation35_spill] sm:$0xff] %v6938_v38 }
 0x38b   :  { %v1805_v22 = vsub.f32 1.0, %v1804_v2  ;;  %vm1810_vm14 = vmor %vm1808_vm9, %vm1809_vm8  ;;  %vm1828_vm2 = vweird.f32 %v6735_v51  ;;  %v1832_v42 = vand.u32 2147483647, %v6735_v51  ;;  %v6824_v2 = vld [vmem:[#allocation7 + $0x180] sm:$0xff] }
 0x38c   :  { %3818 = vtanh.f32 %v6743_v7  ;;  %v1787_v45 = vmul.f32 %v3811_v11, %v1786_v8  ;;  %v1684_v16 = vsel %vm6762_vm11, %v6728_v32, %v1680_v13  ;;  %v1835_v56 = vor.u32 1.1754944e-38, %v1834_v39  ;;  %v6848_v13 = vld [vmem:[#allocation7 + $0x170] sm:$0xff] }
 0x38d   :  { %v6752_v17 = vpop.eup %3814  ;;  %v1806_v27 = vmul.f32 %v3813_v48, %v1805_v22  ;;  %v1689_v30 = vsel %vm1686_vm0, %v1688_v1, %v1684_v16  ;;  %vm1833_vm4 = vcmp.eq.f32.partialorder %v1832_v42, 8.507059e+37  ;;  %v6838_v22 = vld [vmem:[#allocation7 + $0x160] sm:$0xff]  ;;  %v6887_v16 = vld [vmem:[#allocation7 + $0x118] sm:$0xff]  ;;  %v6932_v39 = vld [vmem:[#allocation7 + $0x90] sm:$0xff] }
 0x38e   :  { %v1788_v0 = vadd.f32 %v3811_v11, %v1787_v45  ;;  %v1824_v63 = vmul.f32 %v6752_v17, %v6735_v51  ;;  %v3817_v53 = vpop.eup %3816  ;;  %vm1829_vm1 = vweird.f32 %v6752_v17  ;;  %v6854_v45 = vld [vmem:[#allocation7 + $0x140] sm:$0xff]  ;;  %v6899_v1 = vld [vmem:[#allocation7 + $0xf8] sm:$0xff]  ;;  %9948 = vst [vmem:[#allocation31_spill] sm:$0xff] %v6932_v39 }
 0x38f   :  { %v1807_v15 = vadd.f32 %v3813_v48, %v1806_v27  ;;  %vm6793_vm3 = vmor %vm1828_vm2, %vm1829_vm1  ;;  %v6860_v27 = vld [vmem:[#allocation7 + $0x150] sm:$0xff]  ;;  %9937 = vst [vmem:[#allocation110_spill] sm:$0xff] %v6899_v1  ;;  %v6935_v42 = vld [vmem:[#allocation7 + $0x98] sm:$0xff] }
 0x390   :  { %v1792_v43 = vsel %vm1791_vm12, %v3811_v11, %v1788_v0  ;;  %v1825_v59 = vsub.f32 1.0, %v1824_v63  ;;  %v6812_v11 = vld [vmem:[#allocation7 + $0x1a0] sm:$0xff]  ;;  %v6869_v0 = vld [vmem:[#allocation7 + $0x128] sm:$0xff]  ;;  %v6872_v63 = vld [vmem:[#allocation7 + $0x130] sm:$0xff]  ;;  %9949 = vst [vmem:[#allocation36_spill] sm:$0xff] %v6935_v42 }
 0x391   :  { %v1797_v33 = vsel %vm1794_vm13, %v1796_v4, %v1792_v43  ;;  %v1811_v29 = vsel %vm1810_vm14, %v3813_v48, %v1807_v15  ;;  %v6821_v48 = vld [vmem:[#allocation7 + $0x1b8] sm:$0xff]  ;;  %v6881_v4 = vld [vmem:[#allocation7 + $0x108] sm:$0xff]  ;;  %v6884_v15 = vld [vmem:[#allocation7 + $0x110] sm:$0xff] }
 0x392   :  { %v3819_v23 = vpop.eup %3818  ;;  %v1816_v25 = vsel %vm1813_vm15, %v1815_v5, %v1811_v29  ;;  %v1839_v20 = vmul.f32 %v3817_v53, %v1797_v33  ;;  %v1826_v28 = vmul.f32 %v6752_v17, %v1825_v59  ;;  %v6878_v53 = vld [vmem:[#allocation7 + $0x100] sm:$0xff]  ;;  %v6893_v43 = vld [vmem:[#allocation7 + $0xe8] sm:$0xff]  ;;  %v6896_v59 = vld [vmem:[#allocation7 + $0xf0] sm:$0xff] }
 0x393   :  { %v1838_v35 = vmul.f32 %v1816_v25, %v6533_v46  ;;  %v1695_v36 = vmul.f32 %v3819_v23, %v1689_v30  ;;  %v6780_v46 = vld [vmem:[#allocation7 + $0x1e8] sm:$0xff]  ;;  %v6890_v5 = vld [vmem:[#allocation7 + $0xe0] sm:$0xff]  ;;  %9935 = vst [vmem:[#allocation93_spill] sm:$0xff] %v6893_v43  ;;  %v6908_v23 = vld [vmem:[#allocation7 + $0xd0] sm:$0xff] }
 0x394   :  { %v1827_v32 = vadd.f32 %v6752_v17, %v1826_v28  ;;  %9934 = vst [vmem:[#allocation81_spill] sm:$0xff] %v6890_v5  ;;  %v6902_v33 = vld [vmem:[#allocation7 + $0xc0] sm:$0xff]  ;;  %v6905_v29 = vld [vmem:[#allocation7 + $0xc8] sm:$0xff]  ;;  %v6911_v25 = vld [vmem:[#allocation7 + $0xd8] sm:$0xff] }
 0x395   :  { %v6771_v37 = vadd.f32 %v1839_v20, %v1838_v35  ;;  %1859 = vmatmul.f32.vlgmr.msrb.gmra.mxu0 %v1695_v36  ;;  %1879 = vmatmul.f32.vlgmr.msra.gmra.mxu1 %v1695_v36  ;;  %9936 = vst [vmem:[#allocation111_spill] sm:$0xff] %v6896_v59  ;;  %v6914_v20 = vld [vmem:[#allocation7 + $0xa0] sm:$0xff]  ;;  %v6917_v28 = vld [vmem:[#allocation7 + $0xa8] sm:$0xff]  ;;  %v6920_v30 = vld [vmem:[#allocation7 + $0xb0] sm:$0xff] }
 0x396   :  { %1899 = vmatmul.f32.vlgmr.msra.gmra.mxu2 %v1695_v36  ;;  %1919 = vmatmul.f32.vlgmr.msra.gmra.mxu3 %v1695_v36  ;;  %v1831_v51 = vsel %vm6793_vm3, %v6752_v17, %v1827_v32  ;;  %v6857_v17 = vld [vmem:[#allocation7 + $0x148] sm:$0xff]  ;;  %9938 = vst [vmem:[#allocation26_spill] sm:$0xff] %v6902_v33  ;;  %v6923_v35 = vld [vmem:[#allocation7 + $0xb8] sm:$0xff]  ;;  %v6926_v36 = vld [vmem:[#allocation7 + $0x80] sm:$0xff] }
 0x397   :  { %3820 = vtanh.f32 %v6771_v37  ;;  %2070 = vmatpush.msrb.mxu0 %v6777_v41  ;;  %2090 = vmatpush.msra.mxu1 %v6780_v46  ;;  %v1836_v61 = vsel %vm1833_vm4, %v1835_v56, %v1831_v51  ;;  %9939 = vst [vmem:[#allocation21_spill] sm:$0xff] %v6905_v29  ;;  %v6929_v32 = vld [vmem:[#allocation7 + $0x88] sm:$0xff]  ;;  %v6944_v56 = vld [vmem:[#allocation7 + $0x70] sm:$0xff] }
 0x398   :  { %2110 = vmatpush.msra.mxu2 %v6785_v9  ;;  %2130 = vmatpush.msra.mxu3 %v6788_v26  ;;  %9940 = vst [vmem:[#allocation25_spill] sm:$0xff] %v6908_v23  ;;  %v6941_v51 = vld [vmem:[#allocation7 + $0x68] sm:$0xff] }
 0x399   :  { %2071 = vmatpush.msrb.mxu0 %v6797_v47  ;;  %2091 = vmatpush.msra.mxu1 %v6800_v49  ;;  %9941 = vst [vmem:[#allocation32_spill] sm:$0xff] %v6911_v25 }
 0x39a   :  { %2111 = vmatpush.msra.mxu2 %v6806_v52  ;;  %2131 = vmatpush.msra.mxu3 %v6809_v58  ;;  %9942 = vst [vmem:[#allocation30_spill] sm:$0xff] %v6914_v20 }
 0x39b   :  { %2072 = vmatpush.msrb.mxu0 %v6812_v11  ;;  %2092 = vmatpush.msra.mxu1 %v6815_v57  ;;  %9943 = vst [vmem:[#allocation24_spill] sm:$0xff] %v6917_v28 }
 0x39c   :  { %2112 = vmatpush.msra.mxu2 %v6818_v60  ;;  %2132 = vmatpush.msra.mxu3 %v6821_v48  ;;  %9944 = vst [vmem:[#allocation28_spill] sm:$0xff] %v6920_v30 }
 0x39d   :  { %v3821_v18 = vpop.eup %3820  ;;  %2073 = vmatpush.msrb.mxu0 %v6824_v2  ;;  %2093 = vmatpush.msra.mxu1 %v6827_v6  ;;  %9945 = vst [vmem:[#allocation34_spill] sm:$0xff] %v6923_v35 }
 0x39e   :  { %v6830_v8 = vmul.f32 %v3821_v18, %v1836_v61  ;;  %2113 = vmatpush.msra.mxu2 %v6832_v3  ;;  %2133 = vmatpush.msra.mxu3 %v6835_v10  ;;  %9946 = vst [vmem:[#allocation33_spill] sm:$0xff] %v6926_v36  ;;  %v6947_v18 = vld [vmem:[#allocation7 + $0x78] sm:$0xff]  ;;  %v6950_v61 = vld [vmem:[#allocation7 + $0x40] sm:$0xff] }
 0x39f   :  { %2074 = vmatpush.msrb.mxu0 %v6838_v22  ;;  %2094 = vmatpush.msra.mxu1 %v6841_v12  ;;  %9947 = vst [vmem:[#allocation27_spill] sm:$0xff] %v6929_v32 }
 0x3a0   :  { %1939 = vmatmul.f32.vlgmr.msra.gmra.mxu0 %v6830_v8  ;;  %1959 = vmatmul.f32.vlgmr.msrb.gmra.mxu1 %v6830_v8  ;;  %9951 = vst [vmem:[#allocation38_spill] sm:$0xff] %v6941_v51 }
 0x3a1   :  { %1979 = vmatmul.f32.vlgmr.msrb.gmra.mxu2 %v6830_v8  ;;  %1999 = vmatmul.f32.vlgmr.msrb.gmra.mxu3 %v6830_v8  ;;  %9952 = vst [vmem:[#allocation39_spill] sm:$0xff] %v6944_v56 }
 0x3a2   :  { %2114 = vmatpush.msra.mxu2 %v6848_v13  ;;  %2134 = vmatpush.msra.mxu3 %v6851_v34  ;;  %9953 = vst [vmem:[#allocation40_spill] sm:$0xff] %v6947_v18 }
 0x3a3   :  { %2075 = vmatpush.msrb.mxu0 %v6854_v45  ;;  %2095 = vmatpush.msra.mxu1 %v6857_v17  ;;  %9954 = vst [vmem:[#allocation41_spill] sm:$0xff] %v6950_v61 }
 0x3a4   :  { %2115 = vmatpush.msra.mxu2 %v6860_v27  ;;  %2135 = vmatpush.msra.mxu3 %v6863_v14 }
 0x3a5   :  { %2076 = vmatpush.msrb.mxu0 %v6866_v21  ;;  %2096 = vmatpush.msra.mxu1 %v6869_v0 }
 0x3a6   :  { %2116 = vmatpush.msra.mxu2 %v6872_v63  ;;  %2136 = vmatpush.msra.mxu3 %v6875_v44 }
 0x3a7   :  { %2077 = vmatpush.msrb.mxu0 %v6878_v53  ;;  %2097 = vmatpush.msra.mxu1 %v6881_v4 }
 0x3a8   :  { %2117 = vmatpush.msra.mxu2 %v6884_v15  ;;  %2137 = vmatpush.msra.mxu3 %v6887_v16 }
 0x3a9   :  { %2078 = vmatpush.msrb.mxu0 %v6890_v5  ;;  %2098 = vmatpush.msra.mxu1 %v6893_v43 }
 0x3aa   :  { %2118 = vmatpush.msra.mxu2 %v6896_v59  ;;  %2138 = vmatpush.msra.mxu3 %v6899_v1 }
 0x3ab   :  { %2079 = vmatpush.msrb.mxu0 %v6902_v33  ;;  %2099 = vmatpush.msra.mxu1 %v6905_v29 }
 0x3ac   :  { %2119 = vmatpush.msra.mxu2 %v6908_v23  ;;  %2139 = vmatpush.msra.mxu3 %v6911_v25 }
 0x3ad   :  { %2080 = vmatpush.msrb.mxu0 %v6914_v20  ;;  %2100 = vmatpush.msra.mxu1 %v6917_v28 }
 0x3ae   :  { %2120 = vmatpush.msra.mxu2 %v6920_v30  ;;  %2140 = vmatpush.msra.mxu3 %v6923_v35 }
 0x3af   :  { %2081 = vmatpush.msrb.mxu0 %v6926_v36  ;;  %2101 = vmatpush.msra.mxu1 %v6929_v32 }
 0x3b0   :  { %2121 = vmatpush.msra.mxu2 %v6932_v39  ;;  %2141 = vmatpush.msra.mxu3 %v6935_v42  ;;  %v6953_v42 = vld [vmem:[#allocation7 + $0x48] sm:$0xff] }
 0x3b1   :  { %2082 = vmatpush.msrb.mxu0 %v6938_v38  ;;  %2102 = vmatpush.msra.mxu1 %v6941_v51  ;;  %9955 = vst [vmem:[#allocation42_spill] sm:$0xff] %v6953_v42  ;;  %v6956_v38 = vld [vmem:[#allocation7 + $0x50] sm:$0xff]  ;;  %v6959_v51 = vld [vmem:[#allocation7 + $0x58] sm:$0xff] }
 0x3b2   :  { %2122 = vmatpush.msra.mxu2 %v6944_v56  ;;  %2142 = vmatpush.msra.mxu3 %v6947_v18  ;;  %9956 = vst [vmem:[#allocation43_spill] sm:$0xff] %v6956_v38  ;;  %v6962_v56 = vld [vmem:[#allocation7 + $0x20] sm:$0xff]  ;;  %v6965_v18 = vld [vmem:[#allocation7 + $0x28] sm:$0xff] }
 0x3b3   :  { %2083 = vmatpush.msrb.mxu0 %v6950_v61  ;;  %2103 = vmatpush.msra.mxu1 %v6953_v42  ;;  %9957 = vst [vmem:[#allocation44_spill] sm:$0xff] %v6959_v51  ;;  %v6968_v61 = vld [vmem:[#allocation7 + $0x30] sm:$0xff]  ;;  %v6971_v42 = vld [vmem:[#allocation7 + $0x38] sm:$0xff] }
 0x3b4   :  { %2123 = vmatpush.msra.mxu2 %v6956_v38  ;;  %2143 = vmatpush.msra.mxu3 %v6959_v51  ;;  %9958 = vst [vmem:[#allocation45_spill] sm:$0xff] %v6962_v56  ;;  %v6974_v38 = vld [vmem:[#allocation7] sm:$0xff]  ;;  %v6977_v51 = vld [vmem:[#allocation7 + $0x8] sm:$0xff] }
 0x3b5   :  { %2084 = vmatpush.msrb.mxu0 %v6962_v56  ;;  %9959 = vst [vmem:[#allocation46_spill] sm:$0xff] %v6965_v18  ;;  %2104 = vmatpush.msra.mxu1 %v6965_v18  ;;  %v6980_v56 = vld [vmem:[#allocation7 + $0x10] sm:$0xff]  ;;  %v6983_v18 = vld [vmem:[#allocation7 + $0x18] sm:$0xff] }
 0x3b6   :  { %9960 = vst [vmem:[#allocation47_spill] sm:$0xff] %v6968_v61  ;;  %2124 = vmatpush.msra.mxu2 %v6968_v61  ;;  %2144 = vmatpush.msra.mxu3 %v6971_v42 }
 0x3b7   :  { %9961 = vst [vmem:[#allocation48_spill] sm:$0xff] %v6971_v42  ;;  %2085 = vmatpush.msrb.mxu0 %v6974_v38  ;;  %2105 = vmatpush.msra.mxu1 %v6977_v51  ;;  %v7002_v42 = vld [vmem:[#allocation11 + $0x1c0] sm:$0xff] }
 0x3b8   :  { %9962 = vst [vmem:[#allocation49_spill] sm:$0xff] %v6974_v38  ;;  %2125 = vmatpush.msra.mxu2 %v6980_v56  ;;  %2145 = vmatpush.msra.mxu3 %v6983_v18  ;;  %v6990_v38 = vld [vmem:[#allocation11 + $0x1e0] sm:$0xff] }
 0x3b9   :  { %9963 = vst [vmem:[#allocation50_spill] sm:$0xff] %v6977_v51  ;;  %2086 = vmatmul.f32.vlgmr.msrb.gmra.mxu0 %v6830_v8  ;;  %2106 = vmatmul.f32.vlgmr.msra.gmra.mxu1 %v6830_v8  ;;  %v6993_v51 = vld [vmem:[#allocation11 + $0x1e8] sm:$0xff] }
 0x3ba   :  { %9964 = vst [vmem:[#allocation51_spill] sm:$0xff] %v6980_v56  ;;  %2126 = vmatmul.f32.vlgmr.msra.gmra.mxu2 %v6830_v8  ;;  %2146 = vmatmul.f32.vlgmr.msra.gmra.mxu3 %v6830_v8  ;;  %v6996_v56 = vld [vmem:[#allocation11 + $0x1f0] sm:$0xff]  ;;  %v7005_v8 = vld [vmem:[#allocation11 + $0x1c8] sm:$0xff] }
 0x3bb   :  { %9965 = vst [vmem:[#allocation52_spill] sm:$0xff] %v6983_v18  ;;  %2217 = vmatpush.msra.mxu0 %v6990_v38  ;;  %2237 = vmatpush.msrb.mxu1 %v6993_v51  ;;  %v6999_v18 = vld [vmem:[#allocation11 + $0x1f8] sm:$0xff] }
 0x3bc   :  { %9966 = vst [vmem:[#allocation53_spill] sm:$0xff] %v6990_v38  ;;  %2257 = vmatpush.msrb.mxu2 %v6996_v56  ;;  %2277 = vmatpush.msrb.mxu3 %v6999_v18  ;;  %v7008_v38 = vld [vmem:[#allocation11 + $0x1d0] sm:$0xff] }
 0x3bd   :  { %9967 = vst [vmem:[#allocation56_spill] sm:$0xff] %v6993_v51  ;;  %2218 = vmatpush.msra.mxu0 %v7002_v42  ;;  %2238 = vmatpush.msrb.mxu1 %v7005_v8  ;;  %v7011_v51 = vld [vmem:[#allocation11 + $0x1d8] sm:$0xff] }
 0x3be   :  { %9968 = vst [vmem:[#allocation57_spill] sm:$0xff] %v6996_v56  ;;  %2258 = vmatpush.msrb.mxu2 %v7008_v38  ;;  %2278 = vmatpush.msrb.mxu3 %v7011_v51  ;;  %v7014_v56 = vld [vmem:[#allocation11 + $0x1a0] sm:$0xff] }
 0x3bf   :  { %9969 = vst [vmem:[#allocation58_spill] sm:$0xff] %v6999_v18  ;;  %2219 = vmatpush.msra.mxu0 %v7014_v56  ;;  %v7017_v18 = vld [vmem:[#allocation11 + $0x1a8] sm:$0xff] }
 0x3c0   :  { %9970 = vst [vmem:[#allocation60_spill] sm:$0xff] %v7002_v42  ;;  %2239 = vmatpush.msrb.mxu1 %v7017_v18  ;;  %v7020_v42 = vld [vmem:[#allocation11 + $0x1b0] sm:$0xff] }
 0x3c1   :  { %9971 = vst [vmem:[#allocation61_spill] sm:$0xff] %v7005_v8  ;;  %2259 = vmatpush.msrb.mxu2 %v7020_v42  ;;  %v7023_v8 = vld [vmem:[#allocation11 + $0x1b8] sm:$0xff] }
 0x3c2   :  { %9972 = vst [vmem:[#allocation62_spill] sm:$0xff] %v7008_v38  ;;  %2279 = vmatpush.msrb.mxu3 %v7023_v8  ;;  %v7026_v38 = vld [vmem:[#allocation11 + $0x180] sm:$0xff] }
 0x3c3   :  { %9973 = vst [vmem:[#allocation63_spill] sm:$0xff] %v7011_v51  ;;  %2220 = vmatpush.msra.mxu0 %v7026_v38  ;;  %v7029_v51 = vld [vmem:[#allocation11 + $0x188] sm:$0xff] }
 0x3c4   :  { %9974 = vst [vmem:[#allocation64_spill] sm:$0xff] %v7014_v56  ;;  %2240 = vmatpush.msrb.mxu1 %v7029_v51  ;;  %v7032_v56 = vld [vmem:[#allocation11 + $0x190] sm:$0xff] }
 0x3c5   :  { %9975 = vst [vmem:[#allocation65_spill] sm:$0xff] %v7017_v18  ;;  %2260 = vmatpush.msrb.mxu2 %v7032_v56  ;;  %v7035_v18 = vld [vmem:[#allocation11 + $0x198] sm:$0xff] }
 0x3c6   :  { %9976 = vst [vmem:[#allocation66_spill] sm:$0xff] %v7020_v42  ;;  %2280 = vmatpush.msrb.mxu3 %v7035_v18  ;;  %v7038_v42 = vld [vmem:[#allocation11 + $0x160] sm:$0xff] }
 0x3c7   :  { %9977 = vst [vmem:[#allocation67_spill] sm:$0xff] %v7023_v8  ;;  %2221 = vmatpush.msra.mxu0 %v7038_v42  ;;  %v7041_v8 = vld [vmem:[#allocation11 + $0x168] sm:$0xff] }
 0x3c8   :  { %9978 = vst [vmem:[#allocation68_spill] sm:$0xff] %v7026_v38  ;;  %2241 = vmatpush.msrb.mxu1 %v7041_v8  ;;  %v7044_v38 = vld [vmem:[#allocation11 + $0x170] sm:$0xff] }
 0x3c9   :  { %9979 = vst [vmem:[#allocation69_spill] sm:$0xff] %v7029_v51  ;;  %2261 = vmatpush.msrb.mxu2 %v7044_v38  ;;  %v7047_v51 = vld [vmem:[#allocation11 + $0x178] sm:$0xff] }
 0x3ca   :  { %9980 = vst [vmem:[#allocation70_spill] sm:$0xff] %v7032_v56  ;;  %2281 = vmatpush.msrb.mxu3 %v7047_v51  ;;  %v7050_v56 = vld [vmem:[#allocation11 + $0x140] sm:$0xff] }
 0x3cb   :  { %9981 = vst [vmem:[#allocation71_spill] sm:$0xff] %v7035_v18  ;;  %2222 = vmatpush.msra.mxu0 %v7050_v56  ;;  %v7053_v18 = vld [vmem:[#allocation11 + $0x148] sm:$0xff] }
 0x3cc   :  { %9982 = vst [vmem:[#allocation72_spill] sm:$0xff] %v7038_v42  ;;  %2242 = vmatpush.msrb.mxu1 %v7053_v18  ;;  %v7056_v42 = vld [vmem:[#allocation11 + $0x150] sm:$0xff] }
 0x3cd   :  { %9983 = vst [vmem:[#allocation74_spill] sm:$0xff] %v7041_v8  ;;  %2262 = vmatpush.msrb.mxu2 %v7056_v42  ;;  %v7059_v8 = vld [vmem:[#allocation11 + $0x158] sm:$0xff] }
 0x3ce   :  { %9984 = vst [vmem:[#allocation75_spill] sm:$0xff] %v7044_v38  ;;  %2282 = vmatpush.msrb.mxu3 %v7059_v8  ;;  %v7062_v38 = vld [vmem:[#allocation11 + $0x120] sm:$0xff] }
 0x3cf   :  { %9985 = vst [vmem:[#allocation76_spill] sm:$0xff] %v7047_v51  ;;  %2223 = vmatpush.msra.mxu0 %v7062_v38  ;;  %v7065_v51 = vld [vmem:[#allocation11 + $0x128] sm:$0xff] }
 0x3d0   :  { %9986 = vst [vmem:[#allocation77_spill] sm:$0xff] %v7050_v56  ;;  %2243 = vmatpush.msrb.mxu1 %v7065_v51  ;;  %v7068_v56 = vld [vmem:[#allocation11 + $0x130] sm:$0xff] }
 0x3d1   :  { %9987 = vst [vmem:[#allocation78_spill] sm:$0xff] %v7053_v18  ;;  %2263 = vmatpush.msrb.mxu2 %v7068_v56  ;;  %v7071_v18 = vld [vmem:[#allocation11 + $0x138] sm:$0xff] }
 0x3d2   :  { %9988 = vst [vmem:[#allocation79_spill] sm:$0xff] %v7056_v42  ;;  %2283 = vmatpush.msrb.mxu3 %v7071_v18  ;;  %v7074_v42 = vld [vmem:[#allocation11 + $0x100] sm:$0xff] }
 0x3d3   :  { %9989 = vst [vmem:[#allocation80_spill] sm:$0xff] %v7059_v8  ;;  %2224 = vmatpush.msra.mxu0 %v7074_v42  ;;  %v7077_v8 = vld [vmem:[#allocation11 + $0x108] sm:$0xff] }
 0x3d4   :  { %9990 = vst [vmem:[#allocation82_spill] sm:$0xff] %v7062_v38  ;;  %2244 = vmatpush.msrb.mxu1 %v7077_v8  ;;  %v7080_v38 = vld [vmem:[#allocation11 + $0x110] sm:$0xff] }
 0x3d5   :  { %9991 = vst [vmem:[#allocation83_spill] sm:$0xff] %v7065_v51  ;;  %2264 = vmatpush.msrb.mxu2 %v7080_v38  ;;  %v7083_v51 = vld [vmem:[#allocation11 + $0x118] sm:$0xff] }
 0x3d6   :  { %9992 = vst [vmem:[#allocation84_spill] sm:$0xff] %v7068_v56  ;;  %2284 = vmatpush.msrb.mxu3 %v7083_v51  ;;  %v7086_v56 = vld [vmem:[#allocation11 + $0xe0] sm:$0xff] }
 0x3d7   :  { %9993 = vst [vmem:[#allocation85_spill] sm:$0xff] %v7071_v18  ;;  %2225 = vmatpush.msra.mxu0 %v7086_v56  ;;  %v7089_v18 = vld [vmem:[#allocation11 + $0xe8] sm:$0xff] }
 0x3d8   :  { %9994 = vst [vmem:[#allocation86_spill] sm:$0xff] %v7074_v42  ;;  %2245 = vmatpush.msrb.mxu1 %v7089_v18  ;;  %v7092_v42 = vld [vmem:[#allocation11 + $0xf0] sm:$0xff] }
 0x3d9   :  { %9995 = vst [vmem:[#allocation87_spill] sm:$0xff] %v7077_v8  ;;  %2265 = vmatpush.msrb.mxu2 %v7092_v42  ;;  %v7095_v8 = vld [vmem:[#allocation11 + $0xf8] sm:$0xff] }
 0x3da   :  { %9996 = vst [vmem:[#allocation88_spill] sm:$0xff] %v7080_v38  ;;  %2285 = vmatpush.msrb.mxu3 %v7095_v8  ;;  %v7098_v38 = vld [vmem:[#allocation11 + $0xc0] sm:$0xff] }
 0x3db   :  { %9997 = vst [vmem:[#allocation89_spill] sm:$0xff] %v7083_v51  ;;  %2226 = vmatpush.msra.mxu0 %v7098_v38  ;;  %v7101_v51 = vld [vmem:[#allocation11 + $0xc8] sm:$0xff] }
 0x3dc   :  { %9998 = vst [vmem:[#allocation92_spill] sm:$0xff] %v7086_v56  ;;  %2246 = vmatpush.msrb.mxu1 %v7101_v51  ;;  %v7104_v56 = vld [vmem:[#allocation11 + $0xd0] sm:$0xff] }
 0x3dd   :  { %9999 = vst [vmem:[#allocation94_spill] sm:$0xff] %v7089_v18  ;;  %2266 = vmatpush.msrb.mxu2 %v7104_v56  ;;  %v7107_v18 = vld [vmem:[#allocation11 + $0xd8] sm:$0xff] }
 0x3de   :  { %10000 = vst [vmem:[#allocation95_spill] sm:$0xff] %v7092_v42  ;;  %2286 = vmatpush.msrb.mxu3 %v7107_v18  ;;  %v7110_v42 = vld [vmem:[#allocation11 + $0xa0] sm:$0xff] }
 0x3df   :  { %10001 = vst [vmem:[#allocation96_spill] sm:$0xff] %v7095_v8  ;;  %2227 = vmatpush.msra.mxu0 %v7110_v42  ;;  %v7113_v8 = vld [vmem:[#allocation11 + $0xa8] sm:$0xff] }
 0x3e0   :  { %10002 = vst [vmem:[#allocation97_spill] sm:$0xff] %v7098_v38  ;;  %2247 = vmatpush.msrb.mxu1 %v7113_v8  ;;  %v7116_v38 = vld [vmem:[#allocation11 + $0xb0] sm:$0xff] }
 0x3e1   :  { %10003 = vst [vmem:[#allocation98_spill] sm:$0xff] %v7101_v51  ;;  %2267 = vmatpush.msrb.mxu2 %v7116_v38  ;;  %v7119_v51 = vld [vmem:[#allocation11 + $0xb8] sm:$0xff] }
 0x3e2   :  { %10004 = vst [vmem:[#allocation99_spill] sm:$0xff] %v7104_v56  ;;  %2287 = vmatpush.msrb.mxu3 %v7119_v51  ;;  %v7122_v56 = vld [vmem:[#allocation11 + $0x80] sm:$0xff] }
 0x3e3   :  { %10005 = vst [vmem:[#allocation100_spill] sm:$0xff] %v7107_v18  ;;  %2228 = vmatpush.msra.mxu0 %v7122_v56  ;;  %v7125_v18 = vld [vmem:[#allocation11 + $0x88] sm:$0xff] }
 0x3e4   :  { %10006 = vst [vmem:[#allocation101_spill] sm:$0xff] %v7110_v42  ;;  %2248 = vmatpush.msrb.mxu1 %v7125_v18  ;;  %v7128_v42 = vld [vmem:[#allocation11 + $0x90] sm:$0xff] }
 0x3e5   :  { %10007 = vst [vmem:[#allocation102_spill] sm:$0xff] %v7113_v8  ;;  %2268 = vmatpush.msrb.mxu2 %v7128_v42  ;;  %v7131_v8 = vld [vmem:[#allocation11 + $0x98] sm:$0xff] }
 0x3e6   :  { %10008 = vst [vmem:[#allocation103_spill] sm:$0xff] %v7116_v38  ;;  %2288 = vmatpush.msrb.mxu3 %v7131_v8  ;;  %v7134_v38 = vld [vmem:[#allocation11 + $0x60] sm:$0xff] }
 0x3e7   :  { %10009 = vst [vmem:[#allocation104_spill] sm:$0xff] %v7119_v51  ;;  %2229 = vmatpush.msra.mxu0 %v7134_v38  ;;  %v7137_v51 = vld [vmem:[#allocation11 + $0x68] sm:$0xff] }
 0x3e8   :  { %10010 = vst [vmem:[#allocation106_spill] sm:$0xff] %v7122_v56  ;;  %2249 = vmatpush.msrb.mxu1 %v7137_v51  ;;  %v7140_v56 = vld [vmem:[#allocation11 + $0x70] sm:$0xff] }
 0x3e9   :  { %10011 = vst [vmem:[#allocation107_spill] sm:$0xff] %v7125_v18  ;;  %2269 = vmatpush.msrb.mxu2 %v7140_v56  ;;  %v7143_v18 = vld [vmem:[#allocation11 + $0x78] sm:$0xff] }
 0x3ea   :  { %10012 = vst [vmem:[#allocation108_spill] sm:$0xff] %v7128_v42  ;;  %2289 = vmatpush.msrb.mxu3 %v7143_v18  ;;  %v7146_v42 = vld [vmem:[#allocation11 + $0x40] sm:$0xff] }
 0x3eb   :  { %10013 = vst [vmem:[#allocation109_spill] sm:$0xff] %v7131_v8  ;;  %2230 = vmatpush.msra.mxu0 %v7146_v42  ;;  %v7149_v8 = vld [vmem:[#allocation11 + $0x48] sm:$0xff] }
 0x3ec   :  { %10014 = vst [vmem:[#allocation112_spill] sm:$0xff] %v7134_v38  ;;  %2250 = vmatpush.msrb.mxu1 %v7149_v8  ;;  %v7152_v38 = vld [vmem:[#allocation11 + $0x50] sm:$0xff] }
 0x3ed   :  { %10015 = vst [vmem:[#allocation113_spill] sm:$0xff] %v7137_v51  ;;  %2270 = vmatpush.msrb.mxu2 %v7152_v38  ;;  %v7155_v51 = vld [vmem:[#allocation11 + $0x58] sm:$0xff] }
 0x3ee   :  { %10016 = vst [vmem:[#allocation114_spill] sm:$0xff] %v7140_v56  ;;  %2290 = vmatpush.msrb.mxu3 %v7155_v51  ;;  %v7158_v56 = vld [vmem:[#allocation11 + $0x20] sm:$0xff] }
 0x3ef   :  { %10017 = vst [vmem:[#allocation116_spill] sm:$0xff] %v7143_v18  ;;  %2231 = vmatpush.msra.mxu0 %v7158_v56  ;;  %v7161_v18 = vld [vmem:[#allocation11 + $0x28] sm:$0xff] }
 0x3f0   :  { %10018 = vst [vmem:[#allocation117_spill] sm:$0xff] %v7146_v42  ;;  %2251 = vmatpush.msrb.mxu1 %v7161_v18  ;;  %v7164_v42 = vld [vmem:[#allocation11 + $0x30] sm:$0xff] }
 0x3f1   :  { %10019 = vst [vmem:[#allocation118_spill] sm:$0xff] %v7149_v8  ;;  %2271 = vmatpush.msrb.mxu2 %v7164_v42  ;;  %v7167_v8 = vld [vmem:[#allocation11 + $0x38] sm:$0xff] }
 0x3f2   :  { %10020 = vst [vmem:[#allocation119_spill] sm:$0xff] %v7152_v38  ;;  %2291 = vmatpush.msrb.mxu3 %v7167_v8  ;;  %v7170_v38 = vld [vmem:[#allocation11] sm:$0xff] }
 0x3f3   :  { %10021 = vst [vmem:[#allocation120_spill] sm:$0xff] %v7155_v51  ;;  %2232 = vmatpush.msra.mxu0 %v7170_v38  ;;  %v7173_v51 = vld [vmem:[#allocation11 + $0x8] sm:$0xff] }
 0x3f4   :  { %10022 = vst [vmem:[#allocation121_spill] sm:$0xff] %v7158_v56  ;;  %2252 = vmatpush.msrb.mxu1 %v7173_v51  ;;  %v7176_v56 = vld [vmem:[#allocation11 + $0x10] sm:$0xff] }
 0x3f5   :  { %10023 = vst [vmem:[#allocation122_spill] sm:$0xff] %v7161_v18  ;;  %2272 = vmatpush.msrb.mxu2 %v7176_v56  ;;  %v7179_v18 = vld [vmem:[#allocation11 + $0x18] sm:$0xff] }
 0x3f6   :  { %10024 = vst [vmem:[#allocation123_spill] sm:$0xff] %v7164_v42  ;;  %2292 = vmatpush.msrb.mxu3 %v7179_v18  ;;  %v7182_v42 = vld [vmem:[#allocation10 + $0x1e0] sm:$0xff] }
 0x3f7   :  { %10025 = vst [vmem:[#allocation124_spill] sm:$0xff] %v7167_v8  ;;  %2297 = vmatpush.msrb.mxu0 %v7182_v42  ;;  %v7185_v8 = vld [vmem:[#allocation10 + $0x1e8] sm:$0xff] }
 0x3f8   :  { %10026 = vst [vmem:[#allocation125_spill] sm:$0xff] %v7170_v38  ;;  %2317 = vmatpush.msra.mxu1 %v7185_v8  ;;  %v7188_v38 = vld [vmem:[#allocation10 + $0x1f0] sm:$0xff] }
 0x3f9   :  { %10027 = vst [vmem:[#allocation126_spill] sm:$0xff] %v7173_v51  ;;  %2337 = vmatpush.msra.mxu2 %v7188_v38  ;;  %v7191_v51 = vld [vmem:[#allocation10 + $0x1f8] sm:$0xff] }
 0x3fa   :  { %10028 = vst [vmem:[#allocation127_spill] sm:$0xff] %v7176_v56  ;;  %2357 = vmatpush.msra.mxu3 %v7191_v51  ;;  %v7194_v56 = vld [vmem:[#allocation10 + $0x1c0] sm:$0xff] }
 0x3fb   :  { %10029 = vst [vmem:[#allocation128_spill] sm:$0xff] %v7179_v18  ;;  %2298 = vmatpush.msrb.mxu0 %v7194_v56  ;;  %v7197_v18 = vld [vmem:[#allocation10 + $0x1c8] sm:$0xff] }
 0x3fc   :  { %10030 = vst [vmem:[#allocation129_spill] sm:$0xff] %v7182_v42  ;;  %2318 = vmatpush.msra.mxu1 %v7197_v18  ;;  %v7200_v42 = vld [vmem:[#allocation10 + $0x1d0] sm:$0xff] }
 0x3fd   :  { %10031 = vst [vmem:[#allocation132_spill] sm:$0xff] %v7185_v8  ;;  %2338 = vmatpush.msra.mxu2 %v7200_v42  ;;  %v7203_v8 = vld [vmem:[#allocation10 + $0x1d8] sm:$0xff] }
 0x3fe   :  { %10032 = vst [vmem:[#allocation133_spill] sm:$0xff] %v7188_v38  ;;  %2358 = vmatpush.msra.mxu3 %v7203_v8  ;;  %v7206_v38 = vld [vmem:[#allocation10 + $0x1a0] sm:$0xff] }
 0x3ff   :  { %10033 = vst [vmem:[#allocation134_spill] sm:$0xff] %v7191_v51  ;;  %2299 = vmatpush.msrb.mxu0 %v7206_v38  ;;  %v7209_v51 = vld [vmem:[#allocation10 + $0x1a8] sm:$0xff] }
 0x400   :  { %10034 = vst [vmem:[#allocation137_spill] sm:$0xff] %v7194_v56  ;;  %2319 = vmatpush.msra.mxu1 %v7209_v51  ;;  %v7212_v56 = vld [vmem:[#allocation10 + $0x1b0] sm:$0xff] }
 0x401   :  { %10035 = vst [vmem:[#allocation138_spill] sm:$0xff] %v7197_v18  ;;  %2339 = vmatpush.msra.mxu2 %v7212_v56  ;;  %v7215_v18 = vld [vmem:[#allocation10 + $0x1b8] sm:$0xff] }
 0x402   :  { %10036 = vst [vmem:[#allocation139_spill] sm:$0xff] %v7200_v42  ;;  %2359 = vmatpush.msra.mxu3 %v7215_v18  ;;  %v7218_v42 = vld [vmem:[#allocation10 + $0x180] sm:$0xff] }
 0x403   :  { %10037 = vst [vmem:[#allocation140_spill] sm:$0xff] %v7203_v8  ;;  %2300 = vmatpush.msrb.mxu0 %v7218_v42  ;;  %v7221_v8 = vld [vmem:[#allocation10 + $0x188] sm:$0xff] }
 0x404   :  { %10038 = vst [vmem:[#allocation141_spill] sm:$0xff] %v7206_v38  ;;  %2320 = vmatpush.msra.mxu1 %v7221_v8  ;;  %v7224_v38 = vld [vmem:[#allocation10 + $0x190] sm:$0xff] }
 0x405   :  { %10039 = vst [vmem:[#allocation142_spill] sm:$0xff] %v7209_v51  ;;  %2340 = vmatpush.msra.mxu2 %v7224_v38  ;;  %v7227_v51 = vld [vmem:[#allocation10 + $0x198] sm:$0xff] }
 0x406   :  { %10040 = vst [vmem:[#allocation143_spill] sm:$0xff] %v7212_v56  ;;  %2360 = vmatpush.msra.mxu3 %v7227_v51  ;;  %v7230_v56 = vld [vmem:[#allocation10 + $0x160] sm:$0xff] }
 0x407   :  { %10041 = vst [vmem:[#allocation144_spill] sm:$0xff] %v7215_v18  ;;  %2301 = vmatpush.msrb.mxu0 %v7230_v56  ;;  %v7233_v18 = vld [vmem:[#allocation10 + $0x168] sm:$0xff] }
 0x408   :  { %10042 = vst [vmem:[#allocation145_spill] sm:$0xff] %v7218_v42  ;;  %2321 = vmatpush.msra.mxu1 %v7233_v18  ;;  %v7236_v42 = vld [vmem:[#allocation10 + $0x170] sm:$0xff] }
 0x409   :  { %10043 = vst [vmem:[#allocation146_spill] sm:$0xff] %v7221_v8  ;;  %2341 = vmatpush.msra.mxu2 %v7236_v42  ;;  %v7239_v8 = vld [vmem:[#allocation10 + $0x178] sm:$0xff] }
 0x40a   :  { %10044 = vst [vmem:[#allocation147_spill] sm:$0xff] %v7224_v38  ;;  %2361 = vmatpush.msra.mxu3 %v7239_v8  ;;  %v7242_v38 = vld [vmem:[#allocation10 + $0x140] sm:$0xff] }
 0x40b   :  { %10045 = vst [vmem:[#allocation148_spill] sm:$0xff] %v7227_v51  ;;  %2302 = vmatpush.msrb.mxu0 %v7242_v38  ;;  %v7245_v51 = vld [vmem:[#allocation10 + $0x148] sm:$0xff] }
 0x40c   :  { %10046 = vst [vmem:[#allocation149_spill] sm:$0xff] %v7230_v56  ;;  %2322 = vmatpush.msra.mxu1 %v7245_v51  ;;  %v7248_v56 = vld [vmem:[#allocation10 + $0x150] sm:$0xff] }
 0x40d   :  { %10047 = vst [vmem:[#allocation151_spill] sm:$0xff] %v7233_v18  ;;  %2342 = vmatpush.msra.mxu2 %v7248_v56  ;;  %v7251_v18 = vld [vmem:[#allocation10 + $0x158] sm:$0xff] }
 0x40e   :  { %10048 = vst [vmem:[#allocation152_spill] sm:$0xff] %v7236_v42  ;;  %2362 = vmatpush.msra.mxu3 %v7251_v18  ;;  %v7254_v42 = vld [vmem:[#allocation10 + $0x120] sm:$0xff] }
 0x40f   :  { %10049 = vst [vmem:[#allocation153_spill] sm:$0xff] %v7239_v8  ;;  %2303 = vmatpush.msrb.mxu0 %v7254_v42  ;;  %v7257_v8 = vld [vmem:[#allocation10 + $0x128] sm:$0xff] }
 0x410   :  { %10050 = vst [vmem:[#allocation156_spill] sm:$0xff] %v7242_v38  ;;  %2323 = vmatpush.msra.mxu1 %v7257_v8  ;;  %v7260_v38 = vld [vmem:[#allocation10 + $0x130] sm:$0xff] }
 0x411   :  { %10051 = vst [vmem:[#allocation158_spill] sm:$0xff] %v7245_v51  ;;  %2343 = vmatpush.msra.mxu2 %v7260_v38  ;;  %v7263_v51 = vld [vmem:[#allocation10 + $0x138] sm:$0xff] }
 0x412   :  { %10052 = vst [vmem:[#allocation159_spill] sm:$0xff] %v7248_v56  ;;  %2363 = vmatpush.msra.mxu3 %v7263_v51  ;;  %v7266_v56 = vld [vmem:[#allocation10 + $0x100] sm:$0xff]  ;;  %v1880_v61 = vpop.f32.mrf.mxu1 }
 0x413   :  { %10053 = vst [vmem:[#allocation160_spill] sm:$0xff] %v7251_v18  ;;  %2304 = vmatpush.msrb.mxu0 %v7266_v56  ;;  %v7269_v18 = vld [vmem:[#allocation10 + $0x108] sm:$0xff] }
 0x414   :  { %10054 = vst [vmem:[#allocation161_spill] sm:$0xff] %v7254_v42  ;;  %2324 = vmatpush.msra.mxu1 %v7269_v18  ;;  %v7272_v42 = vld [vmem:[#allocation10 + $0x110] sm:$0xff] }
 0x415   :  { %10055 = vst [vmem:[#allocation162_spill] sm:$0xff] %v7257_v8  ;;  %2344 = vmatpush.msra.mxu2 %v7272_v42  ;;  %v7275_v8 = vld [vmem:[#allocation10 + $0x118] sm:$0xff] }
 0x416   :  { %10056 = vst [vmem:[#allocation163_spill] sm:$0xff] %v7260_v38  ;;  %2364 = vmatpush.msra.mxu3 %v7275_v8  ;;  %v7278_v38 = vld [vmem:[#allocation10 + $0xe0] sm:$0xff] }
 0x417   :  { %10057 = vst [vmem:[#allocation164_spill] sm:$0xff] %v7263_v51  ;;  %2305 = vmatpush.msrb.mxu0 %v7278_v38  ;;  %v7281_v51 = vld [vmem:[#allocation10 + $0xe8] sm:$0xff] }
 0x418   :  { %10058 = vst [vmem:[#allocation165_spill] sm:$0xff] %v7266_v56  ;;  %2325 = vmatpush.msra.mxu1 %v7281_v51  ;;  %v7284_v56 = vld [vmem:[#allocation10 + $0xf0] sm:$0xff] }
 0x419   :  { %10059 = vst [vmem:[#allocation166_spill] sm:$0xff] %v7269_v18  ;;  %2345 = vmatpush.msra.mxu2 %v7284_v56  ;;  %v7287_v18 = vld [vmem:[#allocation10 + $0xf8] sm:$0xff]  ;;  %v1920_v39 = vpop.f32.mrf.mxu3 }
 0x41a   :  { %10060 = vst [vmem:[#allocation167_spill] sm:$0xff] %v7272_v42  ;;  %2365 = vmatpush.msra.mxu3 %v7287_v18  ;;  %v7290_v42 = vld [vmem:[#allocation10 + $0xc0] sm:$0xff] }
 0x41b   :  { %10061 = vst [vmem:[#allocation169_spill] sm:$0xff] %v7275_v8  ;;  %2306 = vmatpush.msrb.mxu0 %v7290_v42  ;;  %v7293_v8 = vld [vmem:[#allocation10 + $0xc8] sm:$0xff] }
 0x41c   :  { %10062 = vst [vmem:[#allocation170_spill] sm:$0xff] %v7278_v38  ;;  %2326 = vmatpush.msra.mxu1 %v7293_v8  ;;  %v7296_v38 = vld [vmem:[#allocation10 + $0xd0] sm:$0xff] }
 0x41d   :  { %10063 = vst [vmem:[#allocation173_spill] sm:$0xff] %v7281_v51  ;;  %2346 = vmatpush.msra.mxu2 %v7296_v38  ;;  %v7299_v51 = vld [vmem:[#allocation10 + $0xd8] sm:$0xff]  ;;  %v1960_v32 = vpop.f32.mrf.mxu1 }
 0x41e   :  { %10064 = vst [vmem:[#allocation174_spill] sm:$0xff] %v7284_v56  ;;  %2366 = vmatpush.msra.mxu3 %v7299_v51  ;;  %v7302_v56 = vld [vmem:[#allocation10 + $0xa0] sm:$0xff]  ;;  %v1961_v35 = vadd.f32 %v1960_v32, %v1880_v61 }
 0x41f   :  { %10065 = vst [vmem:[#allocation175_spill] sm:$0xff] %v7287_v18  ;;  %2307 = vmatpush.msrb.mxu0 %v7302_v56  ;;  %v7305_v18 = vld [vmem:[#allocation10 + $0xa8] sm:$0xff] }
 0x420   :  { %10066 = vst [vmem:[#allocation176_spill] sm:$0xff] %v7290_v42  ;;  %2327 = vmatpush.msra.mxu1 %v7305_v18  ;;  %v7308_v42 = vld [vmem:[#allocation10 + $0xb0] sm:$0xff]  ;;  %v2004_v30 = vadd.f32 %v1961_v35, %v9920_v62 }
 0x421   :  { %10067 = vst [vmem:[#allocation177_spill] sm:$0xff] %v7293_v8  ;;  %2347 = vmatpush.msra.mxu2 %v7308_v42  ;;  %v7311_v8 = vld [vmem:[#allocation10 + $0xb8] sm:$0xff] }
 0x422   :  { %10068 = vst [vmem:[#allocation178_spill] sm:$0xff] %v7296_v38  ;;  %2367 = vmatpush.msra.mxu3 %v7311_v8  ;;  %v7314_v38 = vld [vmem:[#allocation10 + $0x80] sm:$0xff]  ;;  %v3664_v20 = vmul.f32 -1.442695, %v2004_v30 }
 0x423   :  { %10069 = vst [vmem:[#allocation179_spill] sm:$0xff] %v7299_v51  ;;  %2308 = vmatpush.msrb.mxu0 %v7314_v38  ;;  %v7317_v51 = vld [vmem:[#allocation10 + $0x88] sm:$0xff] }
 0x424   :  { %10070 = vst [vmem:[#allocation180_spill] sm:$0xff] %v7302_v56  ;;  %2328 = vmatpush.msra.mxu1 %v7317_v51  ;;  %v7320_v56 = vld [vmem:[#allocation10 + $0x90] sm:$0xff] }
 0x425   :  { %10071 = vst [vmem:[#allocation181_spill] sm:$0xff] %v7305_v18  ;;  %2348 = vmatpush.msra.mxu2 %v7320_v56  ;;  %v7323_v18 = vld [vmem:[#allocation10 + $0x98] sm:$0xff] }
 0x426   :  { %10072 = vst [vmem:[#allocation59_spill] sm:$0xff] %v7308_v42  ;;  %2368 = vmatpush.msra.mxu3 %v7323_v18  ;;  %v7326_v42 = vld [vmem:[#allocation10 + $0x60] sm:$0xff] }
 0x427   :  { %10073 = vst [vmem:[#allocation73_spill] sm:$0xff] %v7311_v8  ;;  %2309 = vmatpush.msrb.mxu0 %v7326_v42  ;;  %v7329_v8 = vld [vmem:[#allocation10 + $0x68] sm:$0xff] }
 0x428   :  { %10074 = vst [vmem:[#allocation91_spill] sm:$0xff] %v7314_v38  ;;  %2329 = vmatpush.msra.mxu1 %v7329_v8  ;;  %v7332_v38 = vld [vmem:[#allocation10 + $0x70] sm:$0xff] }
 0x429   :  { %10075 = vst [vmem:[#allocation90_spill] sm:$0xff] %v7317_v51  ;;  %2349 = vmatpush.msra.mxu2 %v7332_v38  ;;  %v7335_v51 = vld [vmem:[#allocation10 + $0x78] sm:$0xff] }
 0x42a   :  { %10076 = vst [vmem:[#allocation189_spill] sm:$0xff] %v7320_v56  ;;  %2369 = vmatpush.msra.mxu3 %v7335_v51  ;;  %v7338_v56 = vld [vmem:[#allocation10 + $0x40] sm:$0xff] }
 0x42b   :  { %10077 = vst [vmem:[#allocation190_spill] sm:$0xff] %v7323_v18  ;;  %2310 = vmatpush.msrb.mxu0 %v7338_v56  ;;  %v7341_v18 = vld [vmem:[#allocation10 + $0x48] sm:$0xff] }
 0x42c   :  { %10078 = vst [vmem:[#allocation191_spill] sm:$0xff] %v7326_v42  ;;  %2330 = vmatpush.msra.mxu1 %v7341_v18  ;;  %v7344_v42 = vld [vmem:[#allocation10 + $0x50] sm:$0xff] }
 0x42d   :  { %10079 = vst [vmem:[#allocation192_spill] sm:$0xff] %v7329_v8  ;;  %2350 = vmatpush.msra.mxu2 %v7344_v42  ;;  %v7347_v8 = vld [vmem:[#allocation10 + $0x58] sm:$0xff] }
 0x42e   :  { %10080 = vst [vmem:[#allocation193_spill] sm:$0xff] %v7332_v38  ;;  %2370 = vmatpush.msra.mxu3 %v7347_v8  ;;  %v7350_v38 = vld [vmem:[#allocation10 + $0x20] sm:$0xff] }
 0x42f   :  { %10081 = vst [vmem:[#allocation194_spill] sm:$0xff] %v7335_v51  ;;  %2311 = vmatpush.msrb.mxu0 %v7350_v38  ;;  %v7353_v51 = vld [vmem:[#allocation10 + $0x28] sm:$0xff] }
 0x430   :  { %10082 = vst [vmem:[#allocation195_spill] sm:$0xff] %v7338_v56  ;;  %2331 = vmatpush.msra.mxu1 %v7353_v51  ;;  %v7356_v56 = vld [vmem:[#allocation10 + $0x30] sm:$0xff] }
 0x431   :  { %10083 = vst [vmem:[#allocation196_spill] sm:$0xff] %v7341_v18  ;;  %2351 = vmatpush.msra.mxu2 %v7356_v56  ;;  %v7359_v18 = vld [vmem:[#allocation10 + $0x38] sm:$0xff] }
 0x432   :  { %10084 = vst [vmem:[#allocation197_spill] sm:$0xff] %v7344_v42  ;;  %2371 = vmatpush.msra.mxu3 %v7359_v18  ;;  %v7362_v42 = vld [vmem:[#allocation10] sm:$0xff] }
 0x433   :  { %10085 = vst [vmem:[#allocation198_spill] sm:$0xff] %v7347_v8  ;;  %2312 = vmatpush.msrb.mxu0 %v7362_v42  ;;  %v7365_v8 = vld [vmem:[#allocation10 + $0x8] sm:$0xff] }
 0x434   :  { %10086 = vst [vmem:[#allocation199_spill] sm:$0xff] %v7350_v38  ;;  %2332 = vmatpush.msra.mxu1 %v7365_v8  ;;  %v7368_v38 = vld [vmem:[#allocation10 + $0x10] sm:$0xff] }
 0x435   :  { %10087 = vst [vmem:[#allocation200_spill] sm:$0xff] %v7353_v51  ;;  %2352 = vmatpush.msra.mxu2 %v7368_v38  ;;  %v7371_v51 = vld [vmem:[#allocation10 + $0x18] sm:$0xff] }
 0x436   :  { %10088 = vst [vmem:[#allocation201_spill] sm:$0xff] %v7356_v56  ;;  %2372 = vmatpush.msra.mxu3 %v7371_v51  ;;  %v1860_v56 = vpop.f32.mrf.mxu0 }
 0x437   :  { %10089 = vst [vmem:[#allocation202_spill] sm:$0xff] %v7359_v18 }
 0x438   :  { %10090 = vst [vmem:[#allocation203_spill] sm:$0xff] %v7362_v42 }
 0x439   :  { %10091 = vst [vmem:[#allocation204_spill] sm:$0xff] %v7365_v8  ;;  %v1900_v8 = vpop.f32.mrf.mxu2 }
 0x43a   :  { %10092 = vst [vmem:[#allocation205_spill] sm:$0xff] %v7368_v38  ;;  %v2000_v38 = vpop.f32.mrf.mxu3 }
 0x43b   :  { %10093 = vst [vmem:[#allocation206_spill] sm:$0xff] %v7371_v51  ;;  %v2001_v25 = vadd.f32 %v2000_v38, %v1920_v39 }
 0x43d   :  { %v2006_v51 = vadd.f32 %v2001_v25, %v9921_v31  ;;  %v10094_v25 = vld [vmem:[#allocation130_spill] sm:$0xff] }
 0x43e   :  { %v1940_v18 = vpop.f32.mrf.mxu0  ;;  %v431_v38 = vadd.f32 %v10094_v25, %v9922_v50 }
 0x43f   :  { %v1941_v36 = vadd.f32 %v1940_v18, %v1860_v56  ;;  %v3665_v23 = vmul.f32 -1.442695, %v2006_v51  ;;  %v2107_v18 = vpop.f32.mrf.mxu1 }
 0x441   :  { %v2003_v42 = vadd.f32 %v1941_v36, %v9919_v40  ;;  %v1980_v59 = vpop.f32.mrf.mxu2 }
 0x442   :  { %v1981_v36 = vadd.f32 %v1980_v59, %v1900_v8 }
 0x443   :  { %v3663_v28 = vmul.f32 -1.442695, %v2003_v42 }
 0x444   :  { %v2005_v42 = vadd.f32 %v1981_v36, %v9928_v19 }
 0x445   :  { %3822 = vpow2.f32 %v3663_v28 }
 0x446   :  { %3824 = vpow2.f32 %v3664_v20  ;;  %v2087_v59 = vpop.f32.mrf.mxu0 }
 0x447   :  { %3826 = vpow2.f32 %v3665_v23  ;;  %v2150_v36 = vadd.f32 %v2087_v59, %v431_v38 }
 0x449   :  { %v3666_v25 = vmul.f32 -1.442695, %v2150_v36 }
 0x44b   :  { %v3823_v29 = vpop.eup %3822 }
 0x44c   :  { %v3825_v33 = vpop.eup %3824  ;;  %v2010_v1 = vadd.f32 1.0, %v3823_v29  ;;  %v10095_v29 = vld [vmem:[#allocation136_spill] sm:$0xff] }
 0x44d   :  { %v2029_v32 = vadd.f32 1.0, %v3825_v33  ;;  %v3827_v35 = vpop.eup %3826  ;;  %v472_v23 = vadd.f32 %v10095_v29, %v9924_v54  ;;  %v10096_v29 = vld [vmem:[#allocation154_spill] sm:$0xff] }
 0x44e   :  { %3828 = vrcp.f32 %v2010_v1  ;;  %v7378_v30 = vadd.f32 1.0, %v3827_v35  ;;  %v2020_v56 = vand.u32 2147483647, %v2010_v1  ;;  %v2022_v8 = vand.u32 2147483648, %v2010_v1 }
 0x44f   :  { %3830 = vrcp.f32 %v2029_v32  ;;  %v2151_v35 = vadd.f32 %v2107_v18, %v472_v23  ;;  %v2041_v19 = vand.u32 2147483648, %v2029_v32  ;;  %v2039_v62 = vand.u32 2147483647, %v2029_v32 }
 0x450   :  { %3832 = vrcp.f32 %v7378_v30  ;;  %vm2035_vm7 = vweird.f32 %v2029_v32  ;;  %vm2016_vm8 = vweird.f32 %v2010_v1  ;;  %vm2021_vm11 = vcmp.eq.f32.partialorder %v2020_v56, 8.507059e+37 }
 0x451   :  { %3834 = vtanh.f32 %v2005_v42  ;;  %v3667_v50 = vmul.f32 -1.442695, %v2151_v35  ;;  %vm2040_vm12 = vcmp.eq.f32.partialorder %v2039_v62, 8.507059e+37  ;;  %v2147_v35 = vpop.f32.mrf.mxu3  ;;  %vm2055_vm14 = vweird.f32 %v7378_v30 }
 0x452   :  { %3836 = vpow2.f32 %v3666_v25 }
 0x453   :  { %3838 = vpow2.f32 %v3667_v50 }
 0x454   :  { %v3829_v28 = vpop.eup %3828 }
 0x455   :  { %v3831_v20 = vpop.eup %3830  ;;  %v2012_v39 = vmul.f32 %v3829_v28, %v2010_v1  ;;  %vm2017_vm5 = vweird.f32 %v3829_v28 }
 0x456   :  { %v2031_v33 = vmul.f32 %v3831_v20, %v2029_v32  ;;  %vm2036_vm6 = vweird.f32 %v3831_v20  ;;  %v3833_v43 = vpop.eup %3832  ;;  %vm2018_vm9 = vmor %vm2016_vm8, %vm2017_vm5 }
 0x457   :  { %v2013_v51 = vsub.f32 1.0, %v2012_v39  ;;  %v554_v39 = vadd.f32 %v10096_v29, %v9926_v55  ;;  %v2051_v38 = vmul.f32 %v3833_v43, %v7378_v30  ;;  %v3835_v23 = vpop.eup %3834  ;;  %vm2037_vm10 = vmor %vm2035_vm7, %vm2036_vm6  ;;  %vm2056_vm13 = vweird.f32 %v3833_v43 }
 0x458   :  { %v2032_v61 = vsub.f32 1.0, %v2031_v33  ;;  %v2023_v33 = vor.u32 1.1754944e-38, %v2022_v8  ;;  %v3837_v55 = vpop.eup %3836  ;;  %vm2057_vm15 = vmor %vm2055_vm14, %vm2056_vm13 }
 0x459   :  { %v2014_v31 = vmul.f32 %v3829_v28, %v2013_v51  ;;  %v2042_v51 = vor.u32 1.1754944e-38, %v2041_v19  ;;  %v2052_v36 = vsub.f32 1.0, %v2051_v38  ;;  %v2153_v1 = vadd.f32 %v2147_v35, %v554_v39  ;;  %v3839_v5 = vpop.eup %3838  ;;  %v10097_v39 = vld [vmem:[#allocation150_spill] sm:$0xff] }
 0x45a   :  { %v2033_v40 = vmul.f32 %v3831_v20, %v2032_v61  ;;  %v7391_v19 = vadd.f32 1.0, %v3837_v55  ;;  %v7394_v62 = vadd.f32 1.0, %v3839_v5 }
 0x45b   :  { %v2015_v42 = vadd.f32 %v3829_v28, %v2014_v31  ;;  %v3668_v29 = vmul.f32 -1.442695, %v2153_v1 }
 0x45c   :  { %v2034_v54 = vadd.f32 %v3831_v20, %v2033_v40  ;;  %v2053_v40 = vmul.f32 %v3833_v43, %v2052_v36  ;;  %v2169_v35 = vand.u32 2147483648, %v7391_v19  ;;  %v2167_v1 = vand.u32 2147483647, %v7391_v19 }
 0x45d   :  { %v2019_v59 = vsel %vm2018_vm9, %v3829_v28, %v2015_v42  ;;  %3840 = vpow2.f32 %v3668_v29  ;;  %v2127_v28 = vpop.f32.mrf.mxu2  ;;  %v513_v42 = vadd.f32 %v10097_v39, %v5593_v24  ;;  %vm2163_vm3 = vweird.f32 %v7391_v19  ;;  %v10117_v39 = vld [vmem:[#allocation40_spill] sm:$0xff] }
 0x45e   :  { %v2024_v18 = vsel %vm2021_vm11, %v2023_v33, %v2019_v59  ;;  %v2038_v61 = vsel %vm2037_vm10, %v3831_v20, %v2034_v54  ;;  %v2054_v50 = vadd.f32 %v3833_v43, %v2053_v40  ;;  %v2061_v54 = vand.u32 2147483648, %v7378_v30 }
 0x45f   :  { %v2043_v32 = vsel %vm2040_vm12, %v2042_v51, %v2038_v61  ;;  %v2066_v31 = vmul.f32 %v3835_v23, %v2024_v18  ;;  %v2152_v51 = vadd.f32 %v2127_v28, %v513_v42  ;;  %v2186_v40 = vand.u32 2147483647, %v7394_v62  ;;  %v10114_v28 = vld [vmem:[#allocation35_spill] sm:$0xff]  ;;  %v10118_v42 = vld [vmem:[#allocation41_spill] sm:$0xff] }
 0x460   :  { %v2065_v8 = vmul.f32 %v2043_v32, %v6743_v7  ;;  %v2059_v7 = vand.u32 2147483647, %v7378_v30  ;;  %v2058_v55 = vsel %vm2057_vm15, %v3833_v43, %v2054_v50  ;;  %v2062_v20 = vor.u32 1.1754944e-38, %v2061_v54  ;;  %v10111_v54 = vld [vmem:[#allocation27_spill] sm:$0xff] }
 0x461   :  { %v2188_v32 = vand.u32 2147483648, %v7394_v62  ;;  %vm2182_vm4 = vweird.f32 %v7394_v62  ;;  %vm2168_vm7 = vcmp.eq.f32.partialorder %v2167_v1, 8.507059e+37  ;;  %vm2187_vm8 = vcmp.eq.f32.partialorder %v2186_v40, 8.507059e+37  ;;  %v10133_v1 = vld [vmem:[#allocation58_spill] sm:$0xff]  ;;  %v10135_v40 = vld [vmem:[#allocation61_spill] sm:$0xff] }
 0x462   :  { %v7389_v25 = vadd.f32 %v2066_v31, %v2065_v8  ;;  %vm2060_vm0 = vcmp.eq.f32.partialorder %v2059_v7, 8.507059e+37  ;;  %v10112_v7 = vld [vmem:[#allocation31_spill] sm:$0xff] }
 0x463   :  { %v3841_v56 = vpop.eup %3840  ;;  %v2063_v38 = vsel %vm2060_vm0, %v2062_v20, %v2058_v55  ;;  %v10113_v55 = vld [vmem:[#allocation36_spill] sm:$0xff]  ;;  %v10115_v20 = vld [vmem:[#allocation38_spill] sm:$0xff] }
 0x464   :  { %3842 = vtanh.f32 %v7389_v25  ;;  %v7403_v33 = vadd.f32 1.0, %v3841_v56  ;;  %v10116_v56 = vld [vmem:[#allocation39_spill] sm:$0xff] }
 0x465   :  { %3844 = vrcp.f32 %v7391_v19 }
 0x466   :  { %3846 = vrcp.f32 %v7394_v62  ;;  %vm2202_vm10 = vweird.f32 %v7403_v33 }
 0x467   :  { %3848 = vrcp.f32 %v7403_v33 }
 0x468   :  { %3850 = vtanh.f32 %v2152_v51  ;;  %v10123_v51 = vld [vmem:[#allocation46_spill] sm:$0xff] }
 0x46a   :  { %v3843_v5 = vpop.eup %3842 }
 0x46b   :  { %v3845_v23 = vpop.eup %3844  ;;  %v2069_v59 = vmul.f32 %v3843_v5, %v2063_v38  ;;  %v10119_v5 = vld [vmem:[#allocation42_spill] sm:$0xff]  ;;  %v10121_v38 = vld [vmem:[#allocation44_spill] sm:$0xff] }
 0x46c   :  { %v3847_v18 = vpop.eup %3846  ;;  %v2159_v30 = vmul.f32 %v3845_v23, %v7391_v19  ;;  %vm2164_vm1 = vweird.f32 %v3845_v23 }
 0x46d   :  { %v2178_v43 = vmul.f32 %v3847_v18, %v7394_v62  ;;  %2233 = vmatmul.f32.vlgmr.msra.gmra.mxu0 %v2069_v59  ;;  %2253 = vmatmul.f32.vlgmr.msrb.gmra.mxu1 %v2069_v59  ;;  %vm2183_vm2 = vweird.f32 %v3847_v18  ;;  %vm2165_vm5 = vmor %vm2163_vm3, %vm2164_vm1 }
 0x46e   :  { %v2160_v61 = vsub.f32 1.0, %v2159_v30  ;;  %2273 = vmatmul.f32.vlgmr.msrb.gmra.mxu2 %v2069_v59  ;;  %2293 = vmatmul.f32.vlgmr.msrb.gmra.mxu3 %v2069_v59  ;;  %vm2184_vm6 = vmor %vm2182_vm4, %vm2183_vm2  ;;  %v10124_v59 = vld [vmem:[#allocation47_spill] sm:$0xff]  ;;  %v10126_v30 = vld [vmem:[#allocation49_spill] sm:$0xff] }
 0x46f   :  { %v2179_v36 = vsub.f32 1.0, %v2178_v43  ;;  %2444 = vmatpush.msra.mxu0 %v6777_v41  ;;  %2464 = vmatpush.msrb.mxu1 %v6780_v46  ;;  %v7418_v41 = vpop.eup %3848  ;;  %v10127_v43 = vld [vmem:[#allocation50_spill] sm:$0xff] }
 0x470   :  { %v2161_v31 = vmul.f32 %v3845_v23, %v2160_v61  ;;  %2484 = vmatpush.msrb.mxu2 %v6785_v9  ;;  %2504 = vmatpush.msrb.mxu3 %v6788_v26  ;;  %v2170_v9 = vor.u32 1.1754944e-38, %v2169_v35  ;;  %vm2203_vm9 = vweird.f32 %v7418_v41  ;;  %v10128_v61 = vld [vmem:[#allocation51_spill] sm:$0xff]  ;;  %v10130_v35 = vld [vmem:[#allocation53_spill] sm:$0xff] }
 0x471   :  { %v2180_v8 = vmul.f32 %v3847_v18, %v2179_v36  ;;  %2445 = vmatpush.msra.mxu0 %v6797_v47  ;;  %2465 = vmatpush.msrb.mxu1 %v6800_v49  ;;  %v2198_v47 = vmul.f32 %v7418_v41, %v7403_v33  ;;  %v2189_v49 = vor.u32 1.1754944e-38, %v2188_v32  ;;  %vm2204_vm11 = vmor %vm2202_vm10, %vm2203_vm9  ;;  %v10129_v36 = vld [vmem:[#allocation52_spill] sm:$0xff] }
 0x472   :  { %v2162_v46 = vadd.f32 %v3845_v23, %v2161_v31  ;;  %2485 = vmatpush.msrb.mxu2 %v6806_v52  ;;  %2505 = vmatpush.msrb.mxu3 %v6809_v58  ;;  %v3851_v52 = vpop.eup %3850  ;;  %v10131_v32 = vld [vmem:[#allocation56_spill] sm:$0xff]  ;;  %v10132_v31 = vld [vmem:[#allocation57_spill] sm:$0xff] }
 0x473   :  { %v2181_v26 = vadd.f32 %v3847_v18, %v2180_v8  ;;  %2446 = vmatpush.msra.mxu0 %v6812_v11  ;;  %2466 = vmatpush.msrb.mxu1 %v6815_v57  ;;  %v2199_v50 = vsub.f32 1.0, %v2198_v47  ;;  %v10134_v8 = vld [vmem:[#allocation60_spill] sm:$0xff]  ;;  %v10140_v47 = vld [vmem:[#allocation66_spill] sm:$0xff] }
 0x474   :  { %v2166_v29 = vsel %vm2165_vm5, %v3845_v23, %v2162_v46  ;;  %2486 = vmatpush.msrb.mxu2 %v6818_v60  ;;  %2506 = vmatpush.msrb.mxu3 %v6821_v48  ;;  %v10122_v23 = vld [vmem:[#allocation45_spill] sm:$0xff]  ;;  %v10137_v46 = vld [vmem:[#allocation63_spill] sm:$0xff] }
 0x475   :  { %v2171_v58 = vsel %vm2168_vm7, %v2170_v9, %v2166_v29  ;;  %v2185_v19 = vsel %vm2184_vm6, %v3847_v18, %v2181_v26  ;;  %2447 = vmatpush.msra.mxu0 %v6824_v2  ;;  %2467 = vmatpush.msrb.mxu1 %v6827_v6  ;;  %v2200_v60 = vmul.f32 %v7418_v41, %v2199_v50  ;;  %v2206_v6 = vand.u32 2147483647, %v7403_v33  ;;  %v10125_v18 = vld [vmem:[#allocation48_spill] sm:$0xff]  ;;  %v10139_v26 = vld [vmem:[#allocation65_spill] sm:$0xff] }
 0x476   :  { %v2190_v11 = vsel %vm2187_vm8, %v2189_v49, %v2185_v19  ;;  %v2213_v57 = vmul.f32 %v3851_v52, %v2171_v58  ;;  %2487 = vmatpush.msrb.mxu2 %v6832_v3  ;;  %2507 = vmatpush.msrb.mxu3 %v6835_v10  ;;  %v10138_v9 = vld [vmem:[#allocation64_spill] sm:$0xff]  ;;  %v10141_v49 = vld [vmem:[#allocation67_spill] sm:$0xff]  ;;  %v10143_v52 = vld [vmem:[#allocation69_spill] sm:$0xff] }
 0x477   :  { %v2212_v62 = vmul.f32 %v2190_v11, %v6771_v37  ;;  %2448 = vmatpush.msra.mxu0 %v6838_v22  ;;  %2468 = vmatpush.msrb.mxu1 %v6841_v12  ;;  %v2201_v2 = vadd.f32 %v7418_v41, %v2200_v60  ;;  %v2208_v37 = vand.u32 2147483648, %v7403_v33  ;;  %v10098_v22 = vld [vmem:[#allocation81_spill] sm:$0xff]  ;;  %vm2207_vm12 = vcmp.eq.f32.partialorder %v2206_v6, 8.507059e+37  ;;  %v10120_v33 = vld [vmem:[#allocation43_spill] sm:$0xff]  ;;  %v10142_v29 = vld [vmem:[#allocation68_spill] sm:$0xff] }
 0x478   :  { %2488 = vmatpush.msrb.mxu2 %v6848_v13  ;;  %2508 = vmatpush.msrb.mxu3 %v6851_v34  ;;  %v10099_v12 = vld [vmem:[#allocation93_spill] sm:$0xff]  ;;  %v10100_v13 = vld [vmem:[#allocation111_spill] sm:$0xff]  ;;  %v10101_v34 = vld [vmem:[#allocation110_spill] sm:$0xff] }
 0x479   :  { %v7442_v48 = vadd.f32 %v2213_v57, %v2212_v62  ;;  %2449 = vmatpush.msra.mxu0 %v6854_v45  ;;  %2469 = vmatpush.msrb.mxu1 %v6857_v17  ;;  %v2205_v3 = vsel %vm2204_vm11, %v7418_v41, %v2201_v2  ;;  %v2209_v10 = vor.u32 1.1754944e-38, %v2208_v37  ;;  %v10136_v41 = vld [vmem:[#allocation62_spill] sm:$0xff]  ;;  %v10145_v19 = vld [vmem:[#allocation71_spill] sm:$0xff]  ;;  %v10146_v50 = vld [vmem:[#allocation72_spill] sm:$0xff] }
 0x47a   :  { %2489 = vmatpush.msrb.mxu2 %v6860_v27  ;;  %2509 = vmatpush.msrb.mxu3 %v6863_v14  ;;  %v10102_v27 = vld [vmem:[#allocation26_spill] sm:$0xff]  ;;  %v10103_v14 = vld [vmem:[#allocation21_spill] sm:$0xff]  ;;  %v10148_v57 = vld [vmem:[#allocation75_spill] sm:$0xff] }
 0x47b   :  { %3852 = vtanh.f32 %v7442_v48  ;;  %2450 = vmatpush.msra.mxu0 %v6866_v21  ;;  %2470 = vmatpush.msrb.mxu1 %v6869_v0  ;;  %v2210_v17 = vsel %vm2207_vm12, %v2209_v10, %v2205_v3  ;;  %v10104_v0 = vld [vmem:[#allocation25_spill] sm:$0xff]  ;;  %v10144_v58 = vld [vmem:[#allocation70_spill] sm:$0xff]  ;;  %v10149_v62 = vld [vmem:[#allocation76_spill] sm:$0xff] }
 0x47c   :  { %2490 = vmatpush.msrb.mxu2 %v6872_v63  ;;  %2510 = vmatpush.msrb.mxu3 %v6875_v44  ;;  %v10105_v63 = vld [vmem:[#allocation32_spill] sm:$0xff]  ;;  %v10106_v44 = vld [vmem:[#allocation30_spill] sm:$0xff]  ;;  %v10150_v60 = vld [vmem:[#allocation77_spill] sm:$0xff] }
 0x47d   :  { %2451 = vmatpush.msra.mxu0 %v6878_v53  ;;  %2471 = vmatpush.msrb.mxu1 %v6881_v4  ;;  %v10107_v53 = vld [vmem:[#allocation24_spill] sm:$0xff]  ;;  %v10147_v11 = vld [vmem:[#allocation74_spill] sm:$0xff]  ;;  %v10152_v37 = vld [vmem:[#allocation79_spill] sm:$0xff] }
 0x47e   :  { %2491 = vmatpush.msrb.mxu2 %v6884_v15  ;;  %2511 = vmatpush.msrb.mxu3 %v6887_v16  ;;  %v10108_v4 = vld [vmem:[#allocation28_spill] sm:$0xff]  ;;  %v10109_v15 = vld [vmem:[#allocation34_spill] sm:$0xff]  ;;  %v10110_v16 = vld [vmem:[#allocation33_spill] sm:$0xff] }
 0x47f   :  { %2452 = vmatpush.msra.mxu0 %v10098_v22  ;;  %2472 = vmatpush.msrb.mxu1 %v10099_v12  ;;  %v10151_v2 = vld [vmem:[#allocation78_spill] sm:$0xff]  ;;  %v10153_v6 = vld [vmem:[#allocation80_spill] sm:$0xff]  ;;  %v10155_v10 = vld [vmem:[#allocation83_spill] sm:$0xff] }
 0x480   :  { %2492 = vmatpush.msrb.mxu2 %v10100_v13  ;;  %2512 = vmatpush.msrb.mxu3 %v10101_v34  ;;  %v10154_v3 = vld [vmem:[#allocation82_spill] sm:$0xff]  ;;  %v10156_v22 = vld [vmem:[#allocation84_spill] sm:$0xff]  ;;  %v10157_v12 = vld [vmem:[#allocation85_spill] sm:$0xff] }
 0x481   :  { %v3853_v45 = vpop.eup %3852  ;;  %2453 = vmatpush.msra.mxu0 %v10102_v27  ;;  %2473 = vmatpush.msrb.mxu1 %v10103_v14  ;;  %v10158_v13 = vld [vmem:[#allocation86_spill] sm:$0xff]  ;;  %v10159_v34 = vld [vmem:[#allocation87_spill] sm:$0xff]  ;;  %v10162_v27 = vld [vmem:[#allocation92_spill] sm:$0xff] }
 0x482   :  { %v2216_v21 = vmul.f32 %v3853_v45, %v2210_v17  ;;  %2493 = vmatpush.msrb.mxu2 %v10104_v0  ;;  %2513 = vmatpush.msrb.mxu3 %v10105_v63  ;;  %v10160_v45 = vld [vmem:[#allocation88_spill] sm:$0xff]  ;;  %v10161_v17 = vld [vmem:[#allocation89_spill] sm:$0xff]  ;;  %v10163_v14 = vld [vmem:[#allocation94_spill] sm:$0xff] }
 0x483   :  { %2454 = vmatpush.msra.mxu0 %v10106_v44  ;;  %2474 = vmatpush.msrb.mxu1 %v10107_v53  ;;  %v10165_v0 = vld [vmem:[#allocation96_spill] sm:$0xff]  ;;  %v10166_v63 = vld [vmem:[#allocation97_spill] sm:$0xff]  ;;  %v10167_v44 = vld [vmem:[#allocation98_spill] sm:$0xff] }
 0x484   :  { %2494 = vmatpush.msrb.mxu2 %v10108_v4  ;;  %2514 = vmatpush.msrb.mxu3 %v10109_v15  ;;  %v10168_v53 = vld [vmem:[#allocation99_spill] sm:$0xff]  ;;  %v10169_v4 = vld [vmem:[#allocation100_spill] sm:$0xff]  ;;  %v10170_v15 = vld [vmem:[#allocation101_spill] sm:$0xff] }
 0x485   :  { %2313 = vmatmul.f32.vlgmr.msrb.gmra.mxu0 %v2216_v21  ;;  %2333 = vmatmul.f32.vlgmr.msra.gmra.mxu1 %v2216_v21 }
 0x486   :  { %2353 = vmatmul.f32.vlgmr.msra.gmra.mxu2 %v2216_v21  ;;  %2373 = vmatmul.f32.vlgmr.msra.gmra.mxu3 %v2216_v21 }
 0x487   :  { %2455 = vmatpush.msra.mxu0 %v10110_v16  ;;  %2475 = vmatpush.msrb.mxu1 %v10111_v54  ;;  %v10171_v16 = vld [vmem:[#allocation102_spill] sm:$0xff]  ;;  %v10172_v54 = vld [vmem:[#allocation103_spill] sm:$0xff] }
 0x488   :  { %2495 = vmatpush.msrb.mxu2 %v10112_v7  ;;  %2515 = vmatpush.msrb.mxu3 %v10113_v55  ;;  %v10173_v7 = vld [vmem:[#allocation104_spill] sm:$0xff]  ;;  %v10174_v55 = vld [vmem:[#allocation106_spill] sm:$0xff] }
 0x489   :  { %2456 = vmatpush.msra.mxu0 %v10114_v28  ;;  %2476 = vmatpush.msrb.mxu1 %v10115_v20  ;;  %v10175_v28 = vld [vmem:[#allocation107_spill] sm:$0xff]  ;;  %v10176_v20 = vld [vmem:[#allocation108_spill] sm:$0xff] }
 0x48a   :  { %2496 = vmatpush.msrb.mxu2 %v10116_v56  ;;  %2516 = vmatpush.msrb.mxu3 %v10117_v39  ;;  %v10177_v56 = vld [vmem:[#allocation109_spill] sm:$0xff]  ;;  %v10178_v39 = vld [vmem:[#allocation112_spill] sm:$0xff] }
 0x48b   :  { %2457 = vmatpush.msra.mxu0 %v10118_v42  ;;  %2477 = vmatpush.msrb.mxu1 %v10119_v5  ;;  %v10179_v42 = vld [vmem:[#allocation113_spill] sm:$0xff]  ;;  %v10180_v5 = vld [vmem:[#allocation114_spill] sm:$0xff] }
 0x48c   :  { %2497 = vmatpush.msrb.mxu2 %v10120_v33  ;;  %2517 = vmatpush.msrb.mxu3 %v10121_v38  ;;  %v10181_v33 = vld [vmem:[#allocation116_spill] sm:$0xff]  ;;  %v10182_v38 = vld [vmem:[#allocation117_spill] sm:$0xff] }
 0x48d   :  { %2458 = vmatpush.msra.mxu0 %v10122_v23  ;;  %2478 = vmatpush.msrb.mxu1 %v10123_v51  ;;  %v10183_v23 = vld [vmem:[#allocation118_spill] sm:$0xff]  ;;  %v10184_v51 = vld [vmem:[#allocation119_spill] sm:$0xff] }
 0x48e   :  { %2498 = vmatpush.msrb.mxu2 %v10124_v59  ;;  %2518 = vmatpush.msrb.mxu3 %v10125_v18  ;;  %v10185_v59 = vld [vmem:[#allocation120_spill] sm:$0xff]  ;;  %v10186_v18 = vld [vmem:[#allocation121_spill] sm:$0xff] }
 0x48f   :  { %2459 = vmatpush.msra.mxu0 %v10126_v30  ;;  %2479 = vmatpush.msrb.mxu1 %v10127_v43  ;;  %v10187_v30 = vld [vmem:[#allocation122_spill] sm:$0xff]  ;;  %v10188_v43 = vld [vmem:[#allocation123_spill] sm:$0xff] }
 0x490   :  { %2499 = vmatpush.msrb.mxu2 %v10128_v61  ;;  %2519 = vmatpush.msrb.mxu3 %v10129_v36  ;;  %v10189_v61 = vld [vmem:[#allocation124_spill] sm:$0xff]  ;;  %v10190_v36 = vld [vmem:[#allocation125_spill] sm:$0xff] }
 0x491   :  { %2460 = vmatmul.f32.vlgmr.msra.gmra.mxu0 %v2216_v21  ;;  %2480 = vmatmul.f32.vlgmr.msrb.gmra.mxu1 %v2216_v21 }
 0x492   :  { %2500 = vmatmul.f32.vlgmr.msrb.gmra.mxu2 %v2216_v21  ;;  %2520 = vmatmul.f32.vlgmr.msrb.gmra.mxu3 %v2216_v21  ;;  %v10164_v21 = vld [vmem:[#allocation95_spill] sm:$0xff] }
 0x493   :  { %2591 = vmatpush.msrb.mxu0 %v10130_v35  ;;  %2611 = vmatpush.msra.mxu1 %v10131_v32  ;;  %v10191_v35 = vld [vmem:[#allocation126_spill] sm:$0xff]  ;;  %v10192_v32 = vld [vmem:[#allocation127_spill] sm:$0xff] }
 0x494   :  { %2631 = vmatpush.msra.mxu2 %v10132_v31  ;;  %2651 = vmatpush.msra.mxu3 %v10133_v1  ;;  %v10193_v31 = vld [vmem:[#allocation128_spill] sm:$0xff]  ;;  %v10194_v1 = vld [vmem:[#allocation129_spill] sm:$0xff] }
 0x495   :  { %2592 = vmatpush.msrb.mxu0 %v10134_v8  ;;  %2612 = vmatpush.msra.mxu1 %v10135_v40  ;;  %v10195_v8 = vld [vmem:[#allocation132_spill] sm:$0xff]  ;;  %v10196_v40 = vld [vmem:[#allocation133_spill] sm:$0xff] }
 0x496   :  { %2632 = vmatpush.msra.mxu2 %v10136_v41  ;;  %2652 = vmatpush.msra.mxu3 %v10137_v46  ;;  %v10197_v41 = vld [vmem:[#allocation134_spill] sm:$0xff]  ;;  %v10198_v46 = vld [vmem:[#allocation137_spill] sm:$0xff] }
 0x497   :  { %2593 = vmatpush.msrb.mxu0 %v10138_v9  ;;  %2613 = vmatpush.msra.mxu1 %v10139_v26  ;;  %v10199_v9 = vld [vmem:[#allocation138_spill] sm:$0xff]  ;;  %v10200_v26 = vld [vmem:[#allocation139_spill] sm:$0xff] }
 0x498   :  { %2633 = vmatpush.msra.mxu2 %v10140_v47  ;;  %2653 = vmatpush.msra.mxu3 %v10141_v49  ;;  %v10201_v47 = vld [vmem:[#allocation140_spill] sm:$0xff]  ;;  %v10202_v49 = vld [vmem:[#allocation141_spill] sm:$0xff] }
 0x499   :  { %2594 = vmatpush.msrb.mxu0 %v10142_v29  ;;  %2614 = vmatpush.msra.mxu1 %v10143_v52  ;;  %v10203_v29 = vld [vmem:[#allocation142_spill] sm:$0xff]  ;;  %v10204_v52 = vld [vmem:[#allocation143_spill] sm:$0xff] }
 0x49a   :  { %2634 = vmatpush.msra.mxu2 %v10144_v58  ;;  %2654 = vmatpush.msra.mxu3 %v10145_v19  ;;  %v10205_v58 = vld [vmem:[#allocation144_spill] sm:$0xff]  ;;  %v10206_v19 = vld [vmem:[#allocation145_spill] sm:$0xff] }
 0x49b   :  { %2595 = vmatpush.msrb.mxu0 %v10146_v50  ;;  %2615 = vmatpush.msra.mxu1 %v10147_v11  ;;  %v10207_v50 = vld [vmem:[#allocation146_spill] sm:$0xff]  ;;  %v10208_v11 = vld [vmem:[#allocation147_spill] sm:$0xff] }
 0x49c   :  { %2635 = vmatpush.msra.mxu2 %v10148_v57  ;;  %2655 = vmatpush.msra.mxu3 %v10149_v62  ;;  %v10209_v57 = vld [vmem:[#allocation148_spill] sm:$0xff]  ;;  %v10210_v62 = vld [vmem:[#allocation149_spill] sm:$0xff] }
 0x49d   :  { %2596 = vmatpush.msrb.mxu0 %v10150_v60  ;;  %2616 = vmatpush.msra.mxu1 %v10151_v2  ;;  %v10211_v60 = vld [vmem:[#allocation151_spill] sm:$0xff]  ;;  %v10212_v2 = vld [vmem:[#allocation152_spill] sm:$0xff] }
 0x49e   :  { %2636 = vmatpush.msra.mxu2 %v10152_v37  ;;  %2656 = vmatpush.msra.mxu3 %v10153_v6  ;;  %v10213_v37 = vld [vmem:[#allocation153_spill] sm:$0xff]  ;;  %v10214_v6 = vld [vmem:[#allocation156_spill] sm:$0xff] }
 0x49f   :  { %2597 = vmatpush.msrb.mxu0 %v10154_v3  ;;  %2617 = vmatpush.msra.mxu1 %v10155_v10  ;;  %v10215_v3 = vld [vmem:[#allocation158_spill] sm:$0xff]  ;;  %v10216_v10 = vld [vmem:[#allocation159_spill] sm:$0xff] }
 0x4a0   :  { %2637 = vmatpush.msra.mxu2 %v10156_v22  ;;  %2657 = vmatpush.msra.mxu3 %v10157_v12  ;;  %v10217_v22 = vld [vmem:[#allocation160_spill] sm:$0xff]  ;;  %v10218_v12 = vld [vmem:[#allocation161_spill] sm:$0xff] }
 0x4a1   :  { %2598 = vmatpush.msrb.mxu0 %v10158_v13  ;;  %2618 = vmatpush.msra.mxu1 %v10159_v34  ;;  %v10219_v13 = vld [vmem:[#allocation162_spill] sm:$0xff]  ;;  %v10220_v34 = vld [vmem:[#allocation163_spill] sm:$0xff] }
 0x4a2   :  { %2638 = vmatpush.msra.mxu2 %v10160_v45  ;;  %2658 = vmatpush.msra.mxu3 %v10161_v17  ;;  %v10221_v45 = vld [vmem:[#allocation164_spill] sm:$0xff]  ;;  %v10222_v17 = vld [vmem:[#allocation165_spill] sm:$0xff] }
 0x4a3   :  { %2599 = vmatpush.msrb.mxu0 %v10162_v27  ;;  %2619 = vmatpush.msra.mxu1 %v10163_v14  ;;  %v10223_v27 = vld [vmem:[#allocation166_spill] sm:$0xff]  ;;  %v10224_v14 = vld [vmem:[#allocation167_spill] sm:$0xff] }
 0x4a4   :  { %2639 = vmatpush.msra.mxu2 %v10164_v21  ;;  %2659 = vmatpush.msra.mxu3 %v10165_v0  ;;  %v10225_v21 = vld [vmem:[#allocation169_spill] sm:$0xff]  ;;  %v10226_v0 = vld [vmem:[#allocation170_spill] sm:$0xff] }
 0x4a5   :  { %2600 = vmatpush.msrb.mxu0 %v10166_v63  ;;  %2620 = vmatpush.msra.mxu1 %v10167_v44  ;;  %v10227_v63 = vld [vmem:[#allocation173_spill] sm:$0xff]  ;;  %v10228_v44 = vld [vmem:[#allocation174_spill] sm:$0xff] }
 0x4a6   :  { %2640 = vmatpush.msra.mxu2 %v10168_v53  ;;  %2660 = vmatpush.msra.mxu3 %v10169_v4  ;;  %v10229_v53 = vld [vmem:[#allocation175_spill] sm:$0xff]  ;;  %v10230_v4 = vld [vmem:[#allocation176_spill] sm:$0xff] }
 0x4a7   :  { %2601 = vmatpush.msrb.mxu0 %v10170_v15  ;;  %2621 = vmatpush.msra.mxu1 %v10171_v16  ;;  %v10231_v15 = vld [vmem:[#allocation177_spill] sm:$0xff]  ;;  %v10232_v16 = vld [vmem:[#allocation178_spill] sm:$0xff] }
 0x4a8   :  { %2641 = vmatpush.msra.mxu2 %v10172_v54  ;;  %2661 = vmatpush.msra.mxu3 %v10173_v7  ;;  %v10233_v54 = vld [vmem:[#allocation179_spill] sm:$0xff]  ;;  %v10234_v7 = vld [vmem:[#allocation180_spill] sm:$0xff] }
 0x4a9   :  { %2602 = vmatpush.msrb.mxu0 %v10174_v55  ;;  %2622 = vmatpush.msra.mxu1 %v10175_v28  ;;  %v10235_v55 = vld [vmem:[#allocation181_spill] sm:$0xff]  ;;  %v10236_v28 = vld [vmem:[#allocation59_spill] sm:$0xff] }
 0x4aa   :  { %2642 = vmatpush.msra.mxu2 %v10176_v20  ;;  %2662 = vmatpush.msra.mxu3 %v10177_v56  ;;  %v10237_v20 = vld [vmem:[#allocation73_spill] sm:$0xff]  ;;  %v10238_v56 = vld [vmem:[#allocation91_spill] sm:$0xff] }
 0x4ab   :  { %2603 = vmatpush.msrb.mxu0 %v10178_v39  ;;  %2623 = vmatpush.msra.mxu1 %v10179_v42  ;;  %v10239_v39 = vld [vmem:[#allocation90_spill] sm:$0xff]  ;;  %v10240_v42 = vld [vmem:[#allocation189_spill] sm:$0xff] }
 0x4ac   :  { %2643 = vmatpush.msra.mxu2 %v10180_v5  ;;  %2663 = vmatpush.msra.mxu3 %v10181_v33  ;;  %v10241_v5 = vld [vmem:[#allocation190_spill] sm:$0xff]  ;;  %v10242_v33 = vld [vmem:[#allocation191_spill] sm:$0xff] }
 0x4ad   :  { %2604 = vmatpush.msrb.mxu0 %v10182_v38  ;;  %2624 = vmatpush.msra.mxu1 %v10183_v23  ;;  %v10243_v38 = vld [vmem:[#allocation192_spill] sm:$0xff]  ;;  %v10244_v23 = vld [vmem:[#allocation193_spill] sm:$0xff] }
 0x4ae   :  { %2644 = vmatpush.msra.mxu2 %v10184_v51  ;;  %2664 = vmatpush.msra.mxu3 %v10185_v59  ;;  %v10245_v51 = vld [vmem:[#allocation194_spill] sm:$0xff]  ;;  %v10246_v59 = vld [vmem:[#allocation195_spill] sm:$0xff] }
 0x4af   :  { %2605 = vmatpush.msrb.mxu0 %v10186_v18  ;;  %2625 = vmatpush.msra.mxu1 %v10187_v30  ;;  %v10247_v18 = vld [vmem:[#allocation196_spill] sm:$0xff]  ;;  %v10248_v30 = vld [vmem:[#allocation197_spill] sm:$0xff] }
 0x4b0   :  { %2645 = vmatpush.msra.mxu2 %v10188_v43  ;;  %2665 = vmatpush.msra.mxu3 %v10189_v61  ;;  %v10249_v43 = vld [vmem:[#allocation198_spill] sm:$0xff]  ;;  %v10250_v61 = vld [vmem:[#allocation199_spill] sm:$0xff] }
 0x4b1   :  { %2606 = vmatpush.msrb.mxu0 %v10190_v36  ;;  %2626 = vmatpush.msra.mxu1 %v10191_v35  ;;  %v10251_v36 = vld [vmem:[#allocation200_spill] sm:$0xff]  ;;  %v10252_v35 = vld [vmem:[#allocation201_spill] sm:$0xff] }
 0x4b2   :  { %2646 = vmatpush.msra.mxu2 %v10192_v32  ;;  %2666 = vmatpush.msra.mxu3 %v10193_v31  ;;  %v10253_v32 = vld [vmem:[#allocation202_spill] sm:$0xff]  ;;  %v10254_v31 = vld [vmem:[#allocation203_spill] sm:$0xff] }
 0x4b3   :  { %2671 = vmatpush.msra.mxu0 %v10194_v1  ;;  %2691 = vmatpush.msrb.mxu1 %v10195_v8  ;;  %v10255_v1 = vld [vmem:[#allocation204_spill] sm:$0xff]  ;;  %v10256_v8 = vld [vmem:[#allocation205_spill] sm:$0xff] }
 0x4b4   :  { %2711 = vmatpush.msrb.mxu2 %v10196_v40  ;;  %2731 = vmatpush.msrb.mxu3 %v10197_v41  ;;  %v10257_v40 = vld [vmem:[#allocation206_spill] sm:$0xff] }
 0x4b5   :  { %2672 = vmatpush.msra.mxu0 %v10198_v46  ;;  %2692 = vmatpush.msrb.mxu1 %v10199_v9 }
 0x4b6   :  { %2712 = vmatpush.msrb.mxu2 %v10200_v26  ;;  %2732 = vmatpush.msrb.mxu3 %v10201_v47 }
 0x4b7   :  { %2673 = vmatpush.msra.mxu0 %v10202_v49  ;;  %2693 = vmatpush.msrb.mxu1 %v10203_v29 }
 0x4b8   :  { %2713 = vmatpush.msrb.mxu2 %v10204_v52  ;;  %2733 = vmatpush.msrb.mxu3 %v10205_v58  ;;  %v10258_v52 = vld [vmem:[#allocation23_spill] sm:$0xff] }
 0x4b9   :  { %2674 = vmatpush.msra.mxu0 %v10206_v19  ;;  %2694 = vmatpush.msrb.mxu1 %v10207_v50  ;;  %v10259_v19 = vld [vmem:[#allocation20_spill] sm:$0xff] }
 0x4ba   :  { %2714 = vmatpush.msrb.mxu2 %v10208_v11  ;;  %2734 = vmatpush.msrb.mxu3 %v10209_v57 }
 0x4bb   :  { %2675 = vmatpush.msra.mxu0 %v10210_v62  ;;  %2695 = vmatpush.msrb.mxu1 %v10211_v60 }
 0x4bc   :  { %2715 = vmatpush.msrb.mxu2 %v10212_v2  ;;  %2735 = vmatpush.msrb.mxu3 %v10213_v37  ;;  %v10260_v37 = vld [vmem:[#allocation22_spill] sm:$0xff] }
 0x4bd   :  { %2676 = vmatpush.msra.mxu0 %v10214_v6  ;;  %2696 = vmatpush.msrb.mxu1 %v10215_v3  ;;  %v10261_v3 = vld [vmem:[#allocation157_spill] sm:$0xff] }
 0x4be   :  { %2716 = vmatpush.msrb.mxu2 %v10216_v10  ;;  %2736 = vmatpush.msrb.mxu3 %v10217_v22  ;;  %v10262_v10 = vld [vmem:[#allocation37_spill] sm:$0xff] }
 0x4bf   :  { %2677 = vmatpush.msra.mxu0 %v10218_v12  ;;  %2697 = vmatpush.msrb.mxu1 %v10219_v13  ;;  %v434_v22 = vadd.f32 %v10262_v10, %v10261_v3  ;;  %v10263_v12 = vld [vmem:[#allocation185_spill] sm:$0xff]  ;;  %v10264_v13 = vld [vmem:[#allocation155_spill] sm:$0xff] }
 0x4c0   :  { %2717 = vmatpush.msrb.mxu2 %v10220_v34  ;;  %2737 = vmatpush.msrb.mxu3 %v10221_v45  ;;  %v475_v34 = vadd.f32 %v10264_v13, %v10263_v12 }
 0x4c1   :  { %2678 = vmatpush.msra.mxu0 %v10222_v17  ;;  %2698 = vmatpush.msrb.mxu1 %v10223_v27 }
 0x4c2   :  { %2718 = vmatpush.msrb.mxu2 %v10224_v14  ;;  %2738 = vmatpush.msrb.mxu3 %v10225_v21 }
 0x4c3   :  { %2679 = vmatpush.msra.mxu0 %v10226_v0  ;;  %2699 = vmatpush.msrb.mxu1 %v10227_v63 }
 0x4c4   :  { %2719 = vmatpush.msrb.mxu2 %v10228_v44  ;;  %2739 = vmatpush.msrb.mxu3 %v10229_v53 }
 0x4c5   :  { %2680 = vmatpush.msra.mxu0 %v10230_v4  ;;  %2700 = vmatpush.msrb.mxu1 %v10231_v15 }
 0x4c6   :  { %2720 = vmatpush.msrb.mxu2 %v10232_v16  ;;  %2740 = vmatpush.msrb.mxu3 %v10233_v54 }
 0x4c7   :  { %2681 = vmatpush.msra.mxu0 %v10234_v7  ;;  %2701 = vmatpush.msrb.mxu1 %v10235_v55  ;;  %v10265_v7 = vld [vmem:[#allocation187_spill] sm:$0xff] }
 0x4c8   :  { %2721 = vmatpush.msrb.mxu2 %v10236_v28  ;;  %2741 = vmatpush.msrb.mxu3 %v10237_v20  ;;  %v10266_v55 = vld [vmem:[#allocation171_spill] sm:$0xff] }
 0x4c9   :  { %2682 = vmatpush.msra.mxu0 %v10238_v56  ;;  %2702 = vmatpush.msrb.mxu1 %v10239_v39  ;;  %v557_v28 = vadd.f32 %v10266_v55, %v10265_v7 }
 0x4ca   :  { %2722 = vmatpush.msrb.mxu2 %v10240_v42  ;;  %2742 = vmatpush.msrb.mxu3 %v10241_v5  ;;  %v10267_v42 = vld [vmem:[#allocation29_spill] sm:$0xff] }
 0x4cb   :  { %2683 = vmatpush.msra.mxu0 %v10242_v33  ;;  %2703 = vmatpush.msrb.mxu1 %v10243_v38 }
 0x4cc   :  { %2723 = vmatpush.msrb.mxu2 %v10244_v23  ;;  %2743 = vmatpush.msrb.mxu3 %v10245_v51 }
 0x4cd   :  { %2684 = vmatpush.msra.mxu0 %v10246_v59  ;;  %2704 = vmatpush.msrb.mxu1 %v10247_v18 }
 0x4ce   :  { %2724 = vmatpush.msrb.mxu2 %v10248_v30  ;;  %2744 = vmatpush.msrb.mxu3 %v10249_v43 }
 0x4cf   :  { %2685 = vmatpush.msra.mxu0 %v10250_v61  ;;  %2705 = vmatpush.msrb.mxu1 %v10251_v36 }
 0x4d0   :  { %2725 = vmatpush.msrb.mxu2 %v10252_v35  ;;  %2745 = vmatpush.msrb.mxu3 %v10253_v32 }
 0x4d1   :  { %2686 = vmatpush.msra.mxu0 %v10254_v31  ;;  %2706 = vmatpush.msrb.mxu1 %v10255_v1 }
 0x4d2   :  { %2726 = vmatpush.msrb.mxu2 %v10256_v8  ;;  %2746 = vmatpush.msrb.mxu3 %v10257_v40 }
 0x4ea   :  { %v2234_v41 = vpop.f32.mrf.mxu0  ;;  %v2254_v46 = vpop.f32.mrf.mxu1 }
 0x4f1   :  { %v2294_v9 = vpop.f32.mrf.mxu3  ;;  %v2274_v62 = vpop.f32.mrf.mxu2 }
 0x502   :  { %v2314_v26 = vpop.f32.mrf.mxu0  ;;  %v2334_v47 = vpop.f32.mrf.mxu1 }
 0x503   :  { %v2315_v49 = vadd.f32 %v2314_v26, %v2234_v41  ;;  %v2335_v29 = vadd.f32 %v2334_v47, %v2254_v46  ;;  %v10268_v47 = vld [vmem:[#allocation168_spill] sm:$0xff] }
 0x505   :  { %v2377_v58 = vadd.f32 %v2315_v49, %v10258_v52  ;;  %v2378_v50 = vadd.f32 %v2335_v29, %v10259_v19  ;;  %v516_v49 = vadd.f32 %v10268_v47, %v5593_v24 }
 0x507   :  { %v3669_v11 = vmul.f32 -1.442695, %v2377_v58  ;;  %v3670_v57 = vmul.f32 -1.442695, %v2378_v50 }
 0x509   :  { %3854 = vpow2.f32 %v3669_v11  ;;  %v2374_v60 = vpop.f32.mrf.mxu3  ;;  %v2354_v53 = vpop.f32.mrf.mxu2 }
 0x50a   :  { %3856 = vpow2.f32 %v3670_v57  ;;  %v2375_v2 = vadd.f32 %v2374_v60, %v2294_v9  ;;  %v2355_v54 = vadd.f32 %v2354_v53, %v2274_v62 }
 0x50c   :  { %v2380_v6 = vadd.f32 %v2375_v2, %v10260_v37  ;;  %v2379_v5 = vadd.f32 %v2355_v54, %v10267_v42 }
 0x50e   :  { %v3671_v45 = vmul.f32 -1.442695, %v2380_v6  ;;  %v2461_v17 = vpop.f32.mrf.mxu0  ;;  %v2481_v27 = vpop.f32.mrf.mxu1 }
 0x50f   :  { %v3855_v14 = vpop.eup %3854  ;;  %v2524_v21 = vadd.f32 %v2461_v17, %v434_v22  ;;  %v2525_v0 = vadd.f32 %v2481_v27, %v475_v34 }
 0x510   :  { %v3857_v63 = vpop.eup %3856  ;;  %v2384_v44 = vadd.f32 1.0, %v3855_v14  ;;  %3858 = vpow2.f32 %v3671_v45 }
 0x511   :  { %v2403_v4 = vadd.f32 1.0, %v3857_v63  ;;  %v3672_v15 = vmul.f32 -1.442695, %v2524_v21  ;;  %v3673_v16 = vmul.f32 -1.442695, %v2525_v0 }
 0x512   :  { %3860 = vrcp.f32 %v2384_v44  ;;  %v2394_v32 = vand.u32 2147483647, %v2384_v44  ;;  %v2396_v31 = vand.u32 2147483648, %v2384_v44  ;;  %vm2390_vm0 = vweird.f32 %v2384_v44 }
 0x513   :  { %3862 = vrcp.f32 %v2403_v4  ;;  %v2415_v8 = vand.u32 2147483648, %v2403_v4  ;;  %v2413_v46 = vand.u32 2147483647, %v2403_v4  ;;  %vm2409_vm15 = vweird.f32 %v2403_v4 }
 0x514   :  { %3864 = vpow2.f32 %v3672_v15  ;;  %vm2395_vm2 = vcmp.eq.f32.partialorder %v2394_v32, 8.507059e+37  ;;  %v2397_v50 = vor.u32 1.1754944e-38, %v2396_v31 }
 0x515   :  { %3866 = vpow2.f32 %v3673_v16  ;;  %v2521_v20 = vpop.f32.mrf.mxu3  ;;  %v2501_v9 = vpop.f32.mrf.mxu2  ;;  %v2416_v60 = vor.u32 1.1754944e-38, %v2415_v8  ;;  %vm2414_vm4 = vcmp.eq.f32.partialorder %v2413_v46, 8.507059e+37 }
 0x516   :  { %v3859_v56 = vpop.eup %3858  ;;  %v2527_v39 = vadd.f32 %v2521_v20, %v557_v28  ;;  %v2526_v6 = vadd.f32 %v2501_v9, %v516_v49 }
 0x517   :  { %v7633_v33 = vadd.f32 1.0, %v3859_v56 }
 0x518   :  { %v3861_v38 = vpop.eup %3860  ;;  %v3674_v23 = vmul.f32 -1.442695, %v2527_v39 }
 0x519   :  { %v3863_v51 = vpop.eup %3862  ;;  %v2386_v59 = vmul.f32 %v3861_v38, %v2384_v44  ;;  %3868 = vrcp.f32 %v7633_v33  ;;  %vm2391_vm13 = vweird.f32 %v3861_v38  ;;  %vm2429_vm5 = vweird.f32 %v7633_v33 }
 0x51a   :  { %v3865_v18 = vpop.eup %3864  ;;  %v2405_v30 = vmul.f32 %v3863_v51, %v2403_v4  ;;  %3870 = vpow2.f32 %v3674_v23  ;;  %vm2410_vm14 = vweird.f32 %v3863_v51  ;;  %vm2392_vm1 = vmor %vm2390_vm0, %vm2391_vm13  ;;  %v2435_v16 = vand.u32 2147483648, %v7633_v33 }
 0x51b   :  { %v3867_v43 = vpop.eup %3866  ;;  %v2387_v61 = vsub.f32 1.0, %v2386_v59  ;;  %3872 = vtanh.f32 %v2379_v5  ;;  %v7636_v36 = vadd.f32 1.0, %v3865_v18  ;;  %vm2411_vm3 = vmor %vm2409_vm15, %vm2410_vm14  ;;  %v7789_v59 = vld [vmem:[#allocation7 + $0x138] sm:$0xff] }
 0x51c   :  { %v2406_v35 = vsub.f32 1.0, %v2405_v30  ;;  %v7638_v1 = vadd.f32 1.0, %v3867_v43  ;;  %v2436_v31 = vor.u32 1.1754944e-38, %v2435_v16  ;;  %v7749_v16 = vld [vmem:[#allocation7 + $0x198] sm:$0xff] }
 0x51d   :  { %v2388_v40 = vmul.f32 %v3861_v38, %v2387_v61  ;;  %3874 = vrcp.f32 %v7636_v36  ;;  %v2541_v15 = vand.u32 2147483647, %v7636_v36  ;;  %v2543_v55 = vand.u32 2147483648, %v7636_v36 }
 0x51e   :  { %v2407_v41 = vmul.f32 %v3863_v51, %v2406_v35  ;;  %3876 = vrcp.f32 %v7638_v1  ;;  %v2562_v28 = vand.u32 2147483648, %v7638_v1  ;;  %v2560_v5 = vand.u32 2147483647, %v7638_v1 }
 0x51f   :  { %v7642_v26 = vpop.eup %3868  ;;  %v2389_v29 = vadd.f32 %v3861_v38, %v2388_v40  ;;  %vm2556_vm9 = vweird.f32 %v7638_v1  ;;  %vm2537_vm10 = vweird.f32 %v7636_v36  ;;  %vm2542_vm13 = vcmp.eq.f32.partialorder %v2541_v15, 8.507059e+37  ;;  %v7746_v15 = vld [vmem:[#allocation7 + $0x190] sm:$0xff] }
 0x520   :  { %v3871_v58 = vpop.eup %3870  ;;  %v2408_v11 = vadd.f32 %v3863_v51, %v2407_v41  ;;  %v2425_v57 = vmul.f32 %v7642_v26, %v7633_v33  ;;  %vm2430_vm6 = vweird.f32 %v7642_v26  ;;  %v2544_v30 = vor.u32 1.1754944e-38, %v2543_v55  ;;  %v7755_v55 = vld [vmem:[#allocation7 + $0x168] sm:$0xff] }
 0x521   :  { %v3873_v62 = vpop.eup %3872  ;;  %v2393_v2 = vsel %vm2392_vm1, %v3861_v38, %v2389_v29  ;;  %v7649_v10 = vadd.f32 1.0, %v3871_v58  ;;  %v2433_v38 = vand.u32 2147483647, %v7633_v33  ;;  %vm7676_vm11 = vmor %vm2429_vm5, %vm2430_vm6  ;;  %vm2561_vm15 = vcmp.eq.f32.partialorder %v2560_v5, 8.507059e+37  ;;  %v7777_v5 = vld [vmem:[#allocation7 + $0x158] sm:$0xff] }
 0x522   :  { %v2398_v22 = vsel %vm2395_vm2, %v2397_v50, %v2393_v2  ;;  %v2412_v13 = vsel %vm2411_vm3, %v3863_v51, %v2408_v11  ;;  %v2426_v34 = vsub.f32 1.0, %v2425_v57  ;;  %v7691_v50 = vld [vmem:[#allocation7 + $0x1e0] sm:$0xff]  ;;  %v7699_v57 = vld [vmem:[#allocation7 + $0x1f0] sm:$0xff] }
 0x523   :  { %v3875_v45 = vpop.eup %3874  ;;  %v2417_v17 = vsel %vm2414_vm4, %v2416_v60, %v2412_v13  ;;  %v2440_v27 = vmul.f32 %v3873_v62, %v2398_v22  ;;  %3878 = vrcp.f32 %v7649_v10  ;;  %vm2434_vm0 = vcmp.eq.f32.partialorder %v2433_v38, 8.507059e+37  ;;  %v7702_v62 = vld [vmem:[#allocation7 + $0x1f8] sm:$0xff]  ;;  %v7711_v2 = vld [vmem:[#allocation7 + $0x1c0] sm:$0xff]  ;;  %v7720_v22 = vld [vmem:[#allocation7 + $0x1d0] sm:$0xff] }
 0x524   :  { %v3877_v14 = vpop.eup %3876  ;;  %v2439_v21 = vmul.f32 %v2417_v17, %v7389_v25  ;;  %v2533_v0 = vmul.f32 %v3875_v45, %v7636_v36  ;;  %3880 = vtanh.f32 %v2526_v6  ;;  %v2427_v44 = vmul.f32 %v7642_v26, %v2426_v34  ;;  %v7714_v6 = vld [vmem:[#allocation7 + $0x1c8] sm:$0xff]  ;;  %v7723_v13 = vld [vmem:[#allocation7 + $0x1d8] sm:$0xff]  ;;  %v7780_v38 = vld [vmem:[#allocation7 + $0x120] sm:$0xff] }
 0x525   :  { %v2552_v63 = vmul.f32 %v3877_v14, %v7638_v1  ;;  %vm2538_vm7 = vweird.f32 %v3875_v45  ;;  %vm2557_vm8 = vweird.f32 %v3877_v14  ;;  %v2563_v36 = vor.u32 1.1754944e-38, %v2562_v28  ;;  %v7729_v17 = vld [vmem:[#allocation7 + $0x1a8] sm:$0xff]  ;;  %v7765_v28 = vld [vmem:[#allocation7 + $0x178] sm:$0xff]  ;;  %v7852_v60 = vld [vmem:[#allocation7 + $0x60] sm:$0xff] }
 0x526   :  { %v7657_v53 = vadd.f32 %v2440_v27, %v2439_v21  ;;  %v2534_v4 = vsub.f32 1.0, %v2533_v0  ;;  %v2428_v25 = vadd.f32 %v7642_v26, %v2427_v44  ;;  %vm2539_vm12 = vmor %vm2537_vm10, %vm2538_vm7  ;;  %v2582_v58 = vand.u32 2147483648, %v7649_v10  ;;  %v7732_v27 = vld [vmem:[#allocation7 + $0x1b0] sm:$0xff]  ;;  %v7741_v44 = vld [vmem:[#allocation7 + $0x188] sm:$0xff]  ;;  %10289 = vst [vmem:[#allocation26_spill] sm:$0xff] %v7852_v60 }
 0x527   :  { %v2553_v54 = vsub.f32 1.0, %v2552_v63  ;;  %vm2558_vm14 = vmor %vm2556_vm9, %vm2557_vm8  ;;  %vm2576_vm2 = vweird.f32 %v7649_v10  ;;  %v2580_v11 = vand.u32 2147483647, %v7649_v10  ;;  %v7738_v63 = vld [vmem:[#allocation7 + $0x180] sm:$0xff] }
 0x528   :  { %3882 = vtanh.f32 %v7657_v53  ;;  %v2535_v20 = vmul.f32 %v3875_v45, %v2534_v4  ;;  %v2432_v61 = vsel %vm7676_vm11, %v7642_v26, %v2428_v25  ;;  %v2583_v34 = vor.u32 1.1754944e-38, %v2582_v58  ;;  %v7762_v25 = vld [vmem:[#allocation7 + $0x170] sm:$0xff] }
 0x529   :  { %v7666_v56 = vpop.eup %3878  ;;  %v2554_v39 = vmul.f32 %v3877_v14, %v2553_v54  ;;  %v2437_v9 = vsel %vm2434_vm0, %v2436_v31, %v2432_v61  ;;  %vm2581_vm4 = vcmp.eq.f32.partialorder %v2580_v11, 8.507059e+37  ;;  %v7752_v54 = vld [vmem:[#allocation7 + $0x160] sm:$0xff]  ;;  %v7801_v61 = vld [vmem:[#allocation7 + $0x118] sm:$0xff]  ;;  %v7846_v58 = vld [vmem:[#allocation7 + $0x90] sm:$0xff] }
 0x52a   :  { %v2536_v23 = vadd.f32 %v3875_v45, %v2535_v20  ;;  %v2572_v51 = vmul.f32 %v7666_v56, %v7649_v10  ;;  %v3881_v18 = vpop.eup %3880  ;;  %vm2577_vm1 = vweird.f32 %v7666_v56  ;;  %v7768_v20 = vld [vmem:[#allocation7 + $0x140] sm:$0xff]  ;;  %v7813_v31 = vld [vmem:[#allocation7 + $0xf8] sm:$0xff]  ;;  %10287 = vst [vmem:[#allocation111_spill] sm:$0xff] %v7846_v58 }
 0x52b   :  { %v2555_v43 = vadd.f32 %v3877_v14, %v2554_v39  ;;  %vm7707_vm3 = vmor %vm2576_vm2, %vm2577_vm1  ;;  %v7774_v39 = vld [vmem:[#allocation7 + $0x150] sm:$0xff]  ;;  %10276 = vst [vmem:[#allocation210_spill] sm:$0xff] %v7813_v31  ;;  %v7849_v11 = vld [vmem:[#allocation7 + $0x98] sm:$0xff] }
 0x52c   :  { %v2540_v35 = vsel %vm2539_vm12, %v3875_v45, %v2536_v23  ;;  %v2573_v32 = vsub.f32 1.0, %v2572_v51  ;;  %v7726_v45 = vld [vmem:[#allocation7 + $0x1a0] sm:$0xff]  ;;  %v7783_v23 = vld [vmem:[#allocation7 + $0x128] sm:$0xff]  ;;  %v7786_v51 = vld [vmem:[#allocation7 + $0x130] sm:$0xff]  ;;  %10288 = vst [vmem:[#allocation110_spill] sm:$0xff] %v7849_v11 }
 0x52d   :  { %v2545_v1 = vsel %vm2542_vm13, %v2544_v30, %v2540_v35  ;;  %v2559_v33 = vsel %vm2558_vm14, %v3877_v14, %v2555_v43  ;;  %v7735_v14 = vld [vmem:[#allocation7 + $0x1b8] sm:$0xff]  ;;  %v7795_v30 = vld [vmem:[#allocation7 + $0x108] sm:$0xff]  ;;  %v7798_v43 = vld [vmem:[#allocation7 + $0x110] sm:$0xff] }
 0x52e   :  { %v3883_v8 = vpop.eup %3882  ;;  %v2564_v40 = vsel %vm2561_vm15, %v2563_v36, %v2559_v33  ;;  %v2587_v41 = vmul.f32 %v3881_v18, %v2545_v1  ;;  %v2574_v46 = vmul.f32 %v7666_v56, %v2573_v32  ;;  %v7792_v18 = vld [vmem:[#allocation7 + $0x100] sm:$0xff]  ;;  %v7807_v35 = vld [vmem:[#allocation7 + $0xe8] sm:$0xff]  ;;  %v7810_v32 = vld [vmem:[#allocation7 + $0xf0] sm:$0xff] }
 0x52f   :  { %v2586_v47 = vmul.f32 %v2564_v40, %v7442_v48  ;;  %v2443_v49 = vmul.f32 %v3883_v8, %v2437_v9  ;;  %v7694_v48 = vld [vmem:[#allocation7 + $0x1e8] sm:$0xff]  ;;  %v7804_v36 = vld [vmem:[#allocation7 + $0xe0] sm:$0xff]  ;;  %10274 = vst [vmem:[#allocation208_spill] sm:$0xff] %v7807_v35  ;;  %v7822_v8 = vld [vmem:[#allocation7 + $0xd0] sm:$0xff] }
 0x530   :  { %v2575_v26 = vadd.f32 %v7666_v56, %v2574_v46  ;;  %10273 = vst [vmem:[#allocation207_spill] sm:$0xff] %v7804_v36  ;;  %v7816_v1 = vld [vmem:[#allocation7 + $0xc0] sm:$0xff]  ;;  %v7819_v33 = vld [vmem:[#allocation7 + $0xc8] sm:$0xff]  ;;  %v7825_v40 = vld [vmem:[#allocation7 + $0xd8] sm:$0xff] }
 0x531   :  { %v7685_v29 = vadd.f32 %v2587_v41, %v2586_v47  ;;  %2607 = vmatmul.f32.vlgmr.msrb.gmra.mxu0 %v2443_v49  ;;  %2627 = vmatmul.f32.vlgmr.msra.gmra.mxu1 %v2443_v49  ;;  %10275 = vst [vmem:[#allocation209_spill] sm:$0xff] %v7810_v32  ;;  %v7828_v41 = vld [vmem:[#allocation7 + $0xa0] sm:$0xff]  ;;  %v7831_v46 = vld [vmem:[#allocation7 + $0xa8] sm:$0xff]  ;;  %v7834_v9 = vld [vmem:[#allocation7 + $0xb0] sm:$0xff] }
 0x532   :  { %2647 = vmatmul.f32.vlgmr.msra.gmra.mxu2 %v2443_v49  ;;  %2667 = vmatmul.f32.vlgmr.msra.gmra.mxu3 %v2443_v49  ;;  %v2579_v10 = vsel %vm7707_vm3, %v7666_v56, %v2575_v26  ;;  %v7771_v56 = vld [vmem:[#allocation7 + $0x148] sm:$0xff]  ;;  %10277 = vst [vmem:[#allocation105_spill] sm:$0xff] %v7816_v1  ;;  %v7837_v47 = vld [vmem:[#allocation7 + $0xb8] sm:$0xff]  ;;  %v7840_v49 = vld [vmem:[#allocation7 + $0x80] sm:$0xff] }
 0x533   :  { %3884 = vtanh.f32 %v7685_v29  ;;  %2818 = vmatpush.msrb.mxu0 %v7691_v50  ;;  %2838 = vmatpush.msra.mxu1 %v7694_v48  ;;  %v2584_v0 = vsel %vm2581_vm4, %v2583_v34, %v2579_v10  ;;  %10278 = vst [vmem:[#allocation115_spill] sm:$0xff] %v7819_v33  ;;  %v7843_v26 = vld [vmem:[#allocation7 + $0x88] sm:$0xff]  ;;  %v7858_v34 = vld [vmem:[#allocation7 + $0x70] sm:$0xff] }
 0x534   :  { %2858 = vmatpush.msra.mxu2 %v7699_v57  ;;  %2878 = vmatpush.msra.mxu3 %v7702_v62  ;;  %10279 = vst [vmem:[#allocation135_spill] sm:$0xff] %v7822_v8  ;;  %v7855_v10 = vld [vmem:[#allocation7 + $0x68] sm:$0xff] }
 0x535   :  { %2819 = vmatpush.msrb.mxu0 %v7711_v2  ;;  %2839 = vmatpush.msra.mxu1 %v7714_v6  ;;  %10280 = vst [vmem:[#allocation131_spill] sm:$0xff] %v7825_v40 }
 0x536   :  { %2859 = vmatpush.msra.mxu2 %v7720_v22  ;;  %2879 = vmatpush.msra.mxu3 %v7723_v13  ;;  %10281 = vst [vmem:[#allocation130_spill] sm:$0xff] %v7828_v41 }
 0x537   :  { %2820 = vmatpush.msrb.mxu0 %v7726_v45  ;;  %2840 = vmatpush.msra.mxu1 %v7729_v17  ;;  %10282 = vst [vmem:[#allocation136_spill] sm:$0xff] %v7831_v46 }
 0x538   :  { %2860 = vmatpush.msra.mxu2 %v7732_v27  ;;  %2880 = vmatpush.msra.mxu3 %v7735_v14  ;;  %10283 = vst [vmem:[#allocation154_spill] sm:$0xff] %v7834_v9 }
 0x539   :  { %v3885_v21 = vpop.eup %3884  ;;  %2821 = vmatpush.msrb.mxu0 %v7738_v63  ;;  %2841 = vmatpush.msra.mxu1 %v7741_v44  ;;  %10284 = vst [vmem:[#allocation150_spill] sm:$0xff] %v7837_v47 }
 0x53a   :  { %v7744_v4 = vmul.f32 %v3885_v21, %v2584_v0  ;;  %2861 = vmatpush.msra.mxu2 %v7746_v15  ;;  %2881 = vmatpush.msra.mxu3 %v7749_v16  ;;  %10285 = vst [vmem:[#allocation81_spill] sm:$0xff] %v7840_v49  ;;  %v7861_v21 = vld [vmem:[#allocation7 + $0x78] sm:$0xff]  ;;  %v7864_v0 = vld [vmem:[#allocation7 + $0x40] sm:$0xff] }
 0x53b   :  { %2822 = vmatpush.msrb.mxu0 %v7752_v54  ;;  %2842 = vmatpush.msra.mxu1 %v7755_v55  ;;  %10286 = vst [vmem:[#allocation93_spill] sm:$0xff] %v7843_v26 }
 0x53c   :  { %2687 = vmatmul.f32.vlgmr.msra.gmra.mxu0 %v7744_v4  ;;  %2707 = vmatmul.f32.vlgmr.msrb.gmra.mxu1 %v7744_v4  ;;  %10290 = vst [vmem:[#allocation21_spill] sm:$0xff] %v7855_v10 }
 0x53d   :  { %2727 = vmatmul.f32.vlgmr.msrb.gmra.mxu2 %v7744_v4  ;;  %2747 = vmatmul.f32.vlgmr.msrb.gmra.mxu3 %v7744_v4  ;;  %10291 = vst [vmem:[#allocation25_spill] sm:$0xff] %v7858_v34 }
 0x53e   :  { %2862 = vmatpush.msra.mxu2 %v7762_v25  ;;  %2882 = vmatpush.msra.mxu3 %v7765_v28  ;;  %10292 = vst [vmem:[#allocation32_spill] sm:$0xff] %v7861_v21 }
 0x53f   :  { %2823 = vmatpush.msrb.mxu0 %v7768_v20  ;;  %2843 = vmatpush.msra.mxu1 %v7771_v56  ;;  %10293 = vst [vmem:[#allocation30_spill] sm:$0xff] %v7864_v0 }
 0x540   :  { %2863 = vmatpush.msra.mxu2 %v7774_v39  ;;  %2883 = vmatpush.msra.mxu3 %v7777_v5 }
 0x541   :  { %2824 = vmatpush.msrb.mxu0 %v7780_v38  ;;  %2844 = vmatpush.msra.mxu1 %v7783_v23 }
 0x542   :  { %2864 = vmatpush.msra.mxu2 %v7786_v51  ;;  %2884 = vmatpush.msra.mxu3 %v7789_v59 }
 0x543   :  { %2825 = vmatpush.msrb.mxu0 %v7792_v18  ;;  %2845 = vmatpush.msra.mxu1 %v7795_v30 }
 0x544   :  { %2865 = vmatpush.msra.mxu2 %v7798_v43  ;;  %2885 = vmatpush.msra.mxu3 %v7801_v61 }
 0x545   :  { %2826 = vmatpush.msrb.mxu0 %v7804_v36  ;;  %2846 = vmatpush.msra.mxu1 %v7807_v35 }
 0x546   :  { %2866 = vmatpush.msra.mxu2 %v7810_v32  ;;  %2886 = vmatpush.msra.mxu3 %v7813_v31 }
 0x547   :  { %2827 = vmatpush.msrb.mxu0 %v7816_v1  ;;  %2847 = vmatpush.msra.mxu1 %v7819_v33 }
 0x548   :  { %2867 = vmatpush.msra.mxu2 %v7822_v8  ;;  %2887 = vmatpush.msra.mxu3 %v7825_v40 }
 0x549   :  { %2828 = vmatpush.msrb.mxu0 %v7828_v41  ;;  %2848 = vmatpush.msra.mxu1 %v7831_v46 }
 0x54a   :  { %2868 = vmatpush.msra.mxu2 %v7834_v9  ;;  %2888 = vmatpush.msra.mxu3 %v7837_v47 }
 0x54b   :  { %2829 = vmatpush.msrb.mxu0 %v7840_v49  ;;  %2849 = vmatpush.msra.mxu1 %v7843_v26 }
 0x54c   :  { %2869 = vmatpush.msra.mxu2 %v7846_v58  ;;  %2889 = vmatpush.msra.mxu3 %v7849_v11  ;;  %v7867_v11 = vld [vmem:[#allocation7 + $0x48] sm:$0xff] }
 0x54d   :  { %2830 = vmatpush.msrb.mxu0 %v7852_v60  ;;  %2850 = vmatpush.msra.mxu1 %v7855_v10  ;;  %10294 = vst [vmem:[#allocation24_spill] sm:$0xff] %v7867_v11  ;;  %v7870_v60 = vld [vmem:[#allocation7 + $0x50] sm:$0xff]  ;;  %v7873_v10 = vld [vmem:[#allocation7 + $0x58] sm:$0xff] }
 0x54e   :  { %2870 = vmatpush.msra.mxu2 %v7858_v34  ;;  %2890 = vmatpush.msra.mxu3 %v7861_v21  ;;  %10295 = vst [vmem:[#allocation28_spill] sm:$0xff] %v7870_v60  ;;  %v7876_v34 = vld [vmem:[#allocation7 + $0x20] sm:$0xff]  ;;  %v7879_v21 = vld [vmem:[#allocation7 + $0x28] sm:$0xff] }
 0x54f   :  { %2831 = vmatpush.msrb.mxu0 %v7864_v0  ;;  %2851 = vmatpush.msra.mxu1 %v7867_v11  ;;  %10296 = vst [vmem:[#allocation34_spill] sm:$0xff] %v7873_v10  ;;  %v7882_v0 = vld [vmem:[#allocation7 + $0x30] sm:$0xff]  ;;  %v7885_v11 = vld [vmem:[#allocation7 + $0x38] sm:$0xff] }
 0x550   :  { %2871 = vmatpush.msra.mxu2 %v7870_v60  ;;  %2891 = vmatpush.msra.mxu3 %v7873_v10  ;;  %10297 = vst [vmem:[#allocation33_spill] sm:$0xff] %v7876_v34  ;;  %v7888_v60 = vld [vmem:[#allocation7] sm:$0xff]  ;;  %v7891_v10 = vld [vmem:[#allocation7 + $0x8] sm:$0xff] }
 0x551   :  { %2832 = vmatpush.msrb.mxu0 %v7876_v34  ;;  %10298 = vst [vmem:[#allocation27_spill] sm:$0xff] %v7879_v21  ;;  %2852 = vmatpush.msra.mxu1 %v7879_v21  ;;  %v7894_v34 = vld [vmem:[#allocation7 + $0x10] sm:$0xff]  ;;  %v7897_v21 = vld [vmem:[#allocation7 + $0x18] sm:$0xff] }
 0x552   :  { %10299 = vst [vmem:[#allocation31_spill] sm:$0xff] %v7882_v0  ;;  %2872 = vmatpush.msra.mxu2 %v7882_v0  ;;  %2892 = vmatpush.msra.mxu3 %v7885_v11 }
 0x553   :  { %10300 = vst [vmem:[#allocation36_spill] sm:$0xff] %v7885_v11  ;;  %2833 = vmatpush.msrb.mxu0 %v7888_v60  ;;  %2853 = vmatpush.msra.mxu1 %v7891_v10  ;;  %v7916_v11 = vld [vmem:[#allocation11 + $0x1c0] sm:$0xff] }
 0x554   :  { %10301 = vst [vmem:[#allocation35_spill] sm:$0xff] %v7888_v60  ;;  %2873 = vmatpush.msra.mxu2 %v7894_v34  ;;  %2893 = vmatpush.msra.mxu3 %v7897_v21  ;;  %v7904_v60 = vld [vmem:[#allocation11 + $0x1e0] sm:$0xff] }
 0x555   :  { %10302 = vst [vmem:[#allocation38_spill] sm:$0xff] %v7891_v10  ;;  %2834 = vmatmul.f32.vlgmr.msrb.gmra.mxu0 %v7744_v4  ;;  %2854 = vmatmul.f32.vlgmr.msra.gmra.mxu1 %v7744_v4  ;;  %v7907_v10 = vld [vmem:[#allocation11 + $0x1e8] sm:$0xff] }
 0x556   :  { %10303 = vst [vmem:[#allocation39_spill] sm:$0xff] %v7894_v34  ;;  %2874 = vmatmul.f32.vlgmr.msra.gmra.mxu2 %v7744_v4  ;;  %2894 = vmatmul.f32.vlgmr.msra.gmra.mxu3 %v7744_v4  ;;  %v7910_v34 = vld [vmem:[#allocation11 + $0x1f0] sm:$0xff]  ;;  %v7919_v4 = vld [vmem:[#allocation11 + $0x1c8] sm:$0xff] }
 0x557   :  { %10304 = vst [vmem:[#allocation40_spill] sm:$0xff] %v7897_v21  ;;  %2965 = vmatpush.msra.mxu0 %v7904_v60  ;;  %2985 = vmatpush.msrb.mxu1 %v7907_v10  ;;  %v7913_v21 = vld [vmem:[#allocation11 + $0x1f8] sm:$0xff] }
 0x558   :  { %10305 = vst [vmem:[#allocation41_spill] sm:$0xff] %v7904_v60  ;;  %3005 = vmatpush.msrb.mxu2 %v7910_v34  ;;  %3025 = vmatpush.msrb.mxu3 %v7913_v21  ;;  %v7922_v60 = vld [vmem:[#allocation11 + $0x1d0] sm:$0xff] }
 0x559   :  { %10306 = vst [vmem:[#allocation42_spill] sm:$0xff] %v7907_v10  ;;  %2966 = vmatpush.msra.mxu0 %v7916_v11  ;;  %2986 = vmatpush.msrb.mxu1 %v7919_v4  ;;  %v7925_v10 = vld [vmem:[#allocation11 + $0x1d8] sm:$0xff] }
 0x55a   :  { %10307 = vst [vmem:[#allocation43_spill] sm:$0xff] %v7910_v34  ;;  %3006 = vmatpush.msrb.mxu2 %v7922_v60  ;;  %3026 = vmatpush.msrb.mxu3 %v7925_v10  ;;  %v7928_v34 = vld [vmem:[#allocation11 + $0x1a0] sm:$0xff] }
 0x55b   :  { %10308 = vst [vmem:[#allocation44_spill] sm:$0xff] %v7913_v21  ;;  %2967 = vmatpush.msra.mxu0 %v7928_v34  ;;  %v7931_v21 = vld [vmem:[#allocation11 + $0x1a8] sm:$0xff] }
 0x55c   :  { %10309 = vst [vmem:[#allocation45_spill] sm:$0xff] %v7916_v11  ;;  %2987 = vmatpush.msrb.mxu1 %v7931_v21  ;;  %v7934_v11 = vld [vmem:[#allocation11 + $0x1b0] sm:$0xff] }
 0x55d   :  { %10310 = vst [vmem:[#allocation46_spill] sm:$0xff] %v7919_v4  ;;  %3007 = vmatpush.msrb.mxu2 %v7934_v11  ;;  %v7937_v4 = vld [vmem:[#allocation11 + $0x1b8] sm:$0xff] }
 0x55e   :  { %10311 = vst [vmem:[#allocation47_spill] sm:$0xff] %v7922_v60  ;;  %3027 = vmatpush.msrb.mxu3 %v7937_v4  ;;  %v7940_v60 = vld [vmem:[#allocation11 + $0x180] sm:$0xff] }
 0x55f   :  { %10312 = vst [vmem:[#allocation48_spill] sm:$0xff] %v7925_v10  ;;  %2968 = vmatpush.msra.mxu0 %v7940_v60  ;;  %v7943_v10 = vld [vmem:[#allocation11 + $0x188] sm:$0xff] }
 0x560   :  { %10313 = vst [vmem:[#allocation49_spill] sm:$0xff] %v7928_v34  ;;  %2988 = vmatpush.msrb.mxu1 %v7943_v10  ;;  %v7946_v34 = vld [vmem:[#allocation11 + $0x190] sm:$0xff] }
 0x561   :  { %10314 = vst [vmem:[#allocation50_spill] sm:$0xff] %v7931_v21  ;;  %3008 = vmatpush.msrb.mxu2 %v7946_v34  ;;  %v7949_v21 = vld [vmem:[#allocation11 + $0x198] sm:$0xff] }
 0x562   :  { %10315 = vst [vmem:[#allocation51_spill] sm:$0xff] %v7934_v11  ;;  %3028 = vmatpush.msrb.mxu3 %v7949_v21  ;;  %v7952_v11 = vld [vmem:[#allocation11 + $0x160] sm:$0xff] }
 0x563   :  { %10316 = vst [vmem:[#allocation52_spill] sm:$0xff] %v7937_v4  ;;  %2969 = vmatpush.msra.mxu0 %v7952_v11  ;;  %v7955_v4 = vld [vmem:[#allocation11 + $0x168] sm:$0xff] }
 0x564   :  { %10317 = vst [vmem:[#allocation53_spill] sm:$0xff] %v7940_v60  ;;  %2989 = vmatpush.msrb.mxu1 %v7955_v4  ;;  %v7958_v60 = vld [vmem:[#allocation11 + $0x170] sm:$0xff] }
 0x565   :  { %10318 = vst [vmem:[#allocation56_spill] sm:$0xff] %v7943_v10  ;;  %3009 = vmatpush.msrb.mxu2 %v7958_v60  ;;  %v7961_v10 = vld [vmem:[#allocation11 + $0x178] sm:$0xff] }
 0x566   :  { %10319 = vst [vmem:[#allocation57_spill] sm:$0xff] %v7946_v34  ;;  %3029 = vmatpush.msrb.mxu3 %v7961_v10  ;;  %v7964_v34 = vld [vmem:[#allocation11 + $0x140] sm:$0xff] }
 0x567   :  { %10320 = vst [vmem:[#allocation58_spill] sm:$0xff] %v7949_v21  ;;  %2970 = vmatpush.msra.mxu0 %v7964_v34  ;;  %v7967_v21 = vld [vmem:[#allocation11 + $0x148] sm:$0xff] }
 0x568   :  { %10321 = vst [vmem:[#allocation60_spill] sm:$0xff] %v7952_v11  ;;  %2990 = vmatpush.msrb.mxu1 %v7967_v21  ;;  %v7970_v11 = vld [vmem:[#allocation11 + $0x150] sm:$0xff] }
 0x569   :  { %10322 = vst [vmem:[#allocation61_spill] sm:$0xff] %v7955_v4  ;;  %3010 = vmatpush.msrb.mxu2 %v7970_v11  ;;  %v7973_v4 = vld [vmem:[#allocation11 + $0x158] sm:$0xff] }
 0x56a   :  { %10323 = vst [vmem:[#allocation62_spill] sm:$0xff] %v7958_v60  ;;  %3030 = vmatpush.msrb.mxu3 %v7973_v4  ;;  %v7976_v60 = vld [vmem:[#allocation11 + $0x120] sm:$0xff] }
 0x56b   :  { %10324 = vst [vmem:[#allocation63_spill] sm:$0xff] %v7961_v10  ;;  %2971 = vmatpush.msra.mxu0 %v7976_v60  ;;  %v7979_v10 = vld [vmem:[#allocation11 + $0x128] sm:$0xff] }
 0x56c   :  { %10325 = vst [vmem:[#allocation64_spill] sm:$0xff] %v7964_v34  ;;  %2991 = vmatpush.msrb.mxu1 %v7979_v10  ;;  %v7982_v34 = vld [vmem:[#allocation11 + $0x130] sm:$0xff] }
 0x56d   :  { %10326 = vst [vmem:[#allocation65_spill] sm:$0xff] %v7967_v21  ;;  %3011 = vmatpush.msrb.mxu2 %v7982_v34  ;;  %v7985_v21 = vld [vmem:[#allocation11 + $0x138] sm:$0xff] }
 0x56e   :  { %10327 = vst [vmem:[#allocation66_spill] sm:$0xff] %v7970_v11  ;;  %3031 = vmatpush.msrb.mxu3 %v7985_v21  ;;  %v7988_v11 = vld [vmem:[#allocation11 + $0x100] sm:$0xff] }
 0x56f   :  { %10328 = vst [vmem:[#allocation67_spill] sm:$0xff] %v7973_v4  ;;  %2972 = vmatpush.msra.mxu0 %v7988_v11  ;;  %v7991_v4 = vld [vmem:[#allocation11 + $0x108] sm:$0xff] }
 0x570   :  { %10329 = vst [vmem:[#allocation68_spill] sm:$0xff] %v7976_v60  ;;  %2992 = vmatpush.msrb.mxu1 %v7991_v4  ;;  %v7994_v60 = vld [vmem:[#allocation11 + $0x110] sm:$0xff] }
 0x571   :  { %10330 = vst [vmem:[#allocation69_spill] sm:$0xff] %v7979_v10  ;;  %3012 = vmatpush.msrb.mxu2 %v7994_v60  ;;  %v7997_v10 = vld [vmem:[#allocation11 + $0x118] sm:$0xff] }
 0x572   :  { %10331 = vst [vmem:[#allocation70_spill] sm:$0xff] %v7982_v34  ;;  %3032 = vmatpush.msrb.mxu3 %v7997_v10  ;;  %v8000_v34 = vld [vmem:[#allocation11 + $0xe0] sm:$0xff] }
 0x573   :  { %10332 = vst [vmem:[#allocation71_spill] sm:$0xff] %v7985_v21  ;;  %2973 = vmatpush.msra.mxu0 %v8000_v34  ;;  %v8003_v21 = vld [vmem:[#allocation11 + $0xe8] sm:$0xff] }
 0x574   :  { %10333 = vst [vmem:[#allocation72_spill] sm:$0xff] %v7988_v11  ;;  %2993 = vmatpush.msrb.mxu1 %v8003_v21  ;;  %v8006_v11 = vld [vmem:[#allocation11 + $0xf0] sm:$0xff] }
 0x575   :  { %10334 = vst [vmem:[#allocation74_spill] sm:$0xff] %v7991_v4  ;;  %3013 = vmatpush.msrb.mxu2 %v8006_v11  ;;  %v8009_v4 = vld [vmem:[#allocation11 + $0xf8] sm:$0xff] }
 0x576   :  { %10335 = vst [vmem:[#allocation75_spill] sm:$0xff] %v7994_v60  ;;  %3033 = vmatpush.msrb.mxu3 %v8009_v4  ;;  %v8012_v60 = vld [vmem:[#allocation11 + $0xc0] sm:$0xff] }
 0x577   :  { %10336 = vst [vmem:[#allocation76_spill] sm:$0xff] %v7997_v10  ;;  %2974 = vmatpush.msra.mxu0 %v8012_v60  ;;  %v8015_v10 = vld [vmem:[#allocation11 + $0xc8] sm:$0xff] }
 0x578   :  { %10337 = vst [vmem:[#allocation77_spill] sm:$0xff] %v8000_v34  ;;  %2994 = vmatpush.msrb.mxu1 %v8015_v10  ;;  %v8018_v34 = vld [vmem:[#allocation11 + $0xd0] sm:$0xff] }
 0x579   :  { %10338 = vst [vmem:[#allocation78_spill] sm:$0xff] %v8003_v21  ;;  %3014 = vmatpush.msrb.mxu2 %v8018_v34  ;;  %v8021_v21 = vld [vmem:[#allocation11 + $0xd8] sm:$0xff] }
 0x57a   :  { %10339 = vst [vmem:[#allocation79_spill] sm:$0xff] %v8006_v11  ;;  %3034 = vmatpush.msrb.mxu3 %v8021_v21  ;;  %v8024_v11 = vld [vmem:[#allocation11 + $0xa0] sm:$0xff] }
 0x57b   :  { %10340 = vst [vmem:[#allocation80_spill] sm:$0xff] %v8009_v4  ;;  %2975 = vmatpush.msra.mxu0 %v8024_v11  ;;  %v8027_v4 = vld [vmem:[#allocation11 + $0xa8] sm:$0xff] }
 0x57c   :  { %10341 = vst [vmem:[#allocation82_spill] sm:$0xff] %v8012_v60  ;;  %2995 = vmatpush.msrb.mxu1 %v8027_v4  ;;  %v8030_v60 = vld [vmem:[#allocation11 + $0xb0] sm:$0xff] }
 0x57d   :  { %10342 = vst [vmem:[#allocation83_spill] sm:$0xff] %v8015_v10  ;;  %3015 = vmatpush.msrb.mxu2 %v8030_v60  ;;  %v8033_v10 = vld [vmem:[#allocation11 + $0xb8] sm:$0xff] }
 0x57e   :  { %10343 = vst [vmem:[#allocation84_spill] sm:$0xff] %v8018_v34  ;;  %3035 = vmatpush.msrb.mxu3 %v8033_v10  ;;  %v8036_v34 = vld [vmem:[#allocation11 + $0x80] sm:$0xff] }
 0x57f   :  { %10344 = vst [vmem:[#allocation85_spill] sm:$0xff] %v8021_v21  ;;  %2976 = vmatpush.msra.mxu0 %v8036_v34  ;;  %v8039_v21 = vld [vmem:[#allocation11 + $0x88] sm:$0xff] }
 0x580   :  { %10345 = vst [vmem:[#allocation86_spill] sm:$0xff] %v8024_v11  ;;  %2996 = vmatpush.msrb.mxu1 %v8039_v21  ;;  %v8042_v11 = vld [vmem:[#allocation11 + $0x90] sm:$0xff] }
 0x581   :  { %10346 = vst [vmem:[#allocation87_spill] sm:$0xff] %v8027_v4  ;;  %3016 = vmatpush.msrb.mxu2 %v8042_v11  ;;  %v8045_v4 = vld [vmem:[#allocation11 + $0x98] sm:$0xff] }
 0x582   :  { %10347 = vst [vmem:[#allocation88_spill] sm:$0xff] %v8030_v60  ;;  %3036 = vmatpush.msrb.mxu3 %v8045_v4  ;;  %v8048_v60 = vld [vmem:[#allocation11 + $0x60] sm:$0xff] }
 0x583   :  { %10348 = vst [vmem:[#allocation89_spill] sm:$0xff] %v8033_v10  ;;  %2977 = vmatpush.msra.mxu0 %v8048_v60  ;;  %v8051_v10 = vld [vmem:[#allocation11 + $0x68] sm:$0xff] }
 0x584   :  { %10349 = vst [vmem:[#allocation92_spill] sm:$0xff] %v8036_v34  ;;  %2997 = vmatpush.msrb.mxu1 %v8051_v10  ;;  %v8054_v34 = vld [vmem:[#allocation11 + $0x70] sm:$0xff] }
 0x585   :  { %10350 = vst [vmem:[#allocation94_spill] sm:$0xff] %v8039_v21  ;;  %3017 = vmatpush.msrb.mxu2 %v8054_v34  ;;  %v8057_v21 = vld [vmem:[#allocation11 + $0x78] sm:$0xff] }
 0x586   :  { %10351 = vst [vmem:[#allocation95_spill] sm:$0xff] %v8042_v11  ;;  %3037 = vmatpush.msrb.mxu3 %v8057_v21  ;;  %v8060_v11 = vld [vmem:[#allocation11 + $0x40] sm:$0xff] }
 0x587   :  { %10352 = vst [vmem:[#allocation96_spill] sm:$0xff] %v8045_v4  ;;  %2978 = vmatpush.msra.mxu0 %v8060_v11  ;;  %v8063_v4 = vld [vmem:[#allocation11 + $0x48] sm:$0xff] }
 0x588   :  { %10353 = vst [vmem:[#allocation97_spill] sm:$0xff] %v8048_v60  ;;  %2998 = vmatpush.msrb.mxu1 %v8063_v4  ;;  %v8066_v60 = vld [vmem:[#allocation11 + $0x50] sm:$0xff] }
 0x589   :  { %10354 = vst [vmem:[#allocation98_spill] sm:$0xff] %v8051_v10  ;;  %3018 = vmatpush.msrb.mxu2 %v8066_v60  ;;  %v8069_v10 = vld [vmem:[#allocation11 + $0x58] sm:$0xff] }
 0x58a   :  { %10355 = vst [vmem:[#allocation99_spill] sm:$0xff] %v8054_v34  ;;  %3038 = vmatpush.msrb.mxu3 %v8069_v10  ;;  %v8072_v34 = vld [vmem:[#allocation11 + $0x20] sm:$0xff] }
 0x58b   :  { %10356 = vst [vmem:[#allocation100_spill] sm:$0xff] %v8057_v21  ;;  %2979 = vmatpush.msra.mxu0 %v8072_v34  ;;  %v8075_v21 = vld [vmem:[#allocation11 + $0x28] sm:$0xff] }
 0x58c   :  { %10357 = vst [vmem:[#allocation101_spill] sm:$0xff] %v8060_v11  ;;  %2999 = vmatpush.msrb.mxu1 %v8075_v21  ;;  %v8078_v11 = vld [vmem:[#allocation11 + $0x30] sm:$0xff] }
 0x58d   :  { %10358 = vst [vmem:[#allocation102_spill] sm:$0xff] %v8063_v4  ;;  %3019 = vmatpush.msrb.mxu2 %v8078_v11  ;;  %v8081_v4 = vld [vmem:[#allocation11 + $0x38] sm:$0xff] }
 0x58e   :  { %10359 = vst [vmem:[#allocation103_spill] sm:$0xff] %v8066_v60  ;;  %3039 = vmatpush.msrb.mxu3 %v8081_v4  ;;  %v8084_v60 = vld [vmem:[#allocation11] sm:$0xff] }
 0x58f   :  { %10360 = vst [vmem:[#allocation104_spill] sm:$0xff] %v8069_v10  ;;  %2980 = vmatpush.msra.mxu0 %v8084_v60  ;;  %v8087_v10 = vld [vmem:[#allocation11 + $0x8] sm:$0xff] }
 0x590   :  { %10361 = vst [vmem:[#allocation106_spill] sm:$0xff] %v8072_v34  ;;  %3000 = vmatpush.msrb.mxu1 %v8087_v10  ;;  %v8090_v34 = vld [vmem:[#allocation11 + $0x10] sm:$0xff] }
 0x591   :  { %10362 = vst [vmem:[#allocation107_spill] sm:$0xff] %v8075_v21  ;;  %3020 = vmatpush.msrb.mxu2 %v8090_v34  ;;  %v8093_v21 = vld [vmem:[#allocation11 + $0x18] sm:$0xff] }
 0x592   :  { %10363 = vst [vmem:[#allocation108_spill] sm:$0xff] %v8078_v11  ;;  %3040 = vmatpush.msrb.mxu3 %v8093_v21  ;;  %v8096_v11 = vld [vmem:[#allocation10 + $0x1e0] sm:$0xff] }
 0x593   :  { %10364 = vst [vmem:[#allocation109_spill] sm:$0xff] %v8081_v4  ;;  %3045 = vmatpush.msrb.mxu0 %v8096_v11  ;;  %v8099_v4 = vld [vmem:[#allocation10 + $0x1e8] sm:$0xff] }
 0x594   :  { %10365 = vst [vmem:[#allocation112_spill] sm:$0xff] %v8084_v60  ;;  %3065 = vmatpush.msra.mxu1 %v8099_v4  ;;  %v8102_v60 = vld [vmem:[#allocation10 + $0x1f0] sm:$0xff] }
 0x595   :  { %10366 = vst [vmem:[#allocation113_spill] sm:$0xff] %v8087_v10  ;;  %3085 = vmatpush.msra.mxu2 %v8102_v60  ;;  %v8105_v10 = vld [vmem:[#allocation10 + $0x1f8] sm:$0xff] }
 0x596   :  { %10367 = vst [vmem:[#allocation114_spill] sm:$0xff] %v8090_v34  ;;  %3105 = vmatpush.msra.mxu3 %v8105_v10  ;;  %v8108_v34 = vld [vmem:[#allocation10 + $0x1c0] sm:$0xff] }
 0x597   :  { %10368 = vst [vmem:[#allocation116_spill] sm:$0xff] %v8093_v21  ;;  %3046 = vmatpush.msrb.mxu0 %v8108_v34  ;;  %v8111_v21 = vld [vmem:[#allocation10 + $0x1c8] sm:$0xff] }
 0x598   :  { %10369 = vst [vmem:[#allocation117_spill] sm:$0xff] %v8096_v11  ;;  %3066 = vmatpush.msra.mxu1 %v8111_v21  ;;  %v8114_v11 = vld [vmem:[#allocation10 + $0x1d0] sm:$0xff] }
 0x599   :  { %10370 = vst [vmem:[#allocation118_spill] sm:$0xff] %v8099_v4  ;;  %3086 = vmatpush.msra.mxu2 %v8114_v11  ;;  %v8117_v4 = vld [vmem:[#allocation10 + $0x1d8] sm:$0xff] }
 0x59a   :  { %10371 = vst [vmem:[#allocation119_spill] sm:$0xff] %v8102_v60  ;;  %3106 = vmatpush.msra.mxu3 %v8117_v4  ;;  %v8120_v60 = vld [vmem:[#allocation10 + $0x1a0] sm:$0xff] }
 0x59b   :  { %10372 = vst [vmem:[#allocation120_spill] sm:$0xff] %v8105_v10  ;;  %3047 = vmatpush.msrb.mxu0 %v8120_v60  ;;  %v8123_v10 = vld [vmem:[#allocation10 + $0x1a8] sm:$0xff] }
 0x59c   :  { %10373 = vst [vmem:[#allocation121_spill] sm:$0xff] %v8108_v34  ;;  %3067 = vmatpush.msra.mxu1 %v8123_v10  ;;  %v8126_v34 = vld [vmem:[#allocation10 + $0x1b0] sm:$0xff] }
 0x59d   :  { %10374 = vst [vmem:[#allocation122_spill] sm:$0xff] %v8111_v21  ;;  %3087 = vmatpush.msra.mxu2 %v8126_v34  ;;  %v8129_v21 = vld [vmem:[#allocation10 + $0x1b8] sm:$0xff] }
 0x59e   :  { %10375 = vst [vmem:[#allocation123_spill] sm:$0xff] %v8114_v11  ;;  %3107 = vmatpush.msra.mxu3 %v8129_v21  ;;  %v8132_v11 = vld [vmem:[#allocation10 + $0x180] sm:$0xff] }
 0x59f   :  { %10376 = vst [vmem:[#allocation124_spill] sm:$0xff] %v8117_v4  ;;  %3048 = vmatpush.msrb.mxu0 %v8132_v11  ;;  %v8135_v4 = vld [vmem:[#allocation10 + $0x188] sm:$0xff] }
 0x5a0   :  { %10377 = vst [vmem:[#allocation125_spill] sm:$0xff] %v8120_v60  ;;  %3068 = vmatpush.msra.mxu1 %v8135_v4  ;;  %v8138_v60 = vld [vmem:[#allocation10 + $0x190] sm:$0xff] }
 0x5a1   :  { %10378 = vst [vmem:[#allocation126_spill] sm:$0xff] %v8123_v10  ;;  %3088 = vmatpush.msra.mxu2 %v8138_v60  ;;  %v8141_v10 = vld [vmem:[#allocation10 + $0x198] sm:$0xff] }
 0x5a2   :  { %10379 = vst [vmem:[#allocation127_spill] sm:$0xff] %v8126_v34  ;;  %3108 = vmatpush.msra.mxu3 %v8141_v10  ;;  %v8144_v34 = vld [vmem:[#allocation10 + $0x160] sm:$0xff] }
 0x5a3   :  { %10380 = vst [vmem:[#allocation128_spill] sm:$0xff] %v8129_v21  ;;  %3049 = vmatpush.msrb.mxu0 %v8144_v34  ;;  %v8147_v21 = vld [vmem:[#allocation10 + $0x168] sm:$0xff] }
 0x5a4   :  { %10381 = vst [vmem:[#allocation129_spill] sm:$0xff] %v8132_v11  ;;  %3069 = vmatpush.msra.mxu1 %v8147_v21  ;;  %v8150_v11 = vld [vmem:[#allocation10 + $0x170] sm:$0xff] }
 0x5a5   :  { %10382 = vst [vmem:[#allocation132_spill] sm:$0xff] %v8135_v4  ;;  %3089 = vmatpush.msra.mxu2 %v8150_v11  ;;  %v8153_v4 = vld [vmem:[#allocation10 + $0x178] sm:$0xff] }
 0x5a6   :  { %10383 = vst [vmem:[#allocation133_spill] sm:$0xff] %v8138_v60  ;;  %3109 = vmatpush.msra.mxu3 %v8153_v4  ;;  %v8156_v60 = vld [vmem:[#allocation10 + $0x140] sm:$0xff] }
 0x5a7   :  { %10384 = vst [vmem:[#allocation134_spill] sm:$0xff] %v8141_v10  ;;  %3050 = vmatpush.msrb.mxu0 %v8156_v60  ;;  %v8159_v10 = vld [vmem:[#allocation10 + $0x148] sm:$0xff] }
 0x5a8   :  { %10385 = vst [vmem:[#allocation137_spill] sm:$0xff] %v8144_v34  ;;  %3070 = vmatpush.msra.mxu1 %v8159_v10  ;;  %v8162_v34 = vld [vmem:[#allocation10 + $0x150] sm:$0xff] }
 0x5a9   :  { %10386 = vst [vmem:[#allocation138_spill] sm:$0xff] %v8147_v21  ;;  %3090 = vmatpush.msra.mxu2 %v8162_v34  ;;  %v8165_v21 = vld [vmem:[#allocation10 + $0x158] sm:$0xff] }
 0x5aa   :  { %10387 = vst [vmem:[#allocation139_spill] sm:$0xff] %v8150_v11  ;;  %3110 = vmatpush.msra.mxu3 %v8165_v21  ;;  %v8168_v11 = vld [vmem:[#allocation10 + $0x120] sm:$0xff] }
 0x5ab   :  { %10388 = vst [vmem:[#allocation140_spill] sm:$0xff] %v8153_v4  ;;  %3051 = vmatpush.msrb.mxu0 %v8168_v11  ;;  %v8171_v4 = vld [vmem:[#allocation10 + $0x128] sm:$0xff] }
 0x5ac   :  { %10389 = vst [vmem:[#allocation141_spill] sm:$0xff] %v8156_v60  ;;  %3071 = vmatpush.msra.mxu1 %v8171_v4  ;;  %v8174_v60 = vld [vmem:[#allocation10 + $0x130] sm:$0xff] }
 0x5ad   :  { %10390 = vst [vmem:[#allocation142_spill] sm:$0xff] %v8159_v10  ;;  %3091 = vmatpush.msra.mxu2 %v8174_v60  ;;  %v8177_v10 = vld [vmem:[#allocation10 + $0x138] sm:$0xff] }
 0x5ae   :  { %10391 = vst [vmem:[#allocation143_spill] sm:$0xff] %v8162_v34  ;;  %3111 = vmatpush.msra.mxu3 %v8177_v10  ;;  %v8180_v34 = vld [vmem:[#allocation10 + $0x100] sm:$0xff]  ;;  %v2628_v0 = vpop.f32.mrf.mxu1 }
 0x5af   :  { %10392 = vst [vmem:[#allocation144_spill] sm:$0xff] %v8165_v21  ;;  %3052 = vmatpush.msrb.mxu0 %v8180_v34  ;;  %v8183_v21 = vld [vmem:[#allocation10 + $0x108] sm:$0xff] }
 0x5b0   :  { %10393 = vst [vmem:[#allocation145_spill] sm:$0xff] %v8168_v11  ;;  %3072 = vmatpush.msra.mxu1 %v8183_v21  ;;  %v8186_v11 = vld [vmem:[#allocation10 + $0x110] sm:$0xff] }
 0x5b1   :  { %10394 = vst [vmem:[#allocation146_spill] sm:$0xff] %v8171_v4  ;;  %3092 = vmatpush.msra.mxu2 %v8186_v11  ;;  %v8189_v4 = vld [vmem:[#allocation10 + $0x118] sm:$0xff] }
 0x5b2   :  { %10395 = vst [vmem:[#allocation147_spill] sm:$0xff] %v8174_v60  ;;  %3112 = vmatpush.msra.mxu3 %v8189_v4  ;;  %v8192_v60 = vld [vmem:[#allocation10 + $0xe0] sm:$0xff] }
 0x5b3   :  { %10396 = vst [vmem:[#allocation148_spill] sm:$0xff] %v8177_v10  ;;  %3053 = vmatpush.msrb.mxu0 %v8192_v60  ;;  %v8195_v10 = vld [vmem:[#allocation10 + $0xe8] sm:$0xff] }
 0x5b4   :  { %10397 = vst [vmem:[#allocation149_spill] sm:$0xff] %v8180_v34  ;;  %3073 = vmatpush.msra.mxu1 %v8195_v10  ;;  %v8198_v34 = vld [vmem:[#allocation10 + $0xf0] sm:$0xff] }
 0x5b5   :  { %10398 = vst [vmem:[#allocation151_spill] sm:$0xff] %v8183_v21  ;;  %3093 = vmatpush.msra.mxu2 %v8198_v34  ;;  %v8201_v21 = vld [vmem:[#allocation10 + $0xf8] sm:$0xff]  ;;  %v2668_v58 = vpop.f32.mrf.mxu3 }
 0x5b6   :  { %10399 = vst [vmem:[#allocation152_spill] sm:$0xff] %v8186_v11  ;;  %3113 = vmatpush.msra.mxu3 %v8201_v21  ;;  %v8204_v11 = vld [vmem:[#allocation10 + $0xc0] sm:$0xff] }
 0x5b7   :  { %10400 = vst [vmem:[#allocation153_spill] sm:$0xff] %v8189_v4  ;;  %3054 = vmatpush.msrb.mxu0 %v8204_v11  ;;  %v8207_v4 = vld [vmem:[#allocation10 + $0xc8] sm:$0xff] }
 0x5b8   :  { %10401 = vst [vmem:[#allocation156_spill] sm:$0xff] %v8192_v60  ;;  %3074 = vmatpush.msra.mxu1 %v8207_v4  ;;  %v8210_v60 = vld [vmem:[#allocation10 + $0xd0] sm:$0xff] }
 0x5b9   :  { %10402 = vst [vmem:[#allocation158_spill] sm:$0xff] %v8195_v10  ;;  %3094 = vmatpush.msra.mxu2 %v8210_v60  ;;  %v8213_v10 = vld [vmem:[#allocation10 + $0xd8] sm:$0xff]  ;;  %v2708_v26 = vpop.f32.mrf.mxu1 }
 0x5ba   :  { %10403 = vst [vmem:[#allocation159_spill] sm:$0xff] %v8198_v34  ;;  %3114 = vmatpush.msra.mxu3 %v8213_v10  ;;  %v8216_v34 = vld [vmem:[#allocation10 + $0xa0] sm:$0xff]  ;;  %v2709_v47 = vadd.f32 %v2708_v26, %v2628_v0 }
 0x5bb   :  { %10404 = vst [vmem:[#allocation160_spill] sm:$0xff] %v8201_v21  ;;  %3055 = vmatpush.msrb.mxu0 %v8216_v34  ;;  %v8219_v21 = vld [vmem:[#allocation10 + $0xa8] sm:$0xff] }
 0x5bc   :  { %10405 = vst [vmem:[#allocation161_spill] sm:$0xff] %v8204_v11  ;;  %3075 = vmatpush.msra.mxu1 %v8219_v21  ;;  %v8222_v11 = vld [vmem:[#allocation10 + $0xb0] sm:$0xff]  ;;  %v2752_v9 = vadd.f32 %v2709_v47, %v10259_v19 }
 0x5bd   :  { %10406 = vst [vmem:[#allocation162_spill] sm:$0xff] %v8207_v4  ;;  %3095 = vmatpush.msra.mxu2 %v8222_v11  ;;  %v8225_v4 = vld [vmem:[#allocation10 + $0xb8] sm:$0xff] }
 0x5be   :  { %10407 = vst [vmem:[#allocation163_spill] sm:$0xff] %v8210_v60  ;;  %3115 = vmatpush.msra.mxu3 %v8225_v4  ;;  %v8228_v60 = vld [vmem:[#allocation10 + $0x80] sm:$0xff]  ;;  %v3676_v41 = vmul.f32 -1.442695, %v2752_v9 }
 0x5bf   :  { %10408 = vst [vmem:[#allocation164_spill] sm:$0xff] %v8213_v10  ;;  %3056 = vmatpush.msrb.mxu0 %v8228_v60  ;;  %v8231_v10 = vld [vmem:[#allocation10 + $0x88] sm:$0xff] }
 0x5c0   :  { %10409 = vst [vmem:[#allocation165_spill] sm:$0xff] %v8216_v34  ;;  %3076 = vmatpush.msra.mxu1 %v8231_v10  ;;  %v8234_v34 = vld [vmem:[#allocation10 + $0x90] sm:$0xff] }
 0x5c1   :  { %10410 = vst [vmem:[#allocation166_spill] sm:$0xff] %v8219_v21  ;;  %3096 = vmatpush.msra.mxu2 %v8234_v34  ;;  %v8237_v21 = vld [vmem:[#allocation10 + $0x98] sm:$0xff] }
 0x5c2   :  { %10411 = vst [vmem:[#allocation167_spill] sm:$0xff] %v8222_v11  ;;  %3116 = vmatpush.msra.mxu3 %v8237_v21  ;;  %v8240_v11 = vld [vmem:[#allocation10 + $0x60] sm:$0xff] }
 0x5c3   :  { %10412 = vst [vmem:[#allocation169_spill] sm:$0xff] %v8225_v4  ;;  %3057 = vmatpush.msrb.mxu0 %v8240_v11  ;;  %v8243_v4 = vld [vmem:[#allocation10 + $0x68] sm:$0xff] }
 0x5c4   :  { %10413 = vst [vmem:[#allocation170_spill] sm:$0xff] %v8228_v60  ;;  %3077 = vmatpush.msra.mxu1 %v8243_v4  ;;  %v8246_v60 = vld [vmem:[#allocation10 + $0x70] sm:$0xff] }
 0x5c5   :  { %10414 = vst [vmem:[#allocation173_spill] sm:$0xff] %v8231_v10  ;;  %3097 = vmatpush.msra.mxu2 %v8246_v60  ;;  %v8249_v10 = vld [vmem:[#allocation10 + $0x78] sm:$0xff] }
 0x5c6   :  { %10415 = vst [vmem:[#allocation174_spill] sm:$0xff] %v8234_v34  ;;  %3117 = vmatpush.msra.mxu3 %v8249_v10  ;;  %v8252_v34 = vld [vmem:[#allocation10 + $0x40] sm:$0xff] }
 0x5c7   :  { %10416 = vst [vmem:[#allocation175_spill] sm:$0xff] %v8237_v21  ;;  %3058 = vmatpush.msrb.mxu0 %v8252_v34  ;;  %v8255_v21 = vld [vmem:[#allocation10 + $0x48] sm:$0xff] }
 0x5c8   :  { %10417 = vst [vmem:[#allocation176_spill] sm:$0xff] %v8240_v11  ;;  %3078 = vmatpush.msra.mxu1 %v8255_v21  ;;  %v8258_v11 = vld [vmem:[#allocation10 + $0x50] sm:$0xff] }
 0x5c9   :  { %10418 = vst [vmem:[#allocation177_spill] sm:$0xff] %v8243_v4  ;;  %3098 = vmatpush.msra.mxu2 %v8258_v11  ;;  %v8261_v4 = vld [vmem:[#allocation10 + $0x58] sm:$0xff] }
 0x5ca   :  { %10419 = vst [vmem:[#allocation178_spill] sm:$0xff] %v8246_v60  ;;  %3118 = vmatpush.msra.mxu3 %v8261_v4  ;;  %v8264_v60 = vld [vmem:[#allocation10 + $0x20] sm:$0xff] }
 0x5cb   :  { %10420 = vst [vmem:[#allocation179_spill] sm:$0xff] %v8249_v10  ;;  %3059 = vmatpush.msrb.mxu0 %v8264_v60  ;;  %v8267_v10 = vld [vmem:[#allocation10 + $0x28] sm:$0xff] }
 0x5cc   :  { %10421 = vst [vmem:[#allocation180_spill] sm:$0xff] %v8252_v34  ;;  %3079 = vmatpush.msra.mxu1 %v8267_v10  ;;  %v8270_v34 = vld [vmem:[#allocation10 + $0x30] sm:$0xff] }
 0x5cd   :  { %10422 = vst [vmem:[#allocation181_spill] sm:$0xff] %v8255_v21  ;;  %3099 = vmatpush.msra.mxu2 %v8270_v34  ;;  %v8273_v21 = vld [vmem:[#allocation10 + $0x38] sm:$0xff] }
 0x5ce   :  { %10423 = vst [vmem:[#allocation59_spill] sm:$0xff] %v8258_v11  ;;  %3119 = vmatpush.msra.mxu3 %v8273_v21  ;;  %v8276_v11 = vld [vmem:[#allocation10] sm:$0xff] }
 0x5cf   :  { %10424 = vst [vmem:[#allocation73_spill] sm:$0xff] %v8261_v4  ;;  %3060 = vmatpush.msrb.mxu0 %v8276_v11  ;;  %v8279_v4 = vld [vmem:[#allocation10 + $0x8] sm:$0xff] }
 0x5d0   :  { %10425 = vst [vmem:[#allocation91_spill] sm:$0xff] %v8264_v60  ;;  %3080 = vmatpush.msra.mxu1 %v8279_v4  ;;  %v8282_v60 = vld [vmem:[#allocation10 + $0x10] sm:$0xff] }
 0x5d1   :  { %10426 = vst [vmem:[#allocation90_spill] sm:$0xff] %v8267_v10  ;;  %3100 = vmatpush.msra.mxu2 %v8282_v60  ;;  %v8285_v10 = vld [vmem:[#allocation10 + $0x18] sm:$0xff] }
 0x5d2   :  { %10427 = vst [vmem:[#allocation189_spill] sm:$0xff] %v8270_v34  ;;  %3120 = vmatpush.msra.mxu3 %v8285_v10  ;;  %v2608_v34 = vpop.f32.mrf.mxu0 }
 0x5d3   :  { %10428 = vst [vmem:[#allocation190_spill] sm:$0xff] %v8273_v21 }
 0x5d4   :  { %10429 = vst [vmem:[#allocation191_spill] sm:$0xff] %v8276_v11 }
 0x5d5   :  { %10430 = vst [vmem:[#allocation192_spill] sm:$0xff] %v8279_v4  ;;  %v2648_v4 = vpop.f32.mrf.mxu2 }
 0x5d6   :  { %10431 = vst [vmem:[#allocation193_spill] sm:$0xff] %v8282_v60  ;;  %v2748_v60 = vpop.f32.mrf.mxu3 }
 0x5d7   :  { %10432 = vst [vmem:[#allocation194_spill] sm:$0xff] %v8285_v10  ;;  %v2749_v40 = vadd.f32 %v2748_v60, %v2668_v58 }
 0x5d9   :  { %v2754_v10 = vadd.f32 %v2749_v40, %v10260_v37  ;;  %v10433_v40 = vld [vmem:[#allocation54_spill] sm:$0xff] }
 0x5da   :  { %v2688_v21 = vpop.f32.mrf.mxu0  ;;  %v437_v60 = vadd.f32 %v10433_v40, %v10261_v3 }
 0x5db   :  { %v2689_v49 = vadd.f32 %v2688_v21, %v2608_v34  ;;  %v3677_v8 = vmul.f32 -1.442695, %v2754_v10  ;;  %v2855_v21 = vpop.f32.mrf.mxu1 }
 0x5dd   :  { %v2751_v11 = vadd.f32 %v2689_v49, %v10258_v52  ;;  %v2728_v32 = vpop.f32.mrf.mxu2 }
 0x5de   :  { %v2729_v49 = vadd.f32 %v2728_v32, %v2648_v4 }
 0x5df   :  { %v3675_v46 = vmul.f32 -1.442695, %v2751_v11 }
 0x5e0   :  { %v2753_v11 = vadd.f32 %v2729_v49, %v10267_v42 }
 0x5e1   :  { %3886 = vpow2.f32 %v3675_v46 }
 0x5e2   :  { %3888 = vpow2.f32 %v3676_v41  ;;  %v2835_v32 = vpop.f32.mrf.mxu0 }
 0x5e3   :  { %3890 = vpow2.f32 %v3677_v8  ;;  %v2898_v49 = vadd.f32 %v2835_v32, %v437_v60 }
 0x5e5   :  { %v3678_v40 = vmul.f32 -1.442695, %v2898_v49 }
 0x5e7   :  { %v3887_v33 = vpop.eup %3886 }
 0x5e8   :  { %v3889_v1 = vpop.eup %3888  ;;  %v2758_v31 = vadd.f32 1.0, %v3887_v33  ;;  %v10434_v33 = vld [vmem:[#allocation172_spill] sm:$0xff] }
 0x5e9   :  { %v2777_v26 = vadd.f32 1.0, %v3889_v1  ;;  %v3891_v47 = vpop.eup %3890  ;;  %v478_v8 = vadd.f32 %v10434_v33, %v10263_v12  ;;  %v10435_v33 = vld [vmem:[#allocation182_spill] sm:$0xff] }
 0x5ea   :  { %3892 = vrcp.f32 %v2758_v31  ;;  %v8292_v9 = vadd.f32 1.0, %v3891_v47  ;;  %v2768_v34 = vand.u32 2147483647, %v2758_v31  ;;  %v2770_v4 = vand.u32 2147483648, %v2758_v31 }
 0x5eb   :  { %3894 = vrcp.f32 %v2777_v26  ;;  %v2899_v47 = vadd.f32 %v2855_v21, %v478_v8  ;;  %v2789_v42 = vand.u32 2147483648, %v2777_v26  ;;  %v2787_v19 = vand.u32 2147483647, %v2777_v26 }
 0x5ec   :  { %3896 = vrcp.f32 %v8292_v9  ;;  %vm2783_vm7 = vweird.f32 %v2777_v26  ;;  %vm2764_vm8 = vweird.f32 %v2758_v31  ;;  %vm2769_vm11 = vcmp.eq.f32.partialorder %v2768_v34, 8.507059e+37 }
 0x5ed   :  { %3898 = vtanh.f32 %v2753_v11  ;;  %v3679_v3 = vmul.f32 -1.442695, %v2899_v47  ;;  %vm2788_vm12 = vcmp.eq.f32.partialorder %v2787_v19, 8.507059e+37  ;;  %v2895_v47 = vpop.f32.mrf.mxu3  ;;  %v2809_v19 = vand.u32 2147483648, %v8292_v9 }
 0x5ee   :  { %3900 = vpow2.f32 %v3678_v40  ;;  %vm2803_vm14 = vweird.f32 %v8292_v9 }
 0x5ef   :  { %3902 = vpow2.f32 %v3679_v3 }
 0x5f0   :  { %v3893_v46 = vpop.eup %3892 }
 0x5f1   :  { %v3895_v41 = vpop.eup %3894  ;;  %v2760_v58 = vmul.f32 %v3893_v46, %v2758_v31  ;;  %vm2765_vm5 = vweird.f32 %v3893_v46 }
 0x5f2   :  { %v2779_v1 = vmul.f32 %v3895_v41, %v2777_v26  ;;  %vm2784_vm6 = vweird.f32 %v3895_v41  ;;  %v3897_v35 = vpop.eup %3896  ;;  %vm2766_vm9 = vmor %vm2764_vm8, %vm2765_vm5 }
 0x5f3   :  { %v2761_v10 = vsub.f32 1.0, %v2760_v58  ;;  %v560_v58 = vadd.f32 %v10435_v33, %v10265_v7  ;;  %v2799_v60 = vmul.f32 %v3897_v35, %v8292_v9  ;;  %v3899_v8 = vpop.eup %3898  ;;  %vm2785_vm10 = vmor %vm2783_vm7, %vm2784_vm6  ;;  %vm2804_vm13 = vweird.f32 %v3897_v35 }
 0x5f4   :  { %v2780_v0 = vsub.f32 1.0, %v2779_v1  ;;  %v2771_v1 = vor.u32 1.1754944e-38, %v2770_v4  ;;  %v3901_v7 = vpop.eup %3900  ;;  %vm2805_vm15 = vmor %vm2803_vm14, %vm2804_vm13 }
 0x5f5   :  { %v2762_v37 = vmul.f32 %v3893_v46, %v2761_v10  ;;  %v2790_v10 = vor.u32 1.1754944e-38, %v2789_v42  ;;  %v2800_v49 = vsub.f32 1.0, %v2799_v60  ;;  %v2901_v31 = vadd.f32 %v2895_v47, %v560_v58  ;;  %v3903_v36 = vpop.eup %3902  ;;  %v10436_v58 = vld [vmem:[#allocation184_spill] sm:$0xff] }
 0x5f6   :  { %v2781_v52 = vmul.f32 %v3895_v41, %v2780_v0  ;;  %v8305_v42 = vadd.f32 1.0, %v3901_v7 }
 0x5f7   :  { %v2763_v11 = vadd.f32 %v3893_v46, %v2762_v37  ;;  %v3680_v33 = vmul.f32 -1.442695, %v2901_v31 }
 0x5f8   :  { %v2782_v12 = vadd.f32 %v3895_v41, %v2781_v52  ;;  %v2801_v52 = vmul.f32 %v3897_v35, %v2800_v49  ;;  %v2917_v47 = vand.u32 2147483648, %v8305_v42  ;;  %v2915_v31 = vand.u32 2147483647, %v8305_v42 }
 0x5f9   :  { %v2767_v32 = vsel %vm2766_vm9, %v3893_v46, %v2763_v11  ;;  %3904 = vpow2.f32 %v3680_v33  ;;  %v2875_v46 = vpop.f32.mrf.mxu2  ;;  %v519_v11 = vadd.f32 %v10436_v58, %v5593_v24  ;;  %vm2911_vm3 = vweird.f32 %v8305_v42  ;;  %v10456_v58 = vld [vmem:[#allocation32_spill] sm:$0xff] }
 0x5fa   :  { %v2772_v21 = vsel %vm2769_vm11, %v2771_v1, %v2767_v32  ;;  %v2786_v0 = vsel %vm2785_vm10, %v3895_v41, %v2782_v12  ;;  %v2802_v3 = vadd.f32 %v3897_v35, %v2801_v52  ;;  %v8309_v12 = vadd.f32 1.0, %v3903_v36 }
 0x5fb   :  { %v2791_v26 = vsel %vm2788_vm12, %v2790_v10, %v2786_v0  ;;  %v2814_v37 = vmul.f32 %v3899_v8, %v2772_v21  ;;  %v2810_v41 = vor.u32 1.1754944e-38, %v2809_v19  ;;  %v2900_v10 = vadd.f32 %v2875_v46, %v519_v11  ;;  %v10453_v46 = vld [vmem:[#allocation26_spill] sm:$0xff] }
 0x5fc   :  { %v2813_v4 = vmul.f32 %v2791_v26, %v7657_v53  ;;  %v2807_v53 = vand.u32 2147483647, %v8292_v9  ;;  %v2806_v7 = vsel %vm2805_vm15, %v3897_v35, %v2802_v3  ;;  %v2936_v26 = vand.u32 2147483648, %v8309_v12  ;;  %v10457_v11 = vld [vmem:[#allocation30_spill] sm:$0xff] }
 0x5fd   :  { %v2934_v52 = vand.u32 2147483647, %v8309_v12  ;;  %vm2930_vm4 = vweird.f32 %v8309_v12  ;;  %vm2916_vm7 = vcmp.eq.f32.partialorder %v2915_v31, 8.507059e+37  ;;  %v10472_v31 = vld [vmem:[#allocation44_spill] sm:$0xff] }
 0x5fe   :  { %v8303_v40 = vadd.f32 %v2814_v37, %v2813_v4  ;;  %vm2808_vm0 = vcmp.eq.f32.partialorder %v2807_v53, 8.507059e+37  ;;  %v10451_v53 = vld [vmem:[#allocation111_spill] sm:$0xff] }
 0x5ff   :  { %v3905_v34 = vpop.eup %3904  ;;  %v2811_v60 = vsel %vm2808_vm0, %v2810_v41, %v2806_v7  ;;  %vm2935_vm8 = vcmp.eq.f32.partialorder %v2934_v52, 8.507059e+37  ;;  %v10452_v7 = vld [vmem:[#allocation110_spill] sm:$0xff]  ;;  %v10454_v41 = vld [vmem:[#allocation21_spill] sm:$0xff] }
 0x600   :  { %3906 = vtanh.f32 %v8303_v40  ;;  %v8317_v36 = vadd.f32 1.0, %v3905_v34  ;;  %v10455_v34 = vld [vmem:[#allocation25_spill] sm:$0xff]  ;;  %v10474_v52 = vld [vmem:[#allocation46_spill] sm:$0xff] }
 0x601   :  { %3908 = vrcp.f32 %v8305_v42 }
 0x602   :  { %3910 = vrcp.f32 %v8309_v12  ;;  %vm2950_vm10 = vweird.f32 %v8317_v36 }
 0x603   :  { %3912 = vrcp.f32 %v8317_v36 }
 0x604   :  { %3914 = vtanh.f32 %v2900_v10  ;;  %v10462_v10 = vld [vmem:[#allocation27_spill] sm:$0xff] }
 0x606   :  { %v3907_v1 = vpop.eup %3906 }
 0x607   :  { %v3909_v8 = vpop.eup %3908  ;;  %v2817_v32 = vmul.f32 %v3907_v1, %v2811_v60  ;;  %v10458_v1 = vld [vmem:[#allocation24_spill] sm:$0xff]  ;;  %v10460_v60 = vld [vmem:[#allocation34_spill] sm:$0xff] }
 0x608   :  { %v3911_v21 = vpop.eup %3910  ;;  %v2907_v9 = vmul.f32 %v3909_v8, %v8305_v42  ;;  %vm2912_vm1 = vweird.f32 %v3909_v8 }
 0x609   :  { %v2926_v35 = vmul.f32 %v3911_v21, %v8309_v12  ;;  %2981 = vmatmul.f32.vlgmr.msra.gmra.mxu0 %v2817_v32  ;;  %3001 = vmatmul.f32.vlgmr.msrb.gmra.mxu1 %v2817_v32  ;;  %vm2931_vm2 = vweird.f32 %v3911_v21  ;;  %vm2913_vm5 = vmor %vm2911_vm3, %vm2912_vm1  ;;  %v10450_v12 = vld [vmem:[#allocation93_spill] sm:$0xff] }
 0x60a   :  { %v2908_v0 = vsub.f32 1.0, %v2907_v9  ;;  %3021 = vmatmul.f32.vlgmr.msrb.gmra.mxu2 %v2817_v32  ;;  %3041 = vmatmul.f32.vlgmr.msrb.gmra.mxu3 %v2817_v32  ;;  %vm2932_vm6 = vmor %vm2930_vm4, %vm2931_vm2  ;;  %v10463_v32 = vld [vmem:[#allocation31_spill] sm:$0xff] }
 0x60b   :  { %v2927_v49 = vsub.f32 1.0, %v2926_v35  ;;  %3192 = vmatpush.msra.mxu0 %v7691_v50  ;;  %3212 = vmatpush.msrb.mxu1 %v7694_v48  ;;  %v8332_v50 = vpop.eup %3912  ;;  %v10465_v9 = vld [vmem:[#allocation35_spill] sm:$0xff]  ;;  %v10466_v35 = vld [vmem:[#allocation38_spill] sm:$0xff] }
 0x60c   :  { %v2909_v37 = vmul.f32 %v3909_v8, %v2908_v0  ;;  %3232 = vmatpush.msrb.mxu2 %v7699_v57  ;;  %3252 = vmatpush.msrb.mxu3 %v7702_v62  ;;  %v2918_v57 = vor.u32 1.1754944e-38, %v2917_v47  ;;  %vm2951_vm9 = vweird.f32 %v8332_v50  ;;  %v10467_v0 = vld [vmem:[#allocation39_spill] sm:$0xff]  ;;  %v10469_v47 = vld [vmem:[#allocation41_spill] sm:$0xff] }
 0x60d   :  { %v2928_v4 = vmul.f32 %v3911_v21, %v2927_v49  ;;  %3193 = vmatpush.msra.mxu0 %v7711_v2  ;;  %3213 = vmatpush.msrb.mxu1 %v7714_v6  ;;  %v2946_v2 = vmul.f32 %v8332_v50, %v8317_v36  ;;  %v2937_v6 = vor.u32 1.1754944e-38, %v2936_v26  ;;  %vm2952_vm11 = vmor %vm2950_vm10, %vm2951_vm9  ;;  %v10468_v49 = vld [vmem:[#allocation40_spill] sm:$0xff]  ;;  %v10470_v26 = vld [vmem:[#allocation42_spill] sm:$0xff] }
 0x60e   :  { %v2910_v48 = vadd.f32 %v3909_v8, %v2909_v37  ;;  %3233 = vmatpush.msrb.mxu2 %v7720_v22  ;;  %3253 = vmatpush.msrb.mxu3 %v7723_v13  ;;  %v3915_v22 = vpop.eup %3914  ;;  %v10471_v37 = vld [vmem:[#allocation43_spill] sm:$0xff] }
 0x60f   :  { %v2929_v62 = vadd.f32 %v3911_v21, %v2928_v4  ;;  %3194 = vmatpush.msra.mxu0 %v7726_v45  ;;  %3214 = vmatpush.msrb.mxu1 %v7729_v17  ;;  %v2947_v3 = vsub.f32 1.0, %v2946_v2  ;;  %v10473_v4 = vld [vmem:[#allocation45_spill] sm:$0xff]  ;;  %v10479_v2 = vld [vmem:[#allocation51_spill] sm:$0xff] }
 0x610   :  { %v2914_v33 = vsel %vm2913_vm5, %v3909_v8, %v2910_v48  ;;  %3234 = vmatpush.msrb.mxu2 %v7732_v27  ;;  %3254 = vmatpush.msrb.mxu3 %v7735_v14  ;;  %v10461_v8 = vld [vmem:[#allocation33_spill] sm:$0xff]  ;;  %v10476_v48 = vld [vmem:[#allocation48_spill] sm:$0xff] }
 0x611   :  { %v2919_v13 = vsel %vm2916_vm7, %v2918_v57, %v2914_v33  ;;  %v2933_v42 = vsel %vm2932_vm6, %v3911_v21, %v2929_v62  ;;  %3195 = vmatpush.msra.mxu0 %v7738_v63  ;;  %3215 = vmatpush.msrb.mxu1 %v7741_v44  ;;  %v2948_v27 = vmul.f32 %v8332_v50, %v2947_v3  ;;  %v2954_v44 = vand.u32 2147483647, %v8317_v36  ;;  %v10464_v21 = vld [vmem:[#allocation36_spill] sm:$0xff]  ;;  %v10477_v57 = vld [vmem:[#allocation49_spill] sm:$0xff]  ;;  %v10478_v62 = vld [vmem:[#allocation50_spill] sm:$0xff] }
 0x612   :  { %v2938_v45 = vsel %vm2935_vm8, %v2937_v6, %v2933_v42  ;;  %v2961_v17 = vmul.f32 %v3915_v22, %v2919_v13  ;;  %3235 = vmatpush.msrb.mxu2 %v7746_v15  ;;  %3255 = vmatpush.msrb.mxu3 %v7749_v16  ;;  %v10480_v6 = vld [vmem:[#allocation52_spill] sm:$0xff]  ;;  %v10481_v33 = vld [vmem:[#allocation53_spill] sm:$0xff]  ;;  %v10484_v42 = vld [vmem:[#allocation58_spill] sm:$0xff] }
 0x613   :  { %v2960_v19 = vmul.f32 %v2938_v45, %v7685_v29  ;;  %3196 = vmatpush.msra.mxu0 %v7752_v54  ;;  %3216 = vmatpush.msrb.mxu1 %v7755_v55  ;;  %v2949_v63 = vadd.f32 %v8332_v50, %v2948_v27  ;;  %v2956_v29 = vand.u32 2147483648, %v8317_v36  ;;  %v10437_v54 = vld [vmem:[#allocation207_spill] sm:$0xff]  ;;  %v10438_v55 = vld [vmem:[#allocation208_spill] sm:$0xff]  ;;  %vm2955_vm12 = vcmp.eq.f32.partialorder %v2954_v44, 8.507059e+37  ;;  %v10483_v13 = vld [vmem:[#allocation57_spill] sm:$0xff] }
 0x614   :  { %3236 = vmatpush.msrb.mxu2 %v7762_v25  ;;  %3256 = vmatpush.msrb.mxu3 %v7765_v28  ;;  %v10439_v25 = vld [vmem:[#allocation209_spill] sm:$0xff]  ;;  %v10440_v28 = vld [vmem:[#allocation210_spill] sm:$0xff]  ;;  %v10459_v36 = vld [vmem:[#allocation28_spill] sm:$0xff] }
 0x615   :  { %v8356_v14 = vadd.f32 %v2961_v17, %v2960_v19  ;;  %3197 = vmatpush.msra.mxu0 %v7768_v20  ;;  %3217 = vmatpush.msrb.mxu1 %v7771_v56  ;;  %v2953_v15 = vsel %vm2952_vm11, %v8332_v50, %v2949_v63  ;;  %v2957_v16 = vor.u32 1.1754944e-38, %v2956_v29  ;;  %v10475_v50 = vld [vmem:[#allocation47_spill] sm:$0xff]  ;;  %v10482_v22 = vld [vmem:[#allocation56_spill] sm:$0xff]  ;;  %v10486_v45 = vld [vmem:[#allocation61_spill] sm:$0xff] }
 0x616   :  { %3237 = vmatpush.msrb.mxu2 %v7774_v39  ;;  %3257 = vmatpush.msrb.mxu3 %v7777_v5  ;;  %v10441_v39 = vld [vmem:[#allocation105_spill] sm:$0xff]  ;;  %v10442_v5 = vld [vmem:[#allocation115_spill] sm:$0xff]  ;;  %v10485_v3 = vld [vmem:[#allocation60_spill] sm:$0xff] }
 0x617   :  { %3916 = vtanh.f32 %v8356_v14  ;;  %3198 = vmatpush.msra.mxu0 %v7780_v38  ;;  %3218 = vmatpush.msrb.mxu1 %v7783_v23  ;;  %v2958_v56 = vsel %vm2955_vm12, %v2957_v16, %v2953_v15  ;;  %v10443_v23 = vld [vmem:[#allocation135_spill] sm:$0xff]  ;;  %v10487_v17 = vld [vmem:[#allocation62_spill] sm:$0xff]  ;;  %v10489_v27 = vld [vmem:[#allocation64_spill] sm:$0xff] }
 0x618   :  { %3238 = vmatpush.msrb.mxu2 %v7786_v51  ;;  %3258 = vmatpush.msrb.mxu3 %v7789_v59  ;;  %v10444_v51 = vld [vmem:[#allocation131_spill] sm:$0xff]  ;;  %v10445_v59 = vld [vmem:[#allocation130_spill] sm:$0xff]  ;;  %v10490_v63 = vld [vmem:[#allocation65_spill] sm:$0xff] }
 0x619   :  { %3199 = vmatpush.msra.mxu0 %v7792_v18  ;;  %3219 = vmatpush.msrb.mxu1 %v7795_v30  ;;  %v10446_v18 = vld [vmem:[#allocation136_spill] sm:$0xff]  ;;  %v10447_v30 = vld [vmem:[#allocation154_spill] sm:$0xff]  ;;  %v10488_v19 = vld [vmem:[#allocation63_spill] sm:$0xff] }
 0x61a   :  { %3239 = vmatpush.msrb.mxu2 %v7798_v43  ;;  %3259 = vmatpush.msrb.mxu3 %v7801_v61  ;;  %v10448_v43 = vld [vmem:[#allocation150_spill] sm:$0xff]  ;;  %v10449_v61 = vld [vmem:[#allocation81_spill] sm:$0xff]  ;;  %v10492_v44 = vld [vmem:[#allocation67_spill] sm:$0xff] }
 0x61b   :  { %3200 = vmatpush.msra.mxu0 %v10437_v54  ;;  %3220 = vmatpush.msrb.mxu1 %v10438_v55  ;;  %v10491_v29 = vld [vmem:[#allocation66_spill] sm:$0xff]  ;;  %v10493_v15 = vld [vmem:[#allocation68_spill] sm:$0xff]  ;;  %v10494_v16 = vld [vmem:[#allocation69_spill] sm:$0xff] }
 0x61c   :  { %3240 = vmatpush.msrb.mxu2 %v10439_v25  ;;  %3260 = vmatpush.msrb.mxu3 %v10440_v28  ;;  %v10495_v54 = vld [vmem:[#allocation70_spill] sm:$0xff]  ;;  %v10496_v55 = vld [vmem:[#allocation71_spill] sm:$0xff]  ;;  %v10497_v25 = vld [vmem:[#allocation72_spill] sm:$0xff] }
 0x61d   :  { %v3917_v20 = vpop.eup %3916  ;;  %3201 = vmatpush.msra.mxu0 %v10441_v39  ;;  %3221 = vmatpush.msrb.mxu1 %v10442_v5  ;;  %v10498_v28 = vld [vmem:[#allocation74_spill] sm:$0xff]  ;;  %v10501_v39 = vld [vmem:[#allocation77_spill] sm:$0xff] }
 0x61e   :  { %v2964_v38 = vmul.f32 %v3917_v20, %v2958_v56  ;;  %3241 = vmatpush.msrb.mxu2 %v10443_v23  ;;  %3261 = vmatpush.msrb.mxu3 %v10444_v51  ;;  %v10499_v20 = vld [vmem:[#allocation75_spill] sm:$0xff]  ;;  %v10500_v56 = vld [vmem:[#allocation76_spill] sm:$0xff]  ;;  %v10502_v5 = vld [vmem:[#allocation78_spill] sm:$0xff] }
 0x61f   :  { %3202 = vmatpush.msra.mxu0 %v10445_v59  ;;  %3222 = vmatpush.msrb.mxu1 %v10446_v18  ;;  %v10504_v23 = vld [vmem:[#allocation80_spill] sm:$0xff]  ;;  %v10505_v51 = vld [vmem:[#allocation82_spill] sm:$0xff]  ;;  %v10506_v59 = vld [vmem:[#allocation83_spill] sm:$0xff] }
 0x620   :  { %3242 = vmatpush.msrb.mxu2 %v10447_v30  ;;  %3262 = vmatpush.msrb.mxu3 %v10448_v43  ;;  %v10507_v18 = vld [vmem:[#allocation84_spill] sm:$0xff]  ;;  %v10508_v30 = vld [vmem:[#allocation85_spill] sm:$0xff]  ;;  %v10509_v43 = vld [vmem:[#allocation86_spill] sm:$0xff] }
 0x621   :  { %3061 = vmatmul.f32.vlgmr.msrb.gmra.mxu0 %v2964_v38  ;;  %3081 = vmatmul.f32.vlgmr.msra.gmra.mxu1 %v2964_v38 }
 0x622   :  { %3101 = vmatmul.f32.vlgmr.msra.gmra.mxu2 %v2964_v38  ;;  %3121 = vmatmul.f32.vlgmr.msra.gmra.mxu3 %v2964_v38 }
 0x623   :  { %3203 = vmatpush.msra.mxu0 %v10449_v61  ;;  %3223 = vmatpush.msrb.mxu1 %v10450_v12  ;;  %v10510_v61 = vld [vmem:[#allocation87_spill] sm:$0xff]  ;;  %v10511_v12 = vld [vmem:[#allocation88_spill] sm:$0xff] }
 0x624   :  { %3243 = vmatpush.msrb.mxu2 %v10451_v53  ;;  %3263 = vmatpush.msrb.mxu3 %v10452_v7  ;;  %v10512_v53 = vld [vmem:[#allocation89_spill] sm:$0xff]  ;;  %v10513_v7 = vld [vmem:[#allocation92_spill] sm:$0xff] }
 0x625   :  { %3204 = vmatpush.msra.mxu0 %v10453_v46  ;;  %3224 = vmatpush.msrb.mxu1 %v10454_v41  ;;  %v10514_v46 = vld [vmem:[#allocation94_spill] sm:$0xff]  ;;  %v10515_v41 = vld [vmem:[#allocation95_spill] sm:$0xff] }
 0x626   :  { %3244 = vmatpush.msrb.mxu2 %v10455_v34  ;;  %3264 = vmatpush.msrb.mxu3 %v10456_v58  ;;  %v10516_v34 = vld [vmem:[#allocation96_spill] sm:$0xff]  ;;  %v10517_v58 = vld [vmem:[#allocation97_spill] sm:$0xff] }
 0x627   :  { %3205 = vmatpush.msra.mxu0 %v10457_v11  ;;  %3225 = vmatpush.msrb.mxu1 %v10458_v1  ;;  %v10518_v11 = vld [vmem:[#allocation98_spill] sm:$0xff]  ;;  %v10519_v1 = vld [vmem:[#allocation99_spill] sm:$0xff] }
 0x628   :  { %3245 = vmatpush.msrb.mxu2 %v10459_v36  ;;  %3265 = vmatpush.msrb.mxu3 %v10460_v60  ;;  %v10520_v36 = vld [vmem:[#allocation100_spill] sm:$0xff]  ;;  %v10521_v60 = vld [vmem:[#allocation101_spill] sm:$0xff] }
 0x629   :  { %3206 = vmatpush.msra.mxu0 %v10461_v8  ;;  %3226 = vmatpush.msrb.mxu1 %v10462_v10  ;;  %v10522_v8 = vld [vmem:[#allocation102_spill] sm:$0xff]  ;;  %v10523_v10 = vld [vmem:[#allocation103_spill] sm:$0xff] }
 0x62a   :  { %3246 = vmatpush.msrb.mxu2 %v10463_v32  ;;  %3266 = vmatpush.msrb.mxu3 %v10464_v21  ;;  %v10524_v32 = vld [vmem:[#allocation104_spill] sm:$0xff]  ;;  %v10525_v21 = vld [vmem:[#allocation106_spill] sm:$0xff] }
 0x62b   :  { %3207 = vmatpush.msra.mxu0 %v10465_v9  ;;  %3227 = vmatpush.msrb.mxu1 %v10466_v35  ;;  %v10526_v9 = vld [vmem:[#allocation107_spill] sm:$0xff]  ;;  %v10527_v35 = vld [vmem:[#allocation108_spill] sm:$0xff] }
 0x62c   :  { %3247 = vmatpush.msrb.mxu2 %v10467_v0  ;;  %3267 = vmatpush.msrb.mxu3 %v10468_v49  ;;  %v10528_v0 = vld [vmem:[#allocation109_spill] sm:$0xff]  ;;  %v10529_v49 = vld [vmem:[#allocation112_spill] sm:$0xff] }
 0x62d   :  { %3208 = vmatmul.f32.vlgmr.msra.gmra.mxu0 %v2964_v38  ;;  %3228 = vmatmul.f32.vlgmr.msrb.gmra.mxu1 %v2964_v38 }
 0x62e   :  { %3248 = vmatmul.f32.vlgmr.msrb.gmra.mxu2 %v2964_v38  ;;  %3268 = vmatmul.f32.vlgmr.msrb.gmra.mxu3 %v2964_v38  ;;  %v10503_v38 = vld [vmem:[#allocation79_spill] sm:$0xff] }
 0x62f   :  { %3339 = vmatpush.msrb.mxu0 %v10469_v47  ;;  %3359 = vmatpush.msra.mxu1 %v10470_v26  ;;  %v10530_v47 = vld [vmem:[#allocation113_spill] sm:$0xff]  ;;  %v10531_v26 = vld [vmem:[#allocation114_spill] sm:$0xff] }
 0x630   :  { %3379 = vmatpush.msra.mxu2 %v10471_v37  ;;  %3399 = vmatpush.msra.mxu3 %v10472_v31  ;;  %v10532_v37 = vld [vmem:[#allocation116_spill] sm:$0xff]  ;;  %v10533_v31 = vld [vmem:[#allocation117_spill] sm:$0xff] }
 0x631   :  { %3340 = vmatpush.msrb.mxu0 %v10473_v4  ;;  %3360 = vmatpush.msra.mxu1 %v10474_v52  ;;  %v10534_v4 = vld [vmem:[#allocation118_spill] sm:$0xff]  ;;  %v10535_v52 = vld [vmem:[#allocation119_spill] sm:$0xff] }
 0x632   :  { %3380 = vmatpush.msra.mxu2 %v10475_v50  ;;  %3400 = vmatpush.msra.mxu3 %v10476_v48  ;;  %v10536_v50 = vld [vmem:[#allocation120_spill] sm:$0xff]  ;;  %v10537_v48 = vld [vmem:[#allocation121_spill] sm:$0xff] }
 0x633   :  { %3341 = vmatpush.msrb.mxu0 %v10477_v57  ;;  %3361 = vmatpush.msra.mxu1 %v10478_v62  ;;  %v10538_v57 = vld [vmem:[#allocation122_spill] sm:$0xff]  ;;  %v10539_v62 = vld [vmem:[#allocation123_spill] sm:$0xff] }
 0x634   :  { %3381 = vmatpush.msra.mxu2 %v10479_v2  ;;  %3401 = vmatpush.msra.mxu3 %v10480_v6  ;;  %v10540_v2 = vld [vmem:[#allocation124_spill] sm:$0xff]  ;;  %v10541_v6 = vld [vmem:[#allocation125_spill] sm:$0xff] }
 0x635   :  { %3342 = vmatpush.msrb.mxu0 %v10481_v33  ;;  %3362 = vmatpush.msra.mxu1 %v10482_v22  ;;  %v10542_v33 = vld [vmem:[#allocation126_spill] sm:$0xff]  ;;  %v10543_v22 = vld [vmem:[#allocation127_spill] sm:$0xff] }
 0x636   :  { %3382 = vmatpush.msra.mxu2 %v10483_v13  ;;  %3402 = vmatpush.msra.mxu3 %v10484_v42  ;;  %v10544_v13 = vld [vmem:[#allocation128_spill] sm:$0xff]  ;;  %v10545_v42 = vld [vmem:[#allocation129_spill] sm:$0xff] }
 0x637   :  { %3343 = vmatpush.msrb.mxu0 %v10485_v3  ;;  %3363 = vmatpush.msra.mxu1 %v10486_v45  ;;  %v10546_v3 = vld [vmem:[#allocation132_spill] sm:$0xff]  ;;  %v10547_v45 = vld [vmem:[#allocation133_spill] sm:$0xff] }
 0x638   :  { %3383 = vmatpush.msra.mxu2 %v10487_v17  ;;  %3403 = vmatpush.msra.mxu3 %v10488_v19  ;;  %v10548_v17 = vld [vmem:[#allocation134_spill] sm:$0xff]  ;;  %v10549_v19 = vld [vmem:[#allocation137_spill] sm:$0xff] }
 0x639   :  { %3344 = vmatpush.msrb.mxu0 %v10489_v27  ;;  %3364 = vmatpush.msra.mxu1 %v10490_v63  ;;  %v10550_v27 = vld [vmem:[#allocation138_spill] sm:$0xff]  ;;  %v10551_v63 = vld [vmem:[#allocation139_spill] sm:$0xff] }
 0x63a   :  { %3384 = vmatpush.msra.mxu2 %v10491_v29  ;;  %3404 = vmatpush.msra.mxu3 %v10492_v44  ;;  %v10552_v29 = vld [vmem:[#allocation140_spill] sm:$0xff]  ;;  %v10553_v44 = vld [vmem:[#allocation141_spill] sm:$0xff] }
 0x63b   :  { %3345 = vmatpush.msrb.mxu0 %v10493_v15  ;;  %3365 = vmatpush.msra.mxu1 %v10494_v16  ;;  %v10554_v15 = vld [vmem:[#allocation142_spill] sm:$0xff]  ;;  %v10555_v16 = vld [vmem:[#allocation143_spill] sm:$0xff] }
 0x63c   :  { %3385 = vmatpush.msra.mxu2 %v10495_v54  ;;  %3405 = vmatpush.msra.mxu3 %v10496_v55  ;;  %v10556_v54 = vld [vmem:[#allocation144_spill] sm:$0xff]  ;;  %v10557_v55 = vld [vmem:[#allocation145_spill] sm:$0xff] }
 0x63d   :  { %3346 = vmatpush.msrb.mxu0 %v10497_v25  ;;  %3366 = vmatpush.msra.mxu1 %v10498_v28  ;;  %v10558_v25 = vld [vmem:[#allocation146_spill] sm:$0xff]  ;;  %v10559_v28 = vld [vmem:[#allocation147_spill] sm:$0xff] }
 0x63e   :  { %3386 = vmatpush.msra.mxu2 %v10499_v20  ;;  %3406 = vmatpush.msra.mxu3 %v10500_v56  ;;  %v10560_v20 = vld [vmem:[#allocation148_spill] sm:$0xff]  ;;  %v10561_v56 = vld [vmem:[#allocation149_spill] sm:$0xff] }
 0x63f   :  { %3347 = vmatpush.msrb.mxu0 %v10501_v39  ;;  %3367 = vmatpush.msra.mxu1 %v10502_v5  ;;  %v10562_v39 = vld [vmem:[#allocation151_spill] sm:$0xff]  ;;  %v10563_v5 = vld [vmem:[#allocation152_spill] sm:$0xff] }
 0x640   :  { %3387 = vmatpush.msra.mxu2 %v10503_v38  ;;  %3407 = vmatpush.msra.mxu3 %v10504_v23  ;;  %v10564_v38 = vld [vmem:[#allocation153_spill] sm:$0xff]  ;;  %v10565_v23 = vld [vmem:[#allocation156_spill] sm:$0xff] }
 0x641   :  { %3348 = vmatpush.msrb.mxu0 %v10505_v51  ;;  %3368 = vmatpush.msra.mxu1 %v10506_v59  ;;  %v10566_v51 = vld [vmem:[#allocation158_spill] sm:$0xff]  ;;  %v10567_v59 = vld [vmem:[#allocation159_spill] sm:$0xff] }
 0x642   :  { %3388 = vmatpush.msra.mxu2 %v10507_v18  ;;  %3408 = vmatpush.msra.mxu3 %v10508_v30  ;;  %v10568_v18 = vld [vmem:[#allocation160_spill] sm:$0xff]  ;;  %v10569_v30 = vld [vmem:[#allocation161_spill] sm:$0xff] }
 0x643   :  { %3349 = vmatpush.msrb.mxu0 %v10509_v43  ;;  %3369 = vmatpush.msra.mxu1 %v10510_v61  ;;  %v10570_v43 = vld [vmem:[#allocation162_spill] sm:$0xff]  ;;  %v10571_v61 = vld [vmem:[#allocation163_spill] sm:$0xff] }
 0x644   :  { %3389 = vmatpush.msra.mxu2 %v10511_v12  ;;  %3409 = vmatpush.msra.mxu3 %v10512_v53  ;;  %v10572_v12 = vld [vmem:[#allocation164_spill] sm:$0xff]  ;;  %v10573_v53 = vld [vmem:[#allocation165_spill] sm:$0xff] }
 0x645   :  { %3350 = vmatpush.msrb.mxu0 %v10513_v7  ;;  %3370 = vmatpush.msra.mxu1 %v10514_v46  ;;  %v10574_v7 = vld [vmem:[#allocation166_spill] sm:$0xff]  ;;  %v10575_v46 = vld [vmem:[#allocation167_spill] sm:$0xff] }
 0x646   :  { %3390 = vmatpush.msra.mxu2 %v10515_v41  ;;  %3410 = vmatpush.msra.mxu3 %v10516_v34  ;;  %v10576_v41 = vld [vmem:[#allocation169_spill] sm:$0xff]  ;;  %v10577_v34 = vld [vmem:[#allocation170_spill] sm:$0xff] }
 0x647   :  { %3351 = vmatpush.msrb.mxu0 %v10517_v58  ;;  %3371 = vmatpush.msra.mxu1 %v10518_v11  ;;  %v10578_v58 = vld [vmem:[#allocation173_spill] sm:$0xff]  ;;  %v10579_v11 = vld [vmem:[#allocation174_spill] sm:$0xff] }
 0x648   :  { %3391 = vmatpush.msra.mxu2 %v10519_v1  ;;  %3411 = vmatpush.msra.mxu3 %v10520_v36  ;;  %v10580_v1 = vld [vmem:[#allocation175_spill] sm:$0xff]  ;;  %v10581_v36 = vld [vmem:[#allocation176_spill] sm:$0xff] }
 0x649   :  { %3352 = vmatpush.msrb.mxu0 %v10521_v60  ;;  %3372 = vmatpush.msra.mxu1 %v10522_v8  ;;  %v10582_v60 = vld [vmem:[#allocation177_spill] sm:$0xff]  ;;  %v10583_v8 = vld [vmem:[#allocation178_spill] sm:$0xff] }
 0x64a   :  { %3392 = vmatpush.msra.mxu2 %v10523_v10  ;;  %3412 = vmatpush.msra.mxu3 %v10524_v32  ;;  %v10584_v10 = vld [vmem:[#allocation179_spill] sm:$0xff]  ;;  %v10585_v32 = vld [vmem:[#allocation180_spill] sm:$0xff] }
 0x64b   :  { %3353 = vmatpush.msrb.mxu0 %v10525_v21  ;;  %3373 = vmatpush.msra.mxu1 %v10526_v9  ;;  %v10586_v21 = vld [vmem:[#allocation181_spill] sm:$0xff]  ;;  %v10587_v9 = vld [vmem:[#allocation59_spill] sm:$0xff] }
 0x64c   :  { %3393 = vmatpush.msra.mxu2 %v10527_v35  ;;  %3413 = vmatpush.msra.mxu3 %v10528_v0  ;;  %v10588_v35 = vld [vmem:[#allocation73_spill] sm:$0xff]  ;;  %v10589_v0 = vld [vmem:[#allocation91_spill] sm:$0xff] }
 0x64d   :  { %3354 = vmatpush.msrb.mxu0 %v10529_v49  ;;  %3374 = vmatpush.msra.mxu1 %v10530_v47  ;;  %v10590_v49 = vld [vmem:[#allocation90_spill] sm:$0xff]  ;;  %v10591_v47 = vld [vmem:[#allocation189_spill] sm:$0xff] }
 0x64e   :  { %3394 = vmatpush.msra.mxu2 %v10531_v26  ;;  %3414 = vmatpush.msra.mxu3 %v10532_v37  ;;  %v10592_v26 = vld [vmem:[#allocation190_spill] sm:$0xff]  ;;  %v10593_v37 = vld [vmem:[#allocation191_spill] sm:$0xff] }
 0x64f   :  { %3419 = vmatpush.msra.mxu0 %v10533_v31  ;;  %3439 = vmatpush.msrb.mxu1 %v10534_v4  ;;  %v10594_v31 = vld [vmem:[#allocation192_spill] sm:$0xff]  ;;  %v10595_v4 = vld [vmem:[#allocation193_spill] sm:$0xff] }
 0x650   :  { %3459 = vmatpush.msrb.mxu2 %v10535_v52  ;;  %3479 = vmatpush.msrb.mxu3 %v10536_v50  ;;  %v10596_v52 = vld [vmem:[#allocation194_spill] sm:$0xff] }
 0x651   :  { %3420 = vmatpush.msra.mxu0 %v10537_v48  ;;  %3440 = vmatpush.msrb.mxu1 %v10538_v57 }
 0x652   :  { %3460 = vmatpush.msrb.mxu2 %v10539_v62  ;;  %3480 = vmatpush.msrb.mxu3 %v10540_v2 }
 0x653   :  { %3421 = vmatpush.msra.mxu0 %v10541_v6  ;;  %3441 = vmatpush.msrb.mxu1 %v10542_v33 }
 0x654   :  { %3461 = vmatpush.msrb.mxu2 %v10543_v22  ;;  %3481 = vmatpush.msrb.mxu3 %v10544_v13  ;;  %v10597_v22 = vld [vmem:[#allocation23_spill] sm:$0xff] }
 0x655   :  { %3422 = vmatpush.msra.mxu0 %v10545_v42  ;;  %3442 = vmatpush.msrb.mxu1 %v10546_v3  ;;  %v10598_v42 = vld [vmem:[#allocation20_spill] sm:$0xff] }
 0x656   :  { %3462 = vmatpush.msrb.mxu2 %v10547_v45  ;;  %3482 = vmatpush.msrb.mxu3 %v10548_v17 }
 0x657   :  { %3423 = vmatpush.msra.mxu0 %v10549_v19  ;;  %3443 = vmatpush.msrb.mxu1 %v10550_v27 }
 0x658   :  { %3463 = vmatpush.msrb.mxu2 %v10551_v63  ;;  %3483 = vmatpush.msrb.mxu3 %v10552_v29  ;;  %v10599_v29 = vld [vmem:[#allocation22_spill] sm:$0xff] }
 0x659   :  { %3424 = vmatpush.msra.mxu0 %v10553_v44  ;;  %3444 = vmatpush.msrb.mxu1 %v10554_v15  ;;  %v10600_v15 = vld [vmem:[#allocation157_spill] sm:$0xff] }
 0x65a   :  { %3464 = vmatpush.msrb.mxu2 %v10555_v16  ;;  %3484 = vmatpush.msrb.mxu3 %v10556_v54  ;;  %v10601_v16 = vld [vmem:[#allocation55_spill] sm:$0xff] }
 0x65b   :  { %3425 = vmatpush.msra.mxu0 %v10557_v55  ;;  %3445 = vmatpush.msrb.mxu1 %v10558_v25  ;;  %v440_v54 = vadd.f32 %v10601_v16, %v10600_v15  ;;  %v10602_v55 = vld [vmem:[#allocation185_spill] sm:$0xff]  ;;  %v10603_v25 = vld [vmem:[#allocation183_spill] sm:$0xff] }
 0x65c   :  { %3465 = vmatpush.msrb.mxu2 %v10559_v28  ;;  %3485 = vmatpush.msrb.mxu3 %v10560_v20  ;;  %v481_v28 = vadd.f32 %v10603_v25, %v10602_v55 }
 0x65d   :  { %3426 = vmatpush.msra.mxu0 %v10561_v56  ;;  %3446 = vmatpush.msrb.mxu1 %v10562_v39 }
 0x65e   :  { %3466 = vmatpush.msrb.mxu2 %v10563_v5  ;;  %3486 = vmatpush.msrb.mxu3 %v10564_v38 }
 0x65f   :  { %3427 = vmatpush.msra.mxu0 %v10565_v23  ;;  %3447 = vmatpush.msrb.mxu1 %v10566_v51 }
 0x660   :  { %3467 = vmatpush.msrb.mxu2 %v10567_v59  ;;  %3487 = vmatpush.msrb.mxu3 %v10568_v18 }
 0x661   :  { %3428 = vmatpush.msra.mxu0 %v10569_v30  ;;  %3448 = vmatpush.msrb.mxu1 %v10570_v43 }
 0x662   :  { %3468 = vmatpush.msrb.mxu2 %v10571_v61  ;;  %3488 = vmatpush.msrb.mxu3 %v10572_v12 }
 0x663   :  { %3429 = vmatpush.msra.mxu0 %v10573_v53  ;;  %3449 = vmatpush.msrb.mxu1 %v10574_v7  ;;  %v10604_v53 = vld [vmem:[#allocation187_spill] sm:$0xff]  ;;  %v10605_v7 = vld [vmem:[#allocation186_spill] sm:$0xff] }
 0x664   :  { %3469 = vmatpush.msrb.mxu2 %v10575_v46  ;;  %3489 = vmatpush.msrb.mxu3 %v10576_v41  ;;  %v563_v46 = vadd.f32 %v10605_v7, %v10604_v53 }
 0x665   :  { %3430 = vmatpush.msra.mxu0 %v10577_v34  ;;  %3450 = vmatpush.msrb.mxu1 %v10578_v58 }
 0x666   :  { %3470 = vmatpush.msrb.mxu2 %v10579_v11  ;;  %3490 = vmatpush.msrb.mxu3 %v10580_v1  ;;  %v10606_v11 = vld [vmem:[#allocation29_spill] sm:$0xff] }
 0x667   :  { %3431 = vmatpush.msra.mxu0 %v10581_v36  ;;  %3451 = vmatpush.msrb.mxu1 %v10582_v60 }
 0x668   :  { %3471 = vmatpush.msrb.mxu2 %v10583_v8  ;;  %3491 = vmatpush.msrb.mxu3 %v10584_v10 }
 0x669   :  { %3432 = vmatpush.msra.mxu0 %v10585_v32  ;;  %3452 = vmatpush.msrb.mxu1 %v10586_v21 }
 0x66a   :  { %3472 = vmatpush.msrb.mxu2 %v10587_v9  ;;  %3492 = vmatpush.msrb.mxu3 %v10588_v35 }
 0x66b   :  { %3433 = vmatpush.msra.mxu0 %v10589_v0  ;;  %3453 = vmatpush.msrb.mxu1 %v10590_v49 }
 0x66c   :  { %3473 = vmatpush.msrb.mxu2 %v10591_v47  ;;  %3493 = vmatpush.msrb.mxu3 %v10592_v26 }
 0x66d   :  { %3434 = vmatpush.msra.mxu0 %v10593_v37  ;;  %3454 = vmatpush.msrb.mxu1 %v10594_v31 }
 0x66e   :  { %3474 = vmatpush.msrb.mxu2 %v10595_v4  ;;  %3494 = vmatpush.msrb.mxu3 %v10596_v52 }
 0x686   :  { %v2982_v50 = vpop.f32.mrf.mxu0  ;;  %v3002_v48 = vpop.f32.mrf.mxu1 }
 0x68d   :  { %v3042_v57 = vpop.f32.mrf.mxu3  ;;  %v3022_v19 = vpop.f32.mrf.mxu2 }
 0x69e   :  { %v3062_v62 = vpop.f32.mrf.mxu0  ;;  %v3082_v2 = vpop.f32.mrf.mxu1 }
 0x69f   :  { %v3063_v6 = vadd.f32 %v3062_v62, %v2982_v50  ;;  %v3083_v33 = vadd.f32 %v3082_v2, %v3002_v48  ;;  %v10607_v2 = vld [vmem:[#allocation188_spill] sm:$0xff] }
 0x6a1   :  { %v3125_v13 = vadd.f32 %v3063_v6, %v10597_v22  ;;  %v3126_v3 = vadd.f32 %v3083_v33, %v10598_v42  ;;  %v522_v6 = vadd.f32 %v10607_v2, %v5593_v24 }
 0x6a3   :  { %v3681_v45 = vmul.f32 -1.442695, %v3125_v13  ;;  %v3682_v17 = vmul.f32 -1.442695, %v3126_v3 }
 0x6a5   :  { %3918 = vpow2.f32 %v3681_v45  ;;  %v3122_v27 = vpop.f32.mrf.mxu3  ;;  %v3102_v18 = vpop.f32.mrf.mxu2 }
 0x6a6   :  { %3920 = vpow2.f32 %v3682_v17  ;;  %v3123_v63 = vadd.f32 %v3122_v27, %v3042_v57  ;;  %v3103_v12 = vadd.f32 %v3102_v18, %v3022_v19 }
 0x6a8   :  { %v3128_v44 = vadd.f32 %v3123_v63, %v10599_v29  ;;  %v3127_v1 = vadd.f32 %v3103_v12, %v10606_v11 }
 0x6aa   :  { %v3683_v20 = vmul.f32 -1.442695, %v3128_v44  ;;  %v3209_v56 = vpop.f32.mrf.mxu0  ;;  %v3229_v39 = vpop.f32.mrf.mxu1 }
 0x6ab   :  { %v3919_v5 = vpop.eup %3918  ;;  %v3272_v38 = vadd.f32 %v3209_v56, %v440_v54  ;;  %v3273_v23 = vadd.f32 %v3229_v39, %v481_v28 }
 0x6ac   :  { %v3921_v51 = vpop.eup %3920  ;;  %v3132_v59 = vadd.f32 1.0, %v3919_v5  ;;  %3922 = vpow2.f32 %v3683_v20 }
 0x6ad   :  { %v3151_v30 = vadd.f32 1.0, %v3921_v51  ;;  %v3684_v43 = vmul.f32 -1.442695, %v3272_v38  ;;  %v3685_v61 = vmul.f32 -1.442695, %v3273_v23 }
 0x6ae   :  { %3924 = vrcp.f32 %v3132_v59  ;;  %v3142_v26 = vand.u32 2147483647, %v3132_v59  ;;  %v3144_v37 = vand.u32 2147483648, %v3132_v59  ;;  %vm3138_vm0 = vweird.f32 %v3132_v59 }
 0x6af   :  { %3926 = vrcp.f32 %v3151_v30  ;;  %v3163_v4 = vand.u32 2147483648, %v3151_v30  ;;  %v3161_v48 = vand.u32 2147483647, %v3151_v30  ;;  %vm3157_vm15 = vweird.f32 %v3151_v30 }
 0x6b0   :  { %3928 = vpow2.f32 %v3684_v43  ;;  %vm3143_vm2 = vcmp.eq.f32.partialorder %v3142_v26, 8.507059e+37  ;;  %v3145_v3 = vor.u32 1.1754944e-38, %v3144_v37 }
 0x6b1   :  { %3930 = vpow2.f32 %v3685_v61  ;;  %v3269_v41 = vpop.f32.mrf.mxu3  ;;  %v3249_v57 = vpop.f32.mrf.mxu2  ;;  %v3164_v27 = vor.u32 1.1754944e-38, %v3163_v4  ;;  %vm3162_vm4 = vcmp.eq.f32.partialorder %v3161_v48, 8.507059e+37 }
 0x6b2   :  { %v3923_v34 = vpop.eup %3922  ;;  %v3275_v58 = vadd.f32 %v3269_v41, %v563_v46  ;;  %v3274_v44 = vadd.f32 %v3249_v57, %v522_v6 }
 0x6b3   :  { %v8547_v36 = vadd.f32 1.0, %v3923_v34 }
 0x6b4   :  { %v3925_v60 = vpop.eup %3924  ;;  %v3686_v8 = vmul.f32 -1.442695, %v3275_v58 }
 0x6b5   :  { %v3927_v10 = vpop.eup %3926  ;;  %v3134_v32 = vmul.f32 %v3925_v60, %v3132_v59  ;;  %3932 = vrcp.f32 %v8547_v36  ;;  %vm3139_vm13 = vweird.f32 %v3925_v60  ;;  %vm3177_vm5 = vweird.f32 %v8547_v36 }
 0x6b6   :  { %v3929_v21 = vpop.eup %3928  ;;  %v3153_v9 = vmul.f32 %v3927_v10, %v3151_v30  ;;  %3934 = vpow2.f32 %v3686_v8  ;;  %vm3158_vm14 = vweird.f32 %v3927_v10  ;;  %vm3140_vm1 = vmor %vm3138_vm0, %vm3139_vm13  ;;  %v3183_v51 = vand.u32 2147483648, %v8547_v36 }
 0x6b7   :  { %v3931_v35 = vpop.eup %3930  ;;  %v3135_v0 = vsub.f32 1.0, %v3134_v32  ;;  %3936 = vtanh.f32 %v3127_v1  ;;  %v8550_v49 = vadd.f32 1.0, %v3929_v21  ;;  %vm3159_vm3 = vmor %vm3157_vm15, %vm3158_vm14  ;;  %v3181_v41 = vand.u32 2147483647, %v8547_v36  ;;  %v342_v1 = vld [vmem:[#allocation13] sm:$0xff] }
 0x6b8   :  { %v3154_v47 = vsub.f32 1.0, %v3153_v9  ;;  %v8552_v31 = vadd.f32 1.0, %v3931_v35 }
 0x6b9   :  { %v3136_v52 = vmul.f32 %v3925_v60, %v3135_v0  ;;  %3938 = vrcp.f32 %v8550_v49  ;;  %v3289_v18 = vand.u32 2147483647, %v8550_v49  ;;  %v3291_v43 = vand.u32 2147483648, %v8550_v49 }
 0x6ba   :  { %v3155_v50 = vmul.f32 %v3927_v10, %v3154_v47  ;;  %3940 = vrcp.f32 %v8552_v31  ;;  %v3310_v61 = vand.u32 2147483648, %v8552_v31  ;;  %v3308_v46 = vand.u32 2147483647, %v8552_v31 }
 0x6bb   :  { %v8556_v62 = vpop.eup %3932  ;;  %v3137_v33 = vadd.f32 %v3925_v60, %v3136_v52  ;;  %vm3285_vm9 = vweird.f32 %v8550_v49  ;;  %vm3304_vm11 = vweird.f32 %v8552_v31  ;;  %vm3290_vm14 = vcmp.eq.f32.partialorder %v3289_v18, 8.507059e+37 }
 0x6bc   :  { %v3935_v13 = vpop.eup %3934  ;;  %v3156_v45 = vadd.f32 %v3927_v10, %v3155_v50  ;;  %v3173_v17 = vmul.f32 %v8556_v62, %v8547_v36  ;;  %vm3178_vm6 = vweird.f32 %v8556_v62  ;;  %v3311_v9 = vor.u32 1.1754944e-38, %v3310_v61 }
 0x6bd   :  { %v3937_v19 = vpop.eup %3936  ;;  %v3141_v63 = vsel %vm3140_vm1, %v3925_v60, %v3137_v33  ;;  %v8563_v15 = vadd.f32 1.0, %v3935_v13  ;;  %vm8586_vm10 = vmor %vm3177_vm5, %vm3178_vm6  ;;  %v3184_v60 = vor.u32 1.1754944e-38, %v3183_v51  ;;  %vm3309_vm15 = vcmp.eq.f32.partialorder %v3308_v46, 8.507059e+37  ;;  %v348_v51 = vld [vmem:[#allocation13 + $0x30] sm:$0xff]  ;;  %v343_v46 = vld [vmem:[#allocation13 + $0x8] sm:$0xff] }
 0x6be   :  { %v3146_v24 = vsel %vm3143_vm2, %v3145_v3, %v3141_v63  ;;  %v3160_v16 = vsel %vm3159_vm3, %v3927_v10, %v3156_v45  ;;  %v3174_v54 = vsub.f32 1.0, %v3173_v17  ;;  %v3292_v10 = vor.u32 1.1754944e-38, %v3291_v43  ;;  %v357_v45 = vld [vmem:[#allocation13 + $0x78] sm:$0xff]  ;;  %v356_v17 = vld [vmem:[#allocation13 + $0x70] sm:$0xff]  ;;  %v355_v63 = vld [vmem:[#allocation13 + $0x68] sm:$0xff] }
 0x6bf   :  { %v3939_v55 = vpop.eup %3938  ;;  %v3165_v25 = vsel %vm3162_vm4, %v3164_v27, %v3160_v16  ;;  %v3188_v28 = vmul.f32 %v3937_v19, %v3146_v24  ;;  %3942 = vrcp.f32 %v8563_v15  ;;  %vm3182_vm0 = vcmp.eq.f32.partialorder %v3181_v41, 8.507059e+37  ;;  %v352_v24 = vld [vmem:[#allocation13 + $0x50] sm:$0xff]  ;;  %v347_v43 = vld [vmem:[#allocation13 + $0x28] sm:$0xff] }
 0x6c0   :  { %v3941_v20 = vpop.eup %3940  ;;  %v3187_v56 = vmul.f32 %v3165_v25, %v8303_v40  ;;  %v3175_v39 = vmul.f32 %v8556_v62, %v3174_v54  ;;  %v3281_v5 = vmul.f32 %v3939_v55, %v8550_v49  ;;  %3944 = vtanh.f32 %v3274_v44  ;;  %v354_v44 = vld [vmem:[#allocation13 + $0x60] sm:$0xff]  ;;  %v351_v54 = vld [vmem:[#allocation13 + $0x48] sm:$0xff] }
 0x6c1   :  { %v3300_v38 = vmul.f32 %v3941_v20, %v8552_v31  ;;  %vm3286_vm7 = vweird.f32 %v3939_v55  ;;  %vm3305_vm8 = vweird.f32 %v3941_v20  ;;  %vm3324_vm2 = vweird.f32 %v8563_v15 }
 0x6c2   :  { %v8571_v23 = vadd.f32 %v3188_v28, %v3187_v56  ;;  %v3282_v59 = vsub.f32 1.0, %v3281_v5  ;;  %v3176_v40 = vadd.f32 %v8556_v62, %v3175_v39  ;;  %vm3287_vm12 = vmor %vm3285_vm9, %vm3286_vm7  ;;  %v3328_v2 = vand.u32 2147483647, %v8563_v15  ;;  %v350_v28 = vld [vmem:[#allocation13 + $0x40] sm:$0xff]  ;;  %v349_v39 = vld [vmem:[#allocation13 + $0x38] sm:$0xff] }
 0x6c3   :  { %v3301_v30 = vsub.f32 1.0, %v3300_v38  ;;  %vm3306_vm13 = vmor %vm3304_vm11, %vm3305_vm8 }
 0x6c4   :  { %3946 = vtanh.f32 %v8571_v23  ;;  %v3283_v12 = vmul.f32 %v3939_v55, %v3282_v59  ;;  %v3180_v21 = vsel %vm8586_vm10, %v8556_v62, %v3176_v40  ;;  %v3330_v62 = vand.u32 2147483648, %v8563_v15  ;;  %v346_v40 = vld [vmem:[#allocation13 + $0x20] sm:$0xff] }
 0x6c5   :  { %v3943_v53 = vpop.eup %3942  ;;  %v3302_v7 = vmul.f32 %v3941_v20, %v3301_v30  ;;  %v3185_v4 = vsel %vm3182_vm0, %v3184_v60, %v3180_v21  ;;  %vm3329_vm4 = vcmp.eq.f32.partialorder %v3328_v2, 8.507059e+37 }
 0x6c6   :  { %v3284_v34 = vadd.f32 %v3939_v55, %v3283_v12  ;;  %v3320_v58 = vmul.f32 %v3943_v53, %v8563_v15  ;;  %v3945_v8 = vpop.eup %3944  ;;  %vm3325_vm1 = vweird.f32 %v3943_v53  ;;  %v3331_v33 = vor.u32 1.1754944e-38, %v3330_v62  ;;  %v353_v15 = vld [vmem:[#allocation13 + $0x58] sm:$0xff] }
 0x6c7   :  { %v3303_v32 = vadd.f32 %v3941_v20, %v3302_v7  ;;  %vm3326_vm3 = vmor %vm3324_vm2, %vm3325_vm1 }
 0x6c8   :  { %v3288_v35 = vsel %vm3287_vm12, %v3939_v55, %v3284_v34  ;;  %v3321_v36 = vsub.f32 1.0, %v3320_v58 }
 0x6c9   :  { %v3293_v0 = vsel %vm3290_vm14, %v3292_v10, %v3288_v35  ;;  %v3307_v49 = vsel %vm3306_vm13, %v3941_v20, %v3303_v32 }
 0x6ca   :  { %v3947_v47 = vpop.eup %3946  ;;  %v3312_v26 = vsel %vm3309_vm15, %v3311_v9, %v3307_v49  ;;  %v3335_v37 = vmul.f32 %v3945_v8, %v3293_v0  ;;  %v3322_v31 = vmul.f32 %v3943_v53, %v3321_v36 }
 0x6cb   :  { %v3334_v52 = vmul.f32 %v3312_v26, %v8356_v14  ;;  %v3191_v50 = vmul.f32 %v3947_v47, %v3185_v4 }
 0x6cc   :  { %v3323_v57 = vadd.f32 %v3943_v53, %v3322_v31 }
 0x6cd   :  { %v3336_v48 = vadd.f32 %v3335_v37, %v3334_v52  ;;  %3355 = vmatmul.f32.vlgmr.msrb.gmra.mxu0 %v3191_v50  ;;  %3375 = vmatmul.f32.vlgmr.msra.gmra.mxu1 %v3191_v50 }
 0x6ce   :  { %3395 = vmatmul.f32.vlgmr.msra.gmra.mxu2 %v3191_v50  ;;  %3415 = vmatmul.f32.vlgmr.msra.gmra.mxu3 %v3191_v50  ;;  %v3327_v6 = vsel %vm3326_vm3, %v3943_v53, %v3323_v57  ;;  %v345_v53 = vld [vmem:[#allocation13 + $0x18] sm:$0xff] }
 0x6cf   :  { %3948 = vtanh.f32 %v3336_v48  ;;  %v3332_v13 = vsel %vm3329_vm4, %v3331_v33, %v3327_v6  ;;  %3569 = vmatpush.msrb.mxu0 %v357_v45 }
 0x6d1   :  { %3570 = vmatpush.msrb.mxu0 %v356_v17 }
 0x6d3   :  { %3571 = vmatpush.msrb.mxu0 %v355_v63 }
 0x6d5   :  { %v3949_v14 = vpop.eup %3948  ;;  %3572 = vmatpush.msrb.mxu0 %v354_v44 }
 0x6d6   :  { %v3338_v3 = vmul.f32 %v3949_v14, %v3332_v13 }
 0x6d7   :  { %3573 = vmatpush.msrb.mxu0 %v353_v15 }
 0x6d8   :  { %3435 = vmatmul.f32.vlgmr.msra.gmra.mxu0 %v3338_v3  ;;  %3455 = vmatmul.f32.vlgmr.msrb.gmra.mxu1 %v3338_v3 }
 0x6d9   :  { %3475 = vmatmul.f32.vlgmr.msrb.gmra.mxu2 %v3338_v3  ;;  %3495 = vmatmul.f32.vlgmr.msrb.gmra.mxu3 %v3338_v3 }
 0x6da   :  { %3574 = vmatpush.msrb.mxu0 %v352_v24 }
 0x6dc   :  { %3575 = vmatpush.msrb.mxu0 %v351_v54 }
 0x6de   :  { %3576 = vmatpush.msrb.mxu0 %v350_v28 }
 0x6e0   :  { %3577 = vmatpush.msrb.mxu0 %v349_v39 }
 0x6e2   :  { %3578 = vmatpush.msrb.mxu0 %v348_v51 }
 0x6e4   :  { %3579 = vmatpush.msrb.mxu0 %v347_v43 }
 0x6e6   :  { %3580 = vmatpush.msrb.mxu0 %v346_v40 }
 0x6e8   :  { %3581 = vmatpush.msrb.mxu0 %v345_v53 }
 0x74a   :  { %v3356_v19 = vpop.f32.mrf.mxu0  ;;  %v3376_v27 = vpop.f32.mrf.mxu1 }
 0x751   :  { %v3416_v16 = vpop.f32.mrf.mxu3  ;;  %v3396_v59 = vpop.f32.mrf.mxu2 }
 0x755   :  { %v3436_v55 = vpop.f32.mrf.mxu0  ;;  %v3456_v25 = vpop.f32.mrf.mxu1 }
 0x756   :  { %v3437_v20 = vadd.f32 %v3436_v55, %v3356_v19  ;;  %v3457_v56 = vadd.f32 %v3456_v25, %v3376_v27 }
 0x758   :  { %v3499_v5 = vadd.f32 %v3437_v20, %v10597_v22  ;;  %v3500_v38 = vadd.f32 %v3457_v56, %v10598_v42  ;;  %v344_v22 = vld [vmem:[#allocation13 + $0x10] sm:$0xff] }
 0x759   :  { %3582 = vmatpush.msrb.mxu0 %v344_v22 }
 0x75a   :  { %v3687_v18 = vmul.f32 -1.442695, %v3499_v5  ;;  %v3688_v30 = vmul.f32 -1.442695, %v3500_v38 }
 0x75b   :  { %3583 = vmatpush.msrb.mxu0 %v343_v46 }
 0x75c   :  { %3950 = vpow2.f32 %v3687_v18  ;;  %v3496_v61 = vpop.f32.mrf.mxu3  ;;  %v3476_v8 = vpop.f32.mrf.mxu2 }
 0x75d   :  { %3952 = vpow2.f32 %v3688_v30  ;;  %v3497_v12 = vadd.f32 %v3496_v61, %v3416_v16  ;;  %3584 = vmatpush.msrb.mxu0 %v342_v1  ;;  %v3477_v10 = vadd.f32 %v3476_v8, %v3396_v59 }
 0x75f   :  { %v3502_v7 = vadd.f32 %v3497_v12, %v10599_v29  ;;  %v3501_v9 = vadd.f32 %v3477_v10, %v10606_v11 }
 0x761   :  { %v3689_v42 = vmul.f32 -1.442695, %v3502_v7 }
 0x762   :  { %v3951_v41 = vpop.eup %3950 }
 0x763   :  { %v3953_v34 = vpop.eup %3952  ;;  %v3506_v58 = vadd.f32 1.0, %v3951_v41  ;;  %3954 = vpow2.f32 %v3689_v42 }
 0x764   :  { %v3525_v60 = vadd.f32 1.0, %v3953_v34 }
 0x765   :  { %3956 = vrcp.f32 %v3506_v58  ;;  %v3518_v26 = vand.u32 2147483648, %v3506_v58  ;;  %v3516_v4 = vand.u32 2147483647, %v3506_v58  ;;  %vm3512_vm7 = vweird.f32 %v3506_v58 }
 0x766   :  { %3958 = vrcp.f32 %v3525_v60  ;;  %v3537_v37 = vand.u32 2147483648, %v3525_v60  ;;  %v3535_v50 = vand.u32 2147483647, %v3525_v60  ;;  %vm3531_vm8 = vweird.f32 %v3525_v60 }
 0x767   :  { %v3519_v11 = vor.u32 1.1754944e-38, %v3518_v26  ;;  %vm3517_vm11 = vcmp.eq.f32.partialorder %v3516_v4, 8.507059e+37 }
 0x768   :  { %v3538_v6 = vor.u32 1.1754944e-38, %v3537_v37  ;;  %vm3536_vm12 = vcmp.eq.f32.partialorder %v3535_v50, 8.507059e+37 }
 0x769   :  { %v3955_v32 = vpop.eup %3954 }
 0x76a   :  { %v3545_v21 = vadd.f32 1.0, %v3955_v32 }
 0x76b   :  { %v3957_v29 = vpop.eup %3956 }
 0x76c   :  { %v3959_v35 = vpop.eup %3958  ;;  %v3508_v36 = vmul.f32 %v3957_v29, %v3506_v58  ;;  %3960 = vrcp.f32 %v3545_v21  ;;  %vm3513_vm5 = vweird.f32 %v3957_v29  ;;  %v3557_v24 = vand.u32 2147483648, %v3545_v21 }
 0x76d   :  { %v3527_v0 = vmul.f32 %v3959_v35, %v3525_v60  ;;  %3962 = vtanh.f32 %v3501_v9  ;;  %vm3532_vm6 = vweird.f32 %v3959_v35  ;;  %vm3514_vm9 = vmor %vm3512_vm7, %vm3513_vm5  ;;  %vm3551_vm14 = vweird.f32 %v3545_v21 }
 0x76e   :  { %v3509_v49 = vsub.f32 1.0, %v3508_v36  ;;  %vm3533_vm10 = vmor %vm3531_vm8, %vm3532_vm6  ;;  %v3555_v16 = vand.u32 2147483647, %v3545_v21  ;;  %v3558_v55 = vor.u32 1.1754944e-38, %v3557_v24 }
 0x76f   :  { %v3528_v47 = vsub.f32 1.0, %v3527_v0 }
 0x770   :  { %v3510_v31 = vmul.f32 %v3957_v29, %v3509_v49  ;;  %vm3556_vm0 = vcmp.eq.f32.partialorder %v3555_v16, 8.507059e+37 }
 0x771   :  { %v3529_v52 = vmul.f32 %v3959_v35, %v3528_v47 }
 0x772   :  { %v3961_v48 = vpop.eup %3960  ;;  %v3511_v57 = vadd.f32 %v3957_v29, %v3510_v31 }
 0x773   :  { %v3530_v62 = vadd.f32 %v3959_v35, %v3529_v52  ;;  %v3547_v2 = vmul.f32 %v3961_v48, %v3545_v21  ;;  %v3963_v14 = vpop.eup %3962  ;;  %vm3552_vm13 = vweird.f32 %v3961_v48 }
 0x774   :  { %v3515_v33 = vsel %vm3514_vm9, %v3957_v29, %v3511_v57  ;;  %vm3553_vm15 = vmor %vm3551_vm14, %vm3552_vm13 }
 0x775   :  { %v3520_v13 = vsel %vm3517_vm11, %v3519_v11, %v3515_v33  ;;  %v3534_v3 = vsel %vm3533_vm10, %v3959_v35, %v3530_v62  ;;  %v3548_v45 = vsub.f32 1.0, %v3547_v2 }
 0x776   :  { %v3539_v17 = vsel %vm3536_vm12, %v3538_v6, %v3534_v3  ;;  %v3562_v19 = vmul.f32 %v3963_v14, %v3520_v13 }
 0x777   :  { %v3561_v27 = vmul.f32 %v3539_v17, %v8571_v23  ;;  %v3549_v63 = vmul.f32 %v3961_v48, %v3548_v45  ;;  %v3709_v23 = vld [vmem:[%s8617_s8] ss:$0 sm:$0xff] }
 0x779   :  { %v3563_v44 = vadd.f32 %v3562_v19, %v3561_v27  ;;  %v3550_v15 = vadd.f32 %v3961_v48, %v3549_v63 }
 0x77b   :  { %3964 = vtanh.f32 %v3563_v44  ;;  %v3554_v54 = vsel %vm3553_vm15, %v3961_v48, %v3550_v15 }
 0x77c   :  { %v3559_v28 = vsel %vm3556_vm0, %v3558_v55, %v3554_v54 }
 0x781   :  { %v3965_v25 = vpop.eup %3964 }
 0x782   :  { %v3565_v20 = vmul.f32 %v3965_v25, %v3559_v28 }
 0x784   :  { %3585 = vmatmul.f32.vlgmr.msrb.gmra.mxu0 %v3565_v20 }
 0x801   :  { %v3586_v56 = vpop.f32.mrf.mxu0 }
 0x802   :  { %v3587_v39 = vadd.f32 %v3709_v23, %v3586_v56 }
 0x804   :  { %3589 = vst [vmem:[#allocation14] sm:$0xff] %v3587_v39 }
 0x805   :  { %3600 = dma.vmem_to_hbm [thread:$0]  %s3596_s23, 128, %s3598_s25, [#allocation4]  }
 0x806   :  { %4742 = dma.done.wait [#allocation4], 128  }
 0x807   :  { %4743 = vsyncadd [#allocation4], 4294967168 }
 0x808   :  { %3605 = vsyncpa [#allocation3], 1 }
 0x809   :  { %3606 = vsyncpa [#allocation6], 1 }
 0x80a   :  { %3607 = vsyncpa [#allocation9], 1 }
 0x80b   :  { %3608 = vsyncpa [#allocation12], 1 }
 0x80c   :  { %3609 = vsyncpa [#allocation4], 1 }

</bundles_post_ra>
